<compile_context>
chip_gen: v7x
topology: tpu7x:2x2x1
jax: 0.10.0
libtpu: 0.0.40
codegen_flags: <defaults>
</compile_context>

<pallas_src>
import functools

import jax
import jax.numpy as jnp
import numpy as np
from jax import lax
from jax.experimental import pallas as pl
from jax.experimental.pallas import tpu as pltpu

VARIANCE = (0.1, 0.2)          # cfg['variance'] in the SSD config
OVERLAP_THRESH = 0.5
NEGPOS_RATIO = 3
LANES = 128
_NEG_LARGE = -1e30             # "minus infinity" for padded priors in the ranking


# ------------------- host-side target preparation (mirrors box_utils.match) -------------------
def point_form(boxes):
    # (cx, cy, w, h) -> (xmin, ymin, xmax, ymax)
    return jnp.concatenate([boxes[:, :2] - boxes[:, 2:] / 2.0,
                            boxes[:, :2] + boxes[:, 2:] / 2.0], axis=1)


def jaccard(box_a, box_b):
    max_xy = jnp.minimum(box_a[:, None, 2:], box_b[None, :, 2:])
    min_xy = jnp.maximum(box_a[:, None, :2], box_b[None, :, :2])
    inter_wh = jnp.clip(max_xy - min_xy, 0.0)
    inter = inter_wh[..., 0] * inter_wh[..., 1]
    area_a = ((box_a[:, 2] - box_a[:, 0]) * (box_a[:, 3] - box_a[:, 1]))[:, None]
    area_b = ((box_b[:, 2] - box_b[:, 0]) * (box_b[:, 3] - box_b[:, 1]))[None, :]
    return inter / (area_a + area_b - inter)


def encode(matched, priors, variances):
    g_cxcy = (matched[:, :2] + matched[:, 2:]) / 2.0 - priors[:, :2]
    g_cxcy = g_cxcy / (variances[0] * priors[:, 2:])
    g_wh = (matched[:, 2:] - matched[:, :2]) / priors[:, 2:]
    g_wh = jnp.log(g_wh) / variances[1]
    return jnp.concatenate([g_cxcy, g_wh], axis=1)


def match(threshold, truths, priors, variances, labels):
    """Single-image matching, mirroring ssd's box_utils.match."""
    num_objs = truths.shape[0]
    overlaps = jaccard(truths, point_form(priors))            # (num_objs, P)
    best_prior_idx = jnp.argmax(overlaps, axis=1)             # (num_objs,)
    best_truth_overlap = jnp.max(overlaps, axis=0)            # (P,)
    best_truth_idx = jnp.argmax(overlaps, axis=0)             # (P,)
    best_truth_overlap = best_truth_overlap.at[best_prior_idx].set(2.0)
    best_truth_idx = best_truth_idx.at[best_prior_idx].set(jnp.arange(num_objs))
    matches = truths[best_truth_idx]                          # (P, 4)
    conf = labels[best_truth_idx].astype(jnp.int32) + 1       # (P,)
    conf = jnp.where(best_truth_overlap < threshold, 0, conf)
    loc = encode(matches, priors, variances)                  # (P, 4)
    return loc, conf


def prepare_targets(targets, priors, threshold):
    def one(t):
        return match(threshold, t[:, :4], priors, VARIANCE, t[:, 4])
    loc_t, conf_t = jax.vmap(one)(targets)
    return loc_t.astype(jnp.float32), conf_t.astype(jnp.int32)


# ----------------------------------- Pallas kernel -----------------------------------
def _multibox_loss_kernel(loc_ref, conf_ref, loct_ref, conft_ref, out_ref, *,
                          negpos_ratio, num_priors, num_classes, rows, imgs):
    """One grid step processes `imgs` images.

    loc_ref / loct_ref : (imgs, 4, rows, 128) f32   priors lane-dense
    conf_ref           : (imgs, C, rows, 128) f32
    conft_ref          : (imgs, rows, 128)    i32   (-1 marks padded prior / padded image)
    out_ref            : (8, 128)             f32   rows 0..2, lane 0 = [loss_l, loss_c, num_pos]
    """
    f32 = jnp.float32

    # Constants hoisted out of the per-image / per-tile loops.
    sub_iota = lax.broadcasted_iota(jnp.int32, (LANES, LANES), 0)
    lane_iota = lax.broadcasted_iota(jnp.int32, (LANES, LANES), 1)
    ident = (sub_iota == lane_iota).astype(f32)        # 128x128 identity for MXU transpose

    ll_tot = jnp.zeros((1, 1), f32)
    lc_tot = jnp.zeros((1, 1), f32)
    np_tot = jnp.zeros((1, 1), f32)

    for t in range(imgs):                 # static unroll; hard-neg mining stays per-image
        conft = conft_ref[t]              # (R, 128) i32
        pos = conft > 0
        valid = conft >= 0                # False on padded priors / padded images
        posf = pos.astype(f32)

        # --- localization loss: smooth L1 summed over positive priors ---
        d = loc_ref[t] - loct_ref[t]                      # (4, R, 128)
        ad = jnp.abs(d)
        sl1 = jnp.where(ad < 1.0, 0.5 * d * d, ad - 0.5)
        sl1 = jnp.sum(sl1, axis=0)                        # (R, 128) — elementwise over 4 slabs
        ll_tot += jnp.sum(sl1 * posf, keepdims=True)      # (1, 1)

        # --- per-prior confidence loss: logsumexp(conf) - conf[gt_class] ---
        conf = conf_ref[t]                                # (C, R, 128), classes on leading dim
        m = jnp.max(conf, axis=0)                         # (R, 128)
        lse = jnp.log(jnp.sum(jnp.exp(conf - m[None]), axis=0)) + m
        gathered = jnp.zeros_like(lse)
        for c in range(num_classes):                      # lane-dense one-hot gather
            gathered = gathered + jnp.where(conft == c, conf[c], 0.0)
        per_prior = lse - gathered                        # (R, 128)

        # --- hard negative mining ---
        masked = jnp.where(pos, 0.0, per_prior)           # positives zeroed (as in torch)
        masked = jnp.where(valid, masked, _NEG_LARGE)     # padded priors rank last

        npos = jnp.sum(posf, keepdims=True)                               # (1, 1)
        nneg = jnp.minimum(negpos_ratio * npos, float(num_priors - 1))    # (1, 1)

        # Column view of the masked losses via an MXU identity transpose:
        #   maskedT[lane, r] == masked[r, lane]
        maskedT = lax.dot_general(ident, masked,
                                  (((1,), (1,)), ((), ())),
                                  preferred_element_type=f32)             # (128, R)

        # Tiled rank: rank[i] = #{ j : loss[j] > loss[i]  or  (loss[j] == loss[i] and j < i) }
        # i stays lane-dense; j runs over 128-wide sublane chunks (reduced on the XLU).
        # TODO(synk): for production prior counts (R large, e.g. P=8732 -> R=69) turn the
        # unrolled ri/rj loops into a lax.fori_loop over j-tiles to keep code size bounded.
        rank_rows = []
        for ri in range(rows):
            row_i = masked[ri:ri + 1, :]                  # (1, 128): i = ri*128 + lane
            i_flat = ri * LANES + lane_iota
            acc = jnp.zeros((1, LANES), f32)
            for rj in range(rows):
                col_j = maskedT[:, rj:rj + 1]             # (128, 1): j = rj*128 + sublane
                j_flat = rj * LANES + sub_iota
                ahead = (j_flat != i_flat) & (
                    (col_j > row_i) | ((col_j == row_i) & (j_flat < i_flat)))
                acc = acc + jnp.sum(ahead.astype(f32), axis=0, keepdims=True)
            rank_rows.append(acc)
        rank = jnp.concatenate(rank_rows, axis=0)          # (R, 128)

        neg = (rank < nneg) & valid
        sel = jnp.logical_or(pos, neg)
        lc_tot += jnp.sum(jnp.where(sel, per_prior, 0.0), keepdims=True)   # (1, 1)
        np_tot += npos

    # Single store per grid step (no read-modify-write accumulation across steps).
    row_id = lax.broadcasted_iota(jnp.int32, (8, LANES), 0)
    out_ref[...] = jnp.where(row_id == 0, ll_tot,
                             jnp.where(row_id == 1, lc_tot,
                                       jnp.where(row_id == 2, np_tot, 0.0)))


def multibox_loss_pallas(loc_data, conf_data, loc_t, conf_t,
                         negpos_ratio=NEGPOS_RATIO, imgs_per_step=2):
    B, P, C = conf_data.shape
    Pp = ((P + LANES - 1) // LANES) * LANES
    R = Pp // LANES
    TB = max(1, min(imgs_per_step, B))
    Bp = ((B + TB - 1) // TB) * TB
    G = Bp // TB

    pp, pb = Pp - P, Bp - B
    loc_p = jnp.pad(loc_data.astype(jnp.float32), ((0, pb), (0, pp), (0, 0)))
    loct_p = jnp.pad(loc_t.astype(jnp.float32), ((0, pb), (0, pp), (0, 0)))
    conf_p = jnp.pad(conf_data.astype(jnp.float32), ((0, pb), (0, pp), (0, 0)))
    conft_p = jnp.pad(conf_t.astype(jnp.int32), ((0, pb), (0, pp)), constant_values=-1)

    # Lane-dense layouts: priors in the last (128-lane) dim, split as (R, 128).
    loc_l = jnp.transpose(loc_p, (0, 2, 1)).reshape(Bp, 4, R, LANES)
    loct_l = jnp.transpose(loct_p, (0, 2, 1)).reshape(Bp, 4, R, LANES)
    conf_l = jnp.transpose(conf_p, (0, 2, 1)).reshape(Bp, C, R, LANES)
    conft_l = conft_p.reshape(Bp, R, LANES)

    kernel = functools.partial(
        _multibox_loss_kernel,
        negpos_ratio=float(negpos_ratio), num_priors=P,
        num_classes=C, rows=R, imgs=TB)

    out = pl.pallas_call(
        kernel,
        out_shape=jax.ShapeDtypeStruct((G, 8, LANES), jnp.float32),
        grid=(G,),
        in_specs=[
            pl.BlockSpec((TB, 4, R, LANES), lambda g: (g, 0, 0, 0)),
            pl.BlockSpec((TB, C, R, LANES), lambda g: (g, 0, 0, 0)),
            pl.BlockSpec((TB, 4, R, LANES), lambda g: (g, 0, 0, 0)),
            pl.BlockSpec((TB, R, LANES), lambda g: (g, 0, 0)),
        ],
        out_specs=pl.BlockSpec((None, 8, LANES), lambda g: (g, 0, 0)),
        compiler_params=pltpu.CompilerParams(
            dimension_semantics=("parallel",)),   # per-step outputs -> batch axis shardable (v7x)
    )(loc_l, conf_l, loct_l, conft_l)

    loss_l = jnp.sum(out[:, 0, 0])
    loss_c = jnp.sum(out[:, 1, 0])
    N = jnp.sum(out[:, 2, 0])
    # NOTE: like the original PyTorch module, N == 0 (no positives in the whole batch)
    # yields inf/nan; callers must guarantee at least one matched prior.
    return loss_l / N, loss_c / N


# ------------------------------ pure-JAX reference (same math) ------------------------------
def multibox_loss_ref(loc_data, conf_data, loc_t, conf_t,
                      negpos_ratio=NEGPOS_RATIO):
    B, P, C = conf_data.shape
    pos = conf_t > 0                                       # (B, P)
    d = loc_data - loc_t
    ad = jnp.abs(d)
    sl1 = jnp.where(ad < 1.0, 0.5 * d * d, ad - 0.5)
    loss_l = jnp.sum(sl1 * pos[..., None].astype(jnp.float32))

    m = jnp.max(conf_data, axis=-1, keepdims=True)
    lse = jnp.log(jnp.sum(jnp.exp(conf_data - m), axis=-1, keepdims=True)) + m
    gathered = jnp.take_along_axis(conf_data, conf_t[..., None], axis=-1)
    per_prior = (lse - gathered)[..., 0]                   # (B, P)

    loss_rank = jnp.where(pos, 0.0, per_prior)
    gt = loss_rank[:, None, :] > loss_rank[:, :, None]
    eq = loss_rank[:, None, :] == loss_rank[:, :, None]
    j_lt_i = jnp.arange(P)[None, None, :] < jnp.arange(P)[None, :, None]
    rank = jnp.sum((gt | (eq & j_lt_i)).astype(jnp.int32), axis=-1)   # (B, P)

    num_pos = jnp.sum(pos.astype(jnp.int32), axis=1, keepdims=True)   # (B, 1)
    num_neg = jnp.minimum(negpos_ratio * num_pos, P - 1)
    neg = rank < num_neg
    sel = pos | neg
    loss_c = jnp.sum(jnp.where(sel, per_prior, 0.0))

    N = jnp.sum(num_pos).astype(jnp.float32)
    return loss_l / N, loss_c / N


# --------------------------------------- demo ---------------------------------------
if __name__ == "__main__":
    key = jax.random.PRNGKey(0)
    B, P, C, num_objs = 3, 500, 21, 4            # P=500 exercises the prior-padding path
    k1, k2, k3, k4, k5 = jax.random.split(key, 5)

    # "network predictions"
    loc_data = jax.random.normal(k1, (B, P, 4), jnp.float32) * 0.5
    conf_data = jax.random.normal(k2, (B, P, C), jnp.float32)

    # prior boxes (cx, cy, w, h) on a 25x20 grid
    idx = jnp.arange(P)
    cx = ((idx % 25).astype(jnp.float32) + 0.5) / 25.0
    cy = ((idx // 25).astype(jnp.float32) + 0.5) / 20.0
    wh = jnp.full((P,), 0.3, jnp.float32)
    priors = jnp.stack([cx, cy, wh, wh], axis=1)

    # ground-truth targets (B, num_objs, 5): [xmin, ymin, xmax, ymax, label]
    ctr = jax.random.uniform(k3, (B, num_objs, 2), minval=0.25, maxval=0.75)
    size = jax.random.uniform(k4, (B, num_objs, 2), minval=0.15, maxval=0.35)
    labels = jax.random.randint(k5, (B, num_objs), 0, C - 1).astype(jnp.float32)
    boxes = jnp.concatenate([ctr - size / 2.0, ctr + size / 2.0], axis=-1)
    targets = jnp.concatenate([boxes, labels[..., None]], axis=-1)

    # host-side matching / encoding (CPU-side in the original torch module)
    loc_t, conf_t = prepare_targets(targets, priors, OVERLAP_THRESH)

    loss_l, loss_c = multibox_loss_pallas(loc_data, conf_data, loc_t, conf_t)
    jax.block_until_ready((loss_l, loss_c))

    ref_l, ref_c = multibox_loss_ref(loc_data, conf_data, loc_t, conf_t)
    assert np.isfinite(float(loss_l)) and np.isfinite(float(loss_c))
    np.testing.assert_allclose(float(loss_l), float(ref_l), rtol=2e-3, atol=2e-3)
    np.testing.assert_allclose(float(loss_c), float(ref_c), rtol=2e-3, atol=2e-3)

    print("KERNEL_OK")
</pallas_src>

<mosaic_0001>
module attributes {stable_mosaic.version = 11 : i64} {
  func.func @_multibox_loss_kernel(%arg0: i32, %arg1: memref<2x4x4x128xf32, #tpu.memory_space<vmem>>, %arg2: memref<2x21x4x128xf32, #tpu.memory_space<vmem>>, %arg3: memref<2x4x4x128xf32, #tpu.memory_space<vmem>>, %arg4: memref<2x4x128xi32, #tpu.memory_space<vmem>>, %arg5: memref<1x8x128xf32, #tpu.memory_space<vmem>>) attributes {dimension_semantics = [#tpu.dimension_semantics<parallel>], iteration_bounds = array<i64: 2>, scalar_prefetch = 0 : i64, scratch_operands = 0 : i64, tpu.core_type = #tpu.core_type<tc>, window_params = [{transform_indices = @transform_0, window_bounds = array<i64: 2, 4, 4, 128>}, {transform_indices = @transform_1, window_bounds = array<i64: 2, 21, 4, 128>}, {transform_indices = @transform_2, window_bounds = array<i64: 2, 4, 4, 128>}, {transform_indices = @transform_3, window_bounds = array<i64: 2, 4, 128>}, {transform_indices = @transform_4, window_bounds = array<i64: 1, 8, 128>}]} {
    %0 = tpu.iota {dimensions = array<i32: 0>} : vector<128x128xi32>
    %1 = tpu.iota {dimensions = array<i32: 1>} : vector<128x128xi32>
    %2 = arith.cmpi eq, %0, %1 : vector<128x128xi32>
    %3 = arith.extui %2 : vector<128x128xi1> to vector<128x128xi32>
    %4 = arith.sitofp %3 : vector<128x128xi32> to vector<128x128xf32>
    %cst = arith.constant 0.000000e+00 : f32
    %5 = vector.broadcast %cst : f32 to vector<1x1xf32>
    %cst_0 = arith.constant 0.000000e+00 : f32
    %6 = vector.broadcast %cst_0 : f32 to vector<1x1xf32>
    %cst_1 = arith.constant 0.000000e+00 : f32
    %7 = vector.broadcast %cst_1 : f32 to vector<1x1xf32>
    %c0 = arith.constant 0 : index
    %c0_2 = arith.constant 0 : index
    %c0_3 = arith.constant 0 : index
    %8 = vector.load %arg4[%c0, %c0_2, %c0_3] : memref<2x4x128xi32, #tpu.memory_space<vmem>>, vector<1x4x128xi32>
    %9 = vector.shape_cast %8 : vector<1x4x128xi32> to vector<4x128xi32>
    %c0_i32 = arith.constant 0 : i32
    %10 = vector.broadcast %c0_i32 : i32 to vector<4x128xi32>
    %11 = arith.cmpi sgt, %9, %10 : vector<4x128xi32>
    %c0_i32_4 = arith.constant 0 : i32
    %12 = vector.broadcast %c0_i32_4 : i32 to vector<4x128xi32>
    %13 = arith.cmpi sge, %9, %12 : vector<4x128xi32>
    %14 = arith.extui %11 : vector<4x128xi1> to vector<4x128xi32>
    %15 = arith.sitofp %14 : vector<4x128xi32> to vector<4x128xf32>
    %c0_5 = arith.constant 0 : index
    %c0_6 = arith.constant 0 : index
    %c0_7 = arith.constant 0 : index
    %c0_8 = arith.constant 0 : index
    %16 = vector.load %arg1[%c0_5, %c0_6, %c0_7, %c0_8] : memref<2x4x4x128xf32, #tpu.memory_space<vmem>>, vector<1x4x4x128xf32>
    %17 = vector.shape_cast %16 : vector<1x4x4x128xf32> to vector<4x4x128xf32>
    %c0_9 = arith.constant 0 : index
    %c0_10 = arith.constant 0 : index
    %c0_11 = arith.constant 0 : index
    %c0_12 = arith.constant 0 : index
    %18 = vector.load %arg3[%c0_9, %c0_10, %c0_11, %c0_12] : memref<2x4x4x128xf32, #tpu.memory_space<vmem>>, vector<1x4x4x128xf32>
    %19 = vector.shape_cast %18 : vector<1x4x4x128xf32> to vector<4x4x128xf32>
    %20 = arith.subf %17, %19 : vector<4x4x128xf32>
    %21 = math.absf %20 : vector<4x4x128xf32>
    %cst_13 = arith.constant 1.000000e+00 : f32
    %22 = vector.broadcast %cst_13 : f32 to vector<4x4x128xf32>
    %23 = arith.cmpf olt, %21, %22 : vector<4x4x128xf32>
    %cst_14 = arith.constant 5.000000e-01 : f32
    %24 = vector.broadcast %cst_14 : f32 to vector<4x4x128xf32>
    %25 = arith.mulf %24, %20 : vector<4x4x128xf32>
    %26 = arith.mulf %25, %20 : vector<4x4x128xf32>
    %cst_15 = arith.constant 5.000000e-01 : f32
    %27 = vector.broadcast %cst_15 : f32 to vector<4x4x128xf32>
    %28 = arith.subf %21, %27 : vector<4x4x128xf32>
    %29 = arith.select %23, %26, %28 : vector<4x4x128xi1>, vector<4x4x128xf32>
    %cst_16 = arith.constant dense<0.000000e+00> : vector<4x128xf32>
    %30 = vector.multi_reduction <add>, %29, %cst_16 [0] : vector<4x4x128xf32> to vector<4x128xf32>
    %31 = arith.mulf %30, %15 : vector<4x128xf32>
    %32 = vector.shape_cast %31 : vector<4x128xf32> to vector<1x4x128xf32>
    %cst_17 = arith.constant dense<0.000000e+00> : vector<1xf32>
    %33 = vector.multi_reduction <add>, %32, %cst_17 [1, 2] : vector<1x4x128xf32> to vector<1xf32>
    %34 = vector.shape_cast %33 : vector<1xf32> to vector<1x1x1xf32>
    %35 = vector.extract %34[0, 0, 0] : f32 from vector<1x1x1xf32>
    %36 = vector.broadcast %35 : f32 to vector<1x1xf32>
    %37 = arith.addf %5, %36 : vector<1x1xf32>
    %c0_18 = arith.constant 0 : index
    %c0_19 = arith.constant 0 : index
    %c0_20 = arith.constant 0 : index
    %c0_21 = arith.constant 0 : index
    %38 = vector.load %arg2[%c0_18, %c0_19, %c0_20, %c0_21] : memref<2x21x4x128xf32, #tpu.memory_space<vmem>>, vector<1x21x4x128xf32>
    %39 = vector.shape_cast %38 : vector<1x21x4x128xf32> to vector<21x4x128xf32>
    %cst_22 = arith.constant dense<0xFF800000> : vector<4x128xf32>
    %40 = vector.multi_reduction <maximumf>, %39, %cst_22 [0] : vector<21x4x128xf32> to vector<4x128xf32>
    %41 = vector.shape_cast %40 : vector<4x128xf32> to vector<1x4x128xf32>
    %42 = vector.broadcast %41 : vector<1x4x128xf32> to vector<21x4x128xf32>
    %43 = arith.subf %39, %42 : vector<21x4x128xf32>
    %44 = math.exp %43 : vector<21x4x128xf32>
    %cst_23 = arith.constant dense<0.000000e+00> : vector<4x128xf32>
    %45 = vector.multi_reduction <add>, %44, %cst_23 [0] : vector<21x4x128xf32> to vector<4x128xf32>
    %46 = math.log %45 : vector<4x128xf32>
    %47 = arith.addf %46, %40 : vector<4x128xf32>
    %cst_24 = arith.constant 0.000000e+00 : f32
    %48 = vector.broadcast %cst_24 : f32 to vector<4x128xf32>
    %c0_i32_25 = arith.constant 0 : i32
    %49 = vector.broadcast %c0_i32_25 : i32 to vector<4x128xi32>
    %50 = arith.cmpi eq, %9, %49 : vector<4x128xi32>
    %51 = vector.extract_strided_slice %39 {offsets = [0, 0, 0], sizes = [1, 4, 128], strides = [1, 1, 1]} : vector<21x4x128xf32> to vector<1x4x128xf32>
    %52 = vector.shape_cast %51 : vector<1x4x128xf32> to vector<4x128xf32>
    %cst_26 = arith.constant 0.000000e+00 : f32
    %53 = vector.broadcast %cst_26 : f32 to vector<4x128xf32>
    %54 = arith.select %50, %52, %53 : vector<4x128xi1>, vector<4x128xf32>
    %55 = arith.addf %48, %54 : vector<4x128xf32>
    %c1_i32 = arith.constant 1 : i32
    %56 = vector.broadcast %c1_i32 : i32 to vector<4x128xi32>
    %57 = arith.cmpi eq, %9, %56 : vector<4x128xi32>
    %58 = vector.extract_strided_slice %39 {offsets = [1, 0, 0], sizes = [1, 4, 128], strides = [1, 1, 1]} : vector<21x4x128xf32> to vector<1x4x128xf32>
    %59 = vector.shape_cast %58 : vector<1x4x128xf32> to vector<4x128xf32>
    %cst_27 = arith.constant 0.000000e+00 : f32
    %60 = vector.broadcast %cst_27 : f32 to vector<4x128xf32>
    %61 = arith.select %57, %59, %60 : vector<4x128xi1>, vector<4x128xf32>
    %62 = arith.addf %55, %61 : vector<4x128xf32>
    %c2_i32 = arith.constant 2 : i32
    %63 = vector.broadcast %c2_i32 : i32 to vector<4x128xi32>
    %64 = arith.cmpi eq, %9, %63 : vector<4x128xi32>
    %65 = vector.extract_strided_slice %39 {offsets = [2, 0, 0], sizes = [1, 4, 128], strides = [1, 1, 1]} : vector<21x4x128xf32> to vector<1x4x128xf32>
    %66 = vector.shape_cast %65 : vector<1x4x128xf32> to vector<4x128xf32>
    %cst_28 = arith.constant 0.000000e+00 : f32
    %67 = vector.broadcast %cst_28 : f32 to vector<4x128xf32>
    %68 = arith.select %64, %66, %67 : vector<4x128xi1>, vector<4x128xf32>
    %69 = arith.addf %62, %68 : vector<4x128xf32>
    %c3_i32 = arith.constant 3 : i32
    %70 = vector.broadcast %c3_i32 : i32 to vector<4x128xi32>
    %71 = arith.cmpi eq, %9, %70 : vector<4x128xi32>
    %72 = vector.extract_strided_slice %39 {offsets = [3, 0, 0], sizes = [1, 4, 128], strides = [1, 1, 1]} : vector<21x4x128xf32> to vector<1x4x128xf32>
    %73 = vector.shape_cast %72 : vector<1x4x128xf32> to vector<4x128xf32>
    %cst_29 = arith.constant 0.000000e+00 : f32
    %74 = vector.broadcast %cst_29 : f32 to vector<4x128xf32>
    %75 = arith.select %71, %73, %74 : vector<4x128xi1>, vector<4x128xf32>
    %76 = arith.addf %69, %75 : vector<4x128xf32>
    %c4_i32 = arith.constant 4 : i32
    %77 = vector.broadcast %c4_i32 : i32 to vector<4x128xi32>
    %78 = arith.cmpi eq, %9, %77 : vector<4x128xi32>
    %79 = vector.extract_strided_slice %39 {offsets = [4, 0, 0], sizes = [1, 4, 128], strides = [1, 1, 1]} : vector<21x4x128xf32> to vector<1x4x128xf32>
    %80 = vector.shape_cast %79 : vector<1x4x128xf32> to vector<4x128xf32>
    %cst_30 = arith.constant 0.000000e+00 : f32
    %81 = vector.broadcast %cst_30 : f32 to vector<4x128xf32>
    %82 = arith.select %78, %80, %81 : vector<4x128xi1>, vector<4x128xf32>
    %83 = arith.addf %76, %82 : vector<4x128xf32>
    %c5_i32 = arith.constant 5 : i32
    %84 = vector.broadcast %c5_i32 : i32 to vector<4x128xi32>
    %85 = arith.cmpi eq, %9, %84 : vector<4x128xi32>
    %86 = vector.extract_strided_slice %39 {offsets = [5, 0, 0], sizes = [1, 4, 128], strides = [1, 1, 1]} : vector<21x4x128xf32> to vector<1x4x128xf32>
    %87 = vector.shape_cast %86 : vector<1x4x128xf32> to vector<4x128xf32>
    %cst_31 = arith.constant 0.000000e+00 : f32
    %88 = vector.broadcast %cst_31 : f32 to vector<4x128xf32>
    %89 = arith.select %85, %87, %88 : vector<4x128xi1>, vector<4x128xf32>
    %90 = arith.addf %83, %89 : vector<4x128xf32>
    %c6_i32 = arith.constant 6 : i32
    %91 = vector.broadcast %c6_i32 : i32 to vector<4x128xi32>
    %92 = arith.cmpi eq, %9, %91 : vector<4x128xi32>
    %93 = vector.extract_strided_slice %39 {offsets = [6, 0, 0], sizes = [1, 4, 128], strides = [1, 1, 1]} : vector<21x4x128xf32> to vector<1x4x128xf32>
    %94 = vector.shape_cast %93 : vector<1x4x128xf32> to vector<4x128xf32>
    %cst_32 = arith.constant 0.000000e+00 : f32
    %95 = vector.broadcast %cst_32 : f32 to vector<4x128xf32>
    %96 = arith.select %92, %94, %95 : vector<4x128xi1>, vector<4x128xf32>
    %97 = arith.addf %90, %96 : vector<4x128xf32>
    %c7_i32 = arith.constant 7 : i32
    %98 = vector.broadcast %c7_i32 : i32 to vector<4x128xi32>
    %99 = arith.cmpi eq, %9, %98 : vector<4x128xi32>
    %100 = vector.extract_strided_slice %39 {offsets = [7, 0, 0], sizes = [1, 4, 128], strides = [1, 1, 1]} : vector<21x4x128xf32> to vector<1x4x128xf32>
    %101 = vector.shape_cast %100 : vector<1x4x128xf32> to vector<4x128xf32>
    %cst_33 = arith.constant 0.000000e+00 : f32
    %102 = vector.broadcast %cst_33 : f32 to vector<4x128xf32>
    %103 = arith.select %99, %101, %102 : vector<4x128xi1>, vector<4x128xf32>
    %104 = arith.addf %97, %103 : vector<4x128xf32>
    %c8_i32 = arith.constant 8 : i32
    %105 = vector.broadcast %c8_i32 : i32 to vector<4x128xi32>
    %106 = arith.cmpi eq, %9, %105 : vector<4x128xi32>
    %107 = vector.extract_strided_slice %39 {offsets = [8, 0, 0], sizes = [1, 4, 128], strides = [1, 1, 1]} : vector<21x4x128xf32> to vector<1x4x128xf32>
    %108 = vector.shape_cast %107 : vector<1x4x128xf32> to vector<4x128xf32>
    %cst_34 = arith.constant 0.000000e+00 : f32
    %109 = vector.broadcast %cst_34 : f32 to vector<4x128xf32>
    %110 = arith.select %106, %108, %109 : vector<4x128xi1>, vector<4x128xf32>
    %111 = arith.addf %104, %110 : vector<4x128xf32>
    %c9_i32 = arith.constant 9 : i32
    %112 = vector.broadcast %c9_i32 : i32 to vector<4x128xi32>
    %113 = arith.cmpi eq, %9, %112 : vector<4x128xi32>
    %114 = vector.extract_strided_slice %39 {offsets = [9, 0, 0], sizes = [1, 4, 128], strides = [1, 1, 1]} : vector<21x4x128xf32> to vector<1x4x128xf32>
    %115 = vector.shape_cast %114 : vector<1x4x128xf32> to vector<4x128xf32>
    %cst_35 = arith.constant 0.000000e+00 : f32
    %116 = vector.broadcast %cst_35 : f32 to vector<4x128xf32>
    %117 = arith.select %113, %115, %116 : vector<4x128xi1>, vector<4x128xf32>
    %118 = arith.addf %111, %117 : vector<4x128xf32>
    %c10_i32 = arith.constant 10 : i32
    %119 = vector.broadcast %c10_i32 : i32 to vector<4x128xi32>
    %120 = arith.cmpi eq, %9, %119 : vector<4x128xi32>
    %121 = vector.extract_strided_slice %39 {offsets = [10, 0, 0], sizes = [1, 4, 128], strides = [1, 1, 1]} : vector<21x4x128xf32> to vector<1x4x128xf32>
    %122 = vector.shape_cast %121 : vector<1x4x128xf32> to vector<4x128xf32>
    %cst_36 = arith.constant 0.000000e+00 : f32
    %123 = vector.broadcast %cst_36 : f32 to vector<4x128xf32>
    %124 = arith.select %120, %122, %123 : vector<4x128xi1>, vector<4x128xf32>
    %125 = arith.addf %118, %124 : vector<4x128xf32>
    %c11_i32 = arith.constant 11 : i32
    %126 = vector.broadcast %c11_i32 : i32 to vector<4x128xi32>
    %127 = arith.cmpi eq, %9, %126 : vector<4x128xi32>
    %128 = vector.extract_strided_slice %39 {offsets = [11, 0, 0], sizes = [1, 4, 128], strides = [1, 1, 1]} : vector<21x4x128xf32> to vector<1x4x128xf32>
    %129 = vector.shape_cast %128 : vector<1x4x128xf32> to vector<4x128xf32>
    %cst_37 = arith.constant 0.000000e+00 : f32
    %130 = vector.broadcast %cst_37 : f32 to vector<4x128xf32>
    %131 = arith.select %127, %129, %130 : vector<4x128xi1>, vector<4x128xf32>
    %132 = arith.addf %125, %131 : vector<4x128xf32>
    %c12_i32 = arith.constant 12 : i32
    %133 = vector.broadcast %c12_i32 : i32 to vector<4x128xi32>
    %134 = arith.cmpi eq, %9, %133 : vector<4x128xi32>
    %135 = vector.extract_strided_slice %39 {offsets = [12, 0, 0], sizes = [1, 4, 128], strides = [1, 1, 1]} : vector<21x4x128xf32> to vector<1x4x128xf32>
    %136 = vector.shape_cast %135 : vector<1x4x128xf32> to vector<4x128xf32>
    %cst_38 = arith.constant 0.000000e+00 : f32
    %137 = vector.broadcast %cst_38 : f32 to vector<4x128xf32>
    %138 = arith.select %134, %136, %137 : vector<4x128xi1>, vector<4x128xf32>
    %139 = arith.addf %132, %138 : vector<4x128xf32>
    %c13_i32 = arith.constant 13 : i32
    %140 = vector.broadcast %c13_i32 : i32 to vector<4x128xi32>
    %141 = arith.cmpi eq, %9, %140 : vector<4x128xi32>
    %142 = vector.extract_strided_slice %39 {offsets = [13, 0, 0], sizes = [1, 4, 128], strides = [1, 1, 1]} : vector<21x4x128xf32> to vector<1x4x128xf32>
    %143 = vector.shape_cast %142 : vector<1x4x128xf32> to vector<4x128xf32>
    %cst_39 = arith.constant 0.000000e+00 : f32
    %144 = vector.broadcast %cst_39 : f32 to vector<4x128xf32>
    %145 = arith.select %141, %143, %144 : vector<4x128xi1>, vector<4x128xf32>
    %146 = arith.addf %139, %145 : vector<4x128xf32>
    %c14_i32 = arith.constant 14 : i32
    %147 = vector.broadcast %c14_i32 : i32 to vector<4x128xi32>
    %148 = arith.cmpi eq, %9, %147 : vector<4x128xi32>
    %149 = vector.extract_strided_slice %39 {offsets = [14, 0, 0], sizes = [1, 4, 128], strides = [1, 1, 1]} : vector<21x4x128xf32> to vector<1x4x128xf32>
    %150 = vector.shape_cast %149 : vector<1x4x128xf32> to vector<4x128xf32>
    %cst_40 = arith.constant 0.000000e+00 : f32
    %151 = vector.broadcast %cst_40 : f32 to vector<4x128xf32>
    %152 = arith.select %148, %150, %151 : vector<4x128xi1>, vector<4x128xf32>
    %153 = arith.addf %146, %152 : vector<4x128xf32>
    %c15_i32 = arith.constant 15 : i32
    %154 = vector.broadcast %c15_i32 : i32 to vector<4x128xi32>
    %155 = arith.cmpi eq, %9, %154 : vector<4x128xi32>
    %156 = vector.extract_strided_slice %39 {offsets = [15, 0, 0], sizes = [1, 4, 128], strides = [1, 1, 1]} : vector<21x4x128xf32> to vector<1x4x128xf32>
    %157 = vector.shape_cast %156 : vector<1x4x128xf32> to vector<4x128xf32>
    %cst_41 = arith.constant 0.000000e+00 : f32
    %158 = vector.broadcast %cst_41 : f32 to vector<4x128xf32>
    %159 = arith.select %155, %157, %158 : vector<4x128xi1>, vector<4x128xf32>
    %160 = arith.addf %153, %159 : vector<4x128xf32>
    %c16_i32 = arith.constant 16 : i32
    %161 = vector.broadcast %c16_i32 : i32 to vector<4x128xi32>
    %162 = arith.cmpi eq, %9, %161 : vector<4x128xi32>
    %163 = vector.extract_strided_slice %39 {offsets = [16, 0, 0], sizes = [1, 4, 128], strides = [1, 1, 1]} : vector<21x4x128xf32> to vector<1x4x128xf32>
    %164 = vector.shape_cast %163 : vector<1x4x128xf32> to vector<4x128xf32>
    %cst_42 = arith.constant 0.000000e+00 : f32
    %165 = vector.broadcast %cst_42 : f32 to vector<4x128xf32>
    %166 = arith.select %162, %164, %165 : vector<4x128xi1>, vector<4x128xf32>
    %167 = arith.addf %160, %166 : vector<4x128xf32>
    %c17_i32 = arith.constant 17 : i32
    %168 = vector.broadcast %c17_i32 : i32 to vector<4x128xi32>
    %169 = arith.cmpi eq, %9, %168 : vector<4x128xi32>
    %170 = vector.extract_strided_slice %39 {offsets = [17, 0, 0], sizes = [1, 4, 128], strides = [1, 1, 1]} : vector<21x4x128xf32> to vector<1x4x128xf32>
    %171 = vector.shape_cast %170 : vector<1x4x128xf32> to vector<4x128xf32>
    %cst_43 = arith.constant 0.000000e+00 : f32
    %172 = vector.broadcast %cst_43 : f32 to vector<4x128xf32>
    %173 = arith.select %169, %171, %172 : vector<4x128xi1>, vector<4x128xf32>
    %174 = arith.addf %167, %173 : vector<4x128xf32>
    %c18_i32 = arith.constant 18 : i32
    %175 = vector.broadcast %c18_i32 : i32 to vector<4x128xi32>
    %176 = arith.cmpi eq, %9, %175 : vector<4x128xi32>
    %177 = vector.extract_strided_slice %39 {offsets = [18, 0, 0], sizes = [1, 4, 128], strides = [1, 1, 1]} : vector<21x4x128xf32> to vector<1x4x128xf32>
    %178 = vector.shape_cast %177 : vector<1x4x128xf32> to vector<4x128xf32>
    %cst_44 = arith.constant 0.000000e+00 : f32
    %179 = vector.broadcast %cst_44 : f32 to vector<4x128xf32>
    %180 = arith.select %176, %178, %179 : vector<4x128xi1>, vector<4x128xf32>
    %181 = arith.addf %174, %180 : vector<4x128xf32>
    %c19_i32 = arith.constant 19 : i32
    %182 = vector.broadcast %c19_i32 : i32 to vector<4x128xi32>
    %183 = arith.cmpi eq, %9, %182 : vector<4x128xi32>
    %184 = vector.extract_strided_slice %39 {offsets = [19, 0, 0], sizes = [1, 4, 128], strides = [1, 1, 1]} : vector<21x4x128xf32> to vector<1x4x128xf32>
    %185 = vector.shape_cast %184 : vector<1x4x128xf32> to vector<4x128xf32>
    %cst_45 = arith.constant 0.000000e+00 : f32
    %186 = vector.broadcast %cst_45 : f32 to vector<4x128xf32>
    %187 = arith.select %183, %185, %186 : vector<4x128xi1>, vector<4x128xf32>
    %188 = arith.addf %181, %187 : vector<4x128xf32>
    %c20_i32 = arith.constant 20 : i32
    %189 = vector.broadcast %c20_i32 : i32 to vector<4x128xi32>
    %190 = arith.cmpi eq, %9, %189 : vector<4x128xi32>
    %191 = vector.extract_strided_slice %39 {offsets = [20, 0, 0], sizes = [1, 4, 128], strides = [1, 1, 1]} : vector<21x4x128xf32> to vector<1x4x128xf32>
    %192 = vector.shape_cast %191 : vector<1x4x128xf32> to vector<4x128xf32>
    %cst_46 = arith.constant 0.000000e+00 : f32
    %193 = vector.broadcast %cst_46 : f32 to vector<4x128xf32>
    %194 = arith.select %190, %192, %193 : vector<4x128xi1>, vector<4x128xf32>
    %195 = arith.addf %188, %194 : vector<4x128xf32>
    %196 = arith.subf %47, %195 : vector<4x128xf32>
    %cst_47 = arith.constant 0.000000e+00 : f32
    %197 = vector.broadcast %cst_47 : f32 to vector<4x128xf32>
    %198 = arith.select %11, %197, %196 : vector<4x128xi1>, vector<4x128xf32>
    %cst_48 = arith.constant -1.000000e+30 : f32
    %199 = vector.broadcast %cst_48 : f32 to vector<4x128xf32>
    %200 = arith.select %13, %198, %199 : vector<4x128xi1>, vector<4x128xf32>
    %201 = vector.shape_cast %15 : vector<4x128xf32> to vector<1x4x128xf32>
    %cst_49 = arith.constant dense<0.000000e+00> : vector<1xf32>
    %202 = vector.multi_reduction <add>, %201, %cst_49 [1, 2] : vector<1x4x128xf32> to vector<1xf32>
    %203 = vector.shape_cast %202 : vector<1xf32> to vector<1x1x1xf32>
    %204 = vector.extract %203[0, 0, 0] : f32 from vector<1x1x1xf32>
    %205 = vector.broadcast %204 : f32 to vector<1x1xf32>
    %cst_50 = arith.constant 3.000000e+00 : f32
    %206 = vector.broadcast %cst_50 : f32 to vector<1x1xf32>
    %207 = arith.mulf %206, %205 : vector<1x1xf32>
    %cst_51 = arith.constant 4.990000e+02 : f32
    %208 = vector.broadcast %cst_51 : f32 to vector<1x1xf32>
    %209 = arith.minimumf %207, %208 : vector<1x1xf32>
    %cst_52 = arith.constant dense<0.000000e+00> : vector<128x4xf32>
    %210 = tpu.matmul %4, %200, %cst_52 {dimension_numbers = #tpu.dot_dimension_numbers<[1], [1], [0], [0], [0, 0, 1, 0], [], []>} : vector<128x128xf32>, vector<4x128xf32>, vector<128x4xf32> -> vector<128x4xf32>
    %211 = vector.extract_strided_slice %200 {offsets = [0, 0], sizes = [1, 128], strides = [1, 1]} : vector<4x128xf32> to vector<1x128xf32>
    %c0_i32_53 = arith.constant 0 : i32
    %212 = vector.broadcast %c0_i32_53 : i32 to vector<128x128xi32>
    %213 = arith.addi %212, %1 : vector<128x128xi32>
    %cst_54 = arith.constant 0.000000e+00 : f32
    %214 = vector.broadcast %cst_54 : f32 to vector<1x128xf32>
    %215 = vector.extract_strided_slice %210 {offsets = [0, 0], sizes = [128, 1], strides = [1, 1]} : vector<128x4xf32> to vector<128x1xf32>
    %c0_i32_55 = arith.constant 0 : i32
    %216 = vector.broadcast %c0_i32_55 : i32 to vector<128x128xi32>
    %217 = arith.addi %216, %0 : vector<128x128xi32>
    %218 = arith.cmpi ne, %217, %213 : vector<128x128xi32>
    %219 = vector.broadcast %215 : vector<128x1xf32> to vector<128x128xf32>
    %220 = vector.broadcast %211 : vector<1x128xf32> to vector<128x128xf32>
    %221 = arith.cmpf ogt, %219, %220 : vector<128x128xf32>
    %222 = vector.broadcast %215 : vector<128x1xf32> to vector<128x128xf32>
    %223 = vector.broadcast %211 : vector<1x128xf32> to vector<128x128xf32>
    %224 = arith.cmpf oeq, %222, %223 : vector<128x128xf32>
    %225 = arith.cmpi slt, %217, %213 : vector<128x128xi32>
    %226 = arith.andi %224, %225 : vector<128x128xi1>
    %227 = arith.ori %221, %226 : vector<128x128xi1>
    %228 = arith.andi %218, %227 : vector<128x128xi1>
    %229 = arith.extui %228 : vector<128x128xi1> to vector<128x128xi32>
    %230 = arith.sitofp %229 : vector<128x128xi32> to vector<128x128xf32>
    %cst_56 = arith.constant dense<0.000000e+00> : vector<128xf32>
    %231 = vector.multi_reduction <add>, %230, %cst_56 [0] : vector<128x128xf32> to vector<128xf32>
    %232 = vector.shape_cast %231 : vector<128xf32> to vector<1x128xf32>
    %233 = arith.addf %214, %232 : vector<1x128xf32>
    %234 = vector.extract_strided_slice %210 {offsets = [0, 1], sizes = [128, 1], strides = [1, 1]} : vector<128x4xf32> to vector<128x1xf32>
    %c128_i32 = arith.constant 128 : i32
    %235 = vector.broadcast %c128_i32 : i32 to vector<128x128xi32>
    %236 = arith.addi %235, %0 : vector<128x128xi32>
    %237 = arith.cmpi ne, %236, %213 : vector<128x128xi32>
    %238 = vector.broadcast %234 : vector<128x1xf32> to vector<128x128xf32>
    %239 = vector.broadcast %211 : vector<1x128xf32> to vector<128x128xf32>
    %240 = arith.cmpf ogt, %238, %239 : vector<128x128xf32>
    %241 = vector.broadcast %234 : vector<128x1xf32> to vector<128x128xf32>
    %242 = vector.broadcast %211 : vector<1x128xf32> to vector<128x128xf32>
    %243 = arith.cmpf oeq, %241, %242 : vector<128x128xf32>
    %244 = arith.cmpi slt, %236, %213 : vector<128x128xi32>
    %245 = arith.andi %243, %244 : vector<128x128xi1>
    %246 = arith.ori %240, %245 : vector<128x128xi1>
    %247 = arith.andi %237, %246 : vector<128x128xi1>
    %248 = arith.extui %247 : vector<128x128xi1> to vector<128x128xi32>
    %249 = arith.sitofp %248 : vector<128x128xi32> to vector<128x128xf32>
    %cst_57 = arith.constant dense<0.000000e+00> : vector<128xf32>
    %250 = vector.multi_reduction <add>, %249, %cst_57 [0] : vector<128x128xf32> to vector<128xf32>
    %251 = vector.shape_cast %250 : vector<128xf32> to vector<1x128xf32>
    %252 = arith.addf %233, %251 : vector<1x128xf32>
    %253 = vector.extract_strided_slice %210 {offsets = [0, 2], sizes = [128, 1], strides = [1, 1]} : vector<128x4xf32> to vector<128x1xf32>
    %c256_i32 = arith.constant 256 : i32
    %254 = vector.broadcast %c256_i32 : i32 to vector<128x128xi32>
    %255 = arith.addi %254, %0 : vector<128x128xi32>
    %256 = arith.cmpi ne, %255, %213 : vector<128x128xi32>
    %257 = vector.broadcast %253 : vector<128x1xf32> to vector<128x128xf32>
    %258 = vector.broadcast %211 : vector<1x128xf32> to vector<128x128xf32>
    %259 = arith.cmpf ogt, %257, %258 : vector<128x128xf32>
    %260 = vector.broadcast %253 : vector<128x1xf32> to vector<128x128xf32>
    %261 = vector.broadcast %211 : vector<1x128xf32> to vector<128x128xf32>
    %262 = arith.cmpf oeq, %260, %261 : vector<128x128xf32>
    %263 = arith.cmpi slt, %255, %213 : vector<128x128xi32>
    %264 = arith.andi %262, %263 : vector<128x128xi1>
    %265 = arith.ori %259, %264 : vector<128x128xi1>
    %266 = arith.andi %256, %265 : vector<128x128xi1>
    %267 = arith.extui %266 : vector<128x128xi1> to vector<128x128xi32>
    %268 = arith.sitofp %267 : vector<128x128xi32> to vector<128x128xf32>
    %cst_58 = arith.constant dense<0.000000e+00> : vector<128xf32>
    %269 = vector.multi_reduction <add>, %268, %cst_58 [0] : vector<128x128xf32> to vector<128xf32>
    %270 = vector.shape_cast %269 : vector<128xf32> to vector<1x128xf32>
    %271 = arith.addf %252, %270 : vector<1x128xf32>
    %272 = vector.extract_strided_slice %210 {offsets = [0, 3], sizes = [128, 1], strides = [1, 1]} : vector<128x4xf32> to vector<128x1xf32>
    %c384_i32 = arith.constant 384 : i32
    %273 = vector.broadcast %c384_i32 : i32 to vector<128x128xi32>
    %274 = arith.addi %273, %0 : vector<128x128xi32>
    %275 = arith.cmpi ne, %274, %213 : vector<128x128xi32>
    %276 = vector.broadcast %272 : vector<128x1xf32> to vector<128x128xf32>
    %277 = vector.broadcast %211 : vector<1x128xf32> to vector<128x128xf32>
    %278 = arith.cmpf ogt, %276, %277 : vector<128x128xf32>
    %279 = vector.broadcast %272 : vector<128x1xf32> to vector<128x128xf32>
    %280 = vector.broadcast %211 : vector<1x128xf32> to vector<128x128xf32>
    %281 = arith.cmpf oeq, %279, %280 : vector<128x128xf32>
    %282 = arith.cmpi slt, %274, %213 : vector<128x128xi32>
    %283 = arith.andi %281, %282 : vector<128x128xi1>
    %284 = arith.ori %278, %283 : vector<128x128xi1>
    %285 = arith.andi %275, %284 : vector<128x128xi1>
    %286 = arith.extui %285 : vector<128x128xi1> to vector<128x128xi32>
    %287 = arith.sitofp %286 : vector<128x128xi32> to vector<128x128xf32>
    %cst_59 = arith.constant dense<0.000000e+00> : vector<128xf32>
    %288 = vector.multi_reduction <add>, %287, %cst_59 [0] : vector<128x128xf32> to vector<128xf32>
    %289 = vector.shape_cast %288 : vector<128xf32> to vector<1x128xf32>
    %290 = arith.addf %271, %289 : vector<1x128xf32>
    %291 = vector.extract_strided_slice %200 {offsets = [1, 0], sizes = [1, 128], strides = [1, 1]} : vector<4x128xf32> to vector<1x128xf32>
    %c128_i32_60 = arith.constant 128 : i32
    %292 = vector.broadcast %c128_i32_60 : i32 to vector<128x128xi32>
    %293 = arith.addi %292, %1 : vector<128x128xi32>
    %cst_61 = arith.constant 0.000000e+00 : f32
    %294 = vector.broadcast %cst_61 : f32 to vector<1x128xf32>
    %295 = vector.extract_strided_slice %210 {offsets = [0, 0], sizes = [128, 1], strides = [1, 1]} : vector<128x4xf32> to vector<128x1xf32>
    %c0_i32_62 = arith.constant 0 : i32
    %296 = vector.broadcast %c0_i32_62 : i32 to vector<128x128xi32>
    %297 = arith.addi %296, %0 : vector<128x128xi32>
    %298 = arith.cmpi ne, %297, %293 : vector<128x128xi32>
    %299 = vector.broadcast %295 : vector<128x1xf32> to vector<128x128xf32>
    %300 = vector.broadcast %291 : vector<1x128xf32> to vector<128x128xf32>
    %301 = arith.cmpf ogt, %299, %300 : vector<128x128xf32>
    %302 = vector.broadcast %295 : vector<128x1xf32> to vector<128x128xf32>
    %303 = vector.broadcast %291 : vector<1x128xf32> to vector<128x128xf32>
    %304 = arith.cmpf oeq, %302, %303 : vector<128x128xf32>
    %305 = arith.cmpi slt, %297, %293 : vector<128x128xi32>
    %306 = arith.andi %304, %305 : vector<128x128xi1>
    %307 = arith.ori %301, %306 : vector<128x128xi1>
    %308 = arith.andi %298, %307 : vector<128x128xi1>
    %309 = arith.extui %308 : vector<128x128xi1> to vector<128x128xi32>
    %310 = arith.sitofp %309 : vector<128x128xi32> to vector<128x128xf32>
    %cst_63 = arith.constant dense<0.000000e+00> : vector<128xf32>
    %311 = vector.multi_reduction <add>, %310, %cst_63 [0] : vector<128x128xf32> to vector<128xf32>
    %312 = vector.shape_cast %311 : vector<128xf32> to vector<1x128xf32>
    %313 = arith.addf %294, %312 : vector<1x128xf32>
    %314 = vector.extract_strided_slice %210 {offsets = [0, 1], sizes = [128, 1], strides = [1, 1]} : vector<128x4xf32> to vector<128x1xf32>
    %c128_i32_64 = arith.constant 128 : i32
    %315 = vector.broadcast %c128_i32_64 : i32 to vector<128x128xi32>
    %316 = arith.addi %315, %0 : vector<128x128xi32>
    %317 = arith.cmpi ne, %316, %293 : vector<128x128xi32>
    %318 = vector.broadcast %314 : vector<128x1xf32> to vector<128x128xf32>
    %319 = vector.broadcast %291 : vector<1x128xf32> to vector<128x128xf32>
    %320 = arith.cmpf ogt, %318, %319 : vector<128x128xf32>
    %321 = vector.broadcast %314 : vector<128x1xf32> to vector<128x128xf32>
    %322 = vector.broadcast %291 : vector<1x128xf32> to vector<128x128xf32>
    %323 = arith.cmpf oeq, %321, %322 : vector<128x128xf32>
    %324 = arith.cmpi slt, %316, %293 : vector<128x128xi32>
    %325 = arith.andi %323, %324 : vector<128x128xi1>
    %326 = arith.ori %320, %325 : vector<128x128xi1>
    %327 = arith.andi %317, %326 : vector<128x128xi1>
    %328 = arith.extui %327 : vector<128x128xi1> to vector<128x128xi32>
    %329 = arith.sitofp %328 : vector<128x128xi32> to vector<128x128xf32>
    %cst_65 = arith.constant dense<0.000000e+00> : vector<128xf32>
    %330 = vector.multi_reduction <add>, %329, %cst_65 [0] : vector<128x128xf32> to vector<128xf32>
    %331 = vector.shape_cast %330 : vector<128xf32> to vector<1x128xf32>
    %332 = arith.addf %313, %331 : vector<1x128xf32>
    %333 = vector.extract_strided_slice %210 {offsets = [0, 2], sizes = [128, 1], strides = [1, 1]} : vector<128x4xf32> to vector<128x1xf32>
    %c256_i32_66 = arith.constant 256 : i32
    %334 = vector.broadcast %c256_i32_66 : i32 to vector<128x128xi32>
    %335 = arith.addi %334, %0 : vector<128x128xi32>
    %336 = arith.cmpi ne, %335, %293 : vector<128x128xi32>
    %337 = vector.broadcast %333 : vector<128x1xf32> to vector<128x128xf32>
    %338 = vector.broadcast %291 : vector<1x128xf32> to vector<128x128xf32>
    %339 = arith.cmpf ogt, %337, %338 : vector<128x128xf32>
    %340 = vector.broadcast %333 : vector<128x1xf32> to vector<128x128xf32>
    %341 = vector.broadcast %291 : vector<1x128xf32> to vector<128x128xf32>
    %342 = arith.cmpf oeq, %340, %341 : vector<128x128xf32>
    %343 = arith.cmpi slt, %335, %293 : vector<128x128xi32>
    %344 = arith.andi %342, %343 : vector<128x128xi1>
    %345 = arith.ori %339, %344 : vector<128x128xi1>
    %346 = arith.andi %336, %345 : vector<128x128xi1>
    %347 = arith.extui %346 : vector<128x128xi1> to vector<128x128xi32>
    %348 = arith.sitofp %347 : vector<128x128xi32> to vector<128x128xf32>
    %cst_67 = arith.constant dense<0.000000e+00> : vector<128xf32>
    %349 = vector.multi_reduction <add>, %348, %cst_67 [0] : vector<128x128xf32> to vector<128xf32>
    %350 = vector.shape_cast %349 : vector<128xf32> to vector<1x128xf32>
    %351 = arith.addf %332, %350 : vector<1x128xf32>
    %352 = vector.extract_strided_slice %210 {offsets = [0, 3], sizes = [128, 1], strides = [1, 1]} : vector<128x4xf32> to vector<128x1xf32>
    %c384_i32_68 = arith.constant 384 : i32
    %353 = vector.broadcast %c384_i32_68 : i32 to vector<128x128xi32>
    %354 = arith.addi %353, %0 : vector<128x128xi32>
    %355 = arith.cmpi ne, %354, %293 : vector<128x128xi32>
    %356 = vector.broadcast %352 : vector<128x1xf32> to vector<128x128xf32>
    %357 = vector.broadcast %291 : vector<1x128xf32> to vector<128x128xf32>
    %358 = arith.cmpf ogt, %356, %357 : vector<128x128xf32>
    %359 = vector.broadcast %352 : vector<128x1xf32> to vector<128x128xf32>
    %360 = vector.broadcast %291 : vector<1x128xf32> to vector<128x128xf32>
    %361 = arith.cmpf oeq, %359, %360 : vector<128x128xf32>
    %362 = arith.cmpi slt, %354, %293 : vector<128x128xi32>
    %363 = arith.andi %361, %362 : vector<128x128xi1>
    %364 = arith.ori %358, %363 : vector<128x128xi1>
    %365 = arith.andi %355, %364 : vector<128x128xi1>
    %366 = arith.extui %365 : vector<128x128xi1> to vector<128x128xi32>
    %367 = arith.sitofp %366 : vector<128x128xi32> to vector<128x128xf32>
    %cst_69 = arith.constant dense<0.000000e+00> : vector<128xf32>
    %368 = vector.multi_reduction <add>, %367, %cst_69 [0] : vector<128x128xf32> to vector<128xf32>
    %369 = vector.shape_cast %368 : vector<128xf32> to vector<1x128xf32>
    %370 = arith.addf %351, %369 : vector<1x128xf32>
    %371 = vector.extract_strided_slice %200 {offsets = [2, 0], sizes = [1, 128], strides = [1, 1]} : vector<4x128xf32> to vector<1x128xf32>
    %c256_i32_70 = arith.constant 256 : i32
    %372 = vector.broadcast %c256_i32_70 : i32 to vector<128x128xi32>
    %373 = arith.addi %372, %1 : vector<128x128xi32>
    %cst_71 = arith.constant 0.000000e+00 : f32
    %374 = vector.broadcast %cst_71 : f32 to vector<1x128xf32>
    %375 = vector.extract_strided_slice %210 {offsets = [0, 0], sizes = [128, 1], strides = [1, 1]} : vector<128x4xf32> to vector<128x1xf32>
    %c0_i32_72 = arith.constant 0 : i32
    %376 = vector.broadcast %c0_i32_72 : i32 to vector<128x128xi32>
    %377 = arith.addi %376, %0 : vector<128x128xi32>
    %378 = arith.cmpi ne, %377, %373 : vector<128x128xi32>
    %379 = vector.broadcast %375 : vector<128x1xf32> to vector<128x128xf32>
    %380 = vector.broadcast %371 : vector<1x128xf32> to vector<128x128xf32>
    %381 = arith.cmpf ogt, %379, %380 : vector<128x128xf32>
    %382 = vector.broadcast %375 : vector<128x1xf32> to vector<128x128xf32>
    %383 = vector.broadcast %371 : vector<1x128xf32> to vector<128x128xf32>
    %384 = arith.cmpf oeq, %382, %383 : vector<128x128xf32>
    %385 = arith.cmpi slt, %377, %373 : vector<128x128xi32>
    %386 = arith.andi %384, %385 : vector<128x128xi1>
    %387 = arith.ori %381, %386 : vector<128x128xi1>
    %388 = arith.andi %378, %387 : vector<128x128xi1>
    %389 = arith.extui %388 : vector<128x128xi1> to vector<128x128xi32>
    %390 = arith.sitofp %389 : vector<128x128xi32> to vector<128x128xf32>
    %cst_73 = arith.constant dense<0.000000e+00> : vector<128xf32>
    %391 = vector.multi_reduction <add>, %390, %cst_73 [0] : vector<128x128xf32> to vector<128xf32>
    %392 = vector.shape_cast %391 : vector<128xf32> to vector<1x128xf32>
    %393 = arith.addf %374, %392 : vector<1x128xf32>
    %394 = vector.extract_strided_slice %210 {offsets = [0, 1], sizes = [128, 1], strides = [1, 1]} : vector<128x4xf32> to vector<128x1xf32>
    %c128_i32_74 = arith.constant 128 : i32
    %395 = vector.broadcast %c128_i32_74 : i32 to vector<128x128xi32>
    %396 = arith.addi %395, %0 : vector<128x128xi32>
    %397 = arith.cmpi ne, %396, %373 : vector<128x128xi32>
    %398 = vector.broadcast %394 : vector<128x1xf32> to vector<128x128xf32>
    %399 = vector.broadcast %371 : vector<1x128xf32> to vector<128x128xf32>
    %400 = arith.cmpf ogt, %398, %399 : vector<128x128xf32>
    %401 = vector.broadcast %394 : vector<128x1xf32> to vector<128x128xf32>
    %402 = vector.broadcast %371 : vector<1x128xf32> to vector<128x128xf32>
    %403 = arith.cmpf oeq, %401, %402 : vector<128x128xf32>
    %404 = arith.cmpi slt, %396, %373 : vector<128x128xi32>
    %405 = arith.andi %403, %404 : vector<128x128xi1>
    %406 = arith.ori %400, %405 : vector<128x128xi1>
    %407 = arith.andi %397, %406 : vector<128x128xi1>
    %408 = arith.extui %407 : vector<128x128xi1> to vector<128x128xi32>
    %409 = arith.sitofp %408 : vector<128x128xi32> to vector<128x128xf32>
    %cst_75 = arith.constant dense<0.000000e+00> : vector<128xf32>
    %410 = vector.multi_reduction <add>, %409, %cst_75 [0] : vector<128x128xf32> to vector<128xf32>
    %411 = vector.shape_cast %410 : vector<128xf32> to vector<1x128xf32>
    %412 = arith.addf %393, %411 : vector<1x128xf32>
    %413 = vector.extract_strided_slice %210 {offsets = [0, 2], sizes = [128, 1], strides = [1, 1]} : vector<128x4xf32> to vector<128x1xf32>
    %c256_i32_76 = arith.constant 256 : i32
    %414 = vector.broadcast %c256_i32_76 : i32 to vector<128x128xi32>
    %415 = arith.addi %414, %0 : vector<128x128xi32>
    %416 = arith.cmpi ne, %415, %373 : vector<128x128xi32>
    %417 = vector.broadcast %413 : vector<128x1xf32> to vector<128x128xf32>
    %418 = vector.broadcast %371 : vector<1x128xf32> to vector<128x128xf32>
    %419 = arith.cmpf ogt, %417, %418 : vector<128x128xf32>
    %420 = vector.broadcast %413 : vector<128x1xf32> to vector<128x128xf32>
    %421 = vector.broadcast %371 : vector<1x128xf32> to vector<128x128xf32>
    %422 = arith.cmpf oeq, %420, %421 : vector<128x128xf32>
    %423 = arith.cmpi slt, %415, %373 : vector<128x128xi32>
    %424 = arith.andi %422, %423 : vector<128x128xi1>
    %425 = arith.ori %419, %424 : vector<128x128xi1>
    %426 = arith.andi %416, %425 : vector<128x128xi1>
    %427 = arith.extui %426 : vector<128x128xi1> to vector<128x128xi32>
    %428 = arith.sitofp %427 : vector<128x128xi32> to vector<128x128xf32>
    %cst_77 = arith.constant dense<0.000000e+00> : vector<128xf32>
    %429 = vector.multi_reduction <add>, %428, %cst_77 [0] : vector<128x128xf32> to vector<128xf32>
    %430 = vector.shape_cast %429 : vector<128xf32> to vector<1x128xf32>
    %431 = arith.addf %412, %430 : vector<1x128xf32>
    %432 = vector.extract_strided_slice %210 {offsets = [0, 3], sizes = [128, 1], strides = [1, 1]} : vector<128x4xf32> to vector<128x1xf32>
    %c384_i32_78 = arith.constant 384 : i32
    %433 = vector.broadcast %c384_i32_78 : i32 to vector<128x128xi32>
    %434 = arith.addi %433, %0 : vector<128x128xi32>
    %435 = arith.cmpi ne, %434, %373 : vector<128x128xi32>
    %436 = vector.broadcast %432 : vector<128x1xf32> to vector<128x128xf32>
    %437 = vector.broadcast %371 : vector<1x128xf32> to vector<128x128xf32>
    %438 = arith.cmpf ogt, %436, %437 : vector<128x128xf32>
    %439 = vector.broadcast %432 : vector<128x1xf32> to vector<128x128xf32>
    %440 = vector.broadcast %371 : vector<1x128xf32> to vector<128x128xf32>
    %441 = arith.cmpf oeq, %439, %440 : vector<128x128xf32>
    %442 = arith.cmpi slt, %434, %373 : vector<128x128xi32>
    %443 = arith.andi %441, %442 : vector<128x128xi1>
    %444 = arith.ori %438, %443 : vector<128x128xi1>
    %445 = arith.andi %435, %444 : vector<128x128xi1>
    %446 = arith.extui %445 : vector<128x128xi1> to vector<128x128xi32>
    %447 = arith.sitofp %446 : vector<128x128xi32> to vector<128x128xf32>
    %cst_79 = arith.constant dense<0.000000e+00> : vector<128xf32>
    %448 = vector.multi_reduction <add>, %447, %cst_79 [0] : vector<128x128xf32> to vector<128xf32>
    %449 = vector.shape_cast %448 : vector<128xf32> to vector<1x128xf32>
    %450 = arith.addf %431, %449 : vector<1x128xf32>
    %451 = vector.extract_strided_slice %200 {offsets = [3, 0], sizes = [1, 128], strides = [1, 1]} : vector<4x128xf32> to vector<1x128xf32>
    %c384_i32_80 = arith.constant 384 : i32
    %452 = vector.broadcast %c384_i32_80 : i32 to vector<128x128xi32>
    %453 = arith.addi %452, %1 : vector<128x128xi32>
    %cst_81 = arith.constant 0.000000e+00 : f32
    %454 = vector.broadcast %cst_81 : f32 to vector<1x128xf32>
    %455 = vector.extract_strided_slice %210 {offsets = [0, 0], sizes = [128, 1], strides = [1, 1]} : vector<128x4xf32> to vector<128x1xf32>
    %c0_i32_82 = arith.constant 0 : i32
    %456 = vector.broadcast %c0_i32_82 : i32 to vector<128x128xi32>
    %457 = arith.addi %456, %0 : vector<128x128xi32>
    %458 = arith.cmpi ne, %457, %453 : vector<128x128xi32>
    %459 = vector.broadcast %455 : vector<128x1xf32> to vector<128x128xf32>
    %460 = vector.broadcast %451 : vector<1x128xf32> to vector<128x128xf32>
    %461 = arith.cmpf ogt, %459, %460 : vector<128x128xf32>
    %462 = vector.broadcast %455 : vector<128x1xf32> to vector<128x128xf32>
    %463 = vector.broadcast %451 : vector<1x128xf32> to vector<128x128xf32>
    %464 = arith.cmpf oeq, %462, %463 : vector<128x128xf32>
    %465 = arith.cmpi slt, %457, %453 : vector<128x128xi32>
    %466 = arith.andi %464, %465 : vector<128x128xi1>
    %467 = arith.ori %461, %466 : vector<128x128xi1>
    %468 = arith.andi %458, %467 : vector<128x128xi1>
    %469 = arith.extui %468 : vector<128x128xi1> to vector<128x128xi32>
    %470 = arith.sitofp %469 : vector<128x128xi32> to vector<128x128xf32>
    %cst_83 = arith.constant dense<0.000000e+00> : vector<128xf32>
    %471 = vector.multi_reduction <add>, %470, %cst_83 [0] : vector<128x128xf32> to vector<128xf32>
    %472 = vector.shape_cast %471 : vector<128xf32> to vector<1x128xf32>
    %473 = arith.addf %454, %472 : vector<1x128xf32>
    %474 = vector.extract_strided_slice %210 {offsets = [0, 1], sizes = [128, 1], strides = [1, 1]} : vector<128x4xf32> to vector<128x1xf32>
    %c128_i32_84 = arith.constant 128 : i32
    %475 = vector.broadcast %c128_i32_84 : i32 to vector<128x128xi32>
    %476 = arith.addi %475, %0 : vector<128x128xi32>
    %477 = arith.cmpi ne, %476, %453 : vector<128x128xi32>
    %478 = vector.broadcast %474 : vector<128x1xf32> to vector<128x128xf32>
    %479 = vector.broadcast %451 : vector<1x128xf32> to vector<128x128xf32>
    %480 = arith.cmpf ogt, %478, %479 : vector<128x128xf32>
    %481 = vector.broadcast %474 : vector<128x1xf32> to vector<128x128xf32>
    %482 = vector.broadcast %451 : vector<1x128xf32> to vector<128x128xf32>
    %483 = arith.cmpf oeq, %481, %482 : vector<128x128xf32>
    %484 = arith.cmpi slt, %476, %453 : vector<128x128xi32>
    %485 = arith.andi %483, %484 : vector<128x128xi1>
    %486 = arith.ori %480, %485 : vector<128x128xi1>
    %487 = arith.andi %477, %486 : vector<128x128xi1>
    %488 = arith.extui %487 : vector<128x128xi1> to vector<128x128xi32>
    %489 = arith.sitofp %488 : vector<128x128xi32> to vector<128x128xf32>
    %cst_85 = arith.constant dense<0.000000e+00> : vector<128xf32>
    %490 = vector.multi_reduction <add>, %489, %cst_85 [0] : vector<128x128xf32> to vector<128xf32>
    %491 = vector.shape_cast %490 : vector<128xf32> to vector<1x128xf32>
    %492 = arith.addf %473, %491 : vector<1x128xf32>
    %493 = vector.extract_strided_slice %210 {offsets = [0, 2], sizes = [128, 1], strides = [1, 1]} : vector<128x4xf32> to vector<128x1xf32>
    %c256_i32_86 = arith.constant 256 : i32
    %494 = vector.broadcast %c256_i32_86 : i32 to vector<128x128xi32>
    %495 = arith.addi %494, %0 : vector<128x128xi32>
    %496 = arith.cmpi ne, %495, %453 : vector<128x128xi32>
    %497 = vector.broadcast %493 : vector<128x1xf32> to vector<128x128xf32>
    %498 = vector.broadcast %451 : vector<1x128xf32> to vector<128x128xf32>
    %499 = arith.cmpf ogt, %497, %498 : vector<128x128xf32>
    %500 = vector.broadcast %493 : vector<128x1xf32> to vector<128x128xf32>
    %501 = vector.broadcast %451 : vector<1x128xf32> to vector<128x128xf32>
    %502 = arith.cmpf oeq, %500, %501 : vector<128x128xf32>
    %503 = arith.cmpi slt, %495, %453 : vector<128x128xi32>
    %504 = arith.andi %502, %503 : vector<128x128xi1>
    %505 = arith.ori %499, %504 : vector<128x128xi1>
    %506 = arith.andi %496, %505 : vector<128x128xi1>
    %507 = arith.extui %506 : vector<128x128xi1> to vector<128x128xi32>
    %508 = arith.sitofp %507 : vector<128x128xi32> to vector<128x128xf32>
    %cst_87 = arith.constant dense<0.000000e+00> : vector<128xf32>
    %509 = vector.multi_reduction <add>, %508, %cst_87 [0] : vector<128x128xf32> to vector<128xf32>
    %510 = vector.shape_cast %509 : vector<128xf32> to vector<1x128xf32>
    %511 = arith.addf %492, %510 : vector<1x128xf32>
    %512 = vector.extract_strided_slice %210 {offsets = [0, 3], sizes = [128, 1], strides = [1, 1]} : vector<128x4xf32> to vector<128x1xf32>
    %c384_i32_88 = arith.constant 384 : i32
    %513 = vector.broadcast %c384_i32_88 : i32 to vector<128x128xi32>
    %514 = arith.addi %513, %0 : vector<128x128xi32>
    %515 = arith.cmpi ne, %514, %453 : vector<128x128xi32>
    %516 = vector.broadcast %512 : vector<128x1xf32> to vector<128x128xf32>
    %517 = vector.broadcast %451 : vector<1x128xf32> to vector<128x128xf32>
    %518 = arith.cmpf ogt, %516, %517 : vector<128x128xf32>
    %519 = vector.broadcast %512 : vector<128x1xf32> to vector<128x128xf32>
    %520 = vector.broadcast %451 : vector<1x128xf32> to vector<128x128xf32>
    %521 = arith.cmpf oeq, %519, %520 : vector<128x128xf32>
    %522 = arith.cmpi slt, %514, %453 : vector<128x128xi32>
    %523 = arith.andi %521, %522 : vector<128x128xi1>
    %524 = arith.ori %518, %523 : vector<128x128xi1>
    %525 = arith.andi %515, %524 : vector<128x128xi1>
    %526 = arith.extui %525 : vector<128x128xi1> to vector<128x128xi32>
    %527 = arith.sitofp %526 : vector<128x128xi32> to vector<128x128xf32>
    %cst_89 = arith.constant dense<0.000000e+00> : vector<128xf32>
    %528 = vector.multi_reduction <add>, %527, %cst_89 [0] : vector<128x128xf32> to vector<128xf32>
    %529 = vector.shape_cast %528 : vector<128xf32> to vector<1x128xf32>
    %530 = arith.addf %511, %529 : vector<1x128xf32>
    %531 = tpu.concatenate %290, %370, %450, %530 in 0 : vector<1x128xf32>, vector<1x128xf32>, vector<1x128xf32>, vector<1x128xf32> -> vector<4x128xf32>
    %532 = vector.broadcast %209 : vector<1x1xf32> to vector<4x128xf32>
    %533 = arith.cmpf olt, %531, %532 : vector<4x128xf32>
    %534 = arith.andi %533, %13 : vector<4x128xi1>
    %535 = arith.ori %11, %534 : vector<4x128xi1>
    %cst_90 = arith.constant 0.000000e+00 : f32
    %536 = vector.broadcast %cst_90 : f32 to vector<4x128xf32>
    %537 = arith.select %535, %196, %536 : vector<4x128xi1>, vector<4x128xf32>
    %538 = vector.shape_cast %537 : vector<4x128xf32> to vector<1x4x128xf32>
    %cst_91 = arith.constant dense<0.000000e+00> : vector<1xf32>
    %539 = vector.multi_reduction <add>, %538, %cst_91 [1, 2] : vector<1x4x128xf32> to vector<1xf32>
    %540 = vector.shape_cast %539 : vector<1xf32> to vector<1x1x1xf32>
    %541 = vector.extract %540[0, 0, 0] : f32 from vector<1x1x1xf32>
    %542 = vector.broadcast %541 : f32 to vector<1x1xf32>
    %543 = arith.addf %6, %542 : vector<1x1xf32>
    %544 = arith.addf %7, %205 : vector<1x1xf32>
    %c1 = arith.constant 1 : index
    %c0_92 = arith.constant 0 : index
    %c0_93 = arith.constant 0 : index
    %545 = vector.load %arg4[%c1, %c0_92, %c0_93] : memref<2x4x128xi32, #tpu.memory_space<vmem>>, vector<1x4x128xi32>
    %546 = vector.shape_cast %545 : vector<1x4x128xi32> to vector<4x128xi32>
    %c0_i32_94 = arith.constant 0 : i32
    %547 = vector.broadcast %c0_i32_94 : i32 to vector<4x128xi32>
    %548 = arith.cmpi sgt, %546, %547 : vector<4x128xi32>
    %c0_i32_95 = arith.constant 0 : i32
    %549 = vector.broadcast %c0_i32_95 : i32 to vector<4x128xi32>
    %550 = arith.cmpi sge, %546, %549 : vector<4x128xi32>
    %551 = arith.extui %548 : vector<4x128xi1> to vector<4x128xi32>
    %552 = arith.sitofp %551 : vector<4x128xi32> to vector<4x128xf32>
    %c1_96 = arith.constant 1 : index
    %c0_97 = arith.constant 0 : index
    %c0_98 = arith.constant 0 : index
    %c0_99 = arith.constant 0 : index
    %553 = vector.load %arg1[%c1_96, %c0_97, %c0_98, %c0_99] : memref<2x4x4x128xf32, #tpu.memory_space<vmem>>, vector<1x4x4x128xf32>
    %554 = vector.shape_cast %553 : vector<1x4x4x128xf32> to vector<4x4x128xf32>
    %c1_100 = arith.constant 1 : index
    %c0_101 = arith.constant 0 : index
    %c0_102 = arith.constant 0 : index
    %c0_103 = arith.constant 0 : index
    %555 = vector.load %arg3[%c1_100, %c0_101, %c0_102, %c0_103] : memref<2x4x4x128xf32, #tpu.memory_space<vmem>>, vector<1x4x4x128xf32>
    %556 = vector.shape_cast %555 : vector<1x4x4x128xf32> to vector<4x4x128xf32>
    %557 = arith.subf %554, %556 : vector<4x4x128xf32>
    %558 = math.absf %557 : vector<4x4x128xf32>
    %cst_104 = arith.constant 1.000000e+00 : f32
    %559 = vector.broadcast %cst_104 : f32 to vector<4x4x128xf32>
    %560 = arith.cmpf olt, %558, %559 : vector<4x4x128xf32>
    %cst_105 = arith.constant 5.000000e-01 : f32
    %561 = vector.broadcast %cst_105 : f32 to vector<4x4x128xf32>
    %562 = arith.mulf %561, %557 : vector<4x4x128xf32>
    %563 = arith.mulf %562, %557 : vector<4x4x128xf32>
    %cst_106 = arith.constant 5.000000e-01 : f32
    %564 = vector.broadcast %cst_106 : f32 to vector<4x4x128xf32>
    %565 = arith.subf %558, %564 : vector<4x4x128xf32>
    %566 = arith.select %560, %563, %565 : vector<4x4x128xi1>, vector<4x4x128xf32>
    %cst_107 = arith.constant dense<0.000000e+00> : vector<4x128xf32>
    %567 = vector.multi_reduction <add>, %566, %cst_107 [0] : vector<4x4x128xf32> to vector<4x128xf32>
    %568 = arith.mulf %567, %552 : vector<4x128xf32>
    %569 = vector.shape_cast %568 : vector<4x128xf32> to vector<1x4x128xf32>
    %cst_108 = arith.constant dense<0.000000e+00> : vector<1xf32>
    %570 = vector.multi_reduction <add>, %569, %cst_108 [1, 2] : vector<1x4x128xf32> to vector<1xf32>
    %571 = vector.shape_cast %570 : vector<1xf32> to vector<1x1x1xf32>
    %572 = vector.extract %571[0, 0, 0] : f32 from vector<1x1x1xf32>
    %573 = vector.broadcast %572 : f32 to vector<1x1xf32>
    %574 = arith.addf %37, %573 : vector<1x1xf32>
    %c1_109 = arith.constant 1 : index
    %c0_110 = arith.constant 0 : index
    %c0_111 = arith.constant 0 : index
    %c0_112 = arith.constant 0 : index
    %575 = vector.load %arg2[%c1_109, %c0_110, %c0_111, %c0_112] : memref<2x21x4x128xf32, #tpu.memory_space<vmem>>, vector<1x21x4x128xf32>
    %576 = vector.shape_cast %575 : vector<1x21x4x128xf32> to vector<21x4x128xf32>
    %cst_113 = arith.constant dense<0xFF800000> : vector<4x128xf32>
    %577 = vector.multi_reduction <maximumf>, %576, %cst_113 [0] : vector<21x4x128xf32> to vector<4x128xf32>
    %578 = vector.shape_cast %577 : vector<4x128xf32> to vector<1x4x128xf32>
    %579 = vector.broadcast %578 : vector<1x4x128xf32> to vector<21x4x128xf32>
    %580 = arith.subf %576, %579 : vector<21x4x128xf32>
    %581 = math.exp %580 : vector<21x4x128xf32>
    %cst_114 = arith.constant dense<0.000000e+00> : vector<4x128xf32>
    %582 = vector.multi_reduction <add>, %581, %cst_114 [0] : vector<21x4x128xf32> to vector<4x128xf32>
    %583 = math.log %582 : vector<4x128xf32>
    %584 = arith.addf %583, %577 : vector<4x128xf32>
    %cst_115 = arith.constant 0.000000e+00 : f32
    %585 = vector.broadcast %cst_115 : f32 to vector<4x128xf32>
    %c0_i32_116 = arith.constant 0 : i32
    %586 = vector.broadcast %c0_i32_116 : i32 to vector<4x128xi32>
    %587 = arith.cmpi eq, %546, %586 : vector<4x128xi32>
    %588 = vector.extract_strided_slice %576 {offsets = [0, 0, 0], sizes = [1, 4, 128], strides = [1, 1, 1]} : vector<21x4x128xf32> to vector<1x4x128xf32>
    %589 = vector.shape_cast %588 : vector<1x4x128xf32> to vector<4x128xf32>
    %cst_117 = arith.constant 0.000000e+00 : f32
    %590 = vector.broadcast %cst_117 : f32 to vector<4x128xf32>
    %591 = arith.select %587, %589, %590 : vector<4x128xi1>, vector<4x128xf32>
    %592 = arith.addf %585, %591 : vector<4x128xf32>
    %c1_i32_118 = arith.constant 1 : i32
    %593 = vector.broadcast %c1_i32_118 : i32 to vector<4x128xi32>
    %594 = arith.cmpi eq, %546, %593 : vector<4x128xi32>
    %595 = vector.extract_strided_slice %576 {offsets = [1, 0, 0], sizes = [1, 4, 128], strides = [1, 1, 1]} : vector<21x4x128xf32> to vector<1x4x128xf32>
    %596 = vector.shape_cast %595 : vector<1x4x128xf32> to vector<4x128xf32>
    %cst_119 = arith.constant 0.000000e+00 : f32
    %597 = vector.broadcast %cst_119 : f32 to vector<4x128xf32>
    %598 = arith.select %594, %596, %597 : vector<4x128xi1>, vector<4x128xf32>
    %599 = arith.addf %592, %598 : vector<4x128xf32>
    %c2_i32_120 = arith.constant 2 : i32
    %600 = vector.broadcast %c2_i32_120 : i32 to vector<4x128xi32>
    %601 = arith.cmpi eq, %546, %600 : vector<4x128xi32>
    %602 = vector.extract_strided_slice %576 {offsets = [2, 0, 0], sizes = [1, 4, 128], strides = [1, 1, 1]} : vector<21x4x128xf32> to vector<1x4x128xf32>
    %603 = vector.shape_cast %602 : vector<1x4x128xf32> to vector<4x128xf32>
    %cst_121 = arith.constant 0.000000e+00 : f32
    %604 = vector.broadcast %cst_121 : f32 to vector<4x128xf32>
    %605 = arith.select %601, %603, %604 : vector<4x128xi1>, vector<4x128xf32>
    %606 = arith.addf %599, %605 : vector<4x128xf32>
    %c3_i32_122 = arith.constant 3 : i32
    %607 = vector.broadcast %c3_i32_122 : i32 to vector<4x128xi32>
    %608 = arith.cmpi eq, %546, %607 : vector<4x128xi32>
    %609 = vector.extract_strided_slice %576 {offsets = [3, 0, 0], sizes = [1, 4, 128], strides = [1, 1, 1]} : vector<21x4x128xf32> to vector<1x4x128xf32>
    %610 = vector.shape_cast %609 : vector<1x4x128xf32> to vector<4x128xf32>
    %cst_123 = arith.constant 0.000000e+00 : f32
    %611 = vector.broadcast %cst_123 : f32 to vector<4x128xf32>
    %612 = arith.select %608, %610, %611 : vector<4x128xi1>, vector<4x128xf32>
    %613 = arith.addf %606, %612 : vector<4x128xf32>
    %c4_i32_124 = arith.constant 4 : i32
    %614 = vector.broadcast %c4_i32_124 : i32 to vector<4x128xi32>
    %615 = arith.cmpi eq, %546, %614 : vector<4x128xi32>
    %616 = vector.extract_strided_slice %576 {offsets = [4, 0, 0], sizes = [1, 4, 128], strides = [1, 1, 1]} : vector<21x4x128xf32> to vector<1x4x128xf32>
    %617 = vector.shape_cast %616 : vector<1x4x128xf32> to vector<4x128xf32>
    %cst_125 = arith.constant 0.000000e+00 : f32
    %618 = vector.broadcast %cst_125 : f32 to vector<4x128xf32>
    %619 = arith.select %615, %617, %618 : vector<4x128xi1>, vector<4x128xf32>
    %620 = arith.addf %613, %619 : vector<4x128xf32>
    %c5_i32_126 = arith.constant 5 : i32
    %621 = vector.broadcast %c5_i32_126 : i32 to vector<4x128xi32>
    %622 = arith.cmpi eq, %546, %621 : vector<4x128xi32>
    %623 = vector.extract_strided_slice %576 {offsets = [5, 0, 0], sizes = [1, 4, 128], strides = [1, 1, 1]} : vector<21x4x128xf32> to vector<1x4x128xf32>
    %624 = vector.shape_cast %623 : vector<1x4x128xf32> to vector<4x128xf32>
    %cst_127 = arith.constant 0.000000e+00 : f32
    %625 = vector.broadcast %cst_127 : f32 to vector<4x128xf32>
    %626 = arith.select %622, %624, %625 : vector<4x128xi1>, vector<4x128xf32>
    %627 = arith.addf %620, %626 : vector<4x128xf32>
    %c6_i32_128 = arith.constant 6 : i32
    %628 = vector.broadcast %c6_i32_128 : i32 to vector<4x128xi32>
    %629 = arith.cmpi eq, %546, %628 : vector<4x128xi32>
    %630 = vector.extract_strided_slice %576 {offsets = [6, 0, 0], sizes = [1, 4, 128], strides = [1, 1, 1]} : vector<21x4x128xf32> to vector<1x4x128xf32>
    %631 = vector.shape_cast %630 : vector<1x4x128xf32> to vector<4x128xf32>
    %cst_129 = arith.constant 0.000000e+00 : f32
    %632 = vector.broadcast %cst_129 : f32 to vector<4x128xf32>
    %633 = arith.select %629, %631, %632 : vector<4x128xi1>, vector<4x128xf32>
    %634 = arith.addf %627, %633 : vector<4x128xf32>
    %c7_i32_130 = arith.constant 7 : i32
    %635 = vector.broadcast %c7_i32_130 : i32 to vector<4x128xi32>
    %636 = arith.cmpi eq, %546, %635 : vector<4x128xi32>
    %637 = vector.extract_strided_slice %576 {offsets = [7, 0, 0], sizes = [1, 4, 128], strides = [1, 1, 1]} : vector<21x4x128xf32> to vector<1x4x128xf32>
    %638 = vector.shape_cast %637 : vector<1x4x128xf32> to vector<4x128xf32>
    %cst_131 = arith.constant 0.000000e+00 : f32
    %639 = vector.broadcast %cst_131 : f32 to vector<4x128xf32>
    %640 = arith.select %636, %638, %639 : vector<4x128xi1>, vector<4x128xf32>
    %641 = arith.addf %634, %640 : vector<4x128xf32>
    %c8_i32_132 = arith.constant 8 : i32
    %642 = vector.broadcast %c8_i32_132 : i32 to vector<4x128xi32>
    %643 = arith.cmpi eq, %546, %642 : vector<4x128xi32>
    %644 = vector.extract_strided_slice %576 {offsets = [8, 0, 0], sizes = [1, 4, 128], strides = [1, 1, 1]} : vector<21x4x128xf32> to vector<1x4x128xf32>
    %645 = vector.shape_cast %644 : vector<1x4x128xf32> to vector<4x128xf32>
    %cst_133 = arith.constant 0.000000e+00 : f32
    %646 = vector.broadcast %cst_133 : f32 to vector<4x128xf32>
    %647 = arith.select %643, %645, %646 : vector<4x128xi1>, vector<4x128xf32>
    %648 = arith.addf %641, %647 : vector<4x128xf32>
    %c9_i32_134 = arith.constant 9 : i32
    %649 = vector.broadcast %c9_i32_134 : i32 to vector<4x128xi32>
    %650 = arith.cmpi eq, %546, %649 : vector<4x128xi32>
    %651 = vector.extract_strided_slice %576 {offsets = [9, 0, 0], sizes = [1, 4, 128], strides = [1, 1, 1]} : vector<21x4x128xf32> to vector<1x4x128xf32>
    %652 = vector.shape_cast %651 : vector<1x4x128xf32> to vector<4x128xf32>
    %cst_135 = arith.constant 0.000000e+00 : f32
    %653 = vector.broadcast %cst_135 : f32 to vector<4x128xf32>
    %654 = arith.select %650, %652, %653 : vector<4x128xi1>, vector<4x128xf32>
    %655 = arith.addf %648, %654 : vector<4x128xf32>
    %c10_i32_136 = arith.constant 10 : i32
    %656 = vector.broadcast %c10_i32_136 : i32 to vector<4x128xi32>
    %657 = arith.cmpi eq, %546, %656 : vector<4x128xi32>
    %658 = vector.extract_strided_slice %576 {offsets = [10, 0, 0], sizes = [1, 4, 128], strides = [1, 1, 1]} : vector<21x4x128xf32> to vector<1x4x128xf32>
    %659 = vector.shape_cast %658 : vector<1x4x128xf32> to vector<4x128xf32>
    %cst_137 = arith.constant 0.000000e+00 : f32
    %660 = vector.broadcast %cst_137 : f32 to vector<4x128xf32>
    %661 = arith.select %657, %659, %660 : vector<4x128xi1>, vector<4x128xf32>
    %662 = arith.addf %655, %661 : vector<4x128xf32>
    %c11_i32_138 = arith.constant 11 : i32
    %663 = vector.broadcast %c11_i32_138 : i32 to vector<4x128xi32>
    %664 = arith.cmpi eq, %546, %663 : vector<4x128xi32>
    %665 = vector.extract_strided_slice %576 {offsets = [11, 0, 0], sizes = [1, 4, 128], strides = [1, 1, 1]} : vector<21x4x128xf32> to vector<1x4x128xf32>
    %666 = vector.shape_cast %665 : vector<1x4x128xf32> to vector<4x128xf32>
    %cst_139 = arith.constant 0.000000e+00 : f32
    %667 = vector.broadcast %cst_139 : f32 to vector<4x128xf32>
    %668 = arith.select %664, %666, %667 : vector<4x128xi1>, vector<4x128xf32>
    %669 = arith.addf %662, %668 : vector<4x128xf32>
    %c12_i32_140 = arith.constant 12 : i32
    %670 = vector.broadcast %c12_i32_140 : i32 to vector<4x128xi32>
    %671 = arith.cmpi eq, %546, %670 : vector<4x128xi32>
    %672 = vector.extract_strided_slice %576 {offsets = [12, 0, 0], sizes = [1, 4, 128], strides = [1, 1, 1]} : vector<21x4x128xf32> to vector<1x4x128xf32>
    %673 = vector.shape_cast %672 : vector<1x4x128xf32> to vector<4x128xf32>
    %cst_141 = arith.constant 0.000000e+00 : f32
    %674 = vector.broadcast %cst_141 : f32 to vector<4x128xf32>
    %675 = arith.select %671, %673, %674 : vector<4x128xi1>, vector<4x128xf32>
    %676 = arith.addf %669, %675 : vector<4x128xf32>
    %c13_i32_142 = arith.constant 13 : i32
    %677 = vector.broadcast %c13_i32_142 : i32 to vector<4x128xi32>
    %678 = arith.cmpi eq, %546, %677 : vector<4x128xi32>
    %679 = vector.extract_strided_slice %576 {offsets = [13, 0, 0], sizes = [1, 4, 128], strides = [1, 1, 1]} : vector<21x4x128xf32> to vector<1x4x128xf32>
    %680 = vector.shape_cast %679 : vector<1x4x128xf32> to vector<4x128xf32>
    %cst_143 = arith.constant 0.000000e+00 : f32
    %681 = vector.broadcast %cst_143 : f32 to vector<4x128xf32>
    %682 = arith.select %678, %680, %681 : vector<4x128xi1>, vector<4x128xf32>
    %683 = arith.addf %676, %682 : vector<4x128xf32>
    %c14_i32_144 = arith.constant 14 : i32
    %684 = vector.broadcast %c14_i32_144 : i32 to vector<4x128xi32>
    %685 = arith.cmpi eq, %546, %684 : vector<4x128xi32>
    %686 = vector.extract_strided_slice %576 {offsets = [14, 0, 0], sizes = [1, 4, 128], strides = [1, 1, 1]} : vector<21x4x128xf32> to vector<1x4x128xf32>
    %687 = vector.shape_cast %686 : vector<1x4x128xf32> to vector<4x128xf32>
    %cst_145 = arith.constant 0.000000e+00 : f32
    %688 = vector.broadcast %cst_145 : f32 to vector<4x128xf32>
    %689 = arith.select %685, %687, %688 : vector<4x128xi1>, vector<4x128xf32>
    %690 = arith.addf %683, %689 : vector<4x128xf32>
    %c15_i32_146 = arith.constant 15 : i32
    %691 = vector.broadcast %c15_i32_146 : i32 to vector<4x128xi32>
    %692 = arith.cmpi eq, %546, %691 : vector<4x128xi32>
    %693 = vector.extract_strided_slice %576 {offsets = [15, 0, 0], sizes = [1, 4, 128], strides = [1, 1, 1]} : vector<21x4x128xf32> to vector<1x4x128xf32>
    %694 = vector.shape_cast %693 : vector<1x4x128xf32> to vector<4x128xf32>
    %cst_147 = arith.constant 0.000000e+00 : f32
    %695 = vector.broadcast %cst_147 : f32 to vector<4x128xf32>
    %696 = arith.select %692, %694, %695 : vector<4x128xi1>, vector<4x128xf32>
    %697 = arith.addf %690, %696 : vector<4x128xf32>
    %c16_i32_148 = arith.constant 16 : i32
    %698 = vector.broadcast %c16_i32_148 : i32 to vector<4x128xi32>
    %699 = arith.cmpi eq, %546, %698 : vector<4x128xi32>
    %700 = vector.extract_strided_slice %576 {offsets = [16, 0, 0], sizes = [1, 4, 128], strides = [1, 1, 1]} : vector<21x4x128xf32> to vector<1x4x128xf32>
    %701 = vector.shape_cast %700 : vector<1x4x128xf32> to vector<4x128xf32>
    %cst_149 = arith.constant 0.000000e+00 : f32
    %702 = vector.broadcast %cst_149 : f32 to vector<4x128xf32>
    %703 = arith.select %699, %701, %702 : vector<4x128xi1>, vector<4x128xf32>
    %704 = arith.addf %697, %703 : vector<4x128xf32>
    %c17_i32_150 = arith.constant 17 : i32
    %705 = vector.broadcast %c17_i32_150 : i32 to vector<4x128xi32>
    %706 = arith.cmpi eq, %546, %705 : vector<4x128xi32>
    %707 = vector.extract_strided_slice %576 {offsets = [17, 0, 0], sizes = [1, 4, 128], strides = [1, 1, 1]} : vector<21x4x128xf32> to vector<1x4x128xf32>
    %708 = vector.shape_cast %707 : vector<1x4x128xf32> to vector<4x128xf32>
    %cst_151 = arith.constant 0.000000e+00 : f32
    %709 = vector.broadcast %cst_151 : f32 to vector<4x128xf32>
    %710 = arith.select %706, %708, %709 : vector<4x128xi1>, vector<4x128xf32>
    %711 = arith.addf %704, %710 : vector<4x128xf32>
    %c18_i32_152 = arith.constant 18 : i32
    %712 = vector.broadcast %c18_i32_152 : i32 to vector<4x128xi32>
    %713 = arith.cmpi eq, %546, %712 : vector<4x128xi32>
    %714 = vector.extract_strided_slice %576 {offsets = [18, 0, 0], sizes = [1, 4, 128], strides = [1, 1, 1]} : vector<21x4x128xf32> to vector<1x4x128xf32>
    %715 = vector.shape_cast %714 : vector<1x4x128xf32> to vector<4x128xf32>
    %cst_153 = arith.constant 0.000000e+00 : f32
    %716 = vector.broadcast %cst_153 : f32 to vector<4x128xf32>
    %717 = arith.select %713, %715, %716 : vector<4x128xi1>, vector<4x128xf32>
    %718 = arith.addf %711, %717 : vector<4x128xf32>
    %c19_i32_154 = arith.constant 19 : i32
    %719 = vector.broadcast %c19_i32_154 : i32 to vector<4x128xi32>
    %720 = arith.cmpi eq, %546, %719 : vector<4x128xi32>
    %721 = vector.extract_strided_slice %576 {offsets = [19, 0, 0], sizes = [1, 4, 128], strides = [1, 1, 1]} : vector<21x4x128xf32> to vector<1x4x128xf32>
    %722 = vector.shape_cast %721 : vector<1x4x128xf32> to vector<4x128xf32>
    %cst_155 = arith.constant 0.000000e+00 : f32
    %723 = vector.broadcast %cst_155 : f32 to vector<4x128xf32>
    %724 = arith.select %720, %722, %723 : vector<4x128xi1>, vector<4x128xf32>
    %725 = arith.addf %718, %724 : vector<4x128xf32>
    %c20_i32_156 = arith.constant 20 : i32
    %726 = vector.broadcast %c20_i32_156 : i32 to vector<4x128xi32>
    %727 = arith.cmpi eq, %546, %726 : vector<4x128xi32>
    %728 = vector.extract_strided_slice %576 {offsets = [20, 0, 0], sizes = [1, 4, 128], strides = [1, 1, 1]} : vector<21x4x128xf32> to vector<1x4x128xf32>
    %729 = vector.shape_cast %728 : vector<1x4x128xf32> to vector<4x128xf32>
    %cst_157 = arith.constant 0.000000e+00 : f32
    %730 = vector.broadcast %cst_157 : f32 to vector<4x128xf32>
    %731 = arith.select %727, %729, %730 : vector<4x128xi1>, vector<4x128xf32>
    %732 = arith.addf %725, %731 : vector<4x128xf32>
    %733 = arith.subf %584, %732 : vector<4x128xf32>
    %cst_158 = arith.constant 0.000000e+00 : f32
    %734 = vector.broadcast %cst_158 : f32 to vector<4x128xf32>
    %735 = arith.select %548, %734, %733 : vector<4x128xi1>, vector<4x128xf32>
    %cst_159 = arith.constant -1.000000e+30 : f32
    %736 = vector.broadcast %cst_159 : f32 to vector<4x128xf32>
    %737 = arith.select %550, %735, %736 : vector<4x128xi1>, vector<4x128xf32>
    %738 = vector.shape_cast %552 : vector<4x128xf32> to vector<1x4x128xf32>
    %cst_160 = arith.constant dense<0.000000e+00> : vector<1xf32>
    %739 = vector.multi_reduction <add>, %738, %cst_160 [1, 2] : vector<1x4x128xf32> to vector<1xf32>
    %740 = vector.shape_cast %739 : vector<1xf32> to vector<1x1x1xf32>
    %741 = vector.extract %740[0, 0, 0] : f32 from vector<1x1x1xf32>
    %742 = vector.broadcast %741 : f32 to vector<1x1xf32>
    %cst_161 = arith.constant 3.000000e+00 : f32
    %743 = vector.broadcast %cst_161 : f32 to vector<1x1xf32>
    %744 = arith.mulf %743, %742 : vector<1x1xf32>
    %cst_162 = arith.constant 4.990000e+02 : f32
    %745 = vector.broadcast %cst_162 : f32 to vector<1x1xf32>
    %746 = arith.minimumf %744, %745 : vector<1x1xf32>
    %cst_163 = arith.constant dense<0.000000e+00> : vector<128x4xf32>
    %747 = tpu.matmul %4, %737, %cst_163 {dimension_numbers = #tpu.dot_dimension_numbers<[1], [1], [0], [0], [0, 0, 1, 0], [], []>} : vector<128x128xf32>, vector<4x128xf32>, vector<128x4xf32> -> vector<128x4xf32>
    %748 = vector.extract_strided_slice %737 {offsets = [0, 0], sizes = [1, 128], strides = [1, 1]} : vector<4x128xf32> to vector<1x128xf32>
    %c0_i32_164 = arith.constant 0 : i32
    %749 = vector.broadcast %c0_i32_164 : i32 to vector<128x128xi32>
    %750 = arith.addi %749, %1 : vector<128x128xi32>
    %cst_165 = arith.constant 0.000000e+00 : f32
    %751 = vector.broadcast %cst_165 : f32 to vector<1x128xf32>
    %752 = vector.extract_strided_slice %747 {offsets = [0, 0], sizes = [128, 1], strides = [1, 1]} : vector<128x4xf32> to vector<128x1xf32>
    %c0_i32_166 = arith.constant 0 : i32
    %753 = vector.broadcast %c0_i32_166 : i32 to vector<128x128xi32>
    %754 = arith.addi %753, %0 : vector<128x128xi32>
    %755 = arith.cmpi ne, %754, %750 : vector<128x128xi32>
    %756 = vector.broadcast %752 : vector<128x1xf32> to vector<128x128xf32>
    %757 = vector.broadcast %748 : vector<1x128xf32> to vector<128x128xf32>
    %758 = arith.cmpf ogt, %756, %757 : vector<128x128xf32>
    %759 = vector.broadcast %752 : vector<128x1xf32> to vector<128x128xf32>
    %760 = vector.broadcast %748 : vector<1x128xf32> to vector<128x128xf32>
    %761 = arith.cmpf oeq, %759, %760 : vector<128x128xf32>
    %762 = arith.cmpi slt, %754, %750 : vector<128x128xi32>
    %763 = arith.andi %761, %762 : vector<128x128xi1>
    %764 = arith.ori %758, %763 : vector<128x128xi1>
    %765 = arith.andi %755, %764 : vector<128x128xi1>
    %766 = arith.extui %765 : vector<128x128xi1> to vector<128x128xi32>
    %767 = arith.sitofp %766 : vector<128x128xi32> to vector<128x128xf32>
    %cst_167 = arith.constant dense<0.000000e+00> : vector<128xf32>
    %768 = vector.multi_reduction <add>, %767, %cst_167 [0] : vector<128x128xf32> to vector<128xf32>
    %769 = vector.shape_cast %768 : vector<128xf32> to vector<1x128xf32>
    %770 = arith.addf %751, %769 : vector<1x128xf32>
    %771 = vector.extract_strided_slice %747 {offsets = [0, 1], sizes = [128, 1], strides = [1, 1]} : vector<128x4xf32> to vector<128x1xf32>
    %c128_i32_168 = arith.constant 128 : i32
    %772 = vector.broadcast %c128_i32_168 : i32 to vector<128x128xi32>
    %773 = arith.addi %772, %0 : vector<128x128xi32>
    %774 = arith.cmpi ne, %773, %750 : vector<128x128xi32>
    %775 = vector.broadcast %771 : vector<128x1xf32> to vector<128x128xf32>
    %776 = vector.broadcast %748 : vector<1x128xf32> to vector<128x128xf32>
    %777 = arith.cmpf ogt, %775, %776 : vector<128x128xf32>
    %778 = vector.broadcast %771 : vector<128x1xf32> to vector<128x128xf32>
    %779 = vector.broadcast %748 : vector<1x128xf32> to vector<128x128xf32>
    %780 = arith.cmpf oeq, %778, %779 : vector<128x128xf32>
    %781 = arith.cmpi slt, %773, %750 : vector<128x128xi32>
    %782 = arith.andi %780, %781 : vector<128x128xi1>
    %783 = arith.ori %777, %782 : vector<128x128xi1>
    %784 = arith.andi %774, %783 : vector<128x128xi1>
    %785 = arith.extui %784 : vector<128x128xi1> to vector<128x128xi32>
    %786 = arith.sitofp %785 : vector<128x128xi32> to vector<128x128xf32>
    %cst_169 = arith.constant dense<0.000000e+00> : vector<128xf32>
    %787 = vector.multi_reduction <add>, %786, %cst_169 [0] : vector<128x128xf32> to vector<128xf32>
    %788 = vector.shape_cast %787 : vector<128xf32> to vector<1x128xf32>
    %789 = arith.addf %770, %788 : vector<1x128xf32>
    %790 = vector.extract_strided_slice %747 {offsets = [0, 2], sizes = [128, 1], strides = [1, 1]} : vector<128x4xf32> to vector<128x1xf32>
    %c256_i32_170 = arith.constant 256 : i32
    %791 = vector.broadcast %c256_i32_170 : i32 to vector<128x128xi32>
    %792 = arith.addi %791, %0 : vector<128x128xi32>
    %793 = arith.cmpi ne, %792, %750 : vector<128x128xi32>
    %794 = vector.broadcast %790 : vector<128x1xf32> to vector<128x128xf32>
    %795 = vector.broadcast %748 : vector<1x128xf32> to vector<128x128xf32>
    %796 = arith.cmpf ogt, %794, %795 : vector<128x128xf32>
    %797 = vector.broadcast %790 : vector<128x1xf32> to vector<128x128xf32>
    %798 = vector.broadcast %748 : vector<1x128xf32> to vector<128x128xf32>
    %799 = arith.cmpf oeq, %797, %798 : vector<128x128xf32>
    %800 = arith.cmpi slt, %792, %750 : vector<128x128xi32>
    %801 = arith.andi %799, %800 : vector<128x128xi1>
    %802 = arith.ori %796, %801 : vector<128x128xi1>
    %803 = arith.andi %793, %802 : vector<128x128xi1>
    %804 = arith.extui %803 : vector<128x128xi1> to vector<128x128xi32>
    %805 = arith.sitofp %804 : vector<128x128xi32> to vector<128x128xf32>
    %cst_171 = arith.constant dense<0.000000e+00> : vector<128xf32>
    %806 = vector.multi_reduction <add>, %805, %cst_171 [0] : vector<128x128xf32> to vector<128xf32>
    %807 = vector.shape_cast %806 : vector<128xf32> to vector<1x128xf32>
    %808 = arith.addf %789, %807 : vector<1x128xf32>
    %809 = vector.extract_strided_slice %747 {offsets = [0, 3], sizes = [128, 1], strides = [1, 1]} : vector<128x4xf32> to vector<128x1xf32>
    %c384_i32_172 = arith.constant 384 : i32
    %810 = vector.broadcast %c384_i32_172 : i32 to vector<128x128xi32>
    %811 = arith.addi %810, %0 : vector<128x128xi32>
    %812 = arith.cmpi ne, %811, %750 : vector<128x128xi32>
    %813 = vector.broadcast %809 : vector<128x1xf32> to vector<128x128xf32>
    %814 = vector.broadcast %748 : vector<1x128xf32> to vector<128x128xf32>
    %815 = arith.cmpf ogt, %813, %814 : vector<128x128xf32>
    %816 = vector.broadcast %809 : vector<128x1xf32> to vector<128x128xf32>
    %817 = vector.broadcast %748 : vector<1x128xf32> to vector<128x128xf32>
    %818 = arith.cmpf oeq, %816, %817 : vector<128x128xf32>
    %819 = arith.cmpi slt, %811, %750 : vector<128x128xi32>
    %820 = arith.andi %818, %819 : vector<128x128xi1>
    %821 = arith.ori %815, %820 : vector<128x128xi1>
    %822 = arith.andi %812, %821 : vector<128x128xi1>
    %823 = arith.extui %822 : vector<128x128xi1> to vector<128x128xi32>
    %824 = arith.sitofp %823 : vector<128x128xi32> to vector<128x128xf32>
    %cst_173 = arith.constant dense<0.000000e+00> : vector<128xf32>
    %825 = vector.multi_reduction <add>, %824, %cst_173 [0] : vector<128x128xf32> to vector<128xf32>
    %826 = vector.shape_cast %825 : vector<128xf32> to vector<1x128xf32>
    %827 = arith.addf %808, %826 : vector<1x128xf32>
    %828 = vector.extract_strided_slice %737 {offsets = [1, 0], sizes = [1, 128], strides = [1, 1]} : vector<4x128xf32> to vector<1x128xf32>
    %c128_i32_174 = arith.constant 128 : i32
    %829 = vector.broadcast %c128_i32_174 : i32 to vector<128x128xi32>
    %830 = arith.addi %829, %1 : vector<128x128xi32>
    %cst_175 = arith.constant 0.000000e+00 : f32
    %831 = vector.broadcast %cst_175 : f32 to vector<1x128xf32>
    %832 = vector.extract_strided_slice %747 {offsets = [0, 0], sizes = [128, 1], strides = [1, 1]} : vector<128x4xf32> to vector<128x1xf32>
    %c0_i32_176 = arith.constant 0 : i32
    %833 = vector.broadcast %c0_i32_176 : i32 to vector<128x128xi32>
    %834 = arith.addi %833, %0 : vector<128x128xi32>
    %835 = arith.cmpi ne, %834, %830 : vector<128x128xi32>
    %836 = vector.broadcast %832 : vector<128x1xf32> to vector<128x128xf32>
    %837 = vector.broadcast %828 : vector<1x128xf32> to vector<128x128xf32>
    %838 = arith.cmpf ogt, %836, %837 : vector<128x128xf32>
    %839 = vector.broadcast %832 : vector<128x1xf32> to vector<128x128xf32>
    %840 = vector.broadcast %828 : vector<1x128xf32> to vector<128x128xf32>
    %841 = arith.cmpf oeq, %839, %840 : vector<128x128xf32>
    %842 = arith.cmpi slt, %834, %830 : vector<128x128xi32>
    %843 = arith.andi %841, %842 : vector<128x128xi1>
    %844 = arith.ori %838, %843 : vector<128x128xi1>
    %845 = arith.andi %835, %844 : vector<128x128xi1>
    %846 = arith.extui %845 : vector<128x128xi1> to vector<128x128xi32>
    %847 = arith.sitofp %846 : vector<128x128xi32> to vector<128x128xf32>
    %cst_177 = arith.constant dense<0.000000e+00> : vector<128xf32>
    %848 = vector.multi_reduction <add>, %847, %cst_177 [0] : vector<128x128xf32> to vector<128xf32>
    %849 = vector.shape_cast %848 : vector<128xf32> to vector<1x128xf32>
    %850 = arith.addf %831, %849 : vector<1x128xf32>
    %851 = vector.extract_strided_slice %747 {offsets = [0, 1], sizes = [128, 1], strides = [1, 1]} : vector<128x4xf32> to vector<128x1xf32>
    %c128_i32_178 = arith.constant 128 : i32
    %852 = vector.broadcast %c128_i32_178 : i32 to vector<128x128xi32>
    %853 = arith.addi %852, %0 : vector<128x128xi32>
    %854 = arith.cmpi ne, %853, %830 : vector<128x128xi32>
    %855 = vector.broadcast %851 : vector<128x1xf32> to vector<128x128xf32>
    %856 = vector.broadcast %828 : vector<1x128xf32> to vector<128x128xf32>
    %857 = arith.cmpf ogt, %855, %856 : vector<128x128xf32>
    %858 = vector.broadcast %851 : vector<128x1xf32> to vector<128x128xf32>
    %859 = vector.broadcast %828 : vector<1x128xf32> to vector<128x128xf32>
    %860 = arith.cmpf oeq, %858, %859 : vector<128x128xf32>
    %861 = arith.cmpi slt, %853, %830 : vector<128x128xi32>
    %862 = arith.andi %860, %861 : vector<128x128xi1>
    %863 = arith.ori %857, %862 : vector<128x128xi1>
    %864 = arith.andi %854, %863 : vector<128x128xi1>
    %865 = arith.extui %864 : vector<128x128xi1> to vector<128x128xi32>
    %866 = arith.sitofp %865 : vector<128x128xi32> to vector<128x128xf32>
    %cst_179 = arith.constant dense<0.000000e+00> : vector<128xf32>
    %867 = vector.multi_reduction <add>, %866, %cst_179 [0] : vector<128x128xf32> to vector<128xf32>
    %868 = vector.shape_cast %867 : vector<128xf32> to vector<1x128xf32>
    %869 = arith.addf %850, %868 : vector<1x128xf32>
    %870 = vector.extract_strided_slice %747 {offsets = [0, 2], sizes = [128, 1], strides = [1, 1]} : vector<128x4xf32> to vector<128x1xf32>
    %c256_i32_180 = arith.constant 256 : i32
    %871 = vector.broadcast %c256_i32_180 : i32 to vector<128x128xi32>
    %872 = arith.addi %871, %0 : vector<128x128xi32>
    %873 = arith.cmpi ne, %872, %830 : vector<128x128xi32>
    %874 = vector.broadcast %870 : vector<128x1xf32> to vector<128x128xf32>
    %875 = vector.broadcast %828 : vector<1x128xf32> to vector<128x128xf32>
    %876 = arith.cmpf ogt, %874, %875 : vector<128x128xf32>
    %877 = vector.broadcast %870 : vector<128x1xf32> to vector<128x128xf32>
    %878 = vector.broadcast %828 : vector<1x128xf32> to vector<128x128xf32>
    %879 = arith.cmpf oeq, %877, %878 : vector<128x128xf32>
    %880 = arith.cmpi slt, %872, %830 : vector<128x128xi32>
    %881 = arith.andi %879, %880 : vector<128x128xi1>
    %882 = arith.ori %876, %881 : vector<128x128xi1>
    %883 = arith.andi %873, %882 : vector<128x128xi1>
    %884 = arith.extui %883 : vector<128x128xi1> to vector<128x128xi32>
    %885 = arith.sitofp %884 : vector<128x128xi32> to vector<128x128xf32>
    %cst_181 = arith.constant dense<0.000000e+00> : vector<128xf32>
    %886 = vector.multi_reduction <add>, %885, %cst_181 [0] : vector<128x128xf32> to vector<128xf32>
    %887 = vector.shape_cast %886 : vector<128xf32> to vector<1x128xf32>
    %888 = arith.addf %869, %887 : vector<1x128xf32>
    %889 = vector.extract_strided_slice %747 {offsets = [0, 3], sizes = [128, 1], strides = [1, 1]} : vector<128x4xf32> to vector<128x1xf32>
    %c384_i32_182 = arith.constant 384 : i32
    %890 = vector.broadcast %c384_i32_182 : i32 to vector<128x128xi32>
    %891 = arith.addi %890, %0 : vector<128x128xi32>
    %892 = arith.cmpi ne, %891, %830 : vector<128x128xi32>
    %893 = vector.broadcast %889 : vector<128x1xf32> to vector<128x128xf32>
    %894 = vector.broadcast %828 : vector<1x128xf32> to vector<128x128xf32>
    %895 = arith.cmpf ogt, %893, %894 : vector<128x128xf32>
    %896 = vector.broadcast %889 : vector<128x1xf32> to vector<128x128xf32>
    %897 = vector.broadcast %828 : vector<1x128xf32> to vector<128x128xf32>
    %898 = arith.cmpf oeq, %896, %897 : vector<128x128xf32>
    %899 = arith.cmpi slt, %891, %830 : vector<128x128xi32>
    %900 = arith.andi %898, %899 : vector<128x128xi1>
    %901 = arith.ori %895, %900 : vector<128x128xi1>
    %902 = arith.andi %892, %901 : vector<128x128xi1>
    %903 = arith.extui %902 : vector<128x128xi1> to vector<128x128xi32>
    %904 = arith.sitofp %903 : vector<128x128xi32> to vector<128x128xf32>
    %cst_183 = arith.constant dense<0.000000e+00> : vector<128xf32>
    %905 = vector.multi_reduction <add>, %904, %cst_183 [0] : vector<128x128xf32> to vector<128xf32>
    %906 = vector.shape_cast %905 : vector<128xf32> to vector<1x128xf32>
    %907 = arith.addf %888, %906 : vector<1x128xf32>
    %908 = vector.extract_strided_slice %737 {offsets = [2, 0], sizes = [1, 128], strides = [1, 1]} : vector<4x128xf32> to vector<1x128xf32>
    %c256_i32_184 = arith.constant 256 : i32
    %909 = vector.broadcast %c256_i32_184 : i32 to vector<128x128xi32>
    %910 = arith.addi %909, %1 : vector<128x128xi32>
    %cst_185 = arith.constant 0.000000e+00 : f32
    %911 = vector.broadcast %cst_185 : f32 to vector<1x128xf32>
    %912 = vector.extract_strided_slice %747 {offsets = [0, 0], sizes = [128, 1], strides = [1, 1]} : vector<128x4xf32> to vector<128x1xf32>
    %c0_i32_186 = arith.constant 0 : i32
    %913 = vector.broadcast %c0_i32_186 : i32 to vector<128x128xi32>
    %914 = arith.addi %913, %0 : vector<128x128xi32>
    %915 = arith.cmpi ne, %914, %910 : vector<128x128xi32>
    %916 = vector.broadcast %912 : vector<128x1xf32> to vector<128x128xf32>
    %917 = vector.broadcast %908 : vector<1x128xf32> to vector<128x128xf32>
    %918 = arith.cmpf ogt, %916, %917 : vector<128x128xf32>
    %919 = vector.broadcast %912 : vector<128x1xf32> to vector<128x128xf32>
    %920 = vector.broadcast %908 : vector<1x128xf32> to vector<128x128xf32>
    %921 = arith.cmpf oeq, %919, %920 : vector<128x128xf32>
    %922 = arith.cmpi slt, %914, %910 : vector<128x128xi32>
    %923 = arith.andi %921, %922 : vector<128x128xi1>
    %924 = arith.ori %918, %923 : vector<128x128xi1>
    %925 = arith.andi %915, %924 : vector<128x128xi1>
    %926 = arith.extui %925 : vector<128x128xi1> to vector<128x128xi32>
    %927 = arith.sitofp %926 : vector<128x128xi32> to vector<128x128xf32>
    %cst_187 = arith.constant dense<0.000000e+00> : vector<128xf32>
    %928 = vector.multi_reduction <add>, %927, %cst_187 [0] : vector<128x128xf32> to vector<128xf32>
    %929 = vector.shape_cast %928 : vector<128xf32> to vector<1x128xf32>
    %930 = arith.addf %911, %929 : vector<1x128xf32>
    %931 = vector.extract_strided_slice %747 {offsets = [0, 1], sizes = [128, 1], strides = [1, 1]} : vector<128x4xf32> to vector<128x1xf32>
    %c128_i32_188 = arith.constant 128 : i32
    %932 = vector.broadcast %c128_i32_188 : i32 to vector<128x128xi32>
    %933 = arith.addi %932, %0 : vector<128x128xi32>
    %934 = arith.cmpi ne, %933, %910 : vector<128x128xi32>
    %935 = vector.broadcast %931 : vector<128x1xf32> to vector<128x128xf32>
    %936 = vector.broadcast %908 : vector<1x128xf32> to vector<128x128xf32>
    %937 = arith.cmpf ogt, %935, %936 : vector<128x128xf32>
    %938 = vector.broadcast %931 : vector<128x1xf32> to vector<128x128xf32>
    %939 = vector.broadcast %908 : vector<1x128xf32> to vector<128x128xf32>
    %940 = arith.cmpf oeq, %938, %939 : vector<128x128xf32>
    %941 = arith.cmpi slt, %933, %910 : vector<128x128xi32>
    %942 = arith.andi %940, %941 : vector<128x128xi1>
    %943 = arith.ori %937, %942 : vector<128x128xi1>
    %944 = arith.andi %934, %943 : vector<128x128xi1>
    %945 = arith.extui %944 : vector<128x128xi1> to vector<128x128xi32>
    %946 = arith.sitofp %945 : vector<128x128xi32> to vector<128x128xf32>
    %cst_189 = arith.constant dense<0.000000e+00> : vector<128xf32>
    %947 = vector.multi_reduction <add>, %946, %cst_189 [0] : vector<128x128xf32> to vector<128xf32>
    %948 = vector.shape_cast %947 : vector<128xf32> to vector<1x128xf32>
    %949 = arith.addf %930, %948 : vector<1x128xf32>
    %950 = vector.extract_strided_slice %747 {offsets = [0, 2], sizes = [128, 1], strides = [1, 1]} : vector<128x4xf32> to vector<128x1xf32>
    %c256_i32_190 = arith.constant 256 : i32
    %951 = vector.broadcast %c256_i32_190 : i32 to vector<128x128xi32>
    %952 = arith.addi %951, %0 : vector<128x128xi32>
    %953 = arith.cmpi ne, %952, %910 : vector<128x128xi32>
    %954 = vector.broadcast %950 : vector<128x1xf32> to vector<128x128xf32>
    %955 = vector.broadcast %908 : vector<1x128xf32> to vector<128x128xf32>
    %956 = arith.cmpf ogt, %954, %955 : vector<128x128xf32>
    %957 = vector.broadcast %950 : vector<128x1xf32> to vector<128x128xf32>
    %958 = vector.broadcast %908 : vector<1x128xf32> to vector<128x128xf32>
    %959 = arith.cmpf oeq, %957, %958 : vector<128x128xf32>
    %960 = arith.cmpi slt, %952, %910 : vector<128x128xi32>
    %961 = arith.andi %959, %960 : vector<128x128xi1>
    %962 = arith.ori %956, %961 : vector<128x128xi1>
    %963 = arith.andi %953, %962 : vector<128x128xi1>
    %964 = arith.extui %963 : vector<128x128xi1> to vector<128x128xi32>
    %965 = arith.sitofp %964 : vector<128x128xi32> to vector<128x128xf32>
    %cst_191 = arith.constant dense<0.000000e+00> : vector<128xf32>
    %966 = vector.multi_reduction <add>, %965, %cst_191 [0] : vector<128x128xf32> to vector<128xf32>
    %967 = vector.shape_cast %966 : vector<128xf32> to vector<1x128xf32>
    %968 = arith.addf %949, %967 : vector<1x128xf32>
    %969 = vector.extract_strided_slice %747 {offsets = [0, 3], sizes = [128, 1], strides = [1, 1]} : vector<128x4xf32> to vector<128x1xf32>
    %c384_i32_192 = arith.constant 384 : i32
    %970 = vector.broadcast %c384_i32_192 : i32 to vector<128x128xi32>
    %971 = arith.addi %970, %0 : vector<128x128xi32>
    %972 = arith.cmpi ne, %971, %910 : vector<128x128xi32>
    %973 = vector.broadcast %969 : vector<128x1xf32> to vector<128x128xf32>
    %974 = vector.broadcast %908 : vector<1x128xf32> to vector<128x128xf32>
    %975 = arith.cmpf ogt, %973, %974 : vector<128x128xf32>
    %976 = vector.broadcast %969 : vector<128x1xf32> to vector<128x128xf32>
    %977 = vector.broadcast %908 : vector<1x128xf32> to vector<128x128xf32>
    %978 = arith.cmpf oeq, %976, %977 : vector<128x128xf32>
    %979 = arith.cmpi slt, %971, %910 : vector<128x128xi32>
    %980 = arith.andi %978, %979 : vector<128x128xi1>
    %981 = arith.ori %975, %980 : vector<128x128xi1>
    %982 = arith.andi %972, %981 : vector<128x128xi1>
    %983 = arith.extui %982 : vector<128x128xi1> to vector<128x128xi32>
    %984 = arith.sitofp %983 : vector<128x128xi32> to vector<128x128xf32>
    %cst_193 = arith.constant dense<0.000000e+00> : vector<128xf32>
    %985 = vector.multi_reduction <add>, %984, %cst_193 [0] : vector<128x128xf32> to vector<128xf32>
    %986 = vector.shape_cast %985 : vector<128xf32> to vector<1x128xf32>
    %987 = arith.addf %968, %986 : vector<1x128xf32>
    %988 = vector.extract_strided_slice %737 {offsets = [3, 0], sizes = [1, 128], strides = [1, 1]} : vector<4x128xf32> to vector<1x128xf32>
    %c384_i32_194 = arith.constant 384 : i32
    %989 = vector.broadcast %c384_i32_194 : i32 to vector<128x128xi32>
    %990 = arith.addi %989, %1 : vector<128x128xi32>
    %cst_195 = arith.constant 0.000000e+00 : f32
    %991 = vector.broadcast %cst_195 : f32 to vector<1x128xf32>
    %992 = vector.extract_strided_slice %747 {offsets = [0, 0], sizes = [128, 1], strides = [1, 1]} : vector<128x4xf32> to vector<128x1xf32>
    %c0_i32_196 = arith.constant 0 : i32
    %993 = vector.broadcast %c0_i32_196 : i32 to vector<128x128xi32>
    %994 = arith.addi %993, %0 : vector<128x128xi32>
    %995 = arith.cmpi ne, %994, %990 : vector<128x128xi32>
    %996 = vector.broadcast %992 : vector<128x1xf32> to vector<128x128xf32>
    %997 = vector.broadcast %988 : vector<1x128xf32> to vector<128x128xf32>
    %998 = arith.cmpf ogt, %996, %997 : vector<128x128xf32>
    %999 = vector.broadcast %992 : vector<128x1xf32> to vector<128x128xf32>
    %1000 = vector.broadcast %988 : vector<1x128xf32> to vector<128x128xf32>
    %1001 = arith.cmpf oeq, %999, %1000 : vector<128x128xf32>
    %1002 = arith.cmpi slt, %994, %990 : vector<128x128xi32>
    %1003 = arith.andi %1001, %1002 : vector<128x128xi1>
    %1004 = arith.ori %998, %1003 : vector<128x128xi1>
    %1005 = arith.andi %995, %1004 : vector<128x128xi1>
    %1006 = arith.extui %1005 : vector<128x128xi1> to vector<128x128xi32>
    %1007 = arith.sitofp %1006 : vector<128x128xi32> to vector<128x128xf32>
    %cst_197 = arith.constant dense<0.000000e+00> : vector<128xf32>
    %1008 = vector.multi_reduction <add>, %1007, %cst_197 [0] : vector<128x128xf32> to vector<128xf32>
    %1009 = vector.shape_cast %1008 : vector<128xf32> to vector<1x128xf32>
    %1010 = arith.addf %991, %1009 : vector<1x128xf32>
    %1011 = vector.extract_strided_slice %747 {offsets = [0, 1], sizes = [128, 1], strides = [1, 1]} : vector<128x4xf32> to vector<128x1xf32>
    %c128_i32_198 = arith.constant 128 : i32
    %1012 = vector.broadcast %c128_i32_198 : i32 to vector<128x128xi32>
    %1013 = arith.addi %1012, %0 : vector<128x128xi32>
    %1014 = arith.cmpi ne, %1013, %990 : vector<128x128xi32>
    %1015 = vector.broadcast %1011 : vector<128x1xf32> to vector<128x128xf32>
    %1016 = vector.broadcast %988 : vector<1x128xf32> to vector<128x128xf32>
    %1017 = arith.cmpf ogt, %1015, %1016 : vector<128x128xf32>
    %1018 = vector.broadcast %1011 : vector<128x1xf32> to vector<128x128xf32>
    %1019 = vector.broadcast %988 : vector<1x128xf32> to vector<128x128xf32>
    %1020 = arith.cmpf oeq, %1018, %1019 : vector<128x128xf32>
    %1021 = arith.cmpi slt, %1013, %990 : vector<128x128xi32>
    %1022 = arith.andi %1020, %1021 : vector<128x128xi1>
    %1023 = arith.ori %1017, %1022 : vector<128x128xi1>
    %1024 = arith.andi %1014, %1023 : vector<128x128xi1>
    %1025 = arith.extui %1024 : vector<128x128xi1> to vector<128x128xi32>
    %1026 = arith.sitofp %1025 : vector<128x128xi32> to vector<128x128xf32>
    %cst_199 = arith.constant dense<0.000000e+00> : vector<128xf32>
    %1027 = vector.multi_reduction <add>, %1026, %cst_199 [0] : vector<128x128xf32> to vector<128xf32>
    %1028 = vector.shape_cast %1027 : vector<128xf32> to vector<1x128xf32>
    %1029 = arith.addf %1010, %1028 : vector<1x128xf32>
    %1030 = vector.extract_strided_slice %747 {offsets = [0, 2], sizes = [128, 1], strides = [1, 1]} : vector<128x4xf32> to vector<128x1xf32>
    %c256_i32_200 = arith.constant 256 : i32
    %1031 = vector.broadcast %c256_i32_200 : i32 to vector<128x128xi32>
    %1032 = arith.addi %1031, %0 : vector<128x128xi32>
    %1033 = arith.cmpi ne, %1032, %990 : vector<128x128xi32>
    %1034 = vector.broadcast %1030 : vector<128x1xf32> to vector<128x128xf32>
    %1035 = vector.broadcast %988 : vector<1x128xf32> to vector<128x128xf32>
    %1036 = arith.cmpf ogt, %1034, %1035 : vector<128x128xf32>
    %1037 = vector.broadcast %1030 : vector<128x1xf32> to vector<128x128xf32>
    %1038 = vector.broadcast %988 : vector<1x128xf32> to vector<128x128xf32>
    %1039 = arith.cmpf oeq, %1037, %1038 : vector<128x128xf32>
    %1040 = arith.cmpi slt, %1032, %990 : vector<128x128xi32>
    %1041 = arith.andi %1039, %1040 : vector<128x128xi1>
    %1042 = arith.ori %1036, %1041 : vector<128x128xi1>
    %1043 = arith.andi %1033, %1042 : vector<128x128xi1>
    %1044 = arith.extui %1043 : vector<128x128xi1> to vector<128x128xi32>
    %1045 = arith.sitofp %1044 : vector<128x128xi32> to vector<128x128xf32>
    %cst_201 = arith.constant dense<0.000000e+00> : vector<128xf32>
    %1046 = vector.multi_reduction <add>, %1045, %cst_201 [0] : vector<128x128xf32> to vector<128xf32>
    %1047 = vector.shape_cast %1046 : vector<128xf32> to vector<1x128xf32>
    %1048 = arith.addf %1029, %1047 : vector<1x128xf32>
    %1049 = vector.extract_strided_slice %747 {offsets = [0, 3], sizes = [128, 1], strides = [1, 1]} : vector<128x4xf32> to vector<128x1xf32>
    %c384_i32_202 = arith.constant 384 : i32
    %1050 = vector.broadcast %c384_i32_202 : i32 to vector<128x128xi32>
    %1051 = arith.addi %1050, %0 : vector<128x128xi32>
    %1052 = arith.cmpi ne, %1051, %990 : vector<128x128xi32>
    %1053 = vector.broadcast %1049 : vector<128x1xf32> to vector<128x128xf32>
    %1054 = vector.broadcast %988 : vector<1x128xf32> to vector<128x128xf32>
    %1055 = arith.cmpf ogt, %1053, %1054 : vector<128x128xf32>
    %1056 = vector.broadcast %1049 : vector<128x1xf32> to vector<128x128xf32>
    %1057 = vector.broadcast %988 : vector<1x128xf32> to vector<128x128xf32>
    %1058 = arith.cmpf oeq, %1056, %1057 : vector<128x128xf32>
    %1059 = arith.cmpi slt, %1051, %990 : vector<128x128xi32>
    %1060 = arith.andi %1058, %1059 : vector<128x128xi1>
    %1061 = arith.ori %1055, %1060 : vector<128x128xi1>
    %1062 = arith.andi %1052, %1061 : vector<128x128xi1>
    %1063 = arith.extui %1062 : vector<128x128xi1> to vector<128x128xi32>
    %1064 = arith.sitofp %1063 : vector<128x128xi32> to vector<128x128xf32>
    %cst_203 = arith.constant dense<0.000000e+00> : vector<128xf32>
    %1065 = vector.multi_reduction <add>, %1064, %cst_203 [0] : vector<128x128xf32> to vector<128xf32>
    %1066 = vector.shape_cast %1065 : vector<128xf32> to vector<1x128xf32>
    %1067 = arith.addf %1048, %1066 : vector<1x128xf32>
    %1068 = tpu.concatenate %827, %907, %987, %1067 in 0 : vector<1x128xf32>, vector<1x128xf32>, vector<1x128xf32>, vector<1x128xf32> -> vector<4x128xf32>
    %1069 = vector.broadcast %746 : vector<1x1xf32> to vector<4x128xf32>
    %1070 = arith.cmpf olt, %1068, %1069 : vector<4x128xf32>
    %1071 = arith.andi %1070, %550 : vector<4x128xi1>
    %1072 = arith.ori %548, %1071 : vector<4x128xi1>
    %cst_204 = arith.constant 0.000000e+00 : f32
    %1073 = vector.broadcast %cst_204 : f32 to vector<4x128xf32>
    %1074 = arith.select %1072, %733, %1073 : vector<4x128xi1>, vector<4x128xf32>
    %1075 = vector.shape_cast %1074 : vector<4x128xf32> to vector<1x4x128xf32>
    %cst_205 = arith.constant dense<0.000000e+00> : vector<1xf32>
    %1076 = vector.multi_reduction <add>, %1075, %cst_205 [1, 2] : vector<1x4x128xf32> to vector<1xf32>
    %1077 = vector.shape_cast %1076 : vector<1xf32> to vector<1x1x1xf32>
    %1078 = vector.extract %1077[0, 0, 0] : f32 from vector<1x1x1xf32>
    %1079 = vector.broadcast %1078 : f32 to vector<1x1xf32>
    %1080 = arith.addf %543, %1079 : vector<1x1xf32>
    %1081 = arith.addf %544, %742 : vector<1x1xf32>
    %1082 = tpu.iota {dimensions = array<i32: 0>} : vector<8x128xi32>
    %c0_i32_206 = arith.constant 0 : i32
    %1083 = vector.broadcast %c0_i32_206 : i32 to vector<8x128xi32>
    %1084 = arith.cmpi eq, %1082, %1083 : vector<8x128xi32>
    %c1_i32_207 = arith.constant 1 : i32
    %1085 = vector.broadcast %c1_i32_207 : i32 to vector<8x128xi32>
    %1086 = arith.cmpi eq, %1082, %1085 : vector<8x128xi32>
    %c2_i32_208 = arith.constant 2 : i32
    %1087 = vector.broadcast %c2_i32_208 : i32 to vector<8x128xi32>
    %1088 = arith.cmpi eq, %1082, %1087 : vector<8x128xi32>
    %cst_209 = arith.constant 0.000000e+00 : f32
    %1089 = vector.shape_cast %1081 : vector<1x1xf32> to vector<1x1xf32>
    %1090 = vector.broadcast %1089 : vector<1x1xf32> to vector<8x128xf32>
    %1091 = vector.broadcast %cst_209 : f32 to vector<8x128xf32>
    %1092 = arith.select %1088, %1090, %1091 : vector<8x128xi1>, vector<8x128xf32>
    %1093 = vector.shape_cast %1080 : vector<1x1xf32> to vector<1x1xf32>
    %1094 = vector.broadcast %1093 : vector<1x1xf32> to vector<8x128xf32>
    %1095 = arith.select %1086, %1094, %1092 : vector<8x128xi1>, vector<8x128xf32>
    %1096 = vector.shape_cast %574 : vector<1x1xf32> to vector<1x1xf32>
    %1097 = vector.broadcast %1096 : vector<1x1xf32> to vector<8x128xf32>
    %1098 = arith.select %1084, %1097, %1095 : vector<8x128xi1>, vector<8x128xf32>
    %c0_210 = arith.constant 0 : index
    %c0_211 = arith.constant 0 : index
    %c0_212 = arith.constant 0 : index
    %1099 = vector.load %arg5[%c0_210, %c0_211, %c0_212] : memref<1x8x128xf32, #tpu.memory_space<vmem>>, vector<1x8x128xf32>
    %1100 = vector.shape_cast %1099 : vector<1x8x128xf32> to vector<8x128xf32>
    %1101 = vector.shape_cast %1098 : vector<8x128xf32> to vector<1x8x128xf32>
    tpu.vector_store %arg5[%c0_210, %c0_211, %c0_212], %1101 {strides = array<i32>} : memref<1x8x128xf32, #tpu.memory_space<vmem>>, vector<1x8x128xf32>,
    return
  }
  func.func @transform_0(%arg0: i32) -> (i32, i32, i32, i32) {
    %c0_i32 = arith.constant 0 : i32
    %c0_i32_0 = arith.constant 0 : i32
    %c0_i32_1 = arith.constant 0 : i32
    %c0_i32_2 = arith.constant 0 : i32
    return %arg0, %c0_i32, %c0_i32_0, %c0_i32_1 : i32, i32, i32, i32
  }
  func.func @transform_1(%arg0: i32) -> (i32, i32, i32, i32) {
    %c0_i32 = arith.constant 0 : i32
    %c0_i32_0 = arith.constant 0 : i32
    %c0_i32_1 = arith.constant 0 : i32
    %c0_i32_2 = arith.constant 0 : i32
    return %arg0, %c0_i32, %c0_i32_0, %c0_i32_1 : i32, i32, i32, i32
  }
  func.func @transform_2(%arg0: i32) -> (i32, i32, i32, i32) {
    %c0_i32 = arith.constant 0 : i32
    %c0_i32_0 = arith.constant 0 : i32
    %c0_i32_1 = arith.constant 0 : i32
    %c0_i32_2 = arith.constant 0 : i32
    return %arg0, %c0_i32, %c0_i32_0, %c0_i32_1 : i32, i32, i32, i32
  }
  func.func @transform_3(%arg0: i32) -> (i32, i32, i32) {
    %c0_i32 = arith.constant 0 : i32
    %c0_i32_0 = arith.constant 0 : i32
    %c0_i32_1 = arith.constant 0 : i32
    return %arg0, %c0_i32, %c0_i32_0 : i32, i32, i32
  }
  func.func @transform_4(%arg0: i32) -> (i32, i32, i32) {
    %c0_i32 = arith.constant 0 : i32
    %c0_i32_0 = arith.constant 0 : i32
    %c0_i32_1 = arith.constant 0 : i32
    return %arg0, %c0_i32, %c0_i32_0 : i32, i32, i32
  }
}

</mosaic_0001>

<bundles_post_ra>
// kernel: tpu_custom_call.1
= control target key start
LH: loop header
LB: loop body
LE: loop exit
PB: predicated region body
PF: predicated region fallthrough
CT: control target
= control target key end

     0   :  { %s18365_s0 = inlined_call_operand.hbm [shape: f32[4,4,4,128], index: 0, kind: input, shape index: {}]   ;;  %s18366_s1 = inlined_call_operand.hbm [shape: f32[4,21,4,128], index: 1, kind: input, shape index: {}]   ;;  %s18367_s2 = inlined_call_operand.hbm [shape: f32[4,4,4,128], index: 2, kind: input, shape index: {}]   ;;  %s18368_s3 = inlined_call_operand.hbm [shape: s32[4,4,128], index: 3, kind: input, shape index: {}]   ;;  %s18369_s4 = inlined_call_operand.hbm [shape: f32[2,8,128], index: 4, kind: output, shape index: {}]  }
   0x1   :  { %18787 = sst [smem:[#allocation192_spill]] %s18366_s1 }
   0x2   :  { %9 = vsyncpa [#allocation3], 0 }
   0x3   :  { %11 = vsyncpa [#allocation3 + $0x1], 0 }
   0x4   :  { %12 = vsyncpa [#allocation6], 0 }
   0x5   :  { %14 = vsyncpa [#allocation6 + $0x1], 0 }
   0x6   :  { %15 = vsyncpa [#allocation9], 0 }
   0x7   :  { %17 = vsyncpa [#allocation9 + $0x1], 0 }
   0x8   :  { %18 = vsyncpa [#allocation4], 0 }
   0x9   :  { %20 = vsyncpa [#allocation4 + $0x1], 0  ;;  %s8179_s15 = smov 0   ;;  %s8181_s16 = smov 0  }
   0xa   :  { %s8183_s17 = smov 0   ;;  %s8185_s18 = smov 0  }
   0xb LB: > { %s8200_s19 = sadd.s32 4294967295, %s8139_s18   ;;  %s6947_s20 = sadd.s32 4294967294, %s8139_s18   ;;  %s8139_s18 = sphi %s8185_s18, %s21070_s18   ;;  %s8135_s17 = sphi %s8183_s17, %s21069_s17   ;;  %s8131_s16 = sphi %s8181_s16, %s21068_s16   ;;  %s8127_s15 = sphi %s8179_s15, %s21067_s15  }
   0xc   : > { %s8204_s21 = sadd.s32 1, %s8139_s18   ;;  %s33_s22 = sadd.s32 1, %s8135_s17 }
   0xd   : > { %s30_s23 = ssub.s32 %s8139_s18, %s8204_s21  ;;  %p40_p0 = scmp.ne.s32.totalorder %s8135_s17, %s8131_s16 }
   0xe   : > { %p31_p1 = scmp.eq.s32.totalorder %s30_s23, 0  ;;  %p41_p2 = scmp.eq.s32.totalorder %s8139_s18, 0 }
   0xf   : > { %p46_p3 = scmp.ne.s32.totalorder %s8131_s16, %s8127_s15  ;;  %p47_p4 = scmp.eq.s32.totalorder %s8200_s19, 0 }
  0x10   : > { %s8216_s24 = scalar_select %p31_p1, %s8135_s17, %s33_s22  }
  0x11   : > { %p42_p5 = por %p41_p2, %p40_p0  ;;  %p8218_p6 = por %p47_p4, %p46_p3 }
  0x12   : > { %18788 = sst [smem:[#allocation15_spill]] %s8216_s24  ;;  %p148_p7 = scmp.eq.s32.totalorder %s8200_s19, 1 }
  0x13   : > { %s18789_s25 = scalar_select %p8218_p6, 1, 0 }
  0x14   : > { %p154_p8 = scmp.eq.s32.totalorder %s6947_s20, 1  ;;  %p7706_p10 = scmp.lt.s32.totalorder %s8139_s18, 2 }
  0x15   : > { %p8225_p11 = por %p148_p7, %p40_p0  ;;  %s8234_s28 = sand.u32 1, %s8135_s17  }
  0x16   : > { %p8229_p12 = por %p154_p8, %p46_p3  ;;  %p8236_p13 = pnand %p7706_p10, %p42_p5 }
  0x17   : > { %s18790_s26 = scalar_select %p8225_p11, 1, 0 }
  0x18   : > { %s18791_s27 = scalar_select %p8229_p12, 1, 0 }
  0x19   : > { %s196_s30 = sand.u32 1, %s8139_s18   ;;  %s7664_s5 = smul.u32 168, %s8234_s28 }
  0x1a   : > { %s7665_s6 = smul.u32 2688, %s8139_s18  ;;  %p6964_p1 = scmp.ge.s32.totalorder %s8139_s18, 1 }
  0x1b   : > { %p259_p0 = scmp.lt.s32.totalorder %s8139_s18, 3  ;;  %s18793_s1 = sld [smem:[#allocation192_spill]] }
  0x1c   : > { %s200_s10 = scalar_lea.vmem [#allocation5], %s7664_s5  ;;  %s8256_s13 = scalar_lea.sflag [#allocation6], %s196_s30 }
  0x1d   : > { %s208_s11 = sshll.u32 %s200_s10, 4  ;;  %p8252_p2 = pnand %p6964_p1, %p259_p0  ;;  %s8250_s11 = int_to_ptr.vmem [resolvable:$true] %s208_s11 }
  0x1e   : > { %p8262_p4 = pneg %p8236_p13 }
  0x1f   : > { %s18794_s12 = scalar_select %p8252_p2, 1, 0 }
  0x21   : > { %s8248_s9 = scalar_lea.hbm %s18793_s1, %s7665_s6  ;;  %s7950_s5 = scalar_lea.hbm %s18793_s1, 5376 }
  0x22   : > { %s7945_s14 = scalar_lea.hbm %s8248_s9, 2688  ;;  %p7951_p8 = scmp.lt.u32.totalorder %s8248_s9, %s18793_s1 }
  0x23   : > { %p7946_p3 = scmp.ne.s32.totalorder %s8248_s9, %s7945_s14  ;;  %p7952_p10 = scmp.lt.u32.totalorder %s7950_s5, %s7945_s14 }
  0x24   : > { %p7954_p0 = scmp.lt.u32.totalorder %s7945_s14, %s8248_s9 }
  0x25   : > { %p7948_p5 = pnand %p8262_p4, %p7946_p3  ;;  %p7953_p1 = por %p7952_p10, %p7951_p8 }
  0x27   : > { %p7949_p7 = pneg %p7948_p5  ;;  %p7955_p9 = por %p7954_p0, %p7953_p1 }
  0x29   : > { %p7956_p12 = pnand %p7955_p9, %p7949_p7 }
  0x2b   : > { %7959 = shalt.err (!%p7956_p12)
}
  0x2c   : > { %s7960_s30 = scalar_lea.vmem %s8250_s11, 2688  ;;  %s8141_s8 = smov [#allocation5]  }
  0x2d   : > { %p7961_p3 = scmp.ne.s32.totalorder %s8250_s11, %s7960_s30  ;;  %s7965_s10 = sshll.u32 %s8141_s8, 4  ;;  %s7966_s10 = int_to_ptr.vmem [resolvable:$false] %s7965_s10 }
  0x2e   : > { %s7967_s22 = scalar_lea.vmem %s7966_s10, 5376  ;;  %p7968_p6 = scmp.lt.s32.totalorder %s8250_s11, %s7966_s10 }
  0x2f   : > { %p7963_p5 = pnand %p7961_p3, %p8262_p4  ;;  %p7969_p2 = scmp.lt.s32.totalorder %s7967_s22, %s7960_s30 }
  0x31   : > { %p7964_p11 = pneg %p7963_p5  ;;  %p7970_p8 = por %p7969_p2, %p7968_p6 }
  0x33   : > { %p7971_p10 = pnand %p7970_p8, %p7964_p11 }
  0x35   : > { %7974 = shalt.err (!%p7971_p10)
}
  0x36   : > { %s8142_s14 = smov 64   ;;  %s8143_s23 = smov 4  }
  0x37   : > { %7695 = dma.hbm_to_vmem [thread:$0]  (!%p8236_p13), %s8248_s9, 2688, %s8250_s11, %s8256_s13, %s8142_s14, %s8142_s14, %s8143_s23  }
  0x38   : > { %s6950_s5 = sshll.u32 %s8234_s28, 5  ;;  %s18372_s6 = sshll.u32 %s8139_s18, 9 }
  0x39   : > { %s8296_s8 = scalar_lea.hbm %s18365_s0, %s18372_s6  ;;  %s178_s10 = scalar_lea.vmem [#allocation2], %s6950_s5 }
  0x3a   : > { %s186_s22 = sshll.u32 %s178_s10, 4  ;;  %s175_s1 = scalar_lea.sflag [#allocation3], %s8234_s28  ;;  %s8300_s22 = int_to_ptr.vmem [resolvable:$true] %s186_s22 }
  0x3b   : > { %s7975_s24 = scalar_lea.hbm %s8296_s8, 512  ;;  %s7980_s7 = scalar_lea.hbm %s18365_s0, 1024 }
  0x3c   : > { %p7976_p6 = scmp.ne.s32.totalorder %s8296_s8, %s7975_s24  ;;  %p7981_p12 = scmp.lt.u32.totalorder %s8296_s8, %s18365_s0 }
  0x3d   : > { %p7982_p2 = scmp.lt.u32.totalorder %s7980_s7, %s7975_s24  ;;  %p7984_p1 = scmp.lt.u32.totalorder %s7975_s24, %s8296_s8 }
  0x3e   : > { %p7978_p9 = pnand %p7976_p6, %p8262_p4 }
  0x3f   : > { %p7983_p7 = por %p7982_p2, %p7981_p12 }
  0x40   : > { %p7979_p11 = pneg %p7978_p9 }
  0x41   : > { %p7985_p0 = por %p7984_p1, %p7983_p7 }
  0x43   : > { %p7986_p3 = pnand %p7985_p0, %p7979_p11 }
  0x45   : > { %7989 = shalt.err (!%p7986_p3)
}
  0x46   : > { %s7990_s10 = scalar_lea.vmem %s8300_s22, 512  ;;  %s8144_s9 = smov [#allocation2]  }
  0x47   : > { %p7991_p5 = scmp.ne.s32.totalorder %s8300_s22, %s7990_s10  ;;  %s7995_s11 = sshll.u32 %s8144_s9, 4  ;;  %s7996_s11 = int_to_ptr.vmem [resolvable:$false] %s7995_s11 }
  0x48   : > { %s7997_s6 = scalar_lea.vmem %s7996_s11, 1024  ;;  %p7998_p6 = scmp.lt.s32.totalorder %s8300_s22, %s7996_s11 }
  0x49   : > { %p7993_p8 = pnand %p7991_p5, %p8262_p4  ;;  %p7999_p9 = scmp.lt.s32.totalorder %s7997_s6, %s7990_s10 }
  0x4b   : > { %p7994_p10 = pneg %p7993_p8  ;;  %p8000_p12 = por %p7999_p9, %p7998_p6 }
  0x4d   : > { %p8001_p2 = pnand %p8000_p12, %p7994_p10 }
  0x4f   : > { %8004 = shalt.err (!%p8001_p2)
}
  0x50   : > { %7692 = dma.hbm_to_vmem [thread:$0]  (!%p8236_p13), %s8296_s8, 512, %s8300_s22, %s175_s1, %s8142_s14, %s8142_s14, %s8143_s23  }
  0x51   : > { %s18796_s24 = sshll.u32 %s8139_s18, 9  ;;  %s222_s9 = scalar_lea.vmem [#allocation7], %s6950_s5 }
  0x52   : > { %s8334_s10 = scalar_lea.hbm %s18367_s2, %s18796_s24  ;;  %s230_s11 = sshll.u32 %s222_s9, 4  ;;  %s8338_s11 = int_to_ptr.vmem [resolvable:$true] %s230_s11 }
  0x53   : > { %s8005_s6 = scalar_lea.hbm %s8334_s10, 512  ;;  %s8010_s22 = scalar_lea.hbm %s18367_s2, 1024 }
  0x54   : > { %p8006_p11 = scmp.ne.s32.totalorder %s8334_s10, %s8005_s6  ;;  %p8011_p0 = scmp.lt.u32.totalorder %s8334_s10, %s18367_s2 }
  0x55   : > { %p8012_p3 = scmp.lt.u32.totalorder %s8010_s22, %s8005_s6  ;;  %p8014_p8 = scmp.lt.u32.totalorder %s8005_s6, %s8334_s10 }
  0x56   : > { %p8008_p7 = pnand %p8006_p11, %p8262_p4 }
  0x57   : > { %p8013_p5 = por %p8012_p3, %p8011_p0 }
  0x58   : > { %p8009_p1 = pneg %p8008_p7 }
  0x59   : > { %p8015_p10 = por %p8014_p8, %p8013_p5 }
  0x5b   : > { %p8016_p6 = pnand %p8015_p10, %p8009_p1 }
  0x5d   : > { %8019 = shalt.err (!%p8016_p6)
}
  0x5e   : > { %s8020_s5 = scalar_lea.vmem %s8338_s11, 512  ;;  %s8145_s30 = smov [#allocation7]  }
  0x5f   : > { %p8021_p9 = scmp.ne.s32.totalorder %s8338_s11, %s8020_s5  ;;  %s8025_s9 = sshll.u32 %s8145_s30, 4  ;;  %s8026_s9 = int_to_ptr.vmem [resolvable:$false] %s8025_s9 }
  0x60   : > { %s8027_s1 = scalar_lea.vmem %s8026_s9, 1024  ;;  %p8028_p11 = scmp.lt.s32.totalorder %s8338_s11, %s8026_s9 }
  0x61   : > { %p8023_p12 = pnand %p8021_p9, %p8262_p4  ;;  %p8029_p7 = scmp.lt.s32.totalorder %s8027_s1, %s8020_s5 }
  0x63   : > { %p8024_p2 = pneg %p8023_p12  ;;  %p8030_p0 = por %p8029_p7, %p8028_p11 }
  0x65   : > { %p8031_p3 = pnand %p8030_p0, %p8024_p2 }
  0x67   : > { %8034 = shalt.err (!%p8031_p3)
}
  0x68   : > { %7698 = dma.hbm_to_vmem [thread:$0]  (!%p8236_p13), %s8334_s10, 512, %s8338_s11, %s8256_s13, %s8142_s14, %s8142_s14, %s8143_s23  }
  0x69   : > { %s6961_s6 = sshll.u32 %s8234_s28, 3  ;;  %s7577_s8 = sshll.u32 %s8139_s18, 7 }
  0x6a   : > { %s8370_s7 = scalar_lea.hbm %s18368_s3, %s7577_s8  ;;  %s244_s5 = scalar_lea.vmem [#allocation8], %s6961_s6 }
  0x6b   : > { %s251_s30 = sshll.u32 %s244_s5, 4  ;;  %s241_s9 = scalar_lea.sflag [#allocation9], %s8234_s28  ;;  %s8372_s30 = int_to_ptr.vmem [resolvable:$true] %s251_s30 }
  0x6c   : > { %s8035_s1 = scalar_lea.hbm %s8370_s7, 128  ;;  %s8040_s11 = scalar_lea.hbm %s18368_s3, 256 }
  0x6d   : > { %p8036_p1 = scmp.ne.s32.totalorder %s8370_s7, %s8035_s1  ;;  %p8041_p10 = scmp.lt.u32.totalorder %s8370_s7, %s18368_s3 }
  0x6e   : > { %p8042_p6 = scmp.lt.u32.totalorder %s8040_s11, %s8035_s1  ;;  %p8044_p12 = scmp.lt.u32.totalorder %s8035_s1, %s8370_s7 }
  0x6f   : > { %p8038_p5 = pnand %p8036_p1, %p8262_p4 }
  0x70   : > { %p8043_p9 = por %p8042_p6, %p8041_p10 }
  0x71   : > { %p8039_p8 = pneg %p8038_p5 }
  0x72   : > { %p8045_p2 = por %p8044_p12, %p8043_p9 }
  0x74   : > { %p8046_p11 = pnand %p8045_p2, %p8039_p8 }
  0x76   : > { %8049 = shalt.err (!%p8046_p11)
}
  0x77   : > { %s8050_s6 = scalar_lea.vmem %s8372_s30, 128  ;;  %s8146_s24 = smov [#allocation8]  }
  0x78   : > { %p8051_p7 = scmp.ne.s32.totalorder %s8372_s30, %s8050_s6  ;;  %s8055_s5 = sshll.u32 %s8146_s24, 4  ;;  %s8056_s5 = int_to_ptr.vmem [resolvable:$false] %s8055_s5 }
  0x79   : > { %s8057_s13 = scalar_lea.vmem %s8056_s5, 256  ;;  %p8058_p1 = scmp.lt.s32.totalorder %s8372_s30, %s8056_s5 }
  0x7a   : > { %p8053_p0 = pnand %p8051_p7, %p8262_p4  ;;  %p8059_p5 = scmp.lt.s32.totalorder %s8057_s13, %s8050_s6 }
  0x7c   : > { %p8054_p3 = pneg %p8053_p0  ;;  %p8060_p10 = por %p8059_p5, %p8058_p1 }
  0x7e   : > { %p8061_p6 = pnand %p8060_p10, %p8054_p3 }
  0x80   : > { %8064 = shalt.err (!%p8061_p6)
}
  0x81   : > { %7701 = dma.hbm_to_vmem [thread:$0]  (!%p8236_p13), %s8370_s7, 128, %s8372_s30, %s241_s9, %s8142_s14, %s8142_s14, %s8143_s23  }
  0x82   : > { %p18797_p4 = scmp.ne.s32.totalorder %s18794_s12, 0 }
  0x84   : > { %263 = sbr.rel (%p18797_p4) target bundleno = 1662 (0x67e), region = 36 }
  0x8b   : > { %s8404_s20 = sand.u32 1, %s8131_s16   ;;  %p18798_p8 = scmp.ne.s32.totalorder %s18789_s25, 0 }
  0x8c   : > { %s6965_s1 = sshll.u32 %s8404_s20, 5  ;;  %s266_s10 = scalar_lea.sflag [#allocation3], %s8404_s20 }
  0x8d   : > { %s8408_s29 = scalar_lea.vmem [#allocation2], %s6965_s1 }
  0x8e   : > { %8110 = dma.done.wait (%p18798_p8), %s266_s10, 512  }
  0x8f   : > { %8112 = vsyncadd (%p18798_p8), %s266_s10, 4294966784  ;;  %s274_s28 = sand.u32 1, %s8200_s19   ;;  %s7666_s12 = smul.u32 168, %s8404_s20 }
  0x90   : > { %s275_s14 = scalar_lea.sflag [#allocation6], %s274_s28 }
  0x91   : > { %s8416_s23 = scalar_lea.vmem [#allocation5], %s7666_s12 }
  0x92   : > { %8114 = dma.done.wait (%p18798_p8), %s275_s14, 3200  }
  0x93   : > { %8116 = vsyncadd (%p18798_p8), %s275_s14, 4294964096  ;;  %s6967_s7 = sshll.u32 %s8404_s20, 3  ;;  %s8423_s30 = scalar_lea.vmem [#allocation7], %s6965_s1 }
  0x94   : > { %s293_s9 = scalar_lea.sflag [#allocation9], %s8404_s20  ;;  %s8428_s11 = scalar_lea.vmem [#allocation8], %s6967_s7 }
  0x95   : > { %8118 = dma.done.wait (%p18798_p8), %s293_s9, 128  }
  0x96   : > { %8120 = vsyncadd (%p18798_p8), %s293_s9, 4294967168  ;;  %v340_v0 = vlaneseq  ;;  %v8147_v3 = vmov 1.0   ;;  %vm18426_vm1 = vcmask 1043456   ;;  %v8443_v4 = vld [vmem:[%s8416_s23] sm:$0xf]  ;;  %s7570_s13 = sshll.u32 %s8200_s19, 7 }
  0x97   : > { %v8446_v5 = vld [vmem:[%s8416_s23 + $0x4] sm:$0xf]  ;;  %v8449_v6 = vld [vmem:[%s8416_s23 + $0x8] sm:$0xf]  ;;  %v8452_v7 = vld [vmem:[%s8416_s23 + $0xc] sm:$0xf]  ;;  %s18321_s12 = scalar_lea.hbm %s18369_s4, %s7570_s13 }
  0x98   : > { %v8434_v1 = vshrl.u32 %v340_v0, 7  ;;  %v8436_v2 = vand.u32 127, %v340_v0  ;;  %v8455_v8 = vld [vmem:[%s8416_s23 + $0x10] sm:$0xf]  ;;  %v8458_v9 = vld [vmem:[%s8416_s23 + $0x14] sm:$0xf] }
  0x99   : > { %v8461_v10 = vld [vmem:[%s8416_s23 + $0x18] sm:$0xf]  ;;  %v8464_v11 = vld [vmem:[%s8416_s23 + $0x1c] sm:$0xf]  ;;  %v8467_v12 = vld [vmem:[%s8416_s23 + $0x20] sm:$0xf] }
  0x9a   : > { %18799 = vst [vmem:[#allocation16_spill] sm:$0xff] %v8434_v1  ;;  %18800 = vst [vmem:[#allocation17_spill] sm:$0xff] %v8436_v2  ;;  %vm359_vm0 = vcmp.eq.s32.totalorder %v8434_v1, %v8436_v2  ;;  %v8470_v13 = vld [vmem:[%s8416_s23 + $0x24] sm:$0xf]  ;;  %v8473_v14 = vld [vmem:[%s8416_s23 + $0x28] sm:$0xf] }
  0x9b   : > { %7614 = vmatprep.mubr.msk.f32.mxu0 %vm359_vm0, %v8147_v3  ;;  %7640 = vmatprep.mubr.msk.f32.mxu1 %vm359_vm0, %v8147_v3  ;;  %v490_v15 = vsel %vm18426_vm1, %v8443_v4, -inf  ;;  %v491_v16 = vsel %vm18426_vm1, %v8446_v5, -inf  ;;  %v8480_v17 = vld [vmem:[%s8416_s23 + $0x2c] sm:$0xf]  ;;  %v492_v18 = vsel %vm18426_vm1, %v8449_v6, -inf  ;;  %v493_v19 = vsel %vm18426_vm1, %v8452_v7, -inf }
  0x9c   : > { %v494_v20 = vsel %vm18426_vm1, %v8455_v8, -inf  ;;  %v496_v21 = vsel %vm18426_vm1, %v8458_v9, -inf  ;;  %v8491_v22 = vld [vmem:[%s8416_s23 + $0x30] sm:$0xf]  ;;  %v8494_v23 = vld [vmem:[%s8416_s23 + $0x34] sm:$0xf] }
  0x9d   : > { %v495_v24 = vmax.f32 %v490_v15, %v494_v20  ;;  %v497_v25 = vmax.f32 %v491_v16, %v496_v21  ;;  %v498_v26 = vsel %vm18426_vm1, %v8461_v10, -inf  ;;  %v500_v27 = vsel %vm18426_vm1, %v8464_v11, -inf  ;;  %v8501_v28 = vld [vmem:[%s8416_s23 + $0x38] sm:$0xf]  ;;  %v8504_v29 = vld [vmem:[%s8416_s23 + $0x3c] sm:$0xf] }
  0x9e   : > { %v499_v30 = vmax.f32 %v492_v18, %v498_v26  ;;  %v501_v31 = vmax.f32 %v493_v19, %v500_v27  ;;  %v502_v32 = vsel %vm18426_vm1, %v8467_v12, -inf  ;;  %v504_v33 = vsel %vm18426_vm1, %v8470_v13, -inf  ;;  %v8511_v34 = vld [vmem:[%s8416_s23 + $0x40] sm:$0xf]  ;;  %v8514_v35 = vld [vmem:[%s8416_s23 + $0x44] sm:$0xf] }
  0x9f   : > { %v503_v36 = vmax.f32 %v495_v24, %v502_v32  ;;  %v505_v37 = vmax.f32 %v497_v25, %v504_v33  ;;  %v506_v38 = vsel %vm18426_vm1, %v8473_v14, -inf  ;;  %v508_v39 = vsel %vm18426_vm1, %v8480_v17, -inf  ;;  %v8521_v40 = vld [vmem:[%s8416_s23 + $0x48] sm:$0xf]  ;;  %v8524_v41 = vld [vmem:[%s8416_s23 + $0x4c] sm:$0xf] }
  0xa0   : > { %v507_v42 = vmax.f32 %v499_v30, %v506_v38  ;;  %v509_v43 = vmax.f32 %v501_v31, %v508_v39  ;;  %v510_v44 = vsel %vm18426_vm1, %v8491_v22, -inf  ;;  %v512_v45 = vsel %vm18426_vm1, %v8494_v23, -inf  ;;  %v8531_v46 = vld [vmem:[%s8428_s11] sm:$0xf]  ;;  %s335_s1 = scalar_lea.vmem [#allocation10], %s6967_s7  ;;  %s6798_s19 = scalar_lea.sflag [#allocation4], %s8404_s20 }
  0xa1   : > { %18801 = vst [vmem:[#allocation18_spill] sm:$0xff] %v8531_v46  ;;  %v8534_v47 = vld [vmem:[%s8416_s23 + $0x50] sm:$0xf]  ;;  %v511_v48 = vmax.f32 %v503_v36, %v510_v44  ;;  %v513_v49 = vmax.f32 %v505_v37, %v512_v45  ;;  %v514_v50 = vsel %vm18426_vm1, %v8501_v28, -inf  ;;  %v516_v51 = vsel %vm18426_vm1, %v8504_v29, -inf  ;;  %s6811_s10 = sshll.u32 %s335_s1, 4  ;;  %s18323_s10 = int_to_ptr.vmem [resolvable:$true] %s6811_s10 }
  0xa2   : > { %v515_v52 = vmax.f32 %v507_v42, %v514_v50  ;;  %v517_v53 = vmax.f32 %v509_v43, %v516_v51  ;;  %v518_v54 = vsel %vm18426_vm1, %v8511_v34, -inf  ;;  %v520_v55 = vsel %vm18426_vm1, %v8514_v35, -inf  ;;  %s8065_s14 = scalar_lea.vmem %s18323_s10, 128  ;;  %p21063_p9 = scmp.ne.s32.totalorder %s18790_s26, 0 }
  0xa3   : > { %v519_v56 = vmax.f32 %v511_v48, %v518_v54  ;;  %v521_v57 = vmax.f32 %v513_v49, %v520_v55  ;;  %v522_v58 = vsel %vm18426_vm1, %v8521_v40, -inf  ;;  %v524_v59 = vsel %vm18426_vm1, %v8524_v41, -inf  ;;  %p8066_p13 = scmp.ne.s32.totalorder %s18323_s10, %s8065_s14 }
  0xa4   : > { %v523_v60 = vmax.f32 %v515_v52, %v522_v58  ;;  %v525_v61 = vmax.f32 %v517_v53, %v524_v59  ;;  %v526_v62 = vsel %vm18426_vm1, %v8534_v47, -inf  ;;  %vm638_vm2 = vcmp.eq.s32.totalorder %v8531_v46, 0 }
  0xa5   : > { %v527_v63 = vmax.f32 %v519_v56, %v526_v62  ;;  %v639_v0 = vsel %vm638_vm2, %v8443_v4, 0.0  ;;  %vm641_vm3 = vcmp.eq.s32.totalorder %v8531_v46, 1  ;;  %vm644_vm4 = vcmp.eq.s32.totalorder %v8531_v46, 2  ;;  %p8067_p12 = pnand %p8066_p13, %p21063_p9 }
  0xa6   : > { %v529_v15 = vmax.f32 %v523_v60, %v525_v61  ;;  %v642_v16 = vsel %vm641_vm3, %v8446_v5, 0.0  ;;  %v645_v20 = vsel %vm644_vm4, %v8449_v6, 0.0  ;;  %vm647_vm5 = vcmp.eq.s32.totalorder %v8531_v46, 3 }
  0xa7   : > { %v528_v18 = vmax.f32 %v527_v63, %v521_v57  ;;  %v643_v19 = vadd.f32 %v642_v16, %v639_v0  ;;  %vm650_vm6 = vcmp.eq.s32.totalorder %v8531_v46, 4  ;;  %vm653_vm7 = vcmp.eq.s32.totalorder %v8531_v46, 5  ;;  %p8068_p2 = pneg %p8067_p12 }
  0xa8   : > { %vm656_vm8 = vcmp.eq.s32.totalorder %v8531_v46, 6  ;;  %vm659_vm9 = vcmp.eq.s32.totalorder %v8531_v46, 7  ;;  %v648_v25 = vsel %vm647_vm5, %v8452_v7, 0.0  ;;  %v651_v26 = vsel %vm650_vm6, %v8455_v8, 0.0 }
  0xa9   : > { %v8558_v21 = vmax.f32 %v528_v18, %v529_v15  ;;  %v646_v24 = vadd.f32 %v645_v20, %v643_v19  ;;  %v654_v32 = vsel %vm653_vm7, %v8458_v9, 0.0  ;;  %v657_v37 = vsel %vm656_vm8, %v8461_v10, 0.0 }
  0xaa   : > { %v8578_v38 = vsel %vm659_vm9, %v8464_v11, 0.0  ;;  %vm662_vm10 = vcmp.eq.s32.totalorder %v8531_v46, 8  ;;  %vm665_vm11 = vcmp.eq.s32.totalorder %v8531_v46, 9  ;;  %vm668_vm12 = vcmp.eq.s32.totalorder %v8531_v46, 10 }
  0xab   : > { %v531_v27 = vsub.f32 %v8443_v4, %v8558_v21  ;;  %v532_v30 = vsub.f32 %v8446_v5, %v8558_v21  ;;  %v533_v31 = vsub.f32 %v8449_v6, %v8558_v21  ;;  %v534_v33 = vsub.f32 %v8452_v7, %v8558_v21 }
  0xac   : > { %v535_v36 = vsub.f32 %v8455_v8, %v8558_v21  ;;  %v536_v4 = vsub.f32 %v8458_v9, %v8558_v21  ;;  %v537_v5 = vsub.f32 %v8461_v10, %v8558_v21  ;;  %v538_v6 = vsub.f32 %v8464_v11, %v8558_v21 }
  0xad   : > { %v539_v7 = vsub.f32 %v8467_v12, %v8558_v21  ;;  %v540_v8 = vsub.f32 %v8470_v13, %v8558_v21  ;;  %v541_v39 = vsub.f32 %v8473_v14, %v8558_v21  ;;  %v542_v42 = vsub.f32 %v8480_v17, %v8558_v21 }
  0xae   : > { %v543_v9 = vsub.f32 %v8491_v22, %v8558_v21  ;;  %v544_v10 = vsub.f32 %v8494_v23, %v8558_v21  ;;  %v552_v11 = vmul.f32 1.442695, %v531_v27  ;;  %v554_v43 = vmul.f32 1.442695, %v532_v30 }
  0xaf   : > { %v556_v44 = vmul.f32 1.442695, %v533_v31  ;;  %v545_v45 = vsub.f32 %v8501_v28, %v8558_v21  ;;  %v546_v48 = vsub.f32 %v8504_v29, %v8558_v21  ;;  %v547_v49 = vsub.f32 %v8511_v34, %v8558_v21 }
  0xb0   : > { %v558_v50 = vmul.f32 1.442695, %v534_v33  ;;  %v548_v51 = vsub.f32 %v8514_v35, %v8558_v21  ;;  %v549_v52 = vsub.f32 %v8521_v40, %v8558_v21  ;;  %7857 = vpow2.f32 %v552_v11 }
  0xb1   : > { %v560_v53 = vmul.f32 1.442695, %v535_v36  ;;  %v550_v54 = vsub.f32 %v8524_v41, %v8558_v21  ;;  %7859 = vpow2.f32 %v554_v43  ;;  %v562_v55 = vmul.f32 1.442695, %v536_v4 }
  0xb2   : > { %v649_v56 = vadd.f32 %v648_v25, %v646_v24  ;;  %v551_v57 = vsub.f32 %v8534_v47, %v8558_v21  ;;  %7861 = vpow2.f32 %v556_v44  ;;  %v564_v58 = vmul.f32 1.442695, %v537_v5 }
  0xb3   : > { %v566_v59 = vmul.f32 1.442695, %v538_v6  ;;  %7863 = vpow2.f32 %v558_v50  ;;  %v568_v60 = vmul.f32 1.442695, %v539_v7  ;;  %v570_v61 = vmul.f32 1.442695, %v540_v8 }
  0xb4   : > { %v572_v62 = vmul.f32 1.442695, %v541_v39  ;;  %7865 = vpow2.f32 %v560_v53  ;;  %v574_v63 = vmul.f32 1.442695, %v542_v42  ;;  %v576_v0 = vmul.f32 1.442695, %v543_v9 }
  0xb5   : > { %v578_v15 = vmul.f32 1.442695, %v544_v10  ;;  %7867 = vpow2.f32 %v562_v55  ;;  %v580_v16 = vmul.f32 1.442695, %v545_v45  ;;  %v582_v18 = vmul.f32 1.442695, %v546_v48 }
  0xb6   : > { %v652_v19 = vadd.f32 %v651_v26, %v649_v56  ;;  %v584_v20 = vmul.f32 1.442695, %v547_v49  ;;  %v586_v24 = vmul.f32 1.442695, %v548_v51  ;;  %v8615_v25 = vmul.f32 1.442695, %v549_v52 }
  0xb7   : > { %7869 = vpow2.f32 %v564_v58  ;;  %vm671_vm13 = vcmp.eq.s32.totalorder %v8531_v46, 11  ;;  %vm674_vm14 = vcmp.eq.s32.totalorder %v8531_v46, 12  ;;  %v8619_v30 = vmul.f32 1.442695, %v550_v54  ;;  %v8660_v50 = vld [vmem:[%s8416_s23 + $0x54] sm:$0xf] }
  0xb8   : > { %v655_v27 = vadd.f32 %v654_v32, %v652_v19  ;;  %7871 = vpow2.f32 %v566_v59  ;;  %v8621_v31 = vmul.f32 1.442695, %v551_v57  ;;  %v663_v33 = vsel %vm662_vm10, %v8467_v12, 0.0  ;;  %v8663_v51 = vld [vmem:[%s8416_s23 + $0x58] sm:$0xf] }
  0xb9   : > { %v666_v36 = vsel %vm665_vm11, %v8470_v13, 0.0  ;;  %v669_v32 = vsel %vm668_vm12, %v8473_v14, 0.0  ;;  %vm677_vm15 = vcmp.eq.s32.totalorder %v8531_v46, 13  ;;  %7873 = vpow2.f32 %v568_v60  ;;  %v8671_v54 = vld [vmem:[%s8416_s23 + $0x5c] sm:$0xf] }
  0xba   : > { %v658_v26 = vadd.f32 %v657_v37, %v655_v27  ;;  %v7858_v4 = vpop.eup %7857  ;;  %v672_v5 = vsel %vm671_vm13, %v8480_v17, 0.0  ;;  %v675_v6 = vsel %vm674_vm14, %v8491_v22, 0.0  ;;  %vm680_vm0 = vcmp.eq.s32.totalorder %v8531_v46, 14  ;;  %v8679_v58 = vld [vmem:[%s8416_s23 + $0x60] sm:$0xf] }
  0xbb   : > { %v7860_v12 = vpop.eup %7859  ;;  %7875 = vpow2.f32 %v570_v61  ;;  %v594_v37 = vsel %vm18426_vm1, %v7858_v4, 0.0  ;;  %vm683_vm2 = vcmp.eq.s32.totalorder %v8531_v46, 15  ;;  %v678_v8 = vsel %vm677_vm15, %v8494_v23, 0.0  ;;  %v8682_v59 = vld [vmem:[%s8416_s23 + $0x64] sm:$0xf] }
  0xbc   : > { %v661_v13 = vadd.f32 %v8578_v38, %v658_v26  ;;  %v7862_v7 = vpop.eup %7861  ;;  %7877 = vpow2.f32 %v572_v62  ;;  %v595_v14 = vsel %vm18426_vm1, %v7860_v12, 0.0  ;;  %vm686_vm3 = vcmp.eq.s32.totalorder %v8531_v46, 16  ;;  %v8692_v62 = vld [vmem:[%s8416_s23 + $0x68] sm:$0xf]  ;;  %v8703_v19 = vld [vmem:[%s8416_s23 + $0x6c] sm:$0xf] }
  0xbd   : > { %v7864_v17 = vpop.eup %7863  ;;  %7879 = vpow2.f32 %v574_v63  ;;  %v596_v22 = vadd.f32 %v595_v14, %v594_v37  ;;  %v597_v39 = vsel %vm18426_vm1, %v7862_v7, 0.0  ;;  %v681_v10 = vsel %vm680_vm0, %v8501_v28, 0.0 }
  0xbe   : > { %v664_v42 = vadd.f32 %v663_v33, %v661_v13  ;;  %v7866_v9 = vpop.eup %7865  ;;  %7881 = vpow2.f32 %v576_v0  ;;  %v599_v38 = vsel %vm18426_vm1, %v7864_v17, 0.0  ;;  %v8648_v11 = vsel %vm683_vm2, %v8504_v29, 0.0  ;;  %v8732_v17 = vld [vmem:[%s8416_s23 + $0x7c] sm:$0xf] }
  0xbf   : > { %v7868_v23 = vpop.eup %7867  ;;  %7883 = vpow2.f32 %v578_v15  ;;  %v598_v43 = vadd.f32 %v597_v39, %v596_v22  ;;  %vm689_vm4 = vcmp.eq.s32.totalorder %v8531_v46, 17  ;;  %v601_v45 = vsel %vm18426_vm1, %v7866_v9, 0.0  ;;  %v8735_v22 = vld [vmem:[%s8416_s23 + $0x80] sm:$0xf] }
  0xc0   : > { %v667_v44 = vadd.f32 %v666_v36, %v664_v42  ;;  %7885 = vpow2.f32 %v580_v16  ;;  %v8655_v48 = vsel %vm686_vm3, %v8511_v34, 0.0  ;;  %vm692_vm5 = vcmp.eq.s32.totalorder %v8531_v46, 18  ;;  %v8716_v36 = vld [vmem:[%s8416_s23 + $0x74] sm:$0xf] }
  0xc1   : > { %v7870_v28 = vpop.eup %7869  ;;  %7887 = vpow2.f32 %v582_v18  ;;  %v600_v29 = vadd.f32 %v599_v38, %v598_v43  ;;  %vm695_vm6 = vcmp.eq.s32.totalorder %v8531_v46, 19  ;;  %v603_v34 = vsel %vm18426_vm1, %v7868_v23, 0.0 }
  0xc2   : > { %v670_v49 = vadd.f32 %v669_v32, %v667_v44  ;;  %v7872_v52 = vpop.eup %7871  ;;  %7889 = vpow2.f32 %v584_v20  ;;  %v8667_v53 = vsel %vm689_vm4, %v8514_v35, 0.0  ;;  %vm698_vm7 = vcmp.eq.s32.totalorder %v8531_v46, 20 }
  0xc3   : > { %7891 = vpow2.f32 %v586_v24  ;;  %v602_v55 = vadd.f32 %v601_v45, %v600_v29  ;;  %v8676_v57 = vsel %vm692_vm5, %v8521_v40, 0.0  ;;  %v7874_v35 = vpop.eup %7873  ;;  %v605_v60 = vsel %vm18426_vm1, %v7870_v28, 0.0  ;;  %v8743_v28 = vld [vmem:[%s8416_s23 + $0x84] sm:$0xf]  ;;  %v8746_v29 = vld [vmem:[%s8416_s23 + $0x88] sm:$0xf] }
  0xc4   : > { %v673_v56 = vadd.f32 %v672_v5, %v670_v49  ;;  %7893 = vpow2.f32 %v8615_v25  ;;  %v8689_v61 = vsel %vm695_vm6, %v8524_v41, 0.0  ;;  %v3966_v40 = vsel %vm18426_vm1, %v8660_v50, -inf  ;;  %v8706_v41 = vld [vmem:[%s8416_s23 + $0x70] sm:$0xf] }
  0xc5   : > { %v7876_v63 = vpop.eup %7875  ;;  %v604_v0 = vadd.f32 %v603_v34, %v602_v55  ;;  %v607_v15 = vsel %vm18426_vm1, %v7872_v52, 0.0  ;;  %v8700_v18 = vsel %vm698_vm7, %v8534_v47, 0.0  ;;  %7895 = vpow2.f32 %v8619_v30  ;;  %v8750_v55 = vld [vmem:[%s8416_s23 + $0x8c] sm:$0xf] }
  0xc6   : > { %v676_v16 = vadd.f32 %v675_v6, %v673_v56  ;;  %v7878_v20 = vpop.eup %7877  ;;  %v3967_v24 = vsel %vm18426_vm1, %v8663_v51, -inf  ;;  %v3968_v25 = vsel %vm18426_vm1, %v8671_v54, -inf  ;;  %v3970_v27 = vsel %vm18426_vm1, %v8682_v59, -inf }
  0xc7   : > { %v7880_v33 = vpop.eup %7879  ;;  %v606_v47 = vadd.f32 %v605_v60, %v604_v0  ;;  %v3969_v30 = vsel %vm18426_vm1, %v8679_v58, -inf  ;;  %v3971_v32 = vmax.f32 %v3966_v40, %v3970_v27  ;;  %v609_v5 = vsel %vm18426_vm1, %v7874_v35, 0.0 }
  0xc8   : > { %v679_v26 = vadd.f32 %v678_v8, %v676_v16  ;;  %v7882_v4 = vpop.eup %7881  ;;  %v3972_v6 = vsel %vm18426_vm1, %v8692_v62, -inf  ;;  %v3974_v12 = vsel %vm18426_vm1, %v8703_v19, -inf  ;;  %v3976_v37 = vsel %vm18426_vm1, %v8706_v41, -inf  ;;  %v8729_v8 = vld [vmem:[%s8416_s23 + $0x78] sm:$0xf] }
  0xc9   : > { %v7884_v13 = vpop.eup %7883  ;;  %7897 = vpow2.f32 %v8621_v31  ;;  %v608_v7 = vadd.f32 %v607_v15, %v606_v47  ;;  %v3973_v39 = vmax.f32 %v3967_v24, %v3972_v6  ;;  %v611_v9 = vsel %vm18426_vm1, %v7876_v63, 0.0  ;;  %v8761_v15 = vld [vmem:[%s8416_s23 + $0x90] sm:$0xf]  ;;  %v8764_v16 = vld [vmem:[%s8416_s23 + $0x94] sm:$0xf] }
  0xca   : > { %v682_v14 = vadd.f32 %v681_v10, %v679_v26  ;;  %v7886_v42 = vpop.eup %7885  ;;  %v3975_v38 = vmax.f32 %v3968_v25, %v3974_v12  ;;  %v3977_v23 = vmax.f32 %v3969_v30, %v3976_v37  ;;  %v3978_v31 = vsel %vm18426_vm1, %v8716_v36, -inf }
  0xcb   : > { %v7888_v43 = vpop.eup %7887  ;;  %v610_v44 = vadd.f32 %v609_v5, %v608_v7  ;;  %v613_v10 = vsel %vm18426_vm1, %v7878_v20, 0.0  ;;  %v3979_v49 = vmax.f32 %v3971_v32, %v3978_v31  ;;  %v615_v34 = vsel %vm18426_vm1, %v7880_v33, 0.0  ;;  %v8772_v32 = vld [vmem:[%s8416_s23 + $0x98] sm:$0xf] }
  0xcc   : > { %v685_v45 = vadd.f32 %v8648_v11, %v682_v14  ;;  %v7890_v52 = vpop.eup %7889  ;;  %v3980_v56 = vsel %vm18426_vm1, %v8729_v8, -inf  ;;  %v3982_v35 = vsel %vm18426_vm1, %v8732_v17, -inf  ;;  %v3984_v60 = vsel %vm18426_vm1, %v8735_v22, -inf }
  0xcd   : > { %v7892_v11 = vpop.eup %7891  ;;  %v612_v40 = vadd.f32 %v611_v9, %v610_v44  ;;  %v617_v63 = vsel %vm18426_vm1, %v7882_v4, 0.0  ;;  %v3981_v20 = vmax.f32 %v3973_v39, %v3980_v56  ;;  %v619_v25 = vsel %vm18426_vm1, %v7884_v13, 0.0  ;;  %v8775_v4 = vld [vmem:[%s8416_s23 + $0x9c] sm:$0xf]  ;;  %v8787_v39 = vld [vmem:[%s8428_s11 + $0x4] sm:$0xf] }
  0xce   : > { %v688_v0 = vadd.f32 %v8655_v48, %v685_v45  ;;  %v7894_v24 = vpop.eup %7893  ;;  %v3983_v27 = vmax.f32 %v3975_v38, %v3982_v35  ;;  %v3985_v33 = vmax.f32 %v3977_v23, %v3984_v60  ;;  %v3986_v47 = vsel %vm18426_vm1, %v8743_v28, -inf  ;;  %18802 = vst [vmem:[#allocation19_spill] sm:$0xff] %v8787_v39  ;;  %v8793_v9 = vld [vmem:[%s8416_s23 + $0xa4] sm:$0xf] }
  0xcf   : > { %v614_v26 = vadd.f32 %v613_v10, %v612_v40  ;;  %v621_v30 = vsel %vm18426_vm1, %v7886_v42, 0.0  ;;  %v3987_v5 = vmax.f32 %v3979_v49, %v3986_v47  ;;  %v7896_v6 = vpop.eup %7895  ;;  %v3988_v12 = vsel %vm18426_vm1, %v8746_v29, -inf  ;;  %v8790_v42 = vld [vmem:[%s8416_s23 + $0xa0] sm:$0xf]  ;;  %s8153_s23 = smov [#allocation10]  }
  0xd0   : > { %v691_v48 = vadd.f32 %v8667_v53, %v688_v0  ;;  %v3990_v37 = vsel %vm18426_vm1, %v8750_v55, -inf  ;;  %v3992_v13 = vsel %vm18426_vm1, %v8761_v15, -inf  ;;  %v3994_v7 = vsel %vm18426_vm1, %v8764_v16, -inf  ;;  %s8069_s7 = sshll.u32 %s8153_s23, 4  ;;  %s8070_s7 = int_to_ptr.vmem [resolvable:$false] %s8069_s7 }
  0xd1   : > { %v616_v14 = vadd.f32 %v615_v34, %v614_v26  ;;  %v3989_v38 = vmax.f32 %v3981_v20, %v3988_v12  ;;  %v3991_v23 = vmax.f32 %v3983_v27, %v3990_v37  ;;  %v3993_v31 = vmax.f32 %v3985_v33, %v3992_v13  ;;  %p8072_p11 = scmp.lt.s32.totalorder %s18323_s10, %s8070_s7 }
  0xd2   : > { %v694_v53 = vadd.f32 %v8676_v57, %v691_v48  ;;  %v3995_v44 = vmax.f32 %v3987_v5, %v3994_v7  ;;  %v3996_v10 = vsel %vm18426_vm1, %v8772_v32, -inf  ;;  %v3998_v45 = vsel %vm18426_vm1, %v8775_v4, -inf }
  0xd3   : > { %v7898_v49 = vpop.eup %7897  ;;  %v618_v34 = vadd.f32 %v617_v63, %v616_v14  ;;  %v3997_v56 = vmax.f32 %v3989_v38, %v3996_v10  ;;  %v3999_v35 = vmax.f32 %v3991_v23, %v3998_v45  ;;  %v4000_v60 = vsel %vm18426_vm1, %v8790_v42, -inf }
  0xd4   : > { %v697_v57 = vadd.f32 %v8689_v61, %v694_v53  ;;  %v4002_v40 = vsel %vm18426_vm1, %v8793_v9, -inf  ;;  %vm4114_vm8 = vcmp.eq.s32.totalorder %v8787_v39, 0  ;;  %vm4117_vm9 = vcmp.eq.s32.totalorder %v8787_v39, 1 }
  0xd5   : > { %v620_v0 = vadd.f32 %v619_v25, %v618_v34  ;;  %v4001_v27 = vmax.f32 %v3993_v31, %v4000_v60  ;;  %v4003_v63 = vmax.f32 %v3995_v44, %v4002_v40  ;;  %v623_v61 = vsel %vm18426_vm1, %v7888_v43, 0.0 }
  0xd6   : > { %v8807_v20 = vadd.f32 %v8700_v18, %v697_v57  ;;  %v4115_v33 = vsel %vm4114_vm8, %v8660_v50, 0.0  ;;  %v4118_v47 = vsel %vm4117_vm9, %v8663_v51, 0.0  ;;  %vm4120_vm10 = vcmp.eq.s32.totalorder %v8787_v39, 2 }
  0xd7   : > { %v622_v26 = vadd.f32 %v621_v30, %v620_v0  ;;  %v4004_v48 = vmax.f32 %v4003_v63, %v3997_v56  ;;  %v4005_v5 = vmax.f32 %v3999_v35, %v4001_v27  ;;  %v625_v12 = vsel %vm18426_vm1, %v7890_v52, 0.0 }
  0xd8   : > { %v4119_v37 = vadd.f32 %v4118_v47, %v4115_v33  ;;  %v4121_v25 = vsel %vm4120_vm10, %v8671_v54, 0.0  ;;  %vm4123_vm11 = vcmp.eq.s32.totalorder %v8787_v39, 3  ;;  %vm4126_vm12 = vcmp.eq.s32.totalorder %v8787_v39, 4 }
  0xd9   : > { %v624_v18 = vadd.f32 %v623_v61, %v622_v26  ;;  %v8816_v13 = vmax.f32 %v4004_v48, %v4005_v5  ;;  %vm4129_vm13 = vcmp.eq.s32.totalorder %v8787_v39, 5  ;;  %v627_v43 = vsel %vm18426_vm1, %v7892_v11, 0.0 }
  0xda   : > { %v629_v30 = vsel %vm18426_vm1, %v7894_v24, 0.0  ;;  %v8823_v7 = vadd.s32 8, %v8434_v1  ;;  %v631_v14 = vsel %vm18426_vm1, %v7896_v6, 0.0  ;;  %v633_v53 = vsel %vm18426_vm1, %v7898_v49, 0.0 }
  0xdb   : > { %v626_v52 = vadd.f32 %v625_v12, %v624_v18  ;;  %v4124_v38 = vsel %vm4123_vm11, %v8679_v58, 0.0  ;;  %v4007_v23 = vsub.f32 %v8660_v50, %v8816_v13  ;;  %v4122_v31 = vadd.f32 %v4121_v25, %v4119_v37 }
  0xdc   : > { %18803 = vst [vmem:[#allocation20_spill] sm:$0xff] %v8823_v7  ;;  %v4127_v44 = vsel %vm4126_vm12, %v8682_v59, 0.0  ;;  %v4130_v11 = vsel %vm4129_vm13, %v8692_v62, 0.0  ;;  %v4008_v24 = vsub.f32 %v8663_v51, %v8816_v13  ;;  %v4009_v45 = vsub.f32 %v8671_v54, %v8816_v13 }
  0xdd   : > { %v628_v10 = vadd.f32 %v627_v43, %v626_v52  ;;  %v4010_v6 = vsub.f32 %v8679_v58, %v8816_v13  ;;  %v4011_v49 = vsub.f32 %v8682_v59, %v8816_v13  ;;  %v4012_v50 = vsub.f32 %v8692_v62, %v8816_v13 }
  0xde   : > { %v4013_v34 = vsub.f32 %v8703_v19, %v8816_v13  ;;  %v4014_v57 = vsub.f32 %v8706_v41, %v8816_v13  ;;  %vm4132_vm14 = vcmp.eq.s32.totalorder %v8787_v39, 6  ;;  %v4015_v54 = vsub.f32 %v8716_v36, %v8816_v13 }
  0xdf   : > { %v630_v51 = vadd.f32 %v629_v30, %v628_v10  ;;  %v4016_v58 = vsub.f32 %v8729_v8, %v8816_v13  ;;  %v4017_v59 = vsub.f32 %v8732_v17, %v8816_v13  ;;  %v4018_v62 = vsub.f32 %v8735_v22, %v8816_v13 }
  0xe0   : > { %v4019_v56 = vsub.f32 %v8743_v28, %v8816_v13  ;;  %v4020_v35 = vsub.f32 %v8746_v29, %v8816_v13  ;;  %v4021_v60 = vsub.f32 %v8750_v55, %v8816_v13  ;;  %vm4135_vm15 = vcmp.eq.s32.totalorder %v8787_v39, 7 }
  0xe1   : > { %v632_v40 = vadd.f32 %v631_v14, %v630_v51  ;;  %v4022_v0 = vsub.f32 %v8761_v15, %v8816_v13  ;;  %v4028_v27 = vmul.f32 1.442695, %v4007_v23  ;;  %v4030_v63 = vmul.f32 1.442695, %v4008_v24 }
  0xe2   : > { %v4023_v61 = vsub.f32 %v8764_v16, %v8816_v13  ;;  %v4024_v33 = vsub.f32 %v8772_v32, %v8816_v13  ;;  %v4025_v47 = vsub.f32 %v8775_v4, %v8816_v13  ;;  %v4032_v26 = vmul.f32 1.442695, %v4009_v45 }
  0xe3   : > { %vm4138_vm0 = vcmp.eq.s32.totalorder %v8787_v39, 8  ;;  %v634_v48 = vadd.f32 %v633_v53, %v632_v40  ;;  %v4026_v5 = vsub.f32 %v8790_v42, %v8816_v13  ;;  %7899 = vpow2.f32 %v4028_v27 }
  0xe4   : > { %v4034_v12 = vmul.f32 1.442695, %v4010_v6  ;;  %v4027_v37 = vsub.f32 %v8793_v9, %v8816_v13  ;;  %7901 = vpow2.f32 %v4030_v63  ;;  %v4036_v25 = vmul.f32 1.442695, %v4011_v49 }
  0xe5   : > { %v4125_v18 = vadd.f32 %v4124_v38, %v4122_v31  ;;  %7903 = vlog2.f32 %v634_v48  ;;  %v4038_v43 = vmul.f32 1.442695, %v4012_v50  ;;  %v4040_v30 = vmul.f32 1.442695, %v4013_v34 }
  0xe6   : > { %v4042_v52 = vmul.f32 1.442695, %v4014_v57  ;;  %7905 = vpow2.f32 %v4032_v26  ;;  %v4044_v14 = vmul.f32 1.442695, %v4015_v54  ;;  %v4046_v23 = vmul.f32 1.442695, %v4016_v58 }
  0xe7   : > { %v4048_v10 = vmul.f32 1.442695, %v4017_v59  ;;  %7907 = vpow2.f32 %v4034_v12  ;;  %v4050_v53 = vmul.f32 1.442695, %v4018_v62  ;;  %v4052_v24 = vmul.f32 1.442695, %v4019_v56 }
  0xe8   : > { %v4054_v45 = vmul.f32 1.442695, %v4020_v35  ;;  %7909 = vpow2.f32 %v4036_v25  ;;  %v4056_v6 = vmul.f32 1.442695, %v4021_v60  ;;  %v4058_v51 = vmul.f32 1.442695, %v4022_v0 }
  0xe9   : > { %v4128_v40 = vadd.f32 %v4127_v44, %v4125_v18  ;;  %7911 = vpow2.f32 %v4038_v43  ;;  %v4060_v27 = vmul.f32 1.442695, %v4023_v61  ;;  %v4062_v49 = vmul.f32 1.442695, %v4024_v33 }
  0xea   : > { %v4133_v38 = vsel %vm4132_vm14, %v8703_v19, 0.0  ;;  %7913 = vpow2.f32 %v4040_v30  ;;  %v4064_v31 = vmul.f32 1.442695, %v4025_v47  ;;  %vm4141_vm2 = vcmp.eq.s32.totalorder %v8787_v39, 9 }
  0xeb   : > { %v4131_v50 = vadd.f32 %v4130_v11, %v4128_v40  ;;  %vm18374_vm3 = vcmp.gt.s32.totalorder %v8531_v46, 0  ;;  %7915 = vpow2.f32 %v4042_v52  ;;  %v4066_v34 = vmul.f32 1.442695, %v4026_v5 }
  0xec   : > { %v4136_v44 = vsel %vm4135_vm15, %v8706_v41, 0.0  ;;  %vm4144_vm4 = vcmp.eq.s32.totalorder %v8787_v39, 10  ;;  %vm18373_vm5 = vcmp.ge.s32.totalorder %v8531_v46, 0  ;;  %7917 = vpow2.f32 %v4044_v14 }
  0xed   : > { %v4134_v57 = vadd.f32 %v4133_v38, %v4131_v50  ;;  %vm4147_vm6 = vcmp.eq.s32.totalorder %v8787_v39, 11  ;;  %vm4150_vm7 = vcmp.eq.s32.totalorder %v8787_v39, 12  ;;  %v7900_v19 = vpop.eup %7899  ;;  %7919 = vpow2.f32 %v4046_v23 }
  0xee   : > { %v4068_v11 = vmul.f32 1.442695, %v4027_v37  ;;  %v4139_v54 = vsel %vm4138_vm0, %v8716_v36, 0.0  ;;  %v4142_v58 = vsel %vm4141_vm2, %v8729_v8, 0.0  ;;  %v7902_v41 = vpop.eup %7901  ;;  %7921 = vpow2.f32 %v4048_v10 }
  0xef   : > { %v4070_v59 = vsel %vm18426_vm1, %v7900_v19, 0.0  ;;  %v4137_v62 = vadd.f32 %v4136_v44, %v4134_v57  ;;  %v4145_v56 = vsel %vm4144_vm4, %v8732_v17, 0.0  ;;  %v7904_v35 = vpop.eup %7903  ;;  %7923 = vpow2.f32 %v4050_v53 }
  0xf0   : > { %v4071_v60 = vsel %vm18426_vm1, %v7902_v41, 0.0  ;;  %v4148_v0 = vsel %vm4147_vm6, %v8735_v22, 0.0  ;;  %v4151_v63 = vsel %vm4150_vm7, %v8743_v28, 0.0  ;;  %v7906_v61 = vpop.eup %7905  ;;  %v636_v33 = vmul.f32 0.6931472, %v7904_v35 }
  0xf1   : > { %7925 = vpow2.f32 %v4052_v24  ;;  %v4072_v36 = vadd.f32 %v4071_v60, %v4070_v59  ;;  %v4140_v8 = vadd.f32 %v4139_v54, %v4137_v62  ;;  %v7908_v47 = vpop.eup %7907  ;;  %vm360_vm8 = vcmp.eq.s32.totalorder %v8823_v7, %v8436_v2 }
  0xf2   : > { %7927 = vpow2.f32 %v4054_v45  ;;  %v4073_v17 = vsel %vm18426_vm1, %v7906_v61, 0.0  ;;  %vm4153_vm9 = vcmp.eq.s32.totalorder %v8787_v39, 13  ;;  %vm4156_vm10 = vcmp.eq.s32.totalorder %v8787_v39, 14  ;;  %v7910_v26 = vpop.eup %7909 }
  0xf3   : > { %v637_v22 = vadd.f32 %v636_v33, %v8558_v21  ;;  %7929 = vpow2.f32 %v4056_v6  ;;  %v4074_v28 = vadd.f32 %v4073_v17, %v4072_v36  ;;  %v4075_v48 = vsel %vm18426_vm1, %v7908_v47, 0.0  ;;  %v7912_v5 = vpop.eup %7911 }
  0xf4   : > { %7931 = vpow2.f32 %v4058_v51  ;;  %v4077_v12 = vsel %vm18426_vm1, %v7910_v26, 0.0  ;;  %v4143_v37 = vadd.f32 %v4142_v58, %v4140_v8  ;;  %vm4159_vm11 = vcmp.eq.s32.totalorder %v8787_v39, 15  ;;  %v7914_v25 = vpop.eup %7913 }
  0xf5   : > { %v8906_v18 = vsub.f32 %v637_v22, %v8807_v20  ;;  %7933 = vpow2.f32 %v4060_v27  ;;  %v4076_v43 = vadd.f32 %v4075_v48, %v4074_v28  ;;  %v4154_v21 = vsel %vm4153_vm9, %v8746_v29, 0.0  ;;  %v7916_v30 = vpop.eup %7915 }
  0xf6   : > { %7935 = vpow2.f32 %v4062_v49  ;;  %v4146_v52 = vadd.f32 %v4145_v56, %v4143_v37  ;;  %vm4162_vm12 = vcmp.eq.s32.totalorder %v8787_v39, 16  ;;  %vm4165_vm13 = vcmp.eq.s32.totalorder %v8787_v39, 17  ;;  %v7918_v14 = vpop.eup %7917 }
  0xf7   : > { %18804 = vst [vmem:[#allocation21_spill] sm:$0xff] %v8906_v18  ;;  %v702_v23 = vsel %vm18374_vm3, 0.0, %v8906_v18  ;;  %7937 = vpow2.f32 %v4064_v31  ;;  %v4078_v20 = vadd.f32 %v4077_v12, %v4076_v43  ;;  %v4079_v10 = vsel %vm18426_vm1, %v7912_v5, 0.0  ;;  %v7920_v53 = vpop.eup %7919 }
  0xf8   : > { %v8919_v29 = vsel %vm18373_vm5, %v702_v23, -1e+30  ;;  %7939 = vpow2.f32 %v4066_v34  ;;  %v4149_v24 = vadd.f32 %v4148_v0, %v4146_v52  ;;  %v4157_v45 = vsel %vm4156_vm10, %v8750_v55, 0.0  ;;  %v7922_v6 = vpop.eup %7921 }
  0xf9   : > { %7612 = vmatprep.subr.mxu0 %v8919_v29  ;;  %v4081_v51 = vsel %vm18426_vm1, %v7914_v25, 0.0  ;;  %v4160_v40 = vsel %vm4159_vm11, %v8761_v15, 0.0  ;;  %v4163_v27 = vsel %vm4162_vm12, %v8764_v16, 0.0  ;;  %v4166_v49 = vsel %vm4165_vm13, %v8772_v32, 0.0  ;;  %v7924_v38 = vpop.eup %7923 }
  0xfa   : > { %7613 = vmatpush3.xpose.msra.mxu0 %v8919_v29  ;;  %7941 = vpow2.f32 %v4068_v11  ;;  %v4080_v55 = vadd.f32 %v4079_v10, %v4078_v20  ;;  %v4083_v31 = vsel %vm18426_vm1, %v7916_v30, 0.0  ;;  %v4085_v50 = vsel %vm18426_vm1, %v7918_v14, 0.0 }
  0xfb   : > { %v7926_v34 = vpop.eup %7925  ;;  %v4087_v15 = vsel %vm18426_vm1, %v7920_v53, 0.0  ;;  %v4152_v44 = vadd.f32 %v4151_v63, %v4149_v24  ;;  %vm4168_vm14 = vcmp.eq.s32.totalorder %v8787_v39, 18  ;;  %vm4171_vm15 = vcmp.eq.s32.totalorder %v8787_v39, 19  ;;  %v412_v24 = vld [vmem:[%s8408_s29] sm:$0xf] }
  0xfc   : > { %v7928_v16 = vpop.eup %7927  ;;  %v4082_v57 = vadd.f32 %v4081_v51, %v4080_v55  ;;  %v4089_v32 = vsel %vm18426_vm1, %v7922_v6, 0.0  ;;  %v4091_v19 = vsel %vm18426_vm1, %v7924_v38, 0.0  ;;  %v8944_v11 = vsel %vm18426_vm1, %v7926_v34, 0.0  ;;  %v417_v34 = vld [vmem:[%s8423_s30 + $0x4] sm:$0xf] }
  0xfd   : > { %v7930_v54 = vpop.eup %7929  ;;  %7615 = vmatmul.mubr.msk.f32.vlgmr.msra.gmra.mrb[0].mxu0 %vm360_vm8, %v8147_v3  ;;  %v4155_v58 = vadd.f32 %v4154_v21, %v4152_v44  ;;  %v4169_v41 = vsel %vm4168_vm14, %v8775_v4, 0.0  ;;  %vm4174_vm0 = vcmp.eq.s32.totalorder %v8787_v39, 20  ;;  %v8953_v59 = vadd.s32 16, %v8434_v1  ;;  %v418_v44 = vld [vmem:[%s8423_s30 + $0x8] sm:$0xf] }
  0xfe   : > { %v7932_v62 = vpop.eup %7931  ;;  %v4084_v56 = vadd.f32 %v4083_v31, %v4082_v57  ;;  %v8956_v35 = vsel %vm18426_vm1, %v7928_v16, 0.0  ;;  %v4172_v60 = vsel %vm4171_vm15, %v8790_v42, 0.0  ;;  %v8960_v0 = vadd.s32 24, %v8434_v1  ;;  %v419_v16 = vld [vmem:[%s8423_s30 + $0xc] sm:$0xf] }
  0xff   : > { %18805 = vst [vmem:[#allocation22_spill] sm:$0xff] %v8953_v59  ;;  %v7934_v63 = vpop.eup %7933  ;;  %v8963_v61 = vsel %vm18426_vm1, %v7930_v54, 0.0  ;;  %v4158_v4 = vadd.f32 %v4157_v45, %v4155_v58  ;;  %vm361_vm2 = vcmp.eq.s32.totalorder %v8953_v59, %v8436_v2  ;;  %v8968_v33 = vadd.s32 32, %v8434_v1  ;;  %v413_v45 = vld [vmem:[%s8408_s29 + $0x4] sm:$0xf] }
 0x100   : > { %18806 = vst [vmem:[#allocation23_spill] sm:$0xff] %v8960_v0  ;;  %v7936_v36 = vpop.eup %7935  ;;  %v4086_v8 = vadd.f32 %v4085_v50, %v4084_v56  ;;  %v4175_v47 = vsel %vm4174_vm0, %v8793_v9, 0.0  ;;  %7617 = vmatprep.mubr.msk.f32.mxu0 %vm361_vm2, %v8147_v3  ;;  %vm362_vm4 = vcmp.eq.s32.totalorder %v8960_v0, %v8436_v2  ;;  %v8978_v42 = vadd.s32 40, %v8434_v1  ;;  %v416_v50 = vld [vmem:[%s8423_s30] sm:$0xf] }
 0x101   : > { %18807 = vst [vmem:[#allocation24_spill] sm:$0xff] %v8968_v33  ;;  %v7938_v17 = vpop.eup %7937  ;;  %v8981_v26 = vsel %vm18426_vm1, %v7932_v62, 0.0  ;;  %v4161_v22 = vadd.f32 %v4160_v40, %v4158_v4  ;;  %7618 = vmatmul.mubr.msk.f32.gmra.mrb[2].mxu0 %vm362_vm4, %v8147_v3  ;;  %vm363_vm6 = vcmp.eq.s32.totalorder %v8968_v33, %v8436_v2  ;;  %v8990_v9 = vadd.s32 48, %v8434_v1 }
 0x102   : > { %18808 = vst [vmem:[#allocation25_spill] sm:$0xff] %v8978_v42  ;;  %v7940_v28 = vpop.eup %7939  ;;  %v4088_v48 = vadd.f32 %v4087_v15, %v4086_v8  ;;  %v8993_v5 = vsel %vm18426_vm1, %v7934_v63, 0.0  ;;  %7620 = vmatprep.mubr.msk.f32.mxu0 %vm363_vm6, %v8147_v3  ;;  %vm364_vm7 = vcmp.eq.s32.totalorder %v8978_v42, %v8436_v2  ;;  %v9002_v12 = vadd.s32 56, %v8434_v1 }
 0x103   : > { %18809 = vst [vmem:[#allocation26_spill] sm:$0xff] %v8990_v9  ;;  %v9005_v37 = vsel %vm18426_vm1, %v7936_v36, 0.0  ;;  %v4164_v25 = vadd.f32 %v4163_v27, %v4161_v22  ;;  %vm365_vm9 = vcmp.eq.s32.totalorder %v8990_v9, %v8436_v2  ;;  %v9010_v43 = vadd.s32 64, %v8434_v1  ;;  %v414_v27 = vld [vmem:[%s8408_s29 + $0x8] sm:$0xf] }
 0x104   : > { %18810 = vst [vmem:[#allocation27_spill] sm:$0xff] %v9002_v12  ;;  %v7942_v21 = vpop.eup %7941  ;;  %v4090_v30 = vadd.f32 %v4089_v32, %v4088_v48  ;;  %v9013_v52 = vsel %vm18426_vm1, %v7938_v17, 0.0  ;;  %v9016_v14 = vadd.s32 72, %v8434_v1  ;;  %v9019_v23 = vadd.s32 80, %v8434_v1  ;;  %v7264_v48 = vld [vmem:[%s8408_s29 + $0x10] sm:$0xf] }
 0x105   : > { %18811 = vst [vmem:[#allocation28_spill] sm:$0xff] %v9010_v43  ;;  %v9022_v20 = vsel %vm18426_vm1, %v7940_v28, 0.0  ;;  %v4167_v10 = vadd.f32 %v4166_v49, %v4164_v25  ;;  %7621 = vmatmul.mubr.msk.f32.gmra.mrb[4].mxu0 %vm364_vm7, %v8147_v3  ;;  %vm18377_vm10 = vcmp.eq.s32.totalorder %v9002_v12, %v8436_v2  ;;  %v9031_v53 = vadd.s32 88, %v8434_v1  ;;  %v415_v49 = vld [vmem:[%s8408_s29 + $0xc] sm:$0xf] }
 0x106   : > { %18812 = vst [vmem:[#allocation29_spill] sm:$0xff] %v9016_v14  ;;  %18813 = vst [vmem:[#allocation30_spill] sm:$0xff] %v9019_v23  ;;  %v4092_v6 = vadd.f32 %v4091_v19, %v4090_v30  ;;  %v9036_v51 = vsel %vm18426_vm1, %v7942_v21, 0.0  ;;  %7623 = vmatprep.mubr.msk.f32.mxu0 %vm365_vm9, %v8147_v3  ;;  %vm18375_vm11 = vcmp.eq.s32.totalorder %v9010_v43, %v8436_v2  ;;  %v9045_v40 = vadd.s32 96, %v8434_v1 }
 0x107   : > { %18814 = vst [vmem:[#allocation31_spill] sm:$0xff] %v9031_v53  ;;  %v4170_v38 = vadd.f32 %v4169_v41, %v4167_v10  ;;  %vm18376_vm12 = vcmp.eq.s32.totalorder %v9016_v14, %v8436_v2  ;;  %v9052_v55 = vadd.s32 104, %v8434_v1  ;;  %v9055_v31 = vadd.s32 112, %v8434_v1  ;;  %v7265_v10 = vld [vmem:[%s8408_s29 + $0x14] sm:$0xf] }
 0x108   : > { %18815 = vst [vmem:[#allocation32_spill] sm:$0xff] %v9045_v40  ;;  %v4094_v15 = vadd.f32 %v8944_v11, %v4092_v6  ;;  %vm18378_vm13 = vcmp.eq.s32.totalorder %v9019_v23, %v8436_v2  ;;  %vm18379_vm14 = vcmp.eq.s32.totalorder %v9031_v53, %v8436_v2  ;;  %vm371_vm15 = vcmp.eq.s32.totalorder %v9045_v40, %v8436_v2 }
 0x109   : > { %18816 = vst [vmem:[#allocation33_spill] sm:$0xff] %v9052_v55  ;;  %18817 = vst [vmem:[#allocation34_spill] sm:$0xff] %v9055_v31  ;;  %v4173_v57 = vadd.f32 %v4172_v60, %v4170_v38  ;;  %7624 = vmatmul.mubr.msk.f32.gmra.mrb[6].mxu0 %vm18377_vm10, %v8147_v3  ;;  %v9073_v32 = vadd.s32 120, %v8434_v1  ;;  %v18380_v19 = vmov 0.0   ;;  %vm372_vm0 = vcmp.eq.s32.totalorder %v9052_v55, %v8436_v2 }
 0x10a   : > { %v9078_v11 = vsel %vm18374_vm3, 1.0, %v18380_v19  ;;  %v4096_v54 = vadd.f32 %v8956_v35, %v4094_v15  ;;  %7626 = vmatprep.mubr.msk.f32.mxu0 %vm18375_vm11, %v8147_v3  ;;  %v420_v58 = vsub.f32 %v412_v24, %v416_v50  ;;  %v421_v41 = vsub.f32 %v413_v45, %v417_v34 }
 0x10b   : > { %18818 = vst [vmem:[#allocation35_spill] sm:$0xff] %v9073_v32  ;;  %v9087_v62 = vadd.f32 %v4175_v47, %v4173_v57  ;;  %vm373_vm5 = vcmp.eq.s32.totalorder %v9055_v31, %v8436_v2  ;;  %v422_v56 = vsub.f32 %v414_v27, %v418_v44  ;;  %v423_v60 = vsub.f32 %v415_v49, %v419_v16  ;;  %v7268_v27 = vld [vmem:[%s8423_s30 + $0x10] sm:$0xf]  ;;  %v7269_v49 = vld [vmem:[%s8423_s30 + $0x14] sm:$0xf] }
 0x10c   : > { %v704_v35 = vsel %vm18426_vm1, %v9078_v11, 0.0  ;;  %v4098_v63 = vadd.f32 %v8963_v61, %v4096_v54  ;;  %v424_v4 = vand.u32 2147483647, %v420_v58  ;;  %v425_v36 = vand.u32 2147483647, %v421_v41 }
 0x10d   : > { %v432_v8 = vmul.f32 0.5, %v420_v58  ;;  %705 = vadd.xlane.f32.xlu0 %v704_v35  ;;  %7627 = vmatmul.mubr.msk.f32.gmra.mrb[8].mxu0 %vm18376_vm12, %v8147_v3  ;;  %v426_v47 = vand.u32 2147483647, %v422_v56  ;;  %v427_v17 = vand.u32 2147483647, %v423_v60  ;;  %v433_v22 = vmul.f32 0.5, %v421_v41 }
 0x10e   : > { %v434_v28 = vmul.f32 0.5, %v422_v56  ;;  %v4100_v25 = vadd.f32 %v8981_v26, %v4098_v63  ;;  %7629 = vmatprep.mubr.msk.f32.mxu0 %vm18378_vm13, %v8147_v3  ;;  %vm9104_vm3 = vcmp.lt.f32.partialorder %v424_v4, 1.0  ;;  %vm9108_vm11 = vcmp.lt.f32.partialorder %v425_v36, 1.0  ;;  %v7266_v54 = vld [vmem:[%s8408_s29 + $0x18] sm:$0xf] }
 0x10f   : > { %v435_v30 = vmul.f32 0.5, %v423_v60  ;;  %vm9113_vm12 = vcmp.lt.f32.partialorder %v426_v47, 1.0  ;;  %vm9117_vm10 = vcmp.lt.f32.partialorder %v427_v17, 1.0  ;;  %v436_v45 = vmul.f32 %v432_v8, %v420_v58 }
 0x110   : > { %v437_v6 = vmul.f32 %v433_v22, %v421_v41  ;;  %v4102_v38 = vadd.f32 %v8993_v5, %v4100_v25  ;;  %v438_v50 = vmul.f32 %v434_v28, %v422_v56  ;;  %v6986_v15 = vadd.f32 -0.5, %v424_v4  ;;  %v7267_v41 = vld [vmem:[%s8408_s29 + $0x1c] sm:$0xf]  ;;  %v7270_v56 = vld [vmem:[%s8423_s30 + $0x18] sm:$0xf] }
 0x111   : > { %v439_v34 = vmul.f32 %v435_v30, %v423_v60  ;;  %7630 = vmatmul.mubr.msk.f32.gmra.mrb[10].mxu0 %vm18379_vm14, %v8147_v3  ;;  %vm374_vm13 = vcmp.eq.s32.totalorder %v9073_v32, %v8436_v2  ;;  %v6987_v44 = vadd.f32 -0.5, %v425_v36  ;;  %v6988_v16 = vadd.f32 -0.5, %v426_v47  ;;  %v7271_v60 = vld [vmem:[%s8423_s30 + $0x1c] sm:$0xf]  ;;  %s8071_s30 = scalar_lea.vmem %s8070_s7, 256 }
 0x112   : > { %v6989_v57 = vadd.f32 -0.5, %v427_v17  ;;  %v4104_v58 = vadd.f32 %v9005_v37, %v4102_v38  ;;  %7632 = vmatprep.mubr.msk.f32.mxu0 %vm371_vm15, %v8147_v3  ;;  %v444_v5 = vsel %vm9104_vm3, %v436_v45, %v6986_v15  ;;  %v3896_v35 = vsub.f32 %v7264_v48, %v7268_v27  ;;  %p8073_p7 = scmp.lt.s32.totalorder %s8071_s30, %s8065_s14 }
 0x113   : > { %v3897_v63 = vsub.f32 %v7265_v10, %v7269_v49  ;;  %vm18394_vm14 = vcmp.gt.s32.totalorder %v8787_v39, 0  ;;  %v445_v4 = vsel %vm9108_vm11, %v437_v6, %v6987_v44  ;;  %v446_v37 = vsel %vm9113_vm12, %v438_v50, %v6988_v16 }
 0x114   : > { %v447_v36 = vsel %vm9117_vm10, %v439_v34, %v6989_v57  ;;  %v449_v8 = vsel %vm18426_vm1, %v444_v5, 0.0  ;;  %v4106_v47 = vadd.f32 %v9013_v52, %v4104_v58  ;;  %v450_v17 = vsel %vm18426_vm1, %v445_v4, 0.0  ;;  %p8074_p0 = por %p8073_p7, %p8072_p11 }
 0x115   : > { %v452_v22 = vsel %vm18426_vm1, %v446_v37, 0.0  ;;  %v454_v28 = vsel %vm18426_vm1, %v447_v36, 0.0  ;;  %7633 = vmatmul.mubr.msk.f32.gmra.mrb[12].mxu0 %vm372_vm0, %v8147_v3  ;;  %v451_v48 = vadd.f32 %v450_v17, %v449_v8  ;;  %v3898_v25 = vsub.f32 %v7266_v54, %v7270_v56 }
 0x116   : > { %v3899_v61 = vsub.f32 %v7267_v41, %v7271_v60  ;;  %v3900_v21 = vand.u32 2147483647, %v3896_v35  ;;  %v4108_v30 = vadd.f32 %v9022_v20, %v4106_v47  ;;  %7635 = vmatprep.mubr.msk.f32.mxu0 %vm373_vm5, %v8147_v3  ;;  %v3901_v52 = vand.u32 2147483647, %v3897_v63  ;;  %p8075_p3 = pnand %p8074_p0, %p8068_p2 }
 0x117   : > { %v3908_v10 = vmul.f32 0.5, %v3896_v35  ;;  %v3909_v24 = vmul.f32 0.5, %v3897_v63  ;;  %v453_v26 = vadd.f32 %v452_v22, %v451_v48  ;;  %v3902_v45 = vand.u32 2147483647, %v3898_v25 }
 0x118   : > { %v3903_v6 = vand.u32 2147483647, %v3899_v61  ;;  %vm9162_vm3 = vcmp.lt.f32.partialorder %v3900_v21, 1.0  ;;  %v4110_v49 = vadd.f32 %v9036_v51, %v4108_v30  ;;  %vm9167_vm10 = vcmp.lt.f32.partialorder %v3901_v52, 1.0 }
 0x119   : > { %v3910_v20 = vmul.f32 0.5, %v3898_v25  ;;  %v3911_v50 = vmul.f32 0.5, %v3899_v61  ;;  %7636 = vmatmul.mubr.msk.f32.gmra.mrb[14].mxu0 %vm374_vm13, %v8147_v3  ;;  %v455_v34 = vadd.f32 %v454_v28, %v453_v26  ;;  %vm9175_vm11 = vcmp.lt.f32.partialorder %v3902_v45, 1.0 }
 0x11a   : > { %vm9179_vm12 = vcmp.lt.f32.partialorder %v3903_v6, 1.0  ;;  %v3912_v51 = vmul.f32 %v3908_v10, %v3896_v35  ;;  %7943 = vlog2.f32 %v4110_v49  ;;  %v3913_v16 = vmul.f32 %v3909_v24, %v3897_v63 }
 0x11b   : > { %v3914_v57 = vmul.f32 %v3910_v20, %v3898_v25  ;;  %v3915_v54 = vmul.f32 %v3911_v50, %v3899_v61  ;;  %v456_v58 = vmul.f32 %v9078_v11, %v455_v34  ;;  %v7272_v5 = vadd.f32 -0.5, %v3900_v21 }
 0x11c   : > { %v7273_v41 = vadd.f32 -0.5, %v3901_v52  ;;  %v7274_v56 = vadd.f32 -0.5, %v3902_v45  ;;  %v7263_v60 = vsel %vm18394_vm14, 1.0, %v18380_v19  ;;  %v7275_v4 = vadd.f32 -0.5, %v3903_v6 }
 0x11d   : > { %v457_v37 = vsel %vm18426_vm1, %v456_v58, 0.0  ;;  %v3920_v36 = vsel %vm9162_vm3, %v3912_v51, %v7272_v5  ;;  %v18382_v11 = vmov 2   ;;  %v18386_v8 = vmov 0  }
 0x11e   : > { %v3921_v35 = vsel %vm9167_vm10, %v3913_v16, %v7273_v41  ;;  %v3922_v63 = vsel %vm9175_vm11, %v3914_v57, %v7274_v56  ;;  %7750 = vset.pattern.permute.xlu0 %v18382_v11  ;;  %7748 = vset.pattern.permute.xlu1 %v18386_v8  ;;  %v3923_v47 = vsel %vm9179_vm12, %v3915_v54, %v7275_v4  ;;  %v3924_v17 = vsel %vm18426_vm1, %v3920_v36, 0.0 }
 0x11f   : > { %458 = vadd.xlane.f32.xlu0 %v457_v37  ;;  %v3925_v22 = vsel %vm18426_vm1, %v3921_v35, 0.0  ;;  %v3927_v28 = vsel %vm18426_vm1, %v3922_v63, 0.0  ;;  %v4180_v25 = vsel %vm18426_vm1, %v7263_v60, 0.0  ;;  %v3929_v61 = vsel %vm18426_vm1, %v3923_v47, 0.0 }
 0x120   : > { %v3926_v48 = vadd.f32 %v3925_v22, %v3924_v17  ;;  %vm18399_vm3 = vcmp.ge.s32.totalorder %v8787_v39, 0  ;;  %v960_v27 = vsub.s32 0, %v8434_v1  ;;  %v1869_v49 = vsub.s32 1, %v8434_v1 }
 0x121   : > { %v2538_v38 = vsub.s32 2, %v8434_v1  ;;  %v3207_v20 = vsub.s32 3, %v8434_v1  ;;  %v18391_v54 = vmov 1   ;;  %v18384_v58 = vmov 3  }
 0x122   : > { %v3928_v21 = vadd.f32 %v3927_v28, %v3926_v48  ;;  %v9462_v39 = vadd.s32 256, %v8436_v2  ;;  %v18893_v32 = vmov 0.0  }
 0x123   : > { %4181 = vadd.xlane.f32.xlu0 %v4180_v25 }
 0x124   : > { %v3930_v30 = vadd.f32 %v3929_v61, %v3928_v21  ;;  %v7944_v52 = vpop.eup %7943  ;;  %18858 = vst [vmem:[#allocation53_spill] sm:$0xff] %v9462_v39 }
 0x125   : > { %v4112_v10 = vmul.f32 0.6931472, %v7944_v52 }
 0x126   : > { %v3931_v24 = vmul.f32 %v7263_v60, %v3930_v30 }
 0x127   : > { %v4113_v26 = vadd.f32 %v4112_v10, %v8816_v13 }
 0x128   : > { %v3932_v45 = vsel %vm18426_vm1, %v3931_v24, 0.0 }
 0x129   : > { %3933 = vadd.xlane.f32.xlu1 %v3932_v45  ;;  %v9207_v6 = vsub.f32 %v4113_v26, %v9087_v62 }
 0x12b   : > { %18835 = vst [vmem:[#allocation36_spill] sm:$0xff] %v9207_v6  ;;  %v4178_v13 = vsel %vm18394_vm14, 0.0, %v9207_v6 }
 0x12c   : > { %v4179_v50 = vsel %vm18399_vm3, %v4178_v13, -1e+30 }
 0x12d   : > { %7638 = vmatprep.subr.mxu1 %v4179_v50  ;;  %v9220_v62 = vrot.slane %v4179_v50, %v960_v27  ;;  %v9224_v34 = vrot.slane %v4179_v50, %v1869_v49  ;;  %v9228_v15 = vrot.slane %v4179_v50, %v2538_v38  ;;  %v9232_v44 = vrot.slane %v4179_v50, %v3207_v20 }
 0x12e   : > { %7639 = vmatpush3.xpose.msra.mxu1 %v4179_v50 }
 0x12f   : > { %18836 = vst [vmem:[#allocation37_spill] sm:$0xff] %v9232_v44 }
 0x131   : > { %7641 = vmatmul.mubr.msk.f32.vlgmr.msra.gmra.mrb[0].mxu1 %vm360_vm8, %v8147_v3  ;;  %vm18837_vm8 = vcmp.eq.s32.totalorder %v9002_v12, %v8436_v2 }
 0x132   : > { %7643 = vmatprep.mubr.msk.f32.mxu1 %vm361_vm2, %v8147_v3  ;;  %vm18838_vm2 = vcmp.eq.s32.totalorder %v9010_v43, %v8436_v2 }
 0x135   : > { %7644 = vmatmul.mubr.msk.f32.gmra.mrb[2].mxu1 %vm362_vm4, %v8147_v3  ;;  %vm18839_vm4 = vcmp.eq.s32.totalorder %v9016_v14, %v8436_v2 }
 0x136   : > { %7646 = vmatprep.mubr.msk.f32.mxu1 %vm363_vm6, %v8147_v3  ;;  %vm18840_vm6 = vcmp.eq.s32.totalorder %v9019_v23, %v8436_v2  ;;  %v18868_v23 = vmov 1  }
 0x139   : > { %7647 = vmatmul.mubr.msk.f32.gmra.mrb[4].mxu1 %vm364_vm7, %v8147_v3  ;;  %vm18841_vm7 = vcmp.eq.s32.totalorder %v9031_v53, %v8436_v2 }
 0x13a   : > { %7649 = vmatprep.mubr.msk.f32.mxu1 %vm365_vm9, %v8147_v3 }
 0x13d   : > { %7650 = vmatmul.mubr.msk.f32.gmra.mrb[6].mxu1 %vm18837_vm8, %v8147_v3 }
 0x13e   : > { %7652 = vmatprep.mubr.msk.f32.mxu1 %vm18838_vm2, %v8147_v3 }
 0x141   : > { %7653 = vmatmul.mubr.msk.f32.gmra.mrb[8].mxu1 %vm18839_vm4, %v8147_v3 }
 0x142   : > { %7655 = vmatprep.mubr.msk.f32.mxu1 %vm18840_vm6, %v8147_v3 }
 0x145   : > { %7656 = vmatmul.mubr.msk.f32.gmra.mrb[10].mxu1 %vm18841_vm7, %v8147_v3 }
 0x146   : > { %7658 = vmatprep.mubr.msk.f32.mxu1 %vm371_vm15, %v8147_v3 }
 0x149   : > { %7659 = vmatmul.mubr.msk.f32.gmra.mrb[12].mxu1 %vm372_vm0, %v8147_v3 }
 0x14a   : > { %7661 = vmatprep.mubr.msk.f32.mxu1 %vm373_vm5, %v8147_v3 }
 0x14d   : > { %7662 = vmatmul.mubr.msk.f32.gmra.mrb[14].mxu1 %vm374_vm13, %v8147_v3 }
 0x1d0   : > { %v7616_v51 = vpop.f32.mrb[0].mxu0 }
 0x1d1   : > { %885 = vperm.xlu1 %7748, %v7616_v51   ;;  %v9294_v16 = vpop.f32.mrb[1].mxu0  ;;  %1395 = vperm.xlu0 %7750, %v7616_v51  }
 0x1d4   : > { %v9296_v57 = vpop.f32.mrb[2].mxu0 }
 0x1d5   : > { %7749 = vset.pattern.permute.xlu1 %v18391_v54  ;;  %7751 = vset.pattern.permute.xlu0 %v18384_v58  ;;  %v9300_v5 = vpop.f32.mrb[3].mxu0 }
 0x1d6   : > { %1149 = vperm.xlu1 %7749, %v7616_v51   ;;  %1641 = vperm.xlu0 %7751, %v7616_v51  }
 0x1d8   : > { %v9302_v41 = vpop.f32.mrb[4].mxu0 }
 0x1d9   : > { %v9304_v3 = vpop.f32.mrb[5].mxu0 }
 0x1da   : > { %7752 = vset.pattern.permute.xlu1 %v18386_v8  ;;  %7756 = vset.pattern.permute.xlu0 %v18391_v54 }
 0x1db   : > { %1145 = vperm.xlu0 %7756, %v9294_v16  }
 0x1dc   : > { %v9309_v56 = vpop.f32.mrb[6].mxu0 }
 0x1dd   : > { %v9311_v60 = vpop.f32.mrb[7].mxu0 }
 0x1df   : > { %1157 = vperm.xlu0 %7756, %v9296_v57  }
 0x1e0   : > { %v9314_v4 = vpop.f32.mrb[8].mxu0 }
 0x1e1   : > { %v9316_v37 = vpop.f32.mrb[9].mxu0 }
 0x1e3   : > { %7764 = vset.pattern.permute.xlu0 %v18386_v8 }
 0x1e4   : > { %890 = vperm.xlu0 %7764, %v9300_v5   ;;  %v9320_v36 = vpop.f32.mrb[10].mxu0 }
 0x1e5   : > { %v9322_v35 = vpop.f32.mrb[11].mxu0 }
 0x1e8   : > { %7771 = vset.pattern.permute.xlu0 %v18391_v54  ;;  %v9325_v63 = vpop.f32.mrb[12].mxu0 }
 0x1e9   : > { %1165 = vperm.xlu0 %7771, %v9302_v41   ;;  %v9328_v47 = vpop.f32.mrb[13].mxu0 }
 0x1ec   : > { %v9330_v17 = vpop.f32.mrb[14].mxu0 }
 0x1ed   : > { %7776 = vset.pattern.permute.xlu0 %v18382_v11  ;;  %v9333_v22 = vpop.f32.mrb[15].mxu0 }
 0x1ee   : > { %18842 = vst [vmem:[#allocation38_spill] sm:$0xff] %v9333_v22  ;;  %1407 = vperm.xlu0 %7776, %v9304_v3  }
 0x1f2   : > { %7777 = vset.pattern.permute.xlu0 %v18384_v58 }
 0x1f3   : > { %1653 = vperm.xlu0 %7777, %v9304_v3  }
 0x1f7   : > { %7779 = vset.pattern.permute.xlu0 %v18391_v54 }
 0x1f8   : > { %1173 = vperm.xlu0 %7779, %v9309_v56  }
 0x1fc   : > { %7784 = vset.pattern.permute.xlu0 %v18382_v11 }
 0x1fd   : > { %1415 = vperm.xlu0 %7784, %v9311_v60  }
 0x201   : > { %7785 = vset.pattern.permute.xlu0 %v18384_v58 }
 0x202   : > { %1661 = vperm.xlu0 %7785, %v9311_v60  }
 0x204   : > { %v9344_v28 = vpop.f32.mrb[0].mxu1 }
 0x205   : > { %v9346_v48 = vpop.f32.mrb[1].mxu1  ;;  %4345 = vperm.xlu1 %7752, %v9344_v28  }
 0x206   : > { %18843 = vst [vmem:[#allocation39_spill] sm:$0xff] %v9346_v48  ;;  %7787 = vset.pattern.permute.xlu0 %v18391_v54 }
 0x207   : > { %1181 = vperm.xlu0 %7787, %v9314_v4  }
 0x208   : > { %v9351_v25 = vpop.f32.mrb[2].mxu1 }
 0x209   : > { %18844 = vst [vmem:[#allocation40_spill] sm:$0xff] %v9351_v25  ;;  %7753 = vset.pattern.permute.xlu1 %v18391_v54  ;;  %v9354_v61 = vpop.f32.mrb[3].mxu1 }
 0x20a   : > { %18845 = vst [vmem:[#allocation41_spill] sm:$0xff] %v9354_v61  ;;  %4561 = vperm.xlu1 %7753, %v9344_v28  }
 0x20b   : > { %7788 = vset.pattern.permute.xlu0 %v18382_v11 }
 0x20c   : > { %1427 = vperm.xlu0 %7788, %v9314_v4   ;;  %v9359_v21 = vpop.f32.mrb[4].mxu1 }
 0x20d   : > { %18846 = vst [vmem:[#allocation42_spill] sm:$0xff] %v9359_v21  ;;  %v9361_v30 = vpop.f32.mrb[5].mxu1 }
 0x20e   : > { %18847 = vst [vmem:[#allocation43_spill] sm:$0xff] %v9361_v30  ;;  %7754 = vset.pattern.permute.xlu1 %v18382_v11 }
 0x20f   : > { %4759 = vperm.xlu1 %7754, %v9344_v28  }
 0x210   : > { %7789 = vset.pattern.permute.xlu0 %v18384_v58  ;;  %v9366_v52 = vpop.f32.mrb[6].mxu1 }
 0x211   : > { %18848 = vst [vmem:[#allocation44_spill] sm:$0xff] %v9366_v52  ;;  %1673 = vperm.xlu0 %7789, %v9314_v4   ;;  %v9369_v10 = vpop.f32.mrb[7].mxu1 }
 0x212   : > { %18849 = vst [vmem:[#allocation45_spill] sm:$0xff] %v9369_v10 }
 0x213   : > { %7755 = vset.pattern.permute.xlu1 %v18386_v8 }
 0x214   : > { %880 = vperm.xlu1 %7755, %v9294_v16   ;;  %v9373_v24 = vpop.f32.mrb[8].mxu1 }
 0x215   : > { %18850 = vst [vmem:[#allocation46_spill] sm:$0xff] %v9373_v24  ;;  %7791 = vset.pattern.permute.xlu0 %v18382_v11  ;;  %v9376_v26 = vpop.f32.mrb[9].mxu1 }
 0x216   : > { %18851 = vst [vmem:[#allocation47_spill] sm:$0xff] %v9376_v26  ;;  %1423 = vperm.xlu0 %7791, %v9316_v37  }
 0x218   : > { %7757 = vset.pattern.permute.xlu1 %v18382_v11  ;;  %v9380_v45 = vpop.f32.mrb[10].mxu1 }
 0x219   : > { %18852 = vst [vmem:[#allocation48_spill] sm:$0xff] %v9380_v45  ;;  %1391 = vperm.xlu1 %7757, %v9294_v16   ;;  %v9383_v13 = vpop.f32.mrb[11].mxu1 }
 0x21a   : > { %18853 = vst [vmem:[#allocation49_spill] sm:$0xff] %v9383_v13  ;;  %7794 = vset.pattern.permute.xlu0 %v18391_v54 }
 0x21b   : > { %1189 = vperm.xlu0 %7794, %v9320_v36  }
 0x21c   : > { %v9387_v50 = vpop.f32.mrb[12].mxu1 }
 0x21d   : > { %18854 = vst [vmem:[#allocation50_spill] sm:$0xff] %v9387_v50  ;;  %7758 = vset.pattern.permute.xlu1 %v18384_v58  ;;  %v9390_v51 = vpop.f32.mrb[13].mxu1 }
 0x21e   : > { %18855 = vst [vmem:[#allocation51_spill] sm:$0xff] %v9390_v51  ;;  %1637 = vperm.xlu1 %7758, %v9294_v16   ;;  %v9417_v16 = vpop.xlane.xlu0 %705 }
 0x21f   : > { %1197 = vperm.xlu0 %7794, %v9325_v63  }
 0x222   : > { %7759 = vset.pattern.permute.xlu1 %v18391_v54 }
 0x223   : > { %4557 = vperm.xlu1 %7759, %v9346_v48   ;;  %7806 = vset.pattern.permute.xlu0 %v18382_v11 }
 0x224   : > { %1439 = vperm.xlu0 %7806, %v9328_v47  }
 0x227   : > { %7760 = vset.pattern.permute.xlu1 %v18382_v11 }
 0x228   : > { %4755 = vperm.xlu1 %7760, %v9346_v48   ;;  %7807 = vset.pattern.permute.xlu0 %v18384_v58 }
 0x229   : > { %1685 = vperm.xlu0 %7807, %v9328_v47  }
 0x22c   : > { %7761 = vset.pattern.permute.xlu1 %v18386_v8 }
 0x22d   : > { %895 = vperm.xlu1 %7761, %v9296_v57   ;;  %7809 = vset.pattern.permute.xlu0 %v18391_v54 }
 0x22e   : > { %1205 = vperm.xlu0 %7809, %v9330_v17  }
 0x231   : > { %7762 = vset.pattern.permute.xlu1 %v18382_v11 }
 0x232   : > { %1403 = vperm.xlu1 %7762, %v9296_v57   ;;  %7810 = vset.pattern.permute.xlu0 %v18382_v11 }
 0x233   : > { %1451 = vperm.xlu0 %7810, %v9330_v17  }
 0x236   : > { %7763 = vset.pattern.permute.xlu1 %v18384_v58 }
 0x237   : > { %1649 = vperm.xlu1 %7763, %v9296_v57   ;;  %4775 = vperm.xlu0 %7810, %v9359_v21   ;;  %v9423_v57 = vpop.xlane.xlu0 %458 }
 0x23b   : > { %7765 = vset.pattern.permute.xlu1 %v18391_v54  ;;  %7825 = vset.pattern.permute.xlu0 %v18386_v8  ;;  %v9429_v19 = vpop.xlane.xlu0 %4181 }
 0x23c   : > { %1153 = vperm.xlu1 %7765, %v9300_v5   ;;  %950 = vperm.xlu0 %7825, %v9333_v22   ;;  %18856 = vst [vmem:[#allocation52_spill] sm:$0xff] %v9429_v19 }
 0x240   : > { %7766 = vset.pattern.permute.xlu1 %v18382_v11  ;;  %4340 = vperm.xlu0 %7825, %v9346_v48   ;;  %v9436_v11 = vrot.slane %v8919_v29, %v960_v27  ;;  %v18857_v27 = vmov 3   ;;  %v9591_v48 = vadd.s32 128, %v8436_v2 }
 0x241   : > { %1399 = vperm.xlu1 %7766, %v9300_v5  }
 0x242   : > { %18876 = vst [vmem:[#allocation62_spill] sm:$0xff] %v9591_v48 }
 0x244   : > { %4370 = vperm.xlu0 %7825, %v9369_v10  }
 0x245   : > { %7767 = vset.pattern.permute.xlu1 %v18384_v58  ;;  %v9441_v58 = vrot.slane %v8919_v29, %v1869_v49  ;;  %v9459_v49 = vadd.s32 256, %v8823_v7 }
 0x246   : > { %1645 = vperm.xlu1 %7767, %v9300_v5   ;;  %v9446_v5 = vrot.slane %v8919_v29, %v2538_v38 }
 0x247   : > { %vm2905_vm11 = vcmp.lt.s32.totalorder %v9459_v49, %v9462_v39 }
 0x248   : > { %4385 = vperm.xlu0 %7825, %v9373_v24  }
 0x24a   : > { %7768 = vset.pattern.permute.xlu1 %v18386_v8  ;;  %v9452_v8 = vrot.slane %v8919_v29, %v3207_v20  ;;  %v18859_v29 = vmov 0   ;;  %v9485_v20 = vadd.s32 384, %v8823_v7 }
 0x24b   : > { %4350 = vperm.xlu1 %7768, %v9354_v61  }
 0x24c   : > { %4400 = vperm.xlu0 %7825, %v9390_v51   ;;  %18860 = vst [vmem:[#allocation54_spill] sm:$0xff] %v9485_v20  ;;  %v18997_v51 = vld [vmem:[#allocation20_spill] sm:$0xff] }
 0x24f   : > { %7769 = vset.pattern.permute.xlu1 %v18391_v54  ;;  %v18861_v54 = vmov 2  }
 0x250   : > { %4565 = vperm.xlu1 %7769, %v9354_v61   ;;  %7840 = vset.pattern.permute.xlu0 %v18857_v27  ;;  %v9456_v6 = vpop.permute.xlu0 %1395 }
 0x251   : > { %4957 = vperm.xlu0 %7840, %v9344_v28   ;;  %vm1455_vm5 = vcmp.gt.f32.partialorder %v9456_v6, %v9436_v11  ;;  %vm2204_vm9 = vcmp.gt.f32.partialorder %v9456_v6, %v9441_v58  ;;  %vm2873_vm13 = vcmp.gt.f32.partialorder %v9456_v6, %v9446_v5  ;;  %vm2889_vm15 = vcmp.eq.f32.partialorder %v9456_v6, %v9446_v5 }
 0x252   : > { %vm3542_vm0 = vcmp.gt.f32.partialorder %v9456_v6, %v9452_v8  ;;  %vm3558_vm10 = vcmp.eq.f32.partialorder %v9456_v6, %v9452_v8  ;;  %v9488_v28 = vadd.s32 384, %v8436_v2  ;;  %vm2921_vm2 = vmand %vm2889_vm15, %vm2905_vm11 }
 0x253   : > { %vm9505_vm7 = vmor %vm2873_vm13, %vm2921_vm2 }
 0x254   : > { %7770 = vset.pattern.permute.xlu1 %v18859_v29  ;;  %vm9521_vm15 = vmor %vm3542_vm0, %vm3558_vm10  ;;  %vm18427_vm13 = vcmp.lt.s32.totalorder %v9485_v20, %v9488_v28 }
 0x255   : > { %905 = vperm.xlu1 %7770, %v9302_v41   ;;  %4969 = vperm.xlu0 %7840, %v9361_v30   ;;  %v9482_v38 = vpop.permute.xlu0 %1641 }
 0x256   : > { %vm1701_vm12 = vcmp.gt.f32.partialorder %v9482_v38, %v9436_v11  ;;  %vm2370_vm8 = vcmp.gt.f32.partialorder %v9482_v38, %v9441_v58  ;;  %vm3708_vm6 = vcmp.gt.f32.partialorder %v9482_v38, %v9452_v8  ;;  %vm3724_vm14 = vcmp.eq.f32.partialorder %v9482_v38, %v9452_v8 }
 0x257   : > { %vm3756_vm2 = vmand %vm3724_vm14, %vm18427_vm13  ;;  %vm18429_vm14 = vcmp.lt.s32.totalorder %v8823_v7, %v8436_v2 }
 0x258   : > { %vm9535_vm3 = vmor %vm3708_vm6, %vm3756_vm2 }
 0x259   : > { %7772 = vset.pattern.permute.xlu1 %v18861_v54  ;;  %4981 = vperm.xlu0 %7840, %v9366_v52   ;;  %v9561_v52 = vpop.xlane.xlu1 %3933 }
 0x25a   : > { %1411 = vperm.xlu1 %7772, %v9302_v41   ;;  %v9513_v18 = vpop.permute.xlu0 %1145  ;;  %18872 = vst [vmem:[#allocation58_spill] sm:$0xff] %v9561_v52 }
 0x25d   : > { %4993 = vperm.xlu0 %7840, %v9383_v13   ;;  %v9567_v10 = vpop.permute.xlu1 %885 }
 0x25e   : > { %7773 = vset.pattern.permute.xlu1 %v18857_v27  ;;  %v9532_v50 = vpop.permute.xlu0 %1157 }
 0x25f   : > { %1657 = vperm.xlu1 %7773, %v9302_v41  }
 0x261   : > { %7845 = vset.pattern.permute.xlu0 %v18868_v23 }
 0x262   : > { %4569 = vperm.xlu0 %7845, %v9351_v25   ;;  %v7039_v25 = vsel %vm1455_vm5, 1.0, %v18893_v32 }
 0x263   : > { %7774 = vset.pattern.permute.xlu1 %v18859_v29  ;;  %v9543_v13 = vpop.permute.xlu0 %890 }
 0x264   : > { %900 = vperm.xlu1 %7774, %v9304_v3   ;;  %18869 = vst [vmem:[#allocation55_spill] sm:$0xff] %v9543_v13 }
 0x266   : > { %4573 = vperm.xlu0 %7845, %v9361_v30   ;;  %v18878_v30 = vmov 0 }
 0x268   : > { %7775 = vset.pattern.permute.xlu1 %v18868_v23  ;;  %v9547_v24 = vpop.permute.xlu0 %1165 }
 0x269   : > { %18870 = vst [vmem:[#allocation56_spill] sm:$0xff] %v9547_v24  ;;  %1161 = vperm.xlu1 %7775, %v9304_v3  }
 0x26a   : > { %4577 = vperm.xlu0 %7845, %v9359_v21   ;;  %v9573_v21 = vpop.permute.xlu1 %1149 }
 0x26d   : > { %7778 = vset.pattern.permute.xlu1 %v18859_v29  ;;  %v9552_v41 = vpop.permute.xlu0 %1407 }
 0x26e   : > { %18871 = vst [vmem:[#allocation57_spill] sm:$0xff] %v9552_v41  ;;  %915 = vperm.xlu1 %7778, %v9309_v56   ;;  %4589 = vperm.xlu0 %7845, %v9376_v26  }
 0x272   : > { %7780 = vset.pattern.permute.xlu1 %v18861_v54  ;;  %v9557_v31 = vpop.permute.xlu0 %1653  ;;  %4601 = vperm.xlu0 %7845, %v9380_v45  }
 0x273   : > { %1419 = vperm.xlu1 %7780, %v9309_v56  }
 0x277   : > { %7781 = vset.pattern.permute.xlu1 %v18857_v27  ;;  %v9564_v3 = vpop.permute.xlu0 %1173 }
 0x278   : > { %18873 = vst [vmem:[#allocation59_spill] sm:$0xff] %v9564_v3  ;;  %1665 = vperm.xlu1 %7781, %v9309_v56   ;;  %v9588_v56 = vadd.s32 128, %v8823_v7 }
 0x27a   : > { %vm18431_vm1 = vcmp.lt.s32.totalorder %v9588_v56, %v9591_v48 }
 0x27c   : > { %7782 = vset.pattern.permute.xlu1 %v18859_v29  ;;  %v9570_v26 = vpop.permute.xlu0 %1415 }
 0x27d   : > { %910 = vperm.xlu1 %7782, %v9311_v60  }
 0x281   : > { %7783 = vset.pattern.permute.xlu1 %v18868_v23  ;;  %v9576_v45 = vpop.permute.xlu0 %1661 }
 0x282   : > { %18874 = vst [vmem:[#allocation60_spill] sm:$0xff] %v9576_v45  ;;  %1169 = vperm.xlu1 %7783, %v9311_v60  }
 0x284   : > { %v9579_v52 = vpop.permute.xlu1 %4345 }
 0x285   : > { %18875 = vst [vmem:[#allocation61_spill] sm:$0xff] %v9579_v52  ;;  %vm4423_vm0 = vcmp.gt.f32.partialorder %v9579_v52, %v9220_v62  ;;  %vm4439_vm10 = vcmp.eq.f32.partialorder %v9579_v52, %v9220_v62 }
 0x286   : > { %vm4455_vm6 = vmand %vm4439_vm10, %vm18429_vm14  ;;  %7786 = vset.pattern.permute.xlu1 %v18859_v29  ;;  %v9597_v60 = vpop.permute.xlu0 %1181 }
 0x287   : > { %18877 = vst [vmem:[#allocation63_spill] sm:$0xff] %v9597_v60  ;;  %vm9599_vm2 = vmor %vm4423_vm0, %vm4455_vm6  ;;  %925 = vperm.xlu1 %7786, %v9314_v4   ;;  %vm18433_vm6 = vcmp.ne.s32.totalorder %v9588_v56, %v9591_v48  ;;  %v18883_v4 = vmov 0 }
 0x288   : > { %v18879_v30 = vsel %vm9599_vm2, 4294967295, %v18878_v30 }
 0x289   : > { %18880 = vst [vmem:[#allocation64_spill] sm:$0xff] %v18879_v30  ;;  %v9604_v52 = vpop.permute.xlu1 %4561 }
 0x28a   : > { %18881 = vst [vmem:[#allocation65_spill] sm:$0xff] %v9604_v52  ;;  %vm5289_vm13 = vcmp.gt.f32.partialorder %v9604_v52, %v9224_v34  ;;  %vm5305_vm10 = vcmp.eq.f32.partialorder %v9604_v52, %v9224_v34 }
 0x28b   : > { %vm5321_vm0 = vmand %vm5305_vm10, %vm18431_vm1  ;;  %920 = vperm.xlu1 %7786, %v9316_v37   ;;  %v9616_v30 = vpop.permute.xlu0 %1427 }
 0x28c   : > { %18882 = vst [vmem:[#allocation66_spill] sm:$0xff] %v9616_v30  ;;  %vm5337_vm14 = vmor %vm5289_vm13, %vm5321_vm0 }
 0x28d   : > { %vm9623_vm4 = vmand %vm18433_vm6, %vm5337_vm14  ;;  %vm2857_vm14 = vcmp.ne.s32.totalorder %v9459_v49, %v9462_v39  ;;  %v9690_v49 = vadd.s32 128, %v8434_v1 }
 0x28e   : > { %v18884_v4 = vsel %vm9623_vm4, 4294967295, %v18883_v4  ;;  %v9627_v60 = vpop.permute.xlu1 %4759  ;;  %vm2953_vm5 = vmand %vm2857_vm14, %vm9505_vm7 }
 0x28f   : > { %18885 = vst [vmem:[#allocation67_spill] sm:$0xff] %v18884_v4  ;;  %18886 = vst [vmem:[#allocation68_spill] sm:$0xff] %v9627_v60  ;;  %vm5963_vm10 = vcmp.gt.f32.partialorder %v9627_v60, %v9228_v15  ;;  %7790 = vset.pattern.permute.xlu1 %v18868_v23  ;;  %vm5979_vm1 = vcmp.eq.f32.partialorder %v9627_v60, %v9228_v15  ;;  %v18888_v4 = vmov 0 }
 0x290   : > { %1177 = vperm.xlu1 %7790, %v9316_v37   ;;  %v9635_v30 = vpop.permute.xlu0 %1673  ;;  %vm5995_vm13 = vmand %vm5979_vm1, %vm2905_vm11 }
 0x291   : > { %18887 = vst [vmem:[#allocation69_spill] sm:$0xff] %v9635_v30  ;;  %vm6011_vm0 = vmor %vm5963_vm10, %vm5995_vm13  ;;  %v9654_v30 = vadd.s32 256, %v8434_v1  ;;  %v7231_v1 = vsel %vm9521_vm15, 1.0, %v18893_v32 }
 0x292   : > { %vm9645_vm6 = vmand %vm2857_vm14, %vm6011_vm0 }
 0x293   : > { %v18889_v4 = vsel %vm9645_vm6, 4294967295, %v18888_v4  ;;  %v9649_v60 = vpop.permute.xlu1 %880  ;;  %vm2904_vm1 = vcmp.lt.s32.totalorder %v9654_v30, %v9462_v39  ;;  %vm2856_vm0 = vcmp.ne.s32.totalorder %v9654_v30, %v9462_v39  ;;  %v707_v30 = vrot.slane %v9417_v16, 4 }
 0x294   : > { %18890 = vst [vmem:[#allocation70_spill] sm:$0xff] %v18889_v4  ;;  %18891 = vst [vmem:[#allocation71_spill] sm:$0xff] %v9649_v60  ;;  %7792 = vset.pattern.permute.xlu1 %v18857_v27 }
 0x295   : > { %1669 = vperm.xlu1 %7792, %v9316_v37   ;;  %v9656_v52 = vpop.permute.xlu0 %1423  ;;  %v7103_v37 = vsel %vm2204_vm9, 1.0, %v18893_v32 }
 0x296   : > { %18892 = vst [vmem:[#allocation72_spill] sm:$0xff] %v9656_v52 }
 0x298   : > { %v1392_v61 = vpop.permute.xlu1 %1391 }
 0x299   : > { %vm1454_vm11 = vcmp.gt.f32.partialorder %v1392_v61, %v9436_v11  ;;  %vm2203_vm10 = vcmp.gt.f32.partialorder %v1392_v61, %v9441_v58  ;;  %7793 = vset.pattern.permute.xlu1 %v18859_v29  ;;  %vm2872_vm13 = vcmp.gt.f32.partialorder %v1392_v61, %v9446_v5  ;;  %vm2888_vm9 = vcmp.eq.f32.partialorder %v1392_v61, %v9446_v5 }
 0x29a   : > { %v7038_v4 = vsel %vm1454_vm11, 1.0, %v18893_v32  ;;  %v7102_v60 = vsel %vm2203_vm10, 1.0, %v18893_v32  ;;  %935 = vperm.xlu1 %7793, %v9320_v36   ;;  %v9680_v52 = vpop.permute.xlu0 %1189  ;;  %vm2920_vm7 = vmand %vm2888_vm9, %vm2904_vm1  ;;  %vm3541_vm14 = vcmp.gt.f32.partialorder %v1392_v61, %v9452_v8  ;;  %vm3557_vm11 = vcmp.eq.f32.partialorder %v1392_v61, %v9452_v8 }
 0x29b   : > { %18894 = vst [vmem:[#allocation73_spill] sm:$0xff] %v9680_v52  ;;  %v9684_v6 = vadd.f32 %v7039_v25, %v7038_v4  ;;  %v9686_v19 = vadd.f32 %v7103_v37, %v7102_v60  ;;  %v7167_v52 = vsel %vm2953_vm5, 1.0, %v18893_v32  ;;  %v7055_v25 = vsel %vm1701_vm12, 1.0, %v18893_v32  ;;  %vm2936_vm9 = vmor %vm2872_vm13, %vm2920_vm7 }
 0x29c   : > { %v7119_v60 = vsel %vm2370_vm8, 1.0, %v18893_v32  ;;  %vm18895_vm10 = vcmp.gt.f32.partialorder %v9482_v38, %v9446_v5  ;;  %vm2952_vm12 = vmand %vm2856_vm0, %vm2936_vm9  ;;  %vm18473_vm13 = vcmp.lt.s32.totalorder %v9690_v49, %v9591_v48  ;;  %vm18472_vm9 = vcmp.ne.s32.totalorder %v9690_v49, %v9591_v48 }
 0x29d   : > { %v7183_v4 = vsel %vm18895_vm10, 1.0, %v18893_v32  ;;  %v9712_v37 = vpop.permute.xlu1 %1637  ;;  %v7166_v46 = vsel %vm2952_vm12, 1.0, %v18893_v32  ;;  %vm3605_vm15 = vmor %vm3541_vm14, %vm3557_vm11 }
 0x29e   : > { %18896 = vst [vmem:[#allocation74_spill] sm:$0xff] %v9712_v37  ;;  %vm1700_vm8 = vcmp.gt.f32.partialorder %v9712_v37, %v9436_v11  ;;  %vm2369_vm5 = vcmp.gt.f32.partialorder %v9712_v37, %v9441_v58  ;;  %vm3038_vm10 = vcmp.gt.f32.partialorder %v9712_v37, %v9446_v5  ;;  %7795 = vset.pattern.permute.xlu1 %v18861_v54  ;;  %v9727_v38 = vpop.permute.xlu0 %1197  ;;  %v7230_v13 = vsel %vm3605_vm15, 1.0, %v18893_v32 }
 0x29f   : > { %18897 = vst [vmem:[#allocation75_spill] sm:$0xff] %v9727_v38  ;;  %v7054_v3 = vsel %vm1700_vm8, 1.0, %v18893_v32  ;;  %v7118_v45 = vsel %vm2369_vm5, 1.0, %v18893_v32  ;;  %v7182_v24 = vsel %vm3038_vm10, 1.0, %v18893_v32  ;;  %1435 = vperm.xlu1 %7795, %v9320_v36   ;;  %v9738_v37 = vadd.f32 %v7167_v52, %v7166_v46 }
 0x2a0   : > { %v9741_v38 = vadd.f32 %v7055_v25, %v7054_v3  ;;  %v9743_v7 = vadd.f32 %v7119_v60, %v7118_v45  ;;  %v9745_v22 = vadd.f32 %v7231_v1, %v7230_v13  ;;  %v9747_v61 = vadd.f32 %v7183_v4, %v7182_v24 }
 0x2a1   : > { %18898 = vst [vmem:[#allocation76_spill] sm:$0xff] %v9738_v37  ;;  %v18901_v1 = vmov 0  ;;  %v460_v4 = vrot.slane %v9423_v57, 4  ;;  %v9812_v37 = vadd.f32 %v707_v30, %v9417_v16  ;;  %v9838_v30 = vadd.s32 128, %v8978_v42 }
 0x2a2   : > { %v9749_v2 = vpop.permute.xlu1 %4557 }
 0x2a3   : > { %18899 = vst [vmem:[#allocation77_spill] sm:$0xff] %v9749_v2  ;;  %vm5288_vm7 = vcmp.gt.f32.partialorder %v9749_v2, %v9224_v34  ;;  %vm5304_vm14 = vcmp.eq.f32.partialorder %v9749_v2, %v9224_v34  ;;  %7796 = vset.pattern.permute.xlu1 %v18857_v27  ;;  %v9758_v52 = vpop.permute.xlu0 %1439  ;;  %18917 = vst [vmem:[#allocation91_spill] sm:$0xff] %v9838_v30 }
 0x2a4   : > { %18900 = vst [vmem:[#allocation78_spill] sm:$0xff] %v9758_v52  ;;  %vm5320_vm11 = vmand %vm5304_vm14, %vm18473_vm13  ;;  %1681 = vperm.xlu1 %7796, %v9320_v36   ;;  %v18906_v36 = vmov 0  ;;  %v9848_v52 = vadd.s32 384, %v8968_v33 }
 0x2a5   : > { %vm5336_vm12 = vmor %vm5288_vm7, %vm5320_vm11  ;;  %vm3561_vm11 = vcmp.eq.f32.partialorder %v9552_v41, %v9452_v8 }
 0x2a6   : > { %vm9769_vm8 = vmand %vm18472_vm9, %vm5336_vm12  ;;  %18919 = vst [vmem:[#allocation93_spill] sm:$0xff] %v9848_v52 }
 0x2a7   : > { %v18902_v1 = vsel %vm9769_vm8, 4294967295, %v18901_v1  ;;  %v9773_v24 = vpop.permute.xlu1 %4755 }
 0x2a8   : > { %18903 = vst [vmem:[#allocation79_spill] sm:$0xff] %v18902_v1  ;;  %18904 = vst [vmem:[#allocation80_spill] sm:$0xff] %v9773_v24  ;;  %vm5962_vm5 = vcmp.gt.f32.partialorder %v9773_v24, %v9228_v15  ;;  %7797 = vset.pattern.permute.xlu1 %v18859_v29  ;;  %v9778_v45 = vpop.permute.xlu0 %1685  ;;  %vm5978_vm10 = vcmp.eq.f32.partialorder %v9773_v24, %v9228_v15 }
 0x2a9   : > { %18905 = vst [vmem:[#allocation81_spill] sm:$0xff] %v9778_v45  ;;  %930 = vperm.xlu1 %7797, %v9322_v35   ;;  %vm5994_vm15 = vmand %vm5978_vm10, %vm2904_vm1  ;;  %vm1458_vm1 = vcmp.gt.f32.partialorder %v9552_v41, %v9436_v11 }
 0x2aa   : > { %vm6010_vm7 = vmor %vm5962_vm5, %vm5994_vm15  ;;  %vm2207_vm5 = vcmp.gt.f32.partialorder %v9552_v41, %v9441_v58  ;;  %v9845_v45 = vsel %vm1458_vm1, 1.0, %v18893_v32 }
 0x2ab   : > { %vm9789_vm14 = vmand %vm2856_vm0, %vm6010_vm7  ;;  %v9854_v16 = vsel %vm2207_vm5, 1.0, %v18893_v32 }
 0x2ac   : > { %v18907_v36 = vsel %vm9789_vm14, 4294967295, %v18906_v36  ;;  %v9793_v13 = vpop.permute.xlu1 %895  ;;  %vm18972_vm14 = vcmp.gt.f32.partialorder %v9573_v21, %v9441_v58 }
 0x2ad   : > { %18908 = vst [vmem:[#allocation82_spill] sm:$0xff] %v18907_v36  ;;  %18909 = vst [vmem:[#allocation83_spill] sm:$0xff] %v9793_v13  ;;  %7798 = vset.pattern.permute.xlu1 %v18868_v23  ;;  %v9797_v3 = vpop.permute.xlu0 %1205  ;;  %v9815_v36 = vadd.f32 %v460_v4, %v9423_v57  ;;  %v9835_v57 = vadd.s32 128, %v8960_v0  ;;  %v9842_v4 = vadd.s32 256, %v8968_v33 }
 0x2ae   : > { %1185 = vperm.xlu1 %7798, %v9322_v35   ;;  %18910 = vst [vmem:[#allocation84_spill] sm:$0xff] %v9797_v3 }
 0x2af   : > { %18916 = vst [vmem:[#allocation90_spill] sm:$0xff] %v9835_v57  ;;  %18918 = vst [vmem:[#allocation92_spill] sm:$0xff] %v9842_v4 }
 0x2b1   : > { %v9799_v25 = vpop.permute.xlu1 %1403 }
 0x2b2   : > { %18911 = vst [vmem:[#allocation85_spill] sm:$0xff] %v9799_v25  ;;  %7799 = vset.pattern.permute.xlu1 %v18861_v54  ;;  %v9803_v60 = vpop.permute.xlu0 %1451  ;;  %vm1457_vm0 = vcmp.gt.f32.partialorder %v9799_v25, %v9436_v11  ;;  %vm2206_vm5 = vcmp.gt.f32.partialorder %v9799_v25, %v9441_v58  ;;  %vm3544_vm15 = vcmp.gt.f32.partialorder %v9799_v25, %v9452_v8 }
 0x2b3   : > { %1431 = vperm.xlu1 %7799, %v9322_v35   ;;  %18912 = vst [vmem:[#allocation86_spill] sm:$0xff] %v9803_v60  ;;  %vm3560_vm7 = vcmp.eq.f32.partialorder %v9799_v25, %v9452_v8  ;;  %v7041_v13 = vsel %vm1457_vm0, 1.0, %v18893_v32  ;;  %v7105_v2 = vsel %vm2206_vm5, 1.0, %v18893_v32 }
 0x2b6   : > { %v9807_v46 = vpop.permute.xlu1 %1649  ;;  %v9817_v3 = vpop.permute.xlu0 %4775 }
 0x2b7   : > { %18913 = vst [vmem:[#allocation87_spill] sm:$0xff] %v9807_v46  ;;  %7800 = vset.pattern.permute.xlu1 %v18857_v27  ;;  %18914 = vst [vmem:[#allocation88_spill] sm:$0xff] %v9817_v3  ;;  %vm2372_vm13 = vcmp.gt.f32.partialorder %v9807_v46, %v9441_v58  ;;  %vm3041_vm5 = vcmp.gt.f32.partialorder %v9807_v46, %v9446_v5 }
 0x2b8   : > { %1677 = vperm.xlu1 %7800, %v9322_v35   ;;  %v9851_v35 = vadd.s32 128, %v9002_v12  ;;  %v7185_v3 = vsel %vm3041_vm5, 1.0, %v18893_v32  ;;  %vm1888_vm5 = vcmp.eq.f32.partialorder %v9567_v10, %v9441_v58 }
 0x2ba   : > { %18920 = vst [vmem:[#allocation94_spill] sm:$0xff] %v9851_v35 }
 0x2bb   : > { %v9821_v60 = vpop.permute.xlu1 %1153  ;;  %v9935_v25 = vpop.permute.xlu0 %950 }
 0x2bc   : > { %18915 = vst [vmem:[#allocation89_spill] sm:$0xff] %v9821_v60  ;;  %7801 = vset.pattern.permute.xlu1 %v18859_v29  ;;  %18926 = vst [vmem:[#allocation97_spill] sm:$0xff] %v9935_v25 }
 0x2bd   : > { %945 = vperm.xlu1 %7801, %v9325_v63  }
 0x2c0   : > { %v9870_v33 = vpop.permute.xlu1 %1399 }
 0x2c1   : > { %18921 = vst [vmem:[#allocation95_spill] sm:$0xff] %v9870_v33  ;;  %vm1456_vm12 = vcmp.gt.f32.partialorder %v9870_v33, %v9436_v11  ;;  %vm2205_vm10 = vcmp.gt.f32.partialorder %v9870_v33, %v9441_v58  ;;  %7802 = vset.pattern.permute.xlu1 %v18861_v54  ;;  %vm3543_vm0 = vcmp.gt.f32.partialorder %v9870_v33, %v9452_v8 }
 0x2c2   : > { %v7040_v12 = vsel %vm1456_vm12, 1.0, %v18893_v32  ;;  %v7104_v24 = vsel %vm2205_vm10, 1.0, %v18893_v32  ;;  %1443 = vperm.xlu1 %7802, %v9325_v63   ;;  %vm9900_vm12 = vmor %vm3544_vm15, %vm3560_vm7  ;;  %vm3559_vm1 = vcmp.eq.f32.partialorder %v9870_v33, %v9452_v8 }
 0x2c3   : > { %v1583_v60 = vadd.f32 %v7040_v12, %v9684_v6  ;;  %v2332_v1 = vadd.f32 %v7104_v24, %v9686_v19  ;;  %vm3607_vm15 = vmor %vm3543_vm0, %vm3559_vm1  ;;  %vm18925_vm1 = vcmp.gt.f32.partialorder %v9552_v41, %v9452_v8  ;;  %v7233_v33 = vsel %vm9900_vm12, 1.0, %v18893_v32 }
 0x2c4   : > { %v7232_v24 = vsel %vm3607_vm15, 1.0, %v18893_v32  ;;  %vm3609_vm0 = vmor %vm18925_vm1, %vm3561_vm11  ;;  %vm18929_vm11 = vcmp.gt.f32.partialorder %v9557_v31, %v9436_v11  ;;  %vm18931_vm12 = vcmp.gt.f32.partialorder %v9557_v31, %v9446_v5  ;;  %vm2541_vm15 = vcmp.gt.f32.partialorder %v9567_v10, %v9446_v5 }
 0x2c5   : > { %v1584_v12 = vadd.f32 %v7041_v13, %v1583_v60  ;;  %v2333_v6 = vadd.f32 %v7105_v2, %v2332_v1  ;;  %v9914_v19 = vpop.permute.xlu1 %1645  ;;  %v3670_v2 = vadd.f32 %v7232_v24, %v9745_v22  ;;  %v7058_v25 = vsel %vm18929_vm11, 1.0, %v18893_v32 }
 0x2c6   : > { %18924 = vst [vmem:[#allocation96_spill] sm:$0xff] %v9914_v19  ;;  %vm1702_vm7 = vcmp.gt.f32.partialorder %v9914_v19, %v9436_v11  ;;  %vm2371_vm9 = vcmp.gt.f32.partialorder %v9914_v19, %v9441_v58  ;;  %vm3040_vm10 = vcmp.gt.f32.partialorder %v9914_v19, %v9446_v5  ;;  %7803 = vset.pattern.permute.xlu1 %v18857_v27 }
 0x2c7   : > { %v7056_v1 = vsel %vm1702_vm7, 1.0, %v18893_v32  ;;  %v7120_v13 = vsel %vm2371_vm9, 1.0, %v18893_v32  ;;  %v7184_v60 = vsel %vm3040_vm10, 1.0, %v18893_v32  ;;  %1689 = vperm.xlu1 %7803, %v9325_v63   ;;  %vm18927_vm9 = vcmp.gt.f32.partialorder %v9807_v46, %v9436_v11 }
 0x2c8   : > { %v1829_v19 = vadd.f32 %v7056_v1, %v9741_v38  ;;  %v2498_v42 = vadd.f32 %v7120_v13, %v9743_v7  ;;  %v3167_v22 = vadd.f32 %v7184_v60, %v9747_v61  ;;  %v7057_v24 = vsel %vm18927_vm9, 1.0, %v18893_v32 }
 0x2c9   : > { %v7121_v63 = vsel %vm2372_vm13, 1.0, %v18893_v32  ;;  %v3671_v38 = vadd.f32 %v7233_v33, %v3670_v2  ;;  %v7234_v7 = vsel %vm3609_vm0, 1.0, %v18893_v32  ;;  %vm18930_vm13 = vcmp.gt.f32.partialorder %v9557_v31, %v9441_v58 }
 0x2ca   : > { %v1830_v1 = vadd.f32 %v7057_v24, %v1829_v19  ;;  %v2499_v61 = vadd.f32 %v7121_v63, %v2498_v42  ;;  %v3168_v13 = vadd.f32 %v7185_v3, %v3167_v22  ;;  %v9956_v60 = vpop.permute.xlu1 %4350  ;;  %v7122_v41 = vsel %vm18930_vm13, 1.0, %v18893_v32 }
 0x2cb   : > { %18928 = vst [vmem:[#allocation98_spill] sm:$0xff] %v9956_v60  ;;  %v7186_v33 = vsel %vm18931_vm12, 1.0, %v18893_v32  ;;  %v9971_v42 = vadd.s32 128, %v8953_v59  ;;  %7804 = vset.pattern.permute.xlu1 %v18859_v29  ;;  %v9975_v19 = vadd.s32 256, %v8990_v9  ;;  %v9978_v2 = vadd.s32 384, %v8990_v9  ;;  %v9997_v9 = vpop.permute.xlu0 %4340 }
 0x2cc   : > { %v9981_v22 = vadd.s32 384, %v8960_v0  ;;  %v9984_v24 = vadd.s32 128, %v9016_v14  ;;  %940 = vperm.xlu1 %7804, %v9328_v47   ;;  %vm1872_vm10 = vcmp.gt.f32.partialorder %v9567_v10, %v9441_v58  ;;  %v9990_v63 = vadd.f32 %v9845_v45, %v1584_v12  ;;  %18937 = vst [vmem:[#allocation104_spill] sm:$0xff] %v9997_v9 }
 0x2cd   : > { %18932 = vst [vmem:[#allocation99_spill] sm:$0xff] %v9971_v42  ;;  %18933 = vst [vmem:[#allocation100_spill] sm:$0xff] %v9975_v19  ;;  %v9993_v3 = vadd.f32 %v9854_v16, %v2333_v6  ;;  %v9995_v60 = vadd.f32 %v7234_v7, %v3671_v38  ;;  %v10001_v0 = vadd.f32 %v7058_v25, %v1830_v1  ;;  %v10014_v45 = vadd.s32 256, %v9016_v14 }
 0x2ce   : > { %18934 = vst [vmem:[#allocation101_spill] sm:$0xff] %v9978_v2  ;;  %18935 = vst [vmem:[#allocation102_spill] sm:$0xff] %v9981_v22  ;;  %v10003_v46 = vadd.f32 %v7122_v41, %v2499_v61  ;;  %v10005_v22 = vadd.f32 %v7186_v33, %v3168_v13  ;;  %vm2557_vm7 = vcmp.eq.f32.partialorder %v9567_v10, %v9446_v5  ;;  %v10025_v41 = vadd.s32 384, %v9016_v14 }
 0x2cf   : > { %18936 = vst [vmem:[#allocation103_spill] sm:$0xff] %v9984_v24  ;;  %18938 = vst [vmem:[#allocation105_spill] sm:$0xff] %v10014_v45  ;;  %v10016_v16 = vpop.permute.xlu1 %4565  ;;  %vm3226_vm9 = vcmp.eq.f32.partialorder %v9567_v10, %v9452_v8  ;;  %v10028_v25 = vadd.s32 384, %v8953_v59  ;;  %v10044_v6 = vadd.s32 256, %v9010_v43  ;;  %v10047_v38 = vadd.s32 128, %v9031_v53  ;;  %v10091_v61 = vpop.permute.xlu0 %4370 }
 0x2d0   : > { %18939 = vst [vmem:[#allocation106_spill] sm:$0xff] %v10016_v16  ;;  %18940 = vst [vmem:[#allocation107_spill] sm:$0xff] %v10025_v41  ;;  %7805 = vset.pattern.permute.xlu1 %v18868_v23  ;;  %v10050_v7 = vadd.s32 128, %v9052_v55  ;;  %vm1209_vm11 = vcmp.gt.f32.partialorder %v9573_v21, %v9436_v11  ;;  %vm18956_vm1 = vcmp.eq.f32.partialorder %v9573_v21, %v9441_v58  ;;  %v18963_v1 = vmov 0 }
 0x2d1   : > { %18941 = vst [vmem:[#allocation108_spill] sm:$0xff] %v10028_v25  ;;  %vm10037_vm13 = vmor %vm1872_vm10, %vm1888_vm5  ;;  %1193 = vperm.xlu1 %7805, %v9328_v47   ;;  %vm18955_vm5 = vcmp.lt.s32.totalorder %v9588_v56, %v9591_v48  ;;  %v7023_v12 = vsel %vm1209_vm11, 1.0, %v18893_v32  ;;  %v18968_v14 = vrot.slane %v9812_v37, 2 }
 0x2d2   : > { %18944 = vst [vmem:[#allocation109_spill] sm:$0xff] %v10044_v6  ;;  %18945 = vst [vmem:[#allocation110_spill] sm:$0xff] %v10047_v38  ;;  %v10110_v33 = vsel %vm10037_vm13, 1.0, %v18893_v32 }
 0x2d3   : > { %18946 = vst [vmem:[#allocation111_spill] sm:$0xff] %v10050_v7  ;;  %vm10059_vm10 = vmor %vm2541_vm15, %vm2557_vm7  ;;  %vm18949_vm15 = vcmp.gt.f32.partialorder %v9567_v10, %v9452_v8 }
 0x2d4   : > { %vm10079_vm7 = vmor %vm18949_vm15, %vm3226_vm9  ;;  %18952 = vst [vmem:[#allocation112_spill] sm:$0xff] %v10091_v61  ;;  %vm5306_vm15 = vcmp.eq.f32.partialorder %v10016_v16, %v9224_v34  ;;  %v10097_v13 = vpop.permute.xlu1 %905  ;;  %vm5290_vm9 = vcmp.gt.f32.partialorder %v10016_v16, %v9224_v34  ;;  %v10134_v53 = vsel %vm10059_vm10, 1.0, %v18893_v32  ;;  %vm18961_vm10 = vcmp.lt.s32.totalorder %v9971_v42, %v9591_v48  ;;  %v10309_v61 = vpop.permute.xlu0 %4385 }
 0x2d5   : > { %18953 = vst [vmem:[#allocation113_spill] sm:$0xff] %v10097_v13  ;;  %18954 = vst [vmem:[#allocation114_spill] sm:$0xff] %v10110_v33  ;;  %7808 = vset.pattern.permute.xlu1 %v18859_v29  ;;  %v10139_v43 = vsel %vm10079_vm7, 1.0, %v18893_v32  ;;  %v18967_v16 = vrot.slane %v9815_v36, 2  ;;  %vm19032_vm7 = vcmp.gt.f32.partialorder %v9513_v18, %v9446_v5 }
 0x2d6   : > { %vm10121_vm12 = vmand %vm18956_vm1, %vm18955_vm5  ;;  %18959 = vst [vmem:[#allocation115_spill] sm:$0xff] %v10134_v53  ;;  %955 = vperm.xlu1 %7808, %v9330_v17   ;;  %vm18962_vm1 = vcmp.ne.s32.totalorder %v9971_v42, %v9591_v48 }
 0x2d7   : > { %18960 = vst [vmem:[#allocation116_spill] sm:$0xff] %v10139_v43  ;;  %vm5322_vm0 = vmand %vm5306_vm15, %vm18961_vm10  ;;  %v463_v13 = vadd.f32 %v18967_v16, %v9815_v36  ;;  %v710_v43 = vadd.f32 %v18968_v14, %v9812_v37  ;;  %vm18970_vm10 = vcmp.gt.f32.partialorder %v9570_v26, %v9436_v11 }
 0x2d8   : > { %vm5338_vm5 = vmor %vm5290_vm9, %vm5322_vm0  ;;  %v7044_v14 = vsel %vm18970_vm10, 1.0, %v18893_v32  ;;  %vm18985_vm10 = vcmp.ne.s32.totalorder %v9588_v56, %v9591_v48 }
 0x2d9   : > { %vm10178_vm11 = vmand %vm18962_vm1, %vm5338_vm5  ;;  %v10182_v47 = vpop.permute.xlu1 %1411  ;;  %vm18969_vm1 = vcmp.gt.f32.partialorder %v9513_v18, %v9436_v11  ;;  %vm2053_vm5 = vcmp.eq.f32.partialorder %v9513_v18, %v9441_v58  ;;  %v464_v25 = vrot.slane %v463_v13, 1  ;;  %v711_v53 = vrot.slane %v710_v43, 1 }
 0x2da   : > { %v18964_v1 = vsel %vm10178_vm11, 4294967295, %v18963_v1  ;;  %18966 = vst [vmem:[#allocation118_spill] sm:$0xff] %v10182_v47  ;;  %v7022_v42 = vsel %vm18969_vm1, 1.0, %v18893_v32  ;;  %vm1459_vm0 = vcmp.gt.f32.partialorder %v10182_v47, %v9436_v11  ;;  %vm2208_vm15 = vcmp.gt.f32.partialorder %v10182_v47, %v9441_v58  ;;  %7811 = vset.pattern.permute.xlu1 %v18857_v27  ;;  %vm10223_vm13 = vmor %vm18972_vm14, %vm10121_vm12 }
 0x2db   : > { %18965 = vst [vmem:[#allocation117_spill] sm:$0xff] %v18964_v1  ;;  %vm18971_vm1 = vcmp.gt.f32.partialorder %v9570_v26, %v9441_v58  ;;  %v7043_v36 = vsel %vm1459_vm0, 1.0, %v18893_v32  ;;  %v7107_v16 = vsel %vm2208_vm15, 1.0, %v18893_v32  ;;  %1697 = vperm.xlu1 %7811, %v9330_v17   ;;  %vm18975_vm15 = vcmp.ne.s32.totalorder %v9485_v20, %v9488_v28 }
 0x2dc   : > { %v7108_v37 = vsel %vm18971_vm1, 1.0, %v18893_v32  ;;  %v1586_v1 = vadd.f32 %v7043_v36, %v9990_v63  ;;  %v2335_v9 = vadd.f32 %v7107_v16, %v9993_v3  ;;  %vm10236_vm0 = vmand %vm18975_vm15, %vm9535_vm3  ;;  %v10240_v17 = vadd.f32 %v7023_v12, %v7022_v42  ;;  %v18983_v42 = vld [vmem:[#allocation17_spill] sm:$0xff] }
 0x2dd   : > { %v10247_v63 = vadd.s32 256, %v9045_v40  ;;  %vm18980_vm1 = vcmp.lt.s32.totalorder %v9690_v49, %v9591_v48  ;;  %v465_v12 = vadd.f32 %v464_v25, %v463_v13  ;;  %v712_v36 = vadd.f32 %v711_v53, %v710_v43  ;;  %v18992_v25 = vld [vmem:[#allocation38_spill] sm:$0xff]  ;;  %v19027_v13 = vld [vmem:[#allocation60_spill] sm:$0xff] }
 0x2de   : > { %18978 = vst [vmem:[#allocation119_spill] sm:$0xff] %v10240_v17  ;;  %vm10255_vm3 = vmand %vm2053_vm5, %vm18980_vm1  ;;  %v10261_v3 = vpop.permute.xlu1 %1657  ;;  %v10263_v16 = vadd.f32 %v7044_v14, %v1586_v1  ;;  %v10265_v20 = vadd.f32 %v7108_v37, %v2335_v9  ;;  %vm18989_vm1 = vcmp.gt.f32.partialorder %v9573_v21, %v9446_v5  ;;  %v10412_v17 = vadd.s32 384, %v9045_v40 }
 0x2df   : > { %18979 = vst [vmem:[#allocation120_spill] sm:$0xff] %v10247_v63  ;;  %18984 = vst [vmem:[#allocation17_spill] sm:$0xff] %v10261_v3  ;;  %vm1705_vm9 = vcmp.gt.f32.partialorder %v10261_v3, %v9436_v11  ;;  %vm2374_vm12 = vcmp.gt.f32.partialorder %v10261_v3, %v9441_v58  ;;  %7812 = vset.pattern.permute.xlu1 %v18868_v23  ;;  %v19104_v23 = vmov 0  ;;  %v19108_v63 = vmov 0 }
 0x2e0   : > { %vm10272_vm5 = vmand %vm18985_vm10, %vm10223_vm13  ;;  %vm3043_vm13 = vcmp.gt.f32.partialorder %v10261_v3, %v9446_v5  ;;  %vm18988_vm10 = vcmp.eq.f32.partialorder %v9573_v21, %v9446_v5  ;;  %v7059_v43 = vsel %vm1705_vm9, 1.0, %v18893_v32  ;;  %v7123_v53 = vsel %vm2374_vm12, 1.0, %v18893_v32  ;;  %1201 = vperm.xlu1 %7812, %v18992_v25   ;;  %7667 = vpush %v465_v12  ;;  %v10471_v12 = vpop.permute.xlu0 %4400 }
 0x2e1   : > { %vm10295_vm15 = vmor %vm18989_vm1, %vm18988_vm10  ;;  %v7187_v56 = vsel %vm3043_vm13, 1.0, %v18893_v32  ;;  %18993 = vst [vmem:[#allocation38_spill] sm:$0xff] %v10309_v61  ;;  %vm18994_vm1 = vcmp.gt.f32.partialorder %v9513_v18, %v9441_v58  ;;  %v10323_v1 = vadd.f32 %v7059_v43, %v10001_v0  ;;  %v10326_v14 = vadd.f32 %v7123_v53, %v10003_v46  ;;  %v19047_v46 = vld [vmem:[#allocation57_spill] sm:$0xff] }
 0x2e2   : > { %vm10316_vm10 = vmor %vm18994_vm1, %vm10255_vm3  ;;  %v10329_v37 = vadd.f32 %v7187_v56, %v10005_v22  ;;  %7669 = vpush %v712_v36  ;;  %vm18998_vm12 = vcmp.lt.s32.totalorder %v18997_v51, %v18983_v42  ;;  %vm18999_vm3 = vcmp.eq.f32.partialorder %v9567_v10, %v9436_v11  ;;  %vm19002_vm1 = vcmp.gt.f32.partialorder %v9532_v50, %v9436_v11  ;;  %v19026_v56 = vld [vmem:[#allocation56_spill] sm:$0xff] }
 0x2e3   : > { %vm10337_vm13 = vmand %vm18999_vm3, %vm18998_vm12  ;;  %v10345_v0 = vsel %vm19002_vm1, 1.0, %v18893_v32  ;;  %vm19004_vm3 = vcmp.eq.f32.partialorder %v9573_v21, %v9452_v8  ;;  %vm19005_vm9 = vcmp.gt.f32.partialorder %v9573_v21, %v9452_v8  ;;  %v10367_v22 = vpop.permute.xlu1 %900  ;;  %v10378_v21 = vsel %vm10236_vm0, 1.0, %v18893_v32  ;;  %19017 = vst [vmem:[#allocation123_spill] sm:$0xff] %v10412_v17 }
 0x2e4   : > { %19003 = vst [vmem:[#allocation20_spill] sm:$0xff] %v10345_v0  ;;  %vm10361_vm1 = vmor %vm19005_vm9, %vm19004_vm3  ;;  %v10383_v36 = vsel %vm10272_vm5, 1.0, %v18893_v32  ;;  %v10388_v43 = vsel %vm10295_vm15, 1.0, %v18893_v32  ;;  %vm19010_vm9 = vcmp.ne.s32.totalorder %v9690_v49, %v9591_v48  ;;  %vm19013_vm5 = vcmp.eq.f32.partialorder %v9570_v26, %v9452_v8  ;;  %7813 = vset.pattern.permute.xlu1 %v18861_v54 }
 0x2e5   : > { %19008 = vst [vmem:[#allocation121_spill] sm:$0xff] %v10367_v22  ;;  %19009 = vst [vmem:[#allocation122_spill] sm:$0xff] %v10378_v21  ;;  %vm19014_vm12 = vcmp.gt.f32.partialorder %v9570_v26, %v9452_v8  ;;  %1447 = vperm.xlu1 %7813, %v18992_v25   ;;  %vm19028_vm0 = vcmp.eq.f32.partialorder %v10182_v47, %v9452_v8  ;;  %v10514_v9 = vsel %vm10361_vm1, 1.0, %v18893_v32  ;;  %v19072_v21 = vld [vmem:[#allocation40_spill] sm:$0xff] }
 0x2e6   : > { %vm10395_vm3 = vmand %vm19010_vm9, %vm10316_vm10  ;;  %vm19018_vm9 = vcmp.gt.f32.partialorder %v9567_v10, %v9436_v11  ;;  %v19025_v10 = vld [vmem:[#allocation55_spill] sm:$0xff]  ;;  %vm19043_vm10 = vcmp.eq.f32.partialorder %v9513_v18, %v9452_v8  ;;  %vm19048_vm1 = vcmp.gt.f32.partialorder %v19027_v13, %v9436_v11 }
 0x2e7   : > { %vm10407_vm15 = vmor %vm19014_vm12, %vm19013_vm5  ;;  %vm19021_vm12 = vcmp.lt.s32.totalorder %v9835_v57, %v9591_v48  ;;  %vm19022_vm5 = vcmp.eq.f32.partialorder %v9532_v50, %v9441_v58  ;;  %19030 = vst [vmem:[#allocation55_spill] sm:$0xff] %v10471_v12  ;;  %vm19106_vm2 = vcmp.eq.f32.partialorder %v19025_v10, %v9452_v8 }
 0x2e8   : > { %vm10422_vm6 = vmor %vm19018_vm9, %vm10337_vm13  ;;  %vm19031_vm9 = vcmp.eq.f32.partialorder %v9513_v18, %v9446_v5  ;;  %v7236_v22 = vsel %vm10407_vm15, 1.0, %v18893_v32  ;;  %v10503_v3 = vpop.permute.xlu1 %1161 }
 0x2e9   : > { %vm10432_vm14 = vmand %vm19022_vm5, %vm19021_vm12  ;;  %vm19029_vm5 = vcmp.gt.f32.partialorder %v10182_v47, %v9452_v8  ;;  %19038 = vst [vmem:[#allocation56_spill] sm:$0xff] %v10503_v3  ;;  %7814 = vset.pattern.permute.xlu1 %v18857_v27  ;;  %v7060_v3 = vsel %vm19048_vm1, 1.0, %v18893_v32 }
 0x2ea   : > { %vm3610_vm12 = vmor %vm19029_vm5, %vm19028_vm0  ;;  %vm3044_vm0 = vcmp.gt.f32.partialorder %v19027_v13, %v9446_v5  ;;  %1693 = vperm.xlu1 %7814, %v18992_v25   ;;  %vm19054_vm5 = vcmp.eq.f32.partialorder %v19026_v56, %v9441_v58 }
 0x2eb   : > { %vm10479_vm8 = vmor %vm19032_vm7, %vm19031_vm9  ;;  %v7235_v47 = vsel %vm3610_vm12, 1.0, %v18893_v32  ;;  %vm19035_vm7 = vcmp.gt.f32.partialorder %v9532_v50, %v9441_v58  ;;  %vm19040_vm12 = vcmp.eq.f32.partialorder %v19025_v10, %v9436_v11  ;;  %v7188_v40 = vsel %vm3044_vm0, 1.0, %v18893_v32 }
 0x2ec   : > { %vm10496_vm9 = vmor %vm19035_vm7, %vm10432_vm14  ;;  %v3673_v55 = vadd.f32 %v7235_v47, %v9995_v60  ;;  %vm964_vm14 = vcmp.gt.f32.partialorder %v19025_v10, %v9436_v11  ;;  %vm19039_vm7 = vcmp.lt.s32.totalorder %v8953_v59, %v18983_v42  ;;  %vm19053_vm0 = vcmp.lt.s32.totalorder %v9838_v30, %v9591_v48 }
 0x2ed   : > { %vm10524_vm13 = vmand %vm19040_vm12, %vm19039_vm7  ;;  %vm19044_vm12 = vcmp.gt.f32.partialorder %v9513_v18, %v9452_v8  ;;  %v10623_v60 = vadd.f32 %v7060_v3, %v10323_v1  ;;  %v7086_v1 = vsel %vm10395_vm3, 1.0, %v18893_v32  ;;  %vm19073_vm3 = vcmp.ne.s32.totalorder %v18997_v51, %v18983_v42 }
 0x2ee   : > { %vm10541_vm7 = vmor %vm19044_vm12, %vm19043_vm10  ;;  %vm19049_vm10 = vcmp.gt.f32.partialorder %v19027_v13, %v9441_v58  ;;  %vm19050_vm12 = vcmp.ne.s32.totalorder %v9835_v57, %v9591_v48  ;;  %v10587_v0 = vadd.f32 %v7236_v22, %v3673_v55  ;;  %v10620_v55 = vpop.permute.xlu1 %915  ;;  %7815 = vset.pattern.permute.xlu1 %v18859_v29  ;;  %v19092_v57 = vmov 0  ;;  %v19098_v22 = vld [vmem:[#allocation72_spill] sm:$0xff] }
 0x2ef   : > { %v7124_v18 = vsel %vm19049_vm10, 1.0, %v18893_v32  ;;  %vm10569_vm11 = vmand %vm19050_vm12, %vm10496_vm9  ;;  %19064 = vst [vmem:[#allocation57_spill] sm:$0xff] %v10620_v55  ;;  %vm19065_vm9 = vcmp.gt.f32.partialorder %v19026_v56, %v9441_v58  ;;  %4355 = vperm.xlu1 %7815, %v19072_v21   ;;  %v10758_v17 = vadd.f32 %v10383_v36, %v7086_v1 }
 0x2f0   : > { %vm10583_vm15 = vmand %vm19054_vm5, %vm19053_vm0  ;;  %19057 = vst [vmem:[#allocation60_spill] sm:$0xff] %v10587_v0  ;;  %vm3727_vm5 = vcmp.eq.f32.partialorder %v9557_v31, %v9452_v8  ;;  %v10626_v12 = vadd.f32 %v7124_v18, %v10326_v14  ;;  %v10629_v0 = vadd.f32 %v7188_v40, %v10329_v37  ;;  %v19068_v40 = vld [vmem:[#allocation59_spill] sm:$0xff]  ;;  %v7150_v14 = vsel %vm10479_vm8, 1.0, %v18893_v32  ;;  %v19179_v18 = vld [vmem:[#allocation65_spill] sm:$0xff] }
 0x2f1   : > { %vm10596_vm12 = vmor %vm964_vm14, %vm10524_vm13  ;;  %vm19060_vm13 = vcmp.lt.s32.totalorder %v9842_v4, %v9462_v39  ;;  %vm19061_vm14 = vcmp.eq.f32.partialorder %v19047_v46, %v9446_v5  ;;  %v7214_v37 = vsel %vm10541_vm7, 1.0, %v18893_v32  ;;  %vm19080_vm8 = vcmp.eq.f32.partialorder %v9532_v50, %v9452_v8  ;;  %19101 = vst [vmem:[#allocation40_spill] sm:$0xff] %v10758_v17 }
 0x2f2   : > { %vm10616_vm4 = vmand %vm19061_vm14, %vm19060_vm13  ;;  %vm19081_vm14 = vcmp.gt.f32.partialorder %v9532_v50, %v9452_v8  ;;  %v10796_v17 = vpop.permute.xlu1 %1419  ;;  %v10799_v33 = vadd.f32 %v10388_v43, %v7150_v14  ;;  %v10802_v53 = vadd.f32 %v10514_v9, %v7214_v37  ;;  %v19127_v9 = vmov 0  ;;  %v19325_v43 = vld [vmem:[#allocation73_spill] sm:$0xff] }
 0x2f3   : > { %vm10642_vm0 = vmor %vm19065_vm9, %vm10583_vm15  ;;  %vm19069_vm9 = vcmp.lt.s32.totalorder %v9848_v52, %v9488_v28  ;;  %19115 = vst [vmem:[#allocation124_spill] sm:$0xff] %v10796_v17  ;;  %7816 = vset.pattern.permute.xlu1 %v18861_v54 }
 0x2f4   : > { %vm10666_vm13 = vmand %vm3727_vm5, %vm19069_vm9  ;;  %vm19076_vm5 = vcmp.eq.f32.partialorder %v9532_v50, %v9446_v5  ;;  %vm19077_vm9 = vcmp.gt.f32.partialorder %v9532_v50, %v9446_v5  ;;  %19116 = vst [vmem:[#allocation125_spill] sm:$0xff] %v10799_v33 }
 0x2f5   : > { %vm10678_vm7 = vmand %vm19073_vm3, %vm10422_vm6  ;;  %vm19084_vm3 = vcmp.ne.s32.totalorder %v8953_v59, %v18983_v42  ;;  %v19099_v59 = vld [vmem:[#allocation25_spill] sm:$0xff]  ;;  %19117 = vst [vmem:[#allocation126_spill] sm:$0xff] %v10802_v53  ;;  %v10869_v53 = vpop.permute.xlu0 %4957 }
 0x2f6   : > { %vm10688_vm15 = vmor %vm19077_vm9, %vm19076_vm5  ;;  %vm19090_vm5 = vcmp.eq.f32.partialorder %v19025_v10, %v9441_v58  ;;  %vm19091_vm9 = vcmp.gt.f32.partialorder %v19025_v10, %v9441_v58  ;;  %v10755_v55 = vadd.s32 256, %v19099_v59 }
 0x2f7   : > { %vm10698_vm6 = vmor %vm19081_vm14, %vm19080_vm8  ;;  %vm19094_vm8 = vcmp.lt.s32.totalorder %v9851_v35, %v9591_v48  ;;  %v10932_v61 = vpop.permute.xlu1 %1665 }
 0x2f8   : > { %vm10707_vm1 = vmand %vm19084_vm3, %vm10596_vm12  ;;  %vm19087_vm12 = vcmp.gt.f32.partialorder %v19047_v46, %v9446_v5  ;;  %19100 = vst [vmem:[#allocation59_spill] sm:$0xff] %v10755_v55 }
 0x2f9   : > { %vm10724_vm3 = vmor %vm19087_vm12, %vm10616_vm4  ;;  %vm19095_vm4 = vcmp.eq.f32.partialorder %v19068_v40, %v9441_v58  ;;  %19156 = vst [vmem:[#allocation133_spill] sm:$0xff] %v10932_v61  ;;  %v10988_v14 = vpop.permute.xlu0 %4969 }
 0x2fa   : > { %vm10734_vm10 = vmor %vm19091_vm9, %vm19090_vm5  ;;  %vm19102_vm9 = vcmp.eq.f32.partialorder %v19025_v10, %v9446_v5  ;;  %vm19107_vm5 = vcmp.gt.f32.partialorder %v19025_v10, %v9452_v8  ;;  %19171 = vst [vmem:[#allocation136_spill] sm:$0xff] %v10988_v14  ;;  %v19255_v14 = vld [vmem:[#allocation67_spill] sm:$0xff] }
 0x2fb   : > { %v19093_v57 = vsel %vm10734_vm10, 4294967295, %v19092_v57  ;;  %vm10746_vm12 = vmand %vm19095_vm4, %vm19094_vm8  ;;  %vm19103_vm8 = vcmp.gt.f32.partialorder %v19025_v10, %v9446_v5  ;;  %v19113_v10 = vld [vmem:[#allocation35_spill] sm:$0xff]  ;;  %vm19125_vm10 = vcmp.eq.f32.partialorder %v19026_v56, %v9452_v8 }
 0x2fc   : > { %vm10766_vm4 = vmor %vm19103_vm8, %vm19102_vm9  ;;  %vm19110_vm9 = vcmp.gt.f32.partialorder %v9557_v31, %v9452_v8  ;;  %v10794_v1 = vadd.s32 128, %v19113_v10  ;;  %v19119_v31 = vmov 0  ;;  %v11040_v47 = vpop.permute.xlu1 %910 }
 0x2fd   : > { %v19105_v23 = vsel %vm10766_vm4, 4294967295, %v19104_v23  ;;  %vm10776_vm14 = vmor %vm19107_vm5, %vm19106_vm2  ;;  %vm19118_vm2 = vcmp.ne.s32.totalorder %v9838_v30, %v9591_v48  ;;  %vm19121_vm5 = vcmp.eq.f32.partialorder %v19026_v56, %v9446_v5  ;;  %v19137_v30 = vld [vmem:[#allocation41_spill] sm:$0xff]  ;;  %19185 = vst [vmem:[#allocation65_spill] sm:$0xff] %v11040_v47  ;;  %v11140_v3 = vpop.permute.xlu0 %4981  ;;  %v19254_v47 = vld [vmem:[#allocation42_spill] sm:$0xff] }
 0x2fe   : > { %v19109_v63 = vsel %vm10776_vm14, 4294967295, %v19108_v63  ;;  %vm10787_vm8 = vmor %vm19110_vm9, %vm10666_vm13  ;;  %19114 = vst [vmem:[#allocation72_spill] sm:$0xff] %v10794_v1  ;;  %vm19122_vm9 = vcmp.gt.f32.partialorder %v19026_v56, %v9446_v5  ;;  %vm19126_vm14 = vcmp.gt.f32.partialorder %v19026_v56, %v9452_v8  ;;  %4763 = vperm.xlu1 %7816, %v19137_v30   ;;  %v19142_v1 = vmov 0 }
 0x2ff   : > { %vm10809_vm13 = vmand %vm19118_vm2, %vm10642_vm0  ;;  %19138 = vst [vmem:[#allocation41_spill] sm:$0xff] %v10869_v53  ;;  %v19660_v53 = vld [vmem:[#allocation126_spill] sm:$0xff] }
 0x300   : > { %v19120_v31 = vsel %vm10809_vm13, 4294967295, %v19119_v31  ;;  %vm10819_vm4 = vmor %vm19122_vm9, %vm19121_vm5  ;;  %vm1461_vm13 = vcmp.gt.f32.partialorder %v10796_v17, %v9436_v11  ;;  %vm2210_vm5 = vcmp.gt.f32.partialorder %v10796_v17, %v9441_v58  ;;  %vm19129_vm9 = vcmp.ne.s32.totalorder %v9842_v4, %v9462_v39  ;;  %19209 = vst [vmem:[#allocation146_spill] sm:$0xff] %v11140_v3 }
 0x301   : > { %vm10829_vm0 = vmor %vm19126_vm14, %vm19125_vm10  ;;  %vm19132_vm14 = vcmp.gt.f32.partialorder %v19068_v40, %v9441_v58  ;;  %v7045_v4 = vsel %vm1461_vm13, 1.0, %v18893_v32  ;;  %v7109_v46 = vsel %vm2210_vm5, 1.0, %v18893_v32  ;;  %vm19144_vm13 = vcmp.lt.s32.totalorder %v9975_v19, %v9462_v39 }
 0x302   : > { %v19128_v9 = vsel %vm10829_vm0, 4294967295, %v19127_v9  ;;  %vm10845_vm10 = vmand %vm19129_vm9, %vm10724_vm3  ;;  %vm19135_vm0 = vcmp.gt.f32.partialorder %v19098_v22, %v9436_v11  ;;  %vm19136_vm3 = vcmp.gt.f32.partialorder %v19098_v22, %v9441_v58  ;;  %vm19145_vm5 = vcmp.eq.f32.partialorder %v9570_v26, %v9446_v5  ;;  %7817 = vset.pattern.permute.xlu1 %v18859_v29 }
 0x303   : > { %vm10854_vm2 = vmor %vm19132_vm14, %vm10746_vm12  ;;  %v7046_v37 = vsel %vm19135_vm0, 1.0, %v18893_v32  ;;  %v7110_v50 = vsel %vm19136_vm3, 1.0, %v18893_v32  ;;  %vm19139_vm12 = vcmp.gt.f32.partialorder %v19026_v56, %v9436_v11  ;;  %vm19141_vm0 = vcmp.ne.s32.totalorder %v9848_v52, %v9488_v28 }
 0x304   : > { %v10875_v33 = vsel %vm19139_vm12, 1.0, %v18893_v32  ;;  %vm10882_vm9 = vmand %vm19141_vm0, %vm10787_vm8  ;;  %vm18555_vm3 = vcmp.lt.s32.totalorder %v10755_v55, %v9462_v39  ;;  %v1588_v56 = vadd.f32 %v7045_v4, %v10263_v16  ;;  %v2337_v36 = vadd.f32 %v7109_v46, %v10265_v20  ;;  %v19151_v20 = vld [vmem:[#allocation88_spill] sm:$0xff] }
 0x305   : > { %19140 = vst [vmem:[#allocation127_spill] sm:$0xff] %v10875_v33  ;;  %v19143_v1 = vsel %vm10882_vm9, 4294967295, %v19142_v1  ;;  %vm10892_vm14 = vmand %vm19145_vm5, %vm19144_vm13  ;;  %v10903_v52 = vsel %vm10569_vm11, 1.0, %v18893_v32  ;;  %v10908_v33 = vadd.s32 256, %v19113_v10  ;;  %v10911_v17 = vadd.s32 384, %v19099_v59  ;;  %v19166_v59 = vld [vmem:[#allocation43_spill] sm:$0xff] }
 0x306   : > { %19148 = vst [vmem:[#allocation128_spill] sm:$0xff] %v10903_v52  ;;  %vm19152_vm0 = vcmp.eq.f32.partialorder %v19151_v20, %v9228_v15  ;;  %vm19153_vm8 = vcmp.gt.f32.partialorder %v19151_v20, %v9228_v15  ;;  %v10928_v4 = vadd.f32 %v7046_v37, %v1588_v56  ;;  %v10930_v16 = vadd.f32 %v7110_v50, %v2337_v36 }
 0x307   : > { %19149 = vst [vmem:[#allocation129_spill] sm:$0xff] %v10908_v33  ;;  %19150 = vst [vmem:[#allocation130_spill] sm:$0xff] %v10911_v17  ;;  %v19158_v46 = vmov 0  ;;  %vm1707_vm13 = vcmp.gt.f32.partialorder %v10932_v61, %v9436_v11  ;;  %vm19162_vm12 = vcmp.gt.f32.partialorder %v19151_v20, %v9232_v44  ;;  %v19163_v37 = vmov 0  ;;  %4360 = vperm.xlu1 %7817, %v19166_v59   ;;  %v19360_v17 = vld [vmem:[#allocation70_spill] sm:$0xff] }
 0x308   : > { %vm5999_vm11 = vmand %vm19152_vm0, %vm18555_vm3  ;;  %19154 = vst [vmem:[#allocation131_spill] sm:$0xff] %v10928_v4  ;;  %vm19157_vm0 = vcmp.ne.s32.totalorder %v10755_v55, %v9462_v39  ;;  %v7061_v50 = vsel %vm1707_vm13, 1.0, %v18893_v32  ;;  %v19329_v55 = vmov 0 }
 0x309   : > { %vm6015_vm9 = vmor %vm19153_vm8, %vm5999_vm11  ;;  %19155 = vst [vmem:[#allocation132_spill] sm:$0xff] %v10930_v16  ;;  %vm2376_vm8 = vcmp.gt.f32.partialorder %v10932_v61, %v9441_v58  ;;  %vm3045_vm11 = vcmp.gt.f32.partialorder %v10932_v61, %v9446_v5  ;;  %v10980_v52 = vadd.f32 %v7061_v50, %v10623_v60  ;;  %v11017_v60 = vsel %vm10678_vm7, 1.0, %v18893_v32 }
 0x30a   : > { %vm10939_vm3 = vmand %vm19157_vm0, %vm6015_vm9  ;;  %vm19161_vm0 = vcmp.eq.f32.partialorder %v19151_v20, %v9232_v44  ;;  %v7125_v56 = vsel %vm2376_vm8, 1.0, %v18893_v32  ;;  %v7189_v36 = vsel %vm3045_vm11, 1.0, %v18893_v32  ;;  %vm19167_vm9 = vcmp.ne.s32.totalorder %v9851_v35, %v9591_v48  ;;  %19178 = vst [vmem:[#allocation140_spill] sm:$0xff] %v11017_v60 }
 0x30b   : > { %v19159_v46 = vsel %vm10939_vm3, 4294967295, %v19158_v46  ;;  %vm10960_vm3 = vmor %vm19162_vm12, %vm19161_vm0  ;;  %vm3398_vm12 = vcmp.eq.f32.partialorder %v19068_v40, %v9452_v8  ;;  %v10983_v61 = vadd.f32 %v7125_v56, %v10626_v12  ;;  %v10993_v35 = vsel %vm10688_vm15, 1.0, %v18893_v32  ;;  %7818 = vset.pattern.permute.xlu1 %v18857_v27 }
 0x30c   : > { %19160 = vst [vmem:[#allocation134_spill] sm:$0xff] %v19159_v46  ;;  %v19164_v37 = vsel %vm10960_vm3, 4294967295, %v19163_v37  ;;  %vm10973_vm5 = vmand %vm19167_vm9, %vm10854_vm2  ;;  %v10998_v46 = vsel %vm10698_vm6, 1.0, %v18893_v32  ;;  %v11003_v12 = vsel %vm10707_vm1, 1.0, %v18893_v32  ;;  %vm19175_vm2 = vcmp.gt.f32.partialorder %v9570_v26, %v9446_v5 }
 0x30d   : > { %19165 = vst [vmem:[#allocation135_spill] sm:$0xff] %v19164_v37  ;;  %v10986_v37 = vadd.f32 %v7189_v36, %v10629_v0  ;;  %19172 = vst [vmem:[#allocation137_spill] sm:$0xff] %v10993_v35  ;;  %vm5829_vm15 = vcmp.gt.f32.partialorder %v19179_v18, %v9228_v15  ;;  %vm5845_vm1 = vcmp.eq.f32.partialorder %v19179_v18, %v9228_v15  ;;  %vm19180_vm6 = vnez %v19093_v57 }
 0x30e   : > { %19173 = vst [vmem:[#allocation138_spill] sm:$0xff] %v10998_v46  ;;  %19174 = vst [vmem:[#allocation139_spill] sm:$0xff] %v11003_v12  ;;  %v11026_v49 = vsel %vm19180_vm6, 1.0, %v18893_v32  ;;  %vm19181_vm8 = vcmp.eq.f32.partialorder %v19068_v40, %v9446_v5  ;;  %vm19182_vm7 = vcmp.gt.f32.partialorder %v19068_v40, %v9446_v5  ;;  %vm6369_vm9 = vcmp.gt.f32.partialorder %v19179_v18, %v9232_v44  ;;  %v19293_v12 = vld [vmem:[#allocation77_spill] sm:$0xff] }
 0x30f   : > { %19170 = vst [vmem:[#allocation43_spill] sm:$0xff] %v10986_v37  ;;  %vm11010_vm13 = vmor %vm19175_vm2, %vm10892_vm14  ;;  %vm1215_vm14 = vcmp.gt.f32.partialorder %v19068_v40, %v9436_v11  ;;  %vm6385_vm0 = vcmp.eq.f32.partialorder %v19179_v18, %v9232_v44  ;;  %vm19186_vm2 = vnez %v19105_v23  ;;  %vm19187_vm6 = vnez %v19109_v63 }
 0x310   : > { %vm11036_vm11 = vmor %vm19182_vm7, %vm19181_vm8  ;;  %v11049_v25 = vsel %vm19186_vm2, 1.0, %v18893_v32  ;;  %v11054_v57 = vsel %vm19187_vm6, 1.0, %v18893_v32  ;;  %vm19188_vm8 = vcmp.gt.f32.partialorder %v19068_v40, %v9452_v8  ;;  %vm19191_vm2 = vnez %v19120_v31  ;;  %v19199_v31 = vld [vmem:[#allocation39_spill] sm:$0xff] }
 0x311   : > { %vm11062_vm7 = vmor %vm19188_vm8, %vm3398_vm12  ;;  %v11070_v23 = vsel %vm19191_vm2, 1.0, %v18893_v32  ;;  %v11075_v63 = vsel %vm10819_vm4, 1.0, %v18893_v32  ;;  %vm19194_vm6 = vnez %v19128_v9  ;;  %vm19196_vm12 = vcmp.ne.s32.totalorder %v9975_v19, %v9462_v39  ;;  %4953 = vperm.xlu1 %7818, %v19199_v31   ;;  %v19202_v9 = vld [vmem:[#allocation71_spill] sm:$0xff]  ;;  %v11395_v31 = vpop.permute.xlu0 %4993  ;;  %s16917_s25 = spop %7667 }
 0x312   : > { %19192 = vst [vmem:[#allocation141_spill] sm:$0xff] %v11070_v23  ;;  %19193 = vst [vmem:[#allocation142_spill] sm:$0xff] %v11075_v63  ;;  %v11080_v50 = vsel %vm19194_vm6, 1.0, %v18893_v32  ;;  %vm3729_vm2 = vcmp.eq.f32.partialorder %v19027_v13, %v9452_v8  ;;  %vm1887_vm6 = vcmp.eq.f32.partialorder %v19202_v9, %v9441_v58  ;;  %v11111_v36 = vsel %vm10845_vm10, 1.0, %v18893_v32  ;;  %v19219_v23 = vld [vmem:[#allocation61_spill] sm:$0xff] }
 0x313   : > { %19195 = vst [vmem:[#allocation143_spill] sm:$0xff] %v11080_v50  ;;  %vm11087_vm8 = vmand %vm19196_vm12, %vm11010_vm13  ;;  %vm1871_vm13 = vcmp.gt.f32.partialorder %v19202_v9, %v9441_v58  ;;  %v11117_v0 = vsel %vm1215_vm14, 1.0, %v18893_v32  ;;  %vm19207_vm14 = vnez %v19143_v1  ;;  %v11145_v19 = vsel %vm10973_vm5, 1.0, %v18893_v32  ;;  %v19214_v1 = vld [vmem:[#allocation63_spill] sm:$0xff]  ;;  %v19227_v50 = vld [vmem:[#allocation66_spill] sm:$0xff]  ;;  %s16939_s8 = spop %7669 }
 0x314   : > { %vm11100_vm4 = vmor %vm5829_vm15, %vm5845_vm1  ;;  %19203 = vst [vmem:[#allocation39_spill] sm:$0xff] %v11111_v36  ;;  %vm2556_vm1 = vcmp.eq.f32.partialorder %v19202_v9, %v9446_v5  ;;  %v11136_v40 = vsel %vm19207_vm14, 1.0, %v18893_v32  ;;  %vm2062_vm14 = vcmp.eq.f32.partialorder %v19214_v1, %v9441_v58  ;;  %vm3225_vm12 = vcmp.eq.f32.partialorder %v19202_v9, %v9452_v8 }
 0x315   : > { %19204 = vst [vmem:[#allocation144_spill] sm:$0xff] %v11117_v0  ;;  %vm11125_vm15 = vmor %vm6369_vm9, %vm6385_vm0  ;;  %vm19211_vm9 = vcmp.lt.s32.totalorder %v9978_v2, %v9488_v28  ;;  %7819 = vset.pattern.permute.xlu1 %v18861_v54  ;;  %vm19220_vm5 = vcmp.gt.f32.partialorder %v19202_v9, %v9446_v5  ;;  %vm1463_vm10 = vcmp.gt.f32.partialorder %v19227_v50, %v9436_v11  ;;  %v11246_v63 = vsel %vm11062_vm7, 1.0, %v18893_v32  ;;  %v19246_v0 = vld [vmem:[#allocation102_spill] sm:$0xff] }
 0x316   : > { %19208 = vst [vmem:[#allocation145_spill] sm:$0xff] %v11136_v40  ;;  %19210 = vst [vmem:[#allocation147_spill] sm:$0xff] %v11145_v19  ;;  %v11158_v40 = vpop.permute.xlu1 %1169  ;;  %v11181_v19 = vsel %vm11036_vm11, 1.0, %v18893_v32  ;;  %4767 = vperm.xlu1 %7819, %v19072_v21   ;;  %vm19236_vm7 = vcmp.gt.f32.partialorder %v19027_v13, %v9452_v8  ;;  %v19240_v13 = vld [vmem:[#allocation68_spill] sm:$0xff]  ;;  %v11290_v36 = vsel %vm11087_vm8, 1.0, %v18893_v32  ;;  %vm19242_vm11 = vcmp.gt.f32.partialorder %v19214_v1, %v9441_v58 }
 0x317   : > { %vm11150_vm0 = vmand %vm3729_vm2, %vm19211_vm9  ;;  %19215 = vst [vmem:[#allocation63_spill] sm:$0xff] %v11158_v40  ;;  %v11309_v56 = vsel %vm1463_vm10, 1.0, %v18893_v32  ;;  %v11369_v10 = vsel %vm11125_vm15, 1.0, %v18893_v32  ;;  %vm19266_vm15 = vcmp.gt.f32.partialorder %v19219_v23, %v9228_v15  ;;  %v19341_v20 = vmov 0 }
 0x318   : > { %vm11170_vm2 = vmor %vm1871_vm13, %vm1887_vm6  ;;  %19218 = vst [vmem:[#allocation148_spill] sm:$0xff] %v11181_v19  ;;  %v19223_v19 = vld [vmem:[#allocation16_spill] sm:$0xff] }
 0x319   : > { %vm11202_vm13 = vmor %vm19220_vm5, %vm2556_vm1  ;;  %vm19224_vm5 = vcmp.lt.s32.totalorder %v9984_v24, %v9591_v48  ;;  %vm19228_vm1 = vcmp.gt.f32.partialorder %v19202_v9, %v9452_v8  ;;  %19231 = vst [vmem:[#allocation61_spill] sm:$0xff] %v11246_v63  ;;  %v19407_v63 = vmov 0 }
 0x31a   : > { %vm11223_vm6 = vmand %vm2062_vm14, %vm19224_vm5  ;;  %vm19232_vm14 = vcmp.gt.f32.partialorder %v19214_v1, %v9436_v11  ;;  %vm2212_vm5 = vcmp.gt.f32.partialorder %v19227_v50, %v9441_v58  ;;  %19241 = vst [vmem:[#allocation68_spill] sm:$0xff] %v11290_v36  ;;  %7820 = vset.pattern.permute.xlu1 %v18859_v29 }
 0x31b   : > { %vm11239_vm3 = vmor %vm19228_vm1, %vm3225_vm12  ;;  %v11252_v60 = vsel %vm19232_vm14, 1.0, %v18893_v32  ;;  %vm19234_vm1 = vcmp.gt.f32.partialorder %v19179_v18, %v9220_v62  ;;  %v11281_v18 = vpop.permute.xlu1 %925  ;;  %19245 = vst [vmem:[#allocation151_spill] sm:$0xff] %v11309_v56  ;;  %v11324_v36 = vsel %vm2212_vm5, 1.0, %v18893_v32  ;;  %vm19251_vm12 = vcmp.ne.s32.totalorder %v18997_v51, %v18983_v42  ;;  %4365 = vperm.xlu1 %7820, %v19254_v47   ;;  %v19338_v47 = vld [vmem:[#allocation116_spill] sm:$0xff] }
 0x31c   : > { %19233 = vst [vmem:[#allocation66_spill] sm:$0xff] %v11252_v60  ;;  %v11262_v40 = vsel %vm19234_vm1, 1.0, %v18893_v32  ;;  %vm11269_vm9 = vmor %vm19236_vm7, %vm11150_vm0  ;;  %vm4819_vm0 = vcmp.gt.f32.partialorder %v19240_v13, %v9220_v62  ;;  %vm5423_vm7 = vcmp.gt.f32.partialorder %v19240_v13, %v9224_v34  ;;  %v19248_v60 = vld [vmem:[#allocation69_spill] sm:$0xff]  ;;  %vm19256_vm1 = vnez %v19255_v14 }
 0x31d   : > { %19235 = vst [vmem:[#allocation149_spill] sm:$0xff] %v11262_v40  ;;  %19239 = vst [vmem:[#allocation150_spill] sm:$0xff] %v11281_v18  ;;  %v19249_v40 = vld [vmem:[#allocation64_spill] sm:$0xff]  ;;  %v11341_v3 = vsel %vm19256_vm1, 1.0, %v18893_v32  ;;  %vm2897_vm5 = vcmp.eq.f32.partialorder %v19227_v50, %v9446_v5  ;;  %v11364_v14 = vsel %vm11100_vm4, 1.0, %v18893_v32  ;;  %v11375_v26 = vsel %vm4819_vm0, 1.0, %v18893_v32 }
 0x31e   : > { %vm11297_vm14 = vmor %vm19242_vm11, %vm11223_vm6  ;;  %vm6519_vm11 = vcmp.eq.f32.partialorder %v19240_v13, %v9232_v44  ;;  %19247 = vst [vmem:[#allocation152_spill] sm:$0xff] %v11324_v36  ;;  %vm19250_vm8 = vnez %v19249_v40  ;;  %v7070_v36 = vsel %vm11170_vm2, 1.0, %v18893_v32  ;;  %v7134_v40 = vsel %vm11202_vm13, 1.0, %v18893_v32 }
 0x31f   : > { %vm11333_vm6 = vmand %vm19251_vm12, %vm19250_vm8  ;;  %vm19257_vm12 = vcmp.eq.f32.partialorder %v19219_v23, %v9224_v34  ;;  %vm19258_vm8 = vcmp.gt.f32.partialorder %v19219_v23, %v9224_v34  ;;  %19261 = vst [vmem:[#allocation69_spill] sm:$0xff] %v11364_v14  ;;  %v11381_v16 = vsel %vm5423_vm7, 1.0, %v18893_v32  ;;  %vm19265_vm2 = vcmp.eq.f32.partialorder %v19219_v23, %v9228_v15  ;;  %v19280_v14 = vld [vmem:[#allocation114_spill] sm:$0xff]  ;;  %7821 = vset.pattern.permute.xlu1 %v18857_v27 }
 0x320   : > { %vm11357_vm10 = vmor %vm19258_vm8, %vm19257_vm12  ;;  %19262 = vst [vmem:[#allocation64_spill] sm:$0xff] %v11369_v10  ;;  %vm19271_vm1 = vcmp.gt.f32.partialorder %v19240_v13, %v9232_v44  ;;  %vm19274_vm7 = vcmp.gt.f32.partialorder %v19248_v60, %v9436_v11  ;;  %vm19286_vm8 = vcmp.lt.s32.totalorder %v19223_v19, %v18983_v42  ;;  %4961 = vperm.xlu1 %7821, %v19137_v30   ;;  %v19298_v30 = vld [vmem:[#allocation79_spill] sm:$0xff]  ;;  %v19416_v51 = vmov 0 }
 0x321   : > { %19263 = vst [vmem:[#allocation67_spill] sm:$0xff] %v11375_v26  ;;  %19264 = vst [vmem:[#allocation153_spill] sm:$0xff] %v11381_v16  ;;  %v11397_v26 = vpop.permute.xlu1 %920  ;;  %v19272_v16 = vmov 0  ;;  %v11413_v10 = vsel %vm19274_vm7, 1.0, %v18893_v32  ;;  %v7378_v4 = vsel %vm11357_vm10, 1.0, %v18893_v32 }
 0x322   : > { %vm11391_vm13 = vmor %vm19266_vm15, %vm19265_vm2  ;;  %19269 = vst [vmem:[#allocation154_spill] sm:$0xff] %v11395_v31  ;;  %vm19276_vm2 = vcmp.eq.f32.partialorder %v19219_v23, %v9232_v44 }
 0x323   : > { %19270 = vst [vmem:[#allocation155_spill] sm:$0xff] %v11397_v26  ;;  %vm11405_vm0 = vmor %vm19271_vm1, %vm6519_vm11  ;;  %vm19277_vm11 = vcmp.gt.f32.partialorder %v19219_v23, %v9232_v44  ;;  %v11434_v26 = vadd.f32 %v19280_v14, %v7070_v36  ;;  %vm3732_vm1 = vcmp.eq.f32.partialorder %v19248_v60, %v9452_v8  ;;  %v19285_v36 = vld [vmem:[#allocation108_spill] sm:$0xff]  ;;  %v7198_v14 = vsel %vm11239_vm3, 1.0, %v18893_v32  ;;  %v19382_v23 = vld [vmem:[#allocation26_spill] sm:$0xff] }
 0x324   : > { %v19273_v16 = vsel %vm11405_vm0, 4294967295, %v19272_v16  ;;  %19275 = vst [vmem:[#allocation156_spill] sm:$0xff] %v11413_v10  ;;  %vm11425_vm15 = vmor %vm19277_vm11, %vm19276_vm2  ;;  %v19281_v10 = vld [vmem:[#allocation115_spill] sm:$0xff]  ;;  %vm19282_vm2 = vcmp.lt.s32.totalorder %v10014_v45, %v9462_v39  ;;  %vm19297_vm3 = vcmp.ne.s32.totalorder %v19223_v19, %v18983_v42  ;;  %7822 = vset.pattern.permute.xlu1 %v18861_v54  ;;  %v3337_v35 = vadd.f32 %v19338_v47, %v7198_v14  ;;  %v19348_v47 = vld [vmem:[#allocation96_spill] sm:$0xff] }
 0x325   : > { %v11437_v56 = vadd.f32 %v19281_v10, %v7134_v40  ;;  %vm11447_vm11 = vmand %vm2897_vm5, %vm19282_vm2  ;;  %v19287_v40 = vld [vmem:[#allocation104_spill] sm:$0xff]  ;;  %vm19289_vm5 = vcmp.ne.s32.totalorder %v9978_v2, %v9488_v28  ;;  %v11531_v31 = vpop.permute.xlu1 %1177  ;;  %v19306_v19 = vld [vmem:[#allocation87_spill] sm:$0xff]  ;;  %4771 = vperm.xlu1 %7822, %v19166_v59   ;;  %v11698_v37 = vadd.f32 %v11026_v49, %v11434_v26  ;;  %v19372_v26 = vmov 0 }
 0x326   : > { %vm19288_vm12 = vcmp.eq.f32.partialorder %v19287_v40, %v9220_v62  ;;  %vm11472_vm2 = vmand %vm19289_vm5, %vm11269_vm9  ;;  %vm19292_vm4 = vcmp.gt.f32.partialorder %v19287_v40, %v9220_v62  ;;  %vm19299_vm5 = vnez %v19298_v30  ;;  %19305 = vst [vmem:[#allocation114_spill] sm:$0xff] %v11531_v31  ;;  %v19334_v59 = vld [vmem:[#allocation75_spill] sm:$0xff] }
 0x327   : > { %vm4454_vm0 = vmand %vm19288_vm12, %vm19286_vm8  ;;  %vm2896_vm8 = vcmp.eq.f32.partialorder %v19098_v22, %v9446_v5  ;;  %v7393_v2 = vsel %vm19299_vm5, 1.0, %v18893_v32  ;;  %v19370_v49 = vld [vmem:[#allocation83_spill] sm:$0xff] }
 0x328   : > { %vm4470_vm7 = vmor %vm19292_vm4, %vm4454_vm0  ;;  %vm19294_vm0 = vcmp.ne.s32.totalorder %v9984_v24, %v9591_v48  ;;  %v7314_v24 = vsel %vm11333_vm6, 1.0, %v18893_v32  ;;  %vm19308_vm6 = vcmp.eq.f32.partialorder %v19287_v40, %v9228_v15  ;;  %v5400_v46 = vadd.f32 %v11341_v3, %v7393_v2  ;;  %v19349_v3 = vld [vmem:[#allocation120_spill] sm:$0xff] }
 0x329   : > { %vm11497_vm12 = vmand %vm19294_vm0, %vm11297_vm14  ;;  %vm19300_vm14 = vcmp.lt.s32.totalorder %v10025_v41, %v9488_v28  ;;  %v11658_v14 = vpop.permute.xlu1 %1669 }
 0x32a   : > { %vm4486_vm9 = vmand %vm19297_vm3, %vm4470_vm7  ;;  %vm19303_vm7 = vcmp.eq.f32.partialorder %v19287_v40, %v9224_v34  ;;  %vm19304_vm3 = vcmp.gt.f32.partialorder %v19287_v40, %v9224_v34  ;;  %19350 = vst [vmem:[#allocation87_spill] sm:$0xff] %v11658_v14 }
 0x32b   : > { %vm11517_vm0 = vmand %vm3732_vm1, %vm19300_vm14  ;;  %v7313_v30 = vsel %vm4486_vm9, 1.0, %v18893_v32  ;;  %vm3726_vm1 = vcmp.eq.f32.partialorder %v19306_v19, %v9452_v8  ;;  %vm19309_vm9 = vcmp.gt.f32.partialorder %v19287_v40, %v9228_v15 }
 0x32c   : > { %vm5202_vm5 = vmor %vm19304_vm3, %vm19303_vm7  ;;  %v11538_v18 = vadd.f32 %v7314_v24, %v7313_v30  ;;  %vm19310_vm7 = vcmp.eq.f32.partialorder %v19214_v1, %v9446_v5  ;;  %vm19311_vm3 = vcmp.gt.f32.partialorder %v19214_v1, %v9446_v5  ;;  %v19314_v24 = vld [vmem:[#allocation89_spill] sm:$0xff]  ;;  %v7442_v30 = vsel %vm11391_vm13, 1.0, %v18893_v32 }
 0x32d   : > { %v7377_v9 = vsel %vm5202_vm5, 1.0, %v18893_v32  ;;  %vm5742_vm14 = vmor %vm19309_vm9, %vm19308_vm6  ;;  %vm19316_vm5 = vcmp.eq.f32.partialorder %v19287_v40, %v9232_v44  ;;  %vm19317_vm6 = vcmp.gt.f32.partialorder %v19287_v40, %v9232_v44  ;;  %v11793_v10 = vpop.permute.xlu1 %935 }
 0x32e   : > { %19307 = vst [vmem:[#allocation115_spill] sm:$0xff] %v11538_v18  ;;  %vm11553_vm4 = vmor %vm19311_vm3, %vm19310_vm7  ;;  %v11562_v18 = vadd.f32 %v7378_v4, %v7377_v9  ;;  %v7441_v31 = vsel %vm5742_vm14, 1.0, %v18893_v32  ;;  %vm19318_vm7 = vcmp.eq.f32.partialorder %v19214_v1, %v9452_v8  ;;  %vm19319_vm3 = vcmp.gt.f32.partialorder %v19214_v1, %v9452_v8 }
 0x32f   : > { %vm6282_vm9 = vmor %vm19317_vm6, %vm19316_vm5  ;;  %vm19322_vm14 = vcmp.lt.s32.totalorder %v10044_v6, %v9462_v39  ;;  %v7506_v1 = vsel %vm11425_vm15, 1.0, %v18893_v32  ;;  %v11597_v40 = vadd.f32 %v7442_v30, %v7441_v31  ;;  %vm19327_vm6 = vcmp.eq.f32.partialorder %v19293_v12, %v9228_v15  ;;  %v19336_v30 = vld [vmem:[#allocation117_spill] sm:$0xff]  ;;  %19390 = vst [vmem:[#allocation70_spill] sm:$0xff] %v11793_v10 }
 0x330   : > { %19315 = vst [vmem:[#allocation104_spill] sm:$0xff] %v11562_v18  ;;  %vm11578_vm13 = vmor %vm19319_vm3, %vm19318_vm7  ;;  %v7505_v18 = vsel %vm6282_vm9, 1.0, %v18893_v32  ;;  %vm19331_vm3 = vcmp.lt.s32.totalorder %v19246_v0, %v9488_v28  ;;  %v19399_v10 = vmov 0  ;;  %v11862_v2 = vsel %vm11553_vm4, 1.0, %v18893_v32 }
 0x331   : > { %vm11588_vm10 = vmand %vm2896_vm8, %vm19322_vm14  ;;  %19326 = vst [vmem:[#allocation77_spill] sm:$0xff] %v11597_v40  ;;  %vm19328_vm8 = vcmp.gt.f32.partialorder %v19293_v12, %v9228_v15  ;;  %v11623_v13 = vadd.f32 %v7506_v1, %v7505_v18  ;;  %vm19337_vm14 = vnez %v19336_v30  ;;  %v19343_v18 = vld [vmem:[#allocation99_spill] sm:$0xff]  ;;  %v19441_v4 = vmov 0 }
 0x332   : > { %vm11607_vm7 = vmor %vm19328_vm8, %vm19327_vm6  ;;  %v7395_v40 = vsel %vm19337_vm14, 1.0, %v18893_v32  ;;  %vm19339_vm6 = vcmp.eq.f32.partialorder %v19293_v12, %v9232_v44  ;;  %vm19345_vm14 = vcmp.eq.f32.partialorder %v19314_v24, %v9441_v58  ;;  %v19449_v9 = vmov 0 }
 0x333   : > { %v19330_v55 = vsel %vm11607_vm7, 4294967295, %v19329_v55  ;;  %vm11617_vm15 = vmand %vm3726_vm1, %vm19331_vm3  ;;  %19335 = vst [vmem:[#allocation79_spill] sm:$0xff] %v11623_v13  ;;  %vm19340_vm1 = vcmp.gt.f32.partialorder %v19293_v12, %v9232_v44  ;;  %vm19344_vm3 = vcmp.lt.s32.totalorder %v19343_v18, %v9591_v48  ;;  %v19357_v13 = vmov 0 }
 0x334   : > { %vm11636_vm8 = vmor %vm19340_vm1, %vm19339_vm6  ;;  %vm19355_vm1 = vcmp.lt.s32.totalorder %v10047_v38, %v9591_v48  ;;  %vm19356_vm6 = vcmp.eq.f32.partialorder %v19325_v43, %v9441_v58  ;;  %vm19366_vm7 = vcmp.eq.f32.partialorder %v19334_v59, %v9441_v58 }
 0x335   : > { %v19342_v20 = vsel %vm11636_vm8, 4294967295, %v19341_v20  ;;  %vm11646_vm9 = vmand %vm19345_vm14, %vm19344_vm3  ;;  %vm19351_vm3 = vcmp.gt.f32.partialorder %v19248_v60, %v9441_v58  ;;  %vm19353_vm14 = vcmp.gt.f32.partialorder %v19248_v60, %v9446_v5  ;;  %vm19375_vm8 = vcmp.eq.f32.partialorder %v19348_v47, %v9452_v8 }
 0x336   : > { %v11664_v1 = vsel %vm19351_vm3, 1.0, %v18893_v32  ;;  %v11670_v30 = vsel %vm19353_vm14, 1.0, %v18893_v32  ;;  %vm11680_vm5 = vmand %vm19356_vm6, %vm19355_vm1  ;;  %vm19361_vm3 = vnez %v19360_v17  ;;  %vm19363_vm14 = vnez %v19273_v16 }
 0x337   : > { %19352 = vst [vmem:[#allocation89_spill] sm:$0xff] %v11664_v1  ;;  %19354 = vst [vmem:[#allocation73_spill] sm:$0xff] %v11670_v30  ;;  %v19358_v13 = vsel %vm11680_vm5, 4294967295, %v19357_v13  ;;  %v11684_v1 = vadd.f32 %v7395_v40, %v5400_v46  ;;  %v11689_v54 = vsel %vm19361_vm3, 1.0, %v18893_v32  ;;  %v11694_v30 = vsel %vm19363_vm14, 1.0, %v18893_v32  ;;  %v19383_v40 = vld [vmem:[#allocation45_spill] sm:$0xff] }
 0x338   : > { %19362 = vst [vmem:[#allocation117_spill] sm:$0xff] %v11689_v54  ;;  %19364 = vst [vmem:[#allocation116_spill] sm:$0xff] %v11694_v30  ;;  %vm19365_vm1 = vcmp.lt.s32.totalorder %v10050_v7, %v9591_v48  ;;  %v19367_v17 = vmov 0  ;;  %v19369_v16 = vmov 1   ;;  %v11715_v46 = vadd.f32 %v11049_v25, %v11437_v56 }
 0x339   : > { %19359 = vst [vmem:[#allocation75_spill] sm:$0xff] %v11684_v1  ;;  %vm11708_vm3 = vmand %vm19366_vm7, %vm19365_vm1  ;;  %7823 = vset.pattern.permute.xlu1 %v19369_v16  ;;  %vm19371_vm7 = vcmp.gt.f32.partialorder %v19227_v50, %v9446_v5  ;;  %vm19374_vm6 = vcmp.lt.s32.totalorder %v19285_v36, %v9488_v28  ;;  %v19380_v56 = vmov 0  ;;  %vm18587_vm14 = vcmp.lt.s32.totalorder %v19382_v23, %v18983_v42  ;;  %v19385_v1 = vld [vmem:[#allocation112_spill] sm:$0xff] }
 0x33a   : > { %v19368_v17 = vsel %vm11708_vm3, 4294967295, %v19367_v17  ;;  %vm11728_vm1 = vmor %vm19371_vm7, %vm11447_vm11  ;;  %vm19378_vm11 = vcmp.eq.f32.partialorder %v19098_v22, %v9452_v8  ;;  %vm19379_vm7 = vcmp.gt.f32.partialorder %v19098_v22, %v9452_v8  ;;  %4581 = vperm.xlu1 %7823, %v19383_v40   ;;  %v11760_v30 = vadd.f32 %v11054_v57, %v3337_v35  ;;  %v19388_v57 = vld [vmem:[#allocation123_spill] sm:$0xff] }
 0x33b   : > { %v19373_v26 = vsel %vm11728_vm1, 4294967295, %v19372_v26  ;;  %vm11742_vm5 = vmand %vm19375_vm8, %vm19374_vm6  ;;  %v11765_v54 = vsel %vm11472_vm2, 1.0, %v18893_v32  ;;  %v11782_v35 = vsel %vm11497_vm12, 1.0, %v18893_v32  ;;  %vm18589_vm8 = vcmp.ne.s32.totalorder %v19382_v23, %v18983_v42  ;;  %v19413_v23 = vld [vmem:[#allocation78_spill] sm:$0xff] }
 0x33c   : > { %vm11752_vm3 = vmor %vm19379_vm7, %vm19378_vm11  ;;  %19384 = vst [vmem:[#allocation99_spill] sm:$0xff] %v11765_v54  ;;  %vm19386_vm11 = vcmp.eq.f32.partialorder %v19385_v1, %v9220_v62  ;;  %v19391_v54 = vld [vmem:[#allocation80_spill] sm:$0xff]  ;;  %vm19392_vm2 = vcmp.eq.f32.partialorder %v19370_v49, %v9441_v58  ;;  %vm19393_vm6 = vcmp.gt.f32.partialorder %v19370_v49, %v9441_v58 }
 0x33d   : > { %v19381_v56 = vsel %vm11752_vm3, 4294967295, %v19380_v56  ;;  %vm4460_vm7 = vmand %vm19386_vm11, %vm18587_vm14  ;;  %19387 = vst [vmem:[#allocation96_spill] sm:$0xff] %v11782_v35  ;;  %vm19389_vm11 = vcmp.gt.f32.partialorder %v19385_v1, %v9220_v62  ;;  %vm19396_vm3 = vcmp.gt.f32.partialorder %v19248_v60, %v9452_v8  ;;  %v19522_v35 = vmov 0 }
 0x33e   : > { %vm4476_vm14 = vmor %vm19389_vm11, %vm4460_vm7  ;;  %vm19406_vm11 = vcmp.gt.f32.partialorder %v19385_v1, %v9224_v34  ;;  %7824 = vset.pattern.permute.xlu1 %v18857_v27  ;;  %19410 = vst [vmem:[#allocation80_spill] sm:$0xff] %v11862_v2  ;;  %v19531_v60 = vmov 0 }
 0x33f   : > { %vm11805_vm1 = vmor %vm19393_vm6, %vm19392_vm2  ;;  %vm19405_vm6 = vcmp.eq.f32.partialorder %v19385_v1, %v9224_v34  ;;  %4965 = vperm.xlu1 %7824, %v19072_v21  }
 0x340   : > { %vm11818_vm12 = vmor %vm19396_vm3, %vm11517_vm0  ;;  %vm19415_vm0 = vcmp.gt.f32.partialorder %v19385_v1, %v9228_v15 }
 0x341   : > { %vm11827_vm2 = vmand %vm18589_vm8, %vm4476_vm14  ;;  %vm19402_vm14 = vcmp.gt.f32.partialorder %v19314_v24, %v9441_v58 }
 0x342   : > { %v19400_v10 = vsel %vm11827_vm2, 4294967295, %v19399_v10  ;;  %vm11844_vm8 = vmor %vm19402_vm14, %vm11646_vm9  ;;  %vm19411_vm14 = vcmp.gt.f32.partialorder %v19325_v43, %v9436_v11  ;;  %vm19421_vm9 = vcmp.eq.f32.partialorder %v19391_v54, %v9232_v44  ;;  %vm19457_vm2 = vcmp.gt.f32.partialorder %v19348_v47, %v9452_v8  ;;  %v19464_v47 = vld [vmem:[#allocation72_spill] sm:$0xff] }
 0x343   : > { %19401 = vst [vmem:[#allocation45_spill] sm:$0xff] %v19400_v10  ;;  %vm11854_vm7 = vmor %vm19406_vm11, %vm19405_vm6  ;;  %v11870_v10 = vsel %vm19411_vm14, 1.0, %v18893_v32  ;;  %vm19414_vm6 = vcmp.eq.f32.partialorder %v19385_v1, %v9228_v15  ;;  %vm19419_vm14 = vcmp.gt.f32.partialorder %v19293_v12, %v9220_v62  ;;  %v11917_v12 = vsel %vm11578_vm13, 1.0, %v18893_v32  ;;  %7826 = vset.pattern.permute.xlu1 %v18859_v29 }
 0x344   : > { %v19408_v63 = vsel %vm11854_vm7, 4294967295, %v19407_v63  ;;  %19412 = vst [vmem:[#allocation157_spill] sm:$0xff] %v11870_v10  ;;  %vm11880_vm4 = vmor %vm19415_vm0, %vm19414_vm6  ;;  %v11889_v2 = vsel %vm19419_vm14, 1.0, %v18893_v32  ;;  %vm19422_vm0 = vcmp.gt.f32.partialorder %v19391_v54, %v9232_v44  ;;  %vm19425_vm14 = vcmp.gt.f32.partialorder %v19306_v19, %v9452_v8  ;;  %v19555_v10 = vld [vmem:[#allocation55_spill] sm:$0xff] }
 0x345   : > { %19409 = vst [vmem:[#allocation112_spill] sm:$0xff] %v19408_v63  ;;  %v19417_v51 = vsel %vm11880_vm4, 4294967295, %v19416_v51  ;;  %19420 = vst [vmem:[#allocation158_spill] sm:$0xff] %v11889_v2  ;;  %vm19433_vm13 = vcmp.gt.f32.partialorder %v19385_v1, %v9232_v44  ;;  %v19434_v19 = vmov 0  ;;  %vm19447_vm7 = vnez %v19358_v13  ;;  %v19501_v2 = vld [vmem:[#allocation60_spill] sm:$0xff] }
 0x346   : > { %19418 = vst [vmem:[#allocation78_spill] sm:$0xff] %v19417_v51  ;;  %vm11899_vm6 = vmor %vm19422_vm0, %vm19421_vm9  ;;  %vm19429_vm0 = vcmp.gt.f32.partialorder %v19098_v22, %v9446_v5  ;;  %vm19437_vm9 = vnez %v19330_v55  ;;  %v19445_v55 = vmov 0  ;;  %v19475_v51 = vld [vmem:[#allocation44_spill] sm:$0xff] }
 0x347   : > { %vm11910_vm4 = vmor %vm19425_vm14, %vm11617_vm15  ;;  %19428 = vst [vmem:[#allocation159_spill] sm:$0xff] %v11917_v12  ;;  %vm19432_vm14 = vcmp.eq.f32.partialorder %v19385_v1, %v9232_v44  ;;  %v11945_v22 = vsel %vm19437_vm9, 1.0, %v18893_v32  ;;  %v19453_v1 = vld [vmem:[#allocation124_spill] sm:$0xff]  ;;  %vm19460_vm9 = vcmp.lt.s32.totalorder %v19349_v3, %v9462_v39  ;;  %4375 = vperm.xlu1 %7826, %v19475_v51  }
 0x348   : > { %vm11926_vm3 = vmor %vm19429_vm0, %vm11588_vm10  ;;  %19438 = vst [vmem:[#allocation161_spill] sm:$0xff] %v11945_v22  ;;  %vm19439_vm10 = vcmp.eq.f32.partialorder %v19370_v49, %v9446_v5  ;;  %vm19440_vm0 = vcmp.gt.f32.partialorder %v19370_v49, %v9446_v5  ;;  %v19484_v22 = vmov 0 }
 0x349   : > { %vm11938_vm11 = vmor %vm19433_vm13, %vm19432_vm14  ;;  %vm19443_vm14 = vcmp.eq.f32.partialorder %v19370_v49, %v9452_v8  ;;  %vm19444_vm13 = vcmp.gt.f32.partialorder %v19370_v49, %v9452_v8  ;;  %v11996_v49 = vpop.permute.xlu1 %1435 }
 0x34a   : > { %v19435_v19 = vsel %vm11938_vm11, 4294967295, %v19434_v19  ;;  %vm11953_vm15 = vmor %vm19440_vm0, %vm19439_vm10  ;;  %vm19448_vm10 = vcmp.gt.f32.partialorder %v19325_v43, %v9441_v58  ;;  %19454 = vst [vmem:[#allocation163_spill] sm:$0xff] %v11996_v49  ;;  %v7073_v49 = vsel %vm11805_vm1, 1.0, %v18893_v32 }
 0x34b   : > { %19436 = vst [vmem:[#allocation160_spill] sm:$0xff] %v19435_v19  ;;  %v19442_v4 = vsel %vm11953_vm15, 4294967295, %v19441_v4  ;;  %vm11963_vm11 = vmor %vm19444_vm13, %vm19443_vm14  ;;  %vm19455_vm13 = vnez %v19342_v20  ;;  %v19469_v19 = vmov 0  ;;  %v19497_v20 = vmov 0  ;;  %7827 = vset.pattern.permute.xlu1 %v19369_v16 }
 0x34c   : > { %v19446_v55 = vsel %vm11963_vm11, 4294967295, %v19445_v55  ;;  %vm11974_vm0 = vmor %vm19448_vm10, %vm19447_vm7  ;;  %vm19451_vm11 = vcmp.gt.f32.partialorder %v19334_v59, %v9436_v11  ;;  %v12001_v12 = vsel %vm19455_vm13, 1.0, %v18893_v32  ;;  %vm19472_vm7 = vcmp.eq.f32.partialorder %v19453_v1, %v9452_v8  ;;  %4585 = vperm.xlu1 %7827, %v19475_v51  }
 0x34d   : > { %v19450_v9 = vsel %vm11974_vm0, 4294967295, %v19449_v9  ;;  %v11990_v13 = vsel %vm19451_vm11, 1.0, %v18893_v32  ;;  %19456 = vst [vmem:[#allocation164_spill] sm:$0xff] %v12001_v12  ;;  %vm12012_vm14 = vmor %vm19457_vm2, %vm11742_vm5  ;;  %vm19461_vm11 = vcmp.eq.f32.partialorder %v19413_v23, %v9446_v5  ;;  %vm19465_vm2 = vcmp.gt.f32.partialorder %v19391_v54, %v9220_v62 }
 0x34e   : > { %19452 = vst [vmem:[#allocation162_spill] sm:$0xff] %v11990_v13  ;;  %v19458_v13 = vmov 0  ;;  %vm12026_vm10 = vmand %vm19461_vm11, %vm19460_vm9  ;;  %v12036_v25 = vsel %vm19465_vm2, 1.0, %v18893_v32  ;;  %vm19467_vm11 = vnez %v19368_v17  ;;  %vm19468_vm5 = vcmp.gt.f32.partialorder %v19334_v59, %v9441_v58  ;;  %v19471_v17 = vld [vmem:[#allocation81_spill] sm:$0xff] }
 0x34f   : > { %v19459_v13 = vsel %vm12012_vm14, 4294967295, %v19458_v13  ;;  %19466 = vst [vmem:[#allocation165_spill] sm:$0xff] %v12036_v25  ;;  %vm12049_vm14 = vmor %vm19468_vm5, %vm19467_vm11  ;;  %v19474_v25 = vld [vmem:[#allocation29_spill] sm:$0xff]  ;;  %vm19476_vm11 = vcmp.gt.f32.partialorder %v19391_v54, %v9224_v34  ;;  %vm19478_vm2 = vnez %v19373_v26  ;;  %vm19479_vm13 = vcmp.ne.s32.totalorder %v10014_v45, %v9462_v39  ;;  %v19493_v45 = vld [vmem:[#allocation38_spill] sm:$0xff] }
 0x350   : > { %v19470_v19 = vsel %vm12049_vm14, 4294967295, %v19469_v19  ;;  %vm19473_vm14 = vcmp.gt.f32.partialorder %v19453_v1, %v9452_v8  ;;  %v12083_v63 = vsel %vm19476_vm11, 1.0, %v18893_v32  ;;  %vm12090_vm5 = vmand %vm19479_vm13, %vm19478_vm2  ;;  %v19480_v12 = vmov 0  ;;  %v12155_v1 = vpop.permute.xlu1 %1681 }
 0x351   : > { %vm3612_vm0 = vmor %vm19473_vm14, %vm19472_vm7  ;;  %19477 = vst [vmem:[#allocation81_spill] sm:$0xff] %v12083_v63  ;;  %v19481_v12 = vsel %vm12090_vm5, 4294967295, %v19480_v12  ;;  %vm19482_vm14 = vcmp.eq.f32.partialorder %v19227_v50, %v9452_v8  ;;  %vm19483_vm7 = vcmp.gt.f32.partialorder %v19227_v50, %v9452_v8  ;;  %vm19486_vm11 = vnez %v19381_v56 }
 0x352   : > { %vm12100_vm9 = vmor %vm19483_vm7, %vm19482_vm14  ;;  %v7238_v54 = vsel %vm19486_vm11, 1.0, %v18893_v32  ;;  %vm19487_vm2 = vcmp.gt.f32.partialorder %v19413_v23, %v9436_v11  ;;  %vm19489_vm14 = vcmp.gt.f32.partialorder %v19413_v23, %v9446_v5  ;;  %v7237_v56 = vsel %vm3612_vm0, 1.0, %v18893_v32  ;;  %19503 = vst [vmem:[#allocation60_spill] sm:$0xff] %v12155_v1 }
 0x353   : > { %v19485_v22 = vsel %vm12100_vm9, 4294967295, %v19484_v22  ;;  %v12113_v26 = vsel %vm19487_vm2, 1.0, %v18893_v32  ;;  %vm12120_vm7 = vmor %vm19489_vm14, %vm12026_vm10  ;;  %vm19492_vm11 = vcmp.lt.s32.totalorder %v19474_v25, %v18983_v42  ;;  %vm19494_vm13 = vcmp.eq.f32.partialorder %v19493_v45, %v9220_v62 }
 0x354   : > { %19488 = vst [vmem:[#allocation166_spill] sm:$0xff] %v12113_v26  ;;  %vm4463_vm9 = vmand %vm19494_vm13, %vm19492_vm11  ;;  %vm19495_vm2 = vcmp.eq.f32.partialorder %v19314_v24, %v9446_v5  ;;  %vm19496_vm5 = vcmp.gt.f32.partialorder %v19314_v24, %v9446_v5  ;;  %vm19499_vm0 = vcmp.gt.f32.partialorder %v19413_v23, %v9441_v58  ;;  %v3675_v26 = vadd.f32 %v7237_v56, %v19501_v2  ;;  %v12323_v21 = vpop.permute.xlu1 %930 }
 0x355   : > { %vm12137_vm15 = vmor %vm19496_vm5, %vm19495_vm2  ;;  %v12145_v63 = vsel %vm19499_vm0, 1.0, %v18893_v32  ;;  %vm19502_vm5 = vcmp.gt.f32.partialorder %v19493_v45, %v9220_v62  ;;  %vm19504_vm11 = vcmp.eq.f32.partialorder %v19314_v24, %v9452_v8  ;;  %vm19505_vm2 = vcmp.gt.f32.partialorder %v19314_v24, %v9452_v8  ;;  %19557 = vst [vmem:[#allocation55_spill] sm:$0xff] %v12323_v21 }
 0x356   : > { %v19498_v20 = vsel %vm12137_vm15, 4294967295, %v19497_v20  ;;  %19500 = vst [vmem:[#allocation38_spill] sm:$0xff] %v12145_v63  ;;  %vm4479_vm14 = vmor %vm19502_vm5, %vm4463_vm9  ;;  %v19506_v63 = vmov 0  ;;  %vm19508_vm13 = vcmp.lt.s32.totalorder %v19388_v57, %v9488_v28  ;;  %vm19509_vm9 = vcmp.eq.f32.partialorder %v19471_v17, %v9452_v8 }
 0x357   : > { %vm12163_vm0 = vmor %vm19505_vm2, %vm19504_vm11  ;;  %v19510_v2 = vmov 0  ;;  %vm19512_vm15 = vcmp.ne.s32.totalorder %v19474_v25, %v18983_v42  ;;  %v19513_v56 = vmov 0  ;;  %vm1708_vm2 = vcmp.gt.f32.partialorder %v11658_v14, %v9436_v11  ;;  %v19540_v25 = vld [vmem:[#allocation32_spill] sm:$0xff] }
 0x358   : > { %v19507_v63 = vsel %vm12163_vm0, 4294967295, %v19506_v63  ;;  %vm12175_vm5 = vmand %vm19509_vm9, %vm19508_vm13  ;;  %vm2377_vm10 = vcmp.gt.f32.partialorder %v11658_v14, %v9441_v58  ;;  %vm3046_vm0 = vcmp.gt.f32.partialorder %v11658_v14, %v9446_v5  ;;  %v12208_v14 = vadd.f32 %v7238_v54, %v3675_v26  ;;  %v19528_v54 = vld [vmem:[#allocation84_spill] sm:$0xff] }
 0x359   : > { %v19511_v2 = vsel %vm12175_vm5, 4294967295, %v19510_v2  ;;  %vm12182_vm11 = vmand %vm19512_vm15, %vm4479_vm14  ;;  %vm19516_vm15 = vcmp.ne.s32.totalorder %v10025_v41, %v9488_v28  ;;  %vm19520_vm1 = vcmp.eq.f32.partialorder %v19493_v45, %v9224_v34  ;;  %vm19530_vm14 = vcmp.gt.f32.partialorder %v19493_v45, %v9228_v15 }
 0x35a   : > { %v19514_v56 = vsel %vm12182_vm11, 4294967295, %v19513_v56  ;;  %vm12200_vm13 = vmand %vm19516_vm15, %vm11818_vm12  ;;  %19519 = vst [vmem:[#allocation168_spill] sm:$0xff] %v12208_v14  ;;  %vm19521_vm11 = vcmp.gt.f32.partialorder %v19493_v45, %v9224_v34  ;;  %vm19525_vm12 = vcmp.ne.s32.totalorder %v19343_v18, %v9591_v48  ;;  %v7062_v18 = vsel %vm1708_vm2, 1.0, %v18893_v32  ;;  %v19541_v14 = vld [vmem:[#allocation43_spill] sm:$0xff] }
 0x35b   : > { %19515 = vst [vmem:[#allocation167_spill] sm:$0xff] %v19514_v56  ;;  %vm12216_vm5 = vmor %vm19521_vm11, %vm19520_vm1  ;;  %vm19529_vm1 = vcmp.eq.f32.partialorder %v19493_v45, %v9228_v15  ;;  %v7126_v26 = vsel %vm2377_vm10, 1.0, %v18893_v32  ;;  %v7190_v41 = vsel %vm3046_vm0, 1.0, %v18893_v32  ;;  %vm18614_vm10 = vcmp.lt.s32.totalorder %v19540_v25, %v18983_v42  ;;  %v19653_v56 = vld [vmem:[#allocation119_spill] sm:$0xff] }
 0x35c   : > { %v19523_v35 = vsel %vm12216_vm5, 4294967295, %v19522_v35  ;;  %vm12226_vm15 = vmand %vm19525_vm12, %vm11844_vm8  ;;  %vm19535_vm12 = vcmp.eq.f32.partialorder %v19493_v45, %v9232_v44  ;;  %v12265_v1 = vadd.f32 %v7062_v18, %v10980_v52  ;;  %v12271_v16 = vadd.f32 %v7190_v41, %v19541_v14  ;;  %v19671_v52 = vld [vmem:[#allocation88_spill] sm:$0xff] }
 0x35d   : > { %19524 = vst [vmem:[#allocation169_spill] sm:$0xff] %v19523_v35  ;;  %vm12240_vm5 = vmor %vm19530_vm14, %vm19529_vm1  ;;  %v12248_v35 = vpop.f32.mrb[14].mxu1  ;;  %vm19536_vm14 = vcmp.gt.f32.partialorder %v19493_v45, %v9232_v44  ;;  %v19543_v45 = vld [vmem:[#allocation82_spill] sm:$0xff]  ;;  %vm19547_vm2 = vcmp.ne.s32.totalorder %v19246_v0, %v9488_v28  ;;  %v12327_v31 = vadd.f32 %v7073_v49, %v11698_v37  ;;  %vm19564_vm8 = vcmp.eq.f32.partialorder %v19325_v43, %v9446_v5 }
 0x35e   : > { %v19532_v60 = vsel %vm12240_vm5, 4294967295, %v19531_v60  ;;  %19534 = vst [vmem:[#allocation170_spill] sm:$0xff] %v12248_v35  ;;  %vm12258_vm1 = vmor %vm19536_vm14, %vm19535_vm12  ;;  %v12268_v35 = vadd.f32 %v7126_v26, %v10983_v61  ;;  %v12273_v51 = vpop.f32.mrb[15].mxu1  ;;  %vm19544_vm0 = vnez %v19543_v45  ;;  %vm19550_vm14 = vcmp.ne.s32.totalorder %v10044_v6, %v9462_v39 }
 0x35f   : > { %19533 = vst [vmem:[#allocation84_spill] sm:$0xff] %v19532_v60  ;;  %v19537_v60 = vmov 0  ;;  %19542 = vst [vmem:[#allocation43_spill] sm:$0xff] %v12273_v51  ;;  %v12278_v27 = vsel %vm19544_vm0, 1.0, %v18893_v32  ;;  %4613 = vperm.xlu0 %7845, %v12273_v51   ;;  %vm19565_vm11 = vcmp.gt.f32.partialorder %v19325_v43, %v9446_v5  ;;  %vm19569_vm9 = vcmp.gt.f32.partialorder %v19325_v43, %v9452_v8  ;;  %v19736_v51 = vld [vmem:[#allocation131_spill] sm:$0xff] }
 0x360   : > { %v19538_v60 = vsel %vm12258_vm1, 4294967295, %v19537_v60  ;;  %19545 = vst [vmem:[#allocation82_spill] sm:$0xff] %v12278_v27  ;;  %vm12290_vm12 = vmand %vm19547_vm2, %vm11910_vm4  ;;  %vm19554_vm4 = vcmp.gt.f32.partialorder %v19471_v17, %v9441_v58  ;;  %vm19560_vm2 = vnez %v19450_v9  ;;  %v19570_v49 = vmov 0  ;;  %v19737_v27 = vld [vmem:[#allocation151_spill] sm:$0xff] }
 0x361   : > { %19539 = vst [vmem:[#allocation171_spill] sm:$0xff] %v19538_v60  ;;  %v12283_v60 = vsel %vm11899_vm6, 1.0, %v18893_v32  ;;  %vm12299_vm0 = vmand %vm19550_vm14, %vm11926_vm3  ;;  %vm19553_vm6 = vcmp.gt.f32.partialorder %v19471_v17, %v9436_v11  ;;  %v12313_v14 = vsel %vm19554_vm4, 1.0, %v18893_v32  ;;  %vm19556_vm3 = vcmp.eq.f32.partialorder %v19555_v10, %v9220_v62 }
 0x362   : > { %19546 = vst [vmem:[#allocation172_spill] sm:$0xff] %v12283_v60  ;;  %v12307_v61 = vsel %vm19553_vm6, 1.0, %v18893_v32  ;;  %vm4466_vm14 = vmand %vm19556_vm3, %vm18614_vm10  ;;  %vm19558_vm6 = vnez %v19442_v4  ;;  %vm19559_vm4 = vnez %v19446_v55  ;;  %vm19561_vm3 = vcmp.ne.s32.totalorder %v10047_v38, %v9591_v48  ;;  %v19580_v55 = vld [vmem:[#allocation113_spill] sm:$0xff] }
 0x363   : > { %v7137_v18 = vsel %vm19558_vm6, 1.0, %v18893_v32  ;;  %v7201_v26 = vsel %vm19559_vm4, 1.0, %v18893_v32  ;;  %vm12340_vm10 = vmand %vm19561_vm3, %vm19560_vm2  ;;  %vm19568_vm4 = vcmp.eq.f32.partialorder %v19325_v43, %v9452_v8  ;;  %vm19572_vm1 = vcmp.gt.f32.partialorder %v19555_v10, %v9220_v62  ;;  %7850 = vset.pattern.permute.xlu0 %v18859_v29 }
 0x364   : > { %vm12350_vm6 = vmor %vm19565_vm11, %vm19564_vm8  ;;  %v19573_v4 = vmov 0  ;;  %vm19576_vm5 = vnez %v19459_v13  ;;  %v19578_v43 = vmov 0  ;;  %vm19581_vm8 = vcmp.lt.s32.totalorder %v19464_v47, %v9591_v48 }
 0x365   : > { %vm12360_vm2 = vmor %vm19569_vm9, %vm19568_vm4  ;;  %vm19577_vm9 = vcmp.ne.s32.totalorder %v19285_v36, %v9488_v28  ;;  %v19585_v13 = vmov 2   ;;  %v19588_v6 = vmov 0  ;;  %v12443_v38 = vadd.f32 %v7201_v26, %v11760_v30 }
 0x366   : > { %v19571_v49 = vsel %vm12360_vm2, 4294967295, %v19570_v49  ;;  %vm12369_vm11 = vmor %vm19572_vm1, %vm4466_vm14  ;;  %7828 = vset.pattern.permute.xlu1 %v19585_v13  ;;  %vm19590_vm14 = vcmp.eq.f32.partialorder %v19334_v59, %v9446_v5  ;;  %v19601_v0 = vmov 0  ;;  %v19628_v26 = vmov 0 }
 0x367   : > { %v19574_v4 = vsel %vm12369_vm11, 4294967295, %v19573_v4  ;;  %vm12380_vm4 = vmand %vm19577_vm9, %vm19576_vm5  ;;  %vm19582_vm11 = vcmp.eq.f32.partialorder %v19528_v54, %v9441_v58  ;;  %vm19586_vm5 = vnez %v19470_v19  ;;  %vm19587_vm9 = vcmp.ne.s32.totalorder %v10050_v7, %v9591_v48  ;;  %4779 = vperm.xlu1 %7828, %v19383_v40  }
 0x368   : > { %19575 = vst [vmem:[#allocation173_spill] sm:$0xff] %v19574_v4  ;;  %v19579_v43 = vsel %vm12380_vm4, 4294967295, %v19578_v43  ;;  %vm12396_vm2 = vmand %vm19582_vm11, %vm19581_vm8  ;;  %vm19591_vm11 = vcmp.gt.f32.partialorder %v19334_v59, %v9446_v5  ;;  %v19592_v4 = vmov 0  ;;  %v19596_v19 = vmov 0 }
 0x369   : > { %vm12406_vm3 = vmand %vm19587_vm9, %vm19586_vm5  ;;  %v12440_v7 = vadd.f32 %v7137_v18, %v11715_v46  ;;  %vm19599_vm5 = vcmp.eq.f32.partialorder %v19334_v59, %v9452_v8  ;;  %vm19600_vm9 = vcmp.gt.f32.partialorder %v19334_v59, %v9452_v8  ;;  %v19606_v59 = vmov 0 }
 0x36a   : > { %v19589_v6 = vsel %vm12406_vm3, 4294967295, %v19588_v6  ;;  %vm12416_vm8 = vmor %vm19591_vm11, %vm19590_vm14  ;;  %vm19594_vm3 = vcmp.eq.f32.partialorder %v19555_v10, %v9224_v34  ;;  %vm19595_vm14 = vcmp.gt.f32.partialorder %v19555_v10, %v9224_v34  ;;  %vm19611_vm4 = vnez %v19485_v22 }
 0x36b   : > { %v19593_v4 = vsel %vm12416_vm8, 4294967295, %v19592_v4  ;;  %vm12434_vm11 = vmor %vm19595_vm14, %vm19594_vm3  ;;  %vm19603_vm3 = vcmp.gt.f32.partialorder %v19471_v17, %v9446_v5  ;;  %v12484_v46 = vsel %vm19611_vm4, 1.0, %v18893_v32  ;;  %v19613_v18 = vmov 0  ;;  %7829 = vset.pattern.permute.xlu1 %v18859_v29 }
 0x36c   : > { %v19597_v19 = vsel %vm12434_vm11, 4294967295, %v19596_v19  ;;  %vm12451_vm1 = vmor %vm19600_vm9, %vm19599_vm5  ;;  %vm19604_vm11 = vcmp.eq.f32.partialorder %v19555_v10, %v9228_v15  ;;  %vm19605_vm5 = vcmp.gt.f32.partialorder %v19555_v10, %v9228_v15  ;;  %vm19615_vm14 = vcmp.eq.f32.partialorder %v19413_v23, %v9452_v8 }
 0x36d   : > { %19598 = vst [vmem:[#allocation174_spill] sm:$0xff] %v19597_v19  ;;  %v19602_v0 = vsel %vm12451_vm1, 4294967295, %v19601_v0  ;;  %v12459_v19 = vsel %vm19603_vm3, 1.0, %v18893_v32  ;;  %vm12471_vm9 = vmor %vm19605_vm5, %vm19604_vm11  ;;  %vm19609_vm3 = vnez %v19481_v12  ;;  %vm19612_vm11 = vcmp.ne.s32.totalorder %v19349_v3, %v9462_v39  ;;  %v12535_v3 = vpop.permute.xlu1 %1185 }
 0x36e   : > { %v19607_v59 = vsel %vm12471_vm9, 4294967295, %v19606_v59  ;;  %v12479_v30 = vsel %vm19609_vm3, 1.0, %v18893_v32  ;;  %vm12491_vm5 = vmand %vm19612_vm11, %vm12120_vm7  ;;  %vm19616_vm3 = vcmp.gt.f32.partialorder %v19413_v23, %v9452_v8  ;;  %v19617_v12 = vmov 0  ;;  %v19625_v23 = vld [vmem:[#allocation130_spill] sm:$0xff]  ;;  %19631 = vst [vmem:[#allocation179_spill] sm:$0xff] %v12535_v3 }
 0x36f   : > { %19608 = vst [vmem:[#allocation175_spill] sm:$0xff] %v19607_v59  ;;  %19610 = vst [vmem:[#allocation176_spill] sm:$0xff] %v12479_v30  ;;  %v19614_v18 = vsel %vm12491_vm5, 4294967295, %v19613_v18  ;;  %vm19619_vm4 = vcmp.eq.f32.partialorder %v19580_v55, %v9441_v58  ;;  %vm19620_vm1 = vcmp.gt.f32.partialorder %v19580_v55, %v9441_v58  ;;  %v19621_v22 = vmov 0 }
 0x370   : > { %vm12501_vm9 = vmor %vm19616_vm3, %vm19615_vm14  ;;  %vm19623_vm11 = vcmp.gt.f32.partialorder %v19528_v54, %v9436_v11  ;;  %vm19633_vm3 = vnez %v19498_v20  ;;  %vm19634_vm14 = vcmp.eq.f32.partialorder %v19580_v55, %v9446_v5  ;;  %v19642_v20 = vld [vmem:[#allocation86_spill] sm:$0xff]  ;;  %v12695_v21 = vsel %vm12350_vm6, 1.0, %v18893_v32 }
 0x371   : > { %v19618_v12 = vsel %vm12501_vm9, 4294967295, %v19617_v12  ;;  %vm12511_vm7 = vmor %vm19620_vm1, %vm19619_vm4  ;;  %v12519_v50 = vsel %vm19623_vm11, 1.0, %v18893_v32  ;;  %vm19626_vm9 = vcmp.eq.f32.partialorder %v19555_v10, %v9232_v44  ;;  %vm19627_vm1 = vcmp.gt.f32.partialorder %v19555_v10, %v9232_v44  ;;  %v12649_v30 = vpop.permute.xlu1 %1431  ;;  %19679 = vst [vmem:[#allocation184_spill] sm:$0xff] %v12695_v21 }
 0x372   : > { %v19622_v22 = vsel %vm12511_vm7, 4294967295, %v19621_v22  ;;  %19624 = vst [vmem:[#allocation177_spill] sm:$0xff] %v12519_v50  ;;  %vm12531_vm4 = vmor %vm19627_vm1, %vm19626_vm9  ;;  %vm19632_vm11 = vcmp.gt.f32.partialorder %v19314_v24, %v9436_v11  ;;  %v7152_v36 = vsel %vm19633_vm3, 1.0, %v18893_v32  ;;  %vm19635_vm9 = vcmp.gt.f32.partialorder %v19580_v55, %v9446_v5  ;;  %v19757_v24 = vld [vmem:[#allocation57_spill] sm:$0xff] }
 0x373   : > { %v19629_v26 = vsel %vm12531_vm4, 4294967295, %v19628_v26  ;;  %v7024_v59 = vsel %vm19632_vm11, 1.0, %v18893_v32  ;;  %vm12550_vm1 = vmor %vm19635_vm9, %vm19634_vm14  ;;  %v19636_v10 = vmov 0  ;;  %vm19638_vm4 = vcmp.eq.f32.partialorder %v19580_v55, %v9452_v8  ;;  %19665 = vst [vmem:[#allocation126_spill] sm:$0xff] %v12649_v30 }
 0x374   : > { %19630 = vst [vmem:[#allocation178_spill] sm:$0xff] %v19629_v26  ;;  %v19637_v10 = vsel %vm12550_vm1, 4294967295, %v19636_v10  ;;  %vm19639_vm11 = vcmp.gt.f32.partialorder %v19580_v55, %v9452_v8  ;;  %vm1469_vm3 = vcmp.gt.f32.partialorder %v19642_v20, %v9436_v11  ;;  %vm19643_vm14 = vnez %v19507_v63  ;;  %v19654_v55 = vld [vmem:[#allocation125_spill] sm:$0xff] }
 0x375   : > { %vm12560_vm7 = vmor %vm19639_vm11, %vm19638_vm4  ;;  %v7216_v26 = vsel %vm19643_vm14, 1.0, %v18893_v32  ;;  %vm19644_vm9 = vnez %v19511_v2  ;;  %vm19645_vm1 = vcmp.gt.f32.partialorder %v19471_v17, %v9452_v8  ;;  %vm2218_vm5 = vcmp.gt.f32.partialorder %v19642_v20, %v9441_v58  ;;  %v19652_v2 = vld [vmem:[#allocation47_spill] sm:$0xff]  ;;  %v19676_v17 = vld [vmem:[#allocation40_spill] sm:$0xff] }
 0x376   : > { %vm12576_vm8 = vmor %vm19645_vm1, %vm19644_vm9  ;;  %v12590_v63 = vsel %vm12200_vm13, 1.0, %v18893_v32  ;;  %vm19649_vm1 = vcmp.gt.f32.partialorder %v19528_v54, %v9441_v58  ;;  %vm3406_vm4 = vcmp.eq.f32.partialorder %v19528_v54, %v9452_v8  ;;  %vm2887_vm11 = vcmp.gt.f32.partialorder %v19642_v20, %v9446_v5  ;;  %4380 = vperm.xlu1 %7829, %v19652_v2  }
 0x377   : > { %19648 = vst [vmem:[#allocation86_spill] sm:$0xff] %v12590_v63  ;;  %vm12597_vm14 = vmor %vm19649_vm1, %vm12396_vm2  ;;  %v1337_v9 = vadd.f32 %v7024_v59, %v19653_v56  ;;  %v7088_v63 = vsel %vm12226_vm15, 1.0, %v18893_v32  ;;  %v2835_v60 = vadd.f32 %v7152_v36, %v19654_v55  ;;  %v12617_v50 = vsel %vm1469_vm3, 1.0, %v18893_v32  ;;  %v19691_v59 = vld [vmem:[#allocation17_spill] sm:$0xff] }
 0x378   : > { %19655 = vst [vmem:[#allocation119_spill] sm:$0xff] %v12617_v50  ;;  %vm19656_vm13 = vcmp.lt.s32.totalorder %v10908_v33, %v9462_v39  ;;  %vm19657_vm2 = vcmp.eq.f32.partialorder %v19642_v20, %v9446_v5  ;;  %v3504_v56 = vadd.f32 %v7216_v26, %v19660_v53  ;;  %vm19661_vm15 = vcmp.ne.s32.totalorder %v19388_v57, %v9488_v28 }
 0x379   : > { %vm12625_vm1 = vmand %vm19657_vm2, %vm19656_vm13  ;;  %v12643_v55 = vsel %vm2218_vm5, 1.0, %v18893_v32  ;;  %vm3556_vm3 = vcmp.gt.f32.partialorder %v19642_v20, %v9452_v8  ;;  %vm3572_vm13 = vcmp.eq.f32.partialorder %v19642_v20, %v9452_v8  ;;  %v12654_v26 = vsel %vm12290_vm12, 1.0, %v18893_v32 }
 0x37a   : > { %vm12635_vm9 = vmand %vm19661_vm15, %vm12576_vm8  ;;  %19664 = vst [vmem:[#allocation125_spill] sm:$0xff] %v12643_v55  ;;  %v12659_v53 = vsel %vm12299_vm0, 1.0, %v18893_v32  ;;  %vm19668_vm8 = vcmp.ne.s32.totalorder %v19464_v47, %v9591_v48  ;;  %vm19672_vm12 = vcmp.gt.f32.partialorder %v19671_v52, %v9220_v62  ;;  %vm19674_vm0 = vcmp.gt.f32.partialorder %v19671_v52, %v9224_v34  ;;  %v19692_v52 = vld [vmem:[#allocation20_spill] sm:$0xff] }
 0x37b   : > { %19666 = vst [vmem:[#allocation180_spill] sm:$0xff] %v12654_v26  ;;  %19667 = vst [vmem:[#allocation181_spill] sm:$0xff] %v12659_v53  ;;  %v12676_v26 = vsel %vm19672_vm12, 1.0, %v18893_v32  ;;  %v12682_v41 = vsel %vm19674_vm0, 1.0, %v18893_v32  ;;  %v12685_v47 = vadd.f32 %v7088_v63, %v19676_v17  ;;  %v12690_v53 = vsel %vm12340_vm10, 1.0, %v18893_v32  ;;  %v19739_v55 = vld [vmem:[#allocation152_spill] sm:$0xff] }
 0x37c   : > { %vm12666_vm5 = vmand %vm19668_vm8, %vm12597_vm14  ;;  %19673 = vst [vmem:[#allocation88_spill] sm:$0xff] %v12676_v26  ;;  %vm19680_vm14 = vnez %v19571_v49  ;;  %v19684_v45 = vmov 3   ;;  %vm19685_vm10 = vnez %v19579_v43  ;;  %vm19687_vm6 = vcmp.eq.f32.partialorder %v19528_v54, %v9446_v5  ;;  %v19694_v43 = vld [vmem:[#allocation42_spill] sm:$0xff] }
 0x37d   : > { %19675 = vst [vmem:[#allocation182_spill] sm:$0xff] %v12682_v41  ;;  %19677 = vst [vmem:[#allocation40_spill] sm:$0xff] %v12685_v47  ;;  %v12700_v26 = vsel %vm19680_vm14, 1.0, %v18893_v32  ;;  %7830 = vset.pattern.permute.xlu1 %v19684_v45  ;;  %v12715_v37 = vsel %vm19685_vm10, 1.0, %v18893_v32  ;;  %vm19688_vm8 = vcmp.gt.f32.partialorder %v19528_v54, %v9446_v5  ;;  %v1338_v17 = vadd.f32 %v19692_v52, %v1337_v9  ;;  %v19693_v41 = vld [vmem:[#allocation137_spill] sm:$0xff]  ;;  %v19705_v9 = vld [vmem:[#allocation138_spill] sm:$0xff] }
 0x37e   : > { %19678 = vst [vmem:[#allocation183_spill] sm:$0xff] %v12690_v53  ;;  %19681 = vst [vmem:[#allocation185_spill] sm:$0xff] %v12700_v26  ;;  %v12731_v21 = vadd.f32 %v19693_v41, %v2835_v60  ;;  %4973 = vperm.xlu1 %7830, %v19694_v43   ;;  %vm19697_vm0 = vnez %v19593_v4  ;;  %v19699_v53 = vld [vmem:[#allocation118_spill] sm:$0xff]  ;;  %vm19700_vm10 = vcmp.gt.f32.partialorder %v19528_v54, %v9452_v8  ;;  %v19704_v4 = vld [vmem:[#allocation97_spill] sm:$0xff]  ;;  %vm19717_vm2 = vnez %v19618_v12 }
 0x37f   : > { %vm12707_vm15 = vmor %vm2887_vm11, %vm12625_vm1  ;;  %19686 = vst [vmem:[#allocation186_spill] sm:$0xff] %v12715_v37  ;;  %vm3728_vm11 = vcmp.eq.f32.partialorder %v19691_v59, %v9452_v8  ;;  %vm19695_vm1 = vnez %v19589_v6  ;;  %v12742_v26 = vsel %vm19697_vm0, 1.0, %v18893_v32  ;;  %vm2893_vm14 = vcmp.eq.f32.partialorder %v19699_v53, %v9446_v5  ;;  %v19703_v6 = vld [vmem:[#allocation34_spill] sm:$0xff]  ;;  %v19712_v43 = vld [vmem:[#allocation27_spill] sm:$0xff] }
 0x380   : > { %vm12723_vm12 = vmor %vm19688_vm8, %vm19687_vm6  ;;  %v12737_v37 = vsel %vm19695_vm1, 1.0, %v18893_v32  ;;  %19698 = vst [vmem:[#allocation20_spill] sm:$0xff] %v12742_v26  ;;  %v12761_v41 = vadd.f32 %v19705_v9, %v3504_v56  ;;  %vm19706_vm0 = vnez %v19602_v0  ;;  %v19711_v56 = vld [vmem:[#allocation56_spill] sm:$0xff]  ;;  %v12782_v9 = vadd.s32 256, %v19712_v43  ;;  %v12784_v0 = vpop.permute.xlu1 %1677 }
 0x381   : > { %19696 = vst [vmem:[#allocation17_spill] sm:$0xff] %v12737_v37  ;;  %vm12752_vm6 = vmor %vm19700_vm10, %vm3406_vm4  ;;  %v12766_v52 = vsel %vm19706_vm0, 1.0, %v18893_v32  ;;  %vm19708_vm10 = vcmp.ne.s32.totalorder %v10908_v33, %v9462_v39  ;;  %vm19715_vm0 = vnez %v19614_v18  ;;  %v12794_v63 = vsel %vm19717_vm2, 1.0, %v18893_v32  ;;  %v19732_v37 = vld [vmem:[#allocation44_spill] sm:$0xff] }
 0x382   : > { %19707 = vst [vmem:[#allocation137_spill] sm:$0xff] %v12766_v52  ;;  %vm12775_vm8 = vmand %vm19708_vm10, %vm12707_vm15  ;;  %v12789_v26 = vsel %vm19715_vm0, 1.0, %v18893_v32  ;;  %vm19719_vm15 = vnez %v19622_v22  ;;  %vm3712_vm10 = vcmp.gt.f32.partialorder %v19691_v59, %v9452_v8  ;;  %vm19720_vm4 = vcmp.lt.s32.totalorder %v19625_v23, %v9488_v28  ;;  %v19722_v22 = vld [vmem:[#allocation59_spill] sm:$0xff]  ;;  %v19726_v52 = vld [vmem:[#allocation121_spill] sm:$0xff]  ;;  %7831 = vset.pattern.permute.xlu1 %v19585_v13 }
 0x383   : > { %19713 = vst [vmem:[#allocation42_spill] sm:$0xff] %v12782_v9  ;;  %19714 = vst [vmem:[#allocation118_spill] sm:$0xff] %v12784_v0  ;;  %v12799_v33 = vsel %vm19719_vm15, 1.0, %v18893_v32  ;;  %vm19721_vm1 = vnez %v19637_v10  ;;  %v12817_v12 = vsel %vm12560_vm7, 1.0, %v18893_v32  ;;  %vm19723_vm2 = vcmp.lt.s32.totalorder %v19722_v22, %v9462_v39  ;;  %4783 = vperm.xlu1 %7831, %v19732_v37   ;;  %v19738_v37 = vld [vmem:[#allocation132_spill] sm:$0xff] }
 0x384   : > { %19716 = vst [vmem:[#allocation97_spill] sm:$0xff] %v12789_v26  ;;  %19718 = vst [vmem:[#allocation138_spill] sm:$0xff] %v12794_v63  ;;  %v12812_v18 = vsel %vm19721_vm1, 1.0, %v18893_v32  ;;  %vm1891_vm1 = vcmp.eq.f32.partialorder %v19726_v52, %v9441_v58  ;;  %v12837_v10 = vsel %vm12635_vm9, 1.0, %v18893_v32  ;;  %vm19730_vm9 = vcmp.gt.f32.partialorder %v19711_v56, %v9436_v11  ;;  %v19735_v63 = vld [vmem:[#allocation71_spill] sm:$0xff] }
 0x385   : > { %vm3760_vm0 = vmand %vm3728_vm11, %vm19720_vm4  ;;  %vm1875_vm11 = vcmp.gt.f32.partialorder %v19726_v52, %v9441_v58  ;;  %19727 = vst [vmem:[#allocation56_spill] sm:$0xff] %v12837_v10  ;;  %v7026_v36 = vsel %vm19730_vm9, 1.0, %v18893_v32  ;;  %v12858_v10 = vadd.s32 384, %v19712_v43  ;;  %v1590_v25 = vadd.f32 %v19737_v27, %v19736_v51  ;;  %v19761_v27 = vld [vmem:[#allocation46_spill] sm:$0xff] }
 0x386   : > { %vm12825_vm15 = vmand %vm2893_vm14, %vm19723_vm2  ;;  %vm1464_vm2 = vcmp.gt.f32.partialorder %v12649_v30, %v9436_v11  ;;  %vm2213_vm9 = vcmp.gt.f32.partialorder %v12649_v30, %v9441_v58  ;;  %v2339_v50 = vadd.f32 %v19739_v55, %v19738_v37  ;;  %v12881_v59 = vsel %vm12666_vm5, 1.0, %v18893_v32  ;;  %v12901_v55 = vpop.permute.xlu1 %945 }
 0x387   : > { %vm12845_vm7 = vmor %vm3556_vm3, %vm3572_vm13  ;;  %19731 = vst [vmem:[#allocation59_spill] sm:$0xff] %v12858_v10  ;;  %v12886_v3 = vsel %vm12723_vm12, 1.0, %v18893_v32  ;;  %v7048_v57 = vsel %vm1464_vm2, 1.0, %v18893_v32  ;;  %v7112_v51 = vsel %vm2213_vm9, 1.0, %v18893_v32  ;;  %v12906_v26 = vsel %vm12752_vm6, 1.0, %v18893_v32 }
 0x388   : > { %vm12864_vm3 = vmor %vm3712_vm10, %vm3760_vm0  ;;  %19740 = vst [vmem:[#allocation44_spill] sm:$0xff] %v12881_v59  ;;  %vm19742_vm10 = vcmp.gt.f32.partialorder %v19699_v53, %v9446_v5  ;;  %v12912_v53 = vadd.f32 %v7026_v36, %v1338_v17  ;;  %v12914_v49 = vadd.f32 %v7048_v57, %v1590_v25  ;;  %v12916_v37 = vadd.f32 %v7112_v51, %v2339_v50  ;;  %v19752_v50 = vld [vmem:[#allocation41_spill] sm:$0xff]  ;;  %v19758_v36 = vld [vmem:[#allocation146_spill] sm:$0xff] }
 0x389   : > { %19741 = vst [vmem:[#allocation71_spill] sm:$0xff] %v12886_v3  ;;  %vm12893_vm0 = vmor %vm19742_vm10, %vm12825_vm15  ;;  %v12923_v60 = vsel %vm12775_vm8, 1.0, %v18893_v32  ;;  %v12928_v3 = vsel %vm12845_vm7, 1.0, %v18893_v32  ;;  %vm19749_vm6 = vcmp.ne.s32.totalorder %v19625_v23, %v9488_v28  ;;  %vm5017_vm10 = vcmp.gt.f32.partialorder %v19752_v50, %v9220_v62  ;;  %v19764_v51 = vld [vmem:[#allocation60_spill] sm:$0xff]  ;;  %v19830_v57 = vld [vmem:[#allocation154_spill] sm:$0xff] }
 0x38a   : > { %19745 = vst [vmem:[#allocation131_spill] sm:$0xff] %v12901_v55  ;;  %19746 = vst [vmem:[#allocation151_spill] sm:$0xff] %v12906_v26  ;;  %v19753_v17 = vmov 1   ;;  %vm18642_vm5 = vcmp.lt.s32.totalorder %v12858_v10, %v9488_v28  ;;  %vm6659_vm12 = vcmp.eq.f32.partialorder %v19758_v36, %v9232_v44  ;;  %vm1711_vm8 = vcmp.gt.f32.partialorder %v19764_v51, %v9436_v11  ;;  %v13012_v26 = vpop.permute.xlu1 %1443 }
 0x38b   : > { %19747 = vst [vmem:[#allocation132_spill] sm:$0xff] %v12923_v60  ;;  %19748 = vst [vmem:[#allocation152_spill] sm:$0xff] %v12928_v3  ;;  %7832 = vset.pattern.permute.xlu1 %v19753_v17  ;;  %vm2379_vm9 = vcmp.gt.f32.partialorder %v12784_v0, %v9441_v58  ;;  %vm19766_vm15 = vcmp.lt.s32.totalorder %v19703_v6, %v18983_v42  ;;  %vm19772_vm7 = vcmp.gt.f32.partialorder %v19758_v36, %v9232_v44 }
 0x38c   : > { %vm12935_vm2 = vmand %vm19749_vm6, %vm12864_vm3  ;;  %vm19754_vm3 = vcmp.ne.s32.totalorder %v19722_v22, %v9462_v39  ;;  %v19759_v22 = vld [vmem:[#allocation168_spill] sm:$0xff]  ;;  %4593 = vperm.xlu1 %7832, %v19761_v27   ;;  %19771 = vst [vmem:[#allocation57_spill] sm:$0xff] %v13012_v26  ;;  %v13053_v55 = vsel %vm5017_vm10, 1.0, %v18893_v32  ;;  %vm19781_vm10 = vcmp.eq.f32.partialorder %v19726_v52, %v9446_v5 }
 0x38d   : > { %vm12953_vm6 = vmand %vm19754_vm3, %vm12893_vm0  ;;  %v12969_v20 = vadd.f32 %v12484_v46, %v19759_v22  ;;  %vm1710_vm0 = vcmp.gt.f32.partialorder %v12784_v0, %v9436_v11  ;;  %v19765_v22 = vld [vmem:[#allocation156_spill] sm:$0xff]  ;;  %19774 = vst [vmem:[#allocation168_spill] sm:$0xff] %v13053_v55  ;;  %v13154_v47 = vsel %vm12935_vm2, 1.0, %v18893_v32  ;;  %vm19807_vm2 = vcmp.eq.f32.partialorder %v19711_v56, %v9446_v5 }
 0x38e   : > { %vm12980_vm3 = vmor %vm1875_vm11, %vm1891_vm1  ;;  %v7064_v46 = vsel %vm1710_vm0, 1.0, %v18893_v32  ;;  %v1836_v23 = vadd.f32 %v19765_v22, %v12265_v1  ;;  %vm19767_vm11 = vcmp.eq.f32.partialorder %v19704_v4, %v9436_v11  ;;  %v7128_v1 = vsel %vm2379_vm9, 1.0, %v18893_v32  ;;  %v19770_v22 = vld [vmem:[#allocation89_spill] sm:$0xff]  ;;  %v19789_v55 = vld [vmem:[#allocation16_spill] sm:$0xff] }
 0x38f   : > { %19760 = vst [vmem:[#allocation41_spill] sm:$0xff] %v12969_v20  ;;  %vm12997_vm1 = vmand %vm19767_vm11, %vm19766_vm15  ;;  %v2505_v3 = vadd.f32 %v19770_v22, %v12268_v35  ;;  %vm3048_vm15 = vcmp.gt.f32.partialorder %v12784_v0, %v9446_v5  ;;  %v19773_v0 = vld [vmem:[#allocation73_spill] sm:$0xff]  ;;  %v19776_v20 = vmov 0  ;;  %vm19787_vm0 = vcmp.gt.f32.partialorder %v19752_v50, %v9228_v15 }
 0x390   : > { %vm6675_vm14 = vmand %vm6659_vm12, %vm18642_vm5  ;;  %v1837_v35 = vadd.f32 %v7064_v46, %v1836_v23  ;;  %v7192_v22 = vsel %vm3048_vm15, 1.0, %v18893_v32  ;;  %v7065_v23 = vsel %vm1711_vm8, 1.0, %v18893_v32  ;;  %vm3049_vm12 = vcmp.gt.f32.partialorder %v19764_v51, %v9446_v5  ;;  %7833 = vset.pattern.permute.xlu1 %v19684_v45 }
 0x391   : > { %vm6691_vm9 = vmor %vm19772_vm7, %vm6675_vm14  ;;  %v2506_v46 = vadd.f32 %v7128_v1, %v2505_v3  ;;  %v3174_v59 = vadd.f32 %v19773_v0, %v12271_v16  ;;  %vm19775_vm14 = vcmp.ne.s32.totalorder %v12858_v10, %v9488_v28  ;;  %v19779_v3 = vld [vmem:[#allocation163_spill] sm:$0xff]  ;;  %vm19780_vm15 = vcmp.gt.f32.partialorder %v19764_v51, %v9441_v58  ;;  %4977 = vperm.xlu1 %7833, %v19383_v40  }
 0x392   : > { %vm13058_vm7 = vmand %vm19775_vm14, %vm6691_vm9  ;;  %vm1465_vm8 = vcmp.gt.f32.partialorder %v19779_v3, %v9436_v11  ;;  %v7129_v16 = vsel %vm19780_vm15, 1.0, %v18893_v32  ;;  %v13068_v0 = vadd.f32 %v7065_v23, %v1837_v35  ;;  %vm19782_vm9 = vcmp.gt.f32.partialorder %v19726_v52, %v9446_v5 }
 0x393   : > { %v19777_v20 = vsel %vm13058_vm7, 4294967295, %v19776_v20  ;;  %vm13077_vm14 = vmor %vm19782_vm9, %vm19781_vm10  ;;  %vm19785_vm15 = vcmp.gt.f32.partialorder %v19752_v50, %v9224_v34  ;;  %v13093_v40 = vsel %vm19787_vm0, 1.0, %v18893_v32  ;;  %v13095_v23 = vadd.f32 %v7129_v16, %v2506_v46  ;;  %v19825_v16 = vld [vmem:[#allocation166_spill] sm:$0xff] }
 0x394   : > { %19778 = vst [vmem:[#allocation46_spill] sm:$0xff] %v19777_v20  ;;  %v13087_v35 = vsel %vm19785_vm15, 1.0, %v18893_v32  ;;  %19788 = vst [vmem:[#allocation89_spill] sm:$0xff] %v13093_v40  ;;  %v3175_v20 = vadd.f32 %v7192_v22, %v3174_v59  ;;  %vm19790_vm10 = vcmp.lt.s32.totalorder %v19789_v55, %v18983_v42  ;;  %vm19791_vm9 = vcmp.eq.f32.partialorder %v19735_v63, %v9436_v11  ;;  %v19795_v40 = vld [vmem:[#allocation30_spill] sm:$0xff]  ;;  %v13120_v22 = vpop.permute.xlu1 %1689 }
 0x395   : > { %19786 = vst [vmem:[#allocation156_spill] sm:$0xff] %v13087_v35  ;;  %vm13103_vm5 = vmand %vm19791_vm9, %vm19790_vm10  ;;  %v19794_v35 = vld [vmem:[#allocation136_spill] sm:$0xff]  ;;  %v13112_v46 = vadd.s32 384, %v19795_v40  ;;  %vm2214_vm4 = vcmp.gt.f32.partialorder %v19779_v3, %v9441_v58  ;;  %v7193_v59 = vsel %vm3049_vm12, 1.0, %v18893_v32  ;;  %vm19798_vm10 = vcmp.gt.f32.partialorder %v19704_v4, %v9436_v11  ;;  %v19801_v40 = vld [vmem:[#allocation106_spill] sm:$0xff]  ;;  %7834 = vset.pattern.permute.xlu1 %v18859_v29 }
 0x396   : > { %vm5020_vm0 = vcmp.gt.f32.partialorder %v19794_v35, %v9220_v62  ;;  %19797 = vst [vmem:[#allocation136_spill] sm:$0xff] %v13120_v22  ;;  %vm13127_vm9 = vmor %vm19798_vm10, %vm12997_vm1  ;;  %v7049_v60 = vsel %vm1465_vm8, 1.0, %v18893_v32  ;;  %v13141_v51 = vadd.f32 %v7193_v59, %v3175_v20  ;;  %vm19803_vm8 = vcmp.eq.f32.partialorder %v19726_v52, %v9452_v8 }
 0x397   : > { %19796 = vst [vmem:[#allocation73_spill] sm:$0xff] %v13112_v46  ;;  %19802 = vst [vmem:[#allocation106_spill] sm:$0xff] %v13154_v47  ;;  %vm19804_vm1 = vcmp.gt.f32.partialorder %v19726_v52, %v9452_v8  ;;  %vm1467_vm15 = vcmp.gt.f32.partialorder %v13012_v26, %v9436_v11  ;;  %v1592_v59 = vadd.f32 %v7049_v60, %v12914_v49  ;;  %v19814_v60 = vld [vmem:[#allocation124_spill] sm:$0xff]  ;;  %v13197_v47 = vsel %vm5020_vm0, 1.0, %v18893_v32  ;;  %v19816_v52 = vld [vmem:[#allocation49_spill] sm:$0xff] }
 0x398   : > { %vm13162_vm12 = vmor %vm19804_vm1, %vm19803_vm8  ;;  %vm19808_vm10 = vcmp.gt.f32.partialorder %v19711_v56, %v9446_v5  ;;  %vm19811_vm8 = vcmp.gt.f32.partialorder %v19735_v63, %v9436_v11  ;;  %19815 = vst [vmem:[#allocation124_spill] sm:$0xff] %v13197_v47  ;;  %v7113_v30 = vsel %vm2214_vm4, 1.0, %v18893_v32  ;;  %v7051_v63 = vsel %vm1467_vm15, 1.0, %v18893_v32  ;;  %4390 = vperm.xlu1 %7834, %v19816_v52   ;;  %v19865_v49 = vld [vmem:[#allocation65_spill] sm:$0xff] }
 0x399   : > { %vm13178_vm1 = vmor %vm19808_vm10, %vm19807_vm2  ;;  %v13208_v10 = vsel %vm12953_vm6, 1.0, %v18893_v32  ;;  %vm19821_vm15 = vcmp.lt.s32.totalorder %v19712_v43, %v18983_v42  ;;  %vm19822_vm10 = vcmp.eq.f32.partialorder %v19757_v24, %v9436_v11  ;;  %vm18652_vm2 = vcmp.lt.s32.totalorder %v13112_v46, %v9488_v28 }
 0x39a   : > { %vm13187_vm11 = vmor %vm19811_vm8, %vm13103_vm5  ;;  %19817 = vst [vmem:[#allocation49_spill] sm:$0xff] %v13208_v10  ;;  %vm19818_vm5 = vcmp.ne.s32.totalorder %v19703_v6, %v18983_v42  ;;  %v1593_v10 = vadd.f32 %v19825_v16, %v1592_v59  ;;  %v2341_v6 = vadd.f32 %v7113_v30, %v12916_v37  ;;  %v7074_v3 = vsel %vm12980_vm3, 1.0, %v18893_v32  ;;  %v13264_v30 = vpop.permute.xlu1 %940 }
 0x39b   : > { %vm13215_vm0 = vmand %vm19818_vm5, %vm13127_vm9  ;;  %vm19826_vm5 = vcmp.gt.f32.partialorder %v19794_v35, %v9224_v34  ;;  %vm19831_vm3 = vcmp.eq.f32.partialorder %v19830_v57, %v9232_v44  ;;  %vm19832_vm9 = vcmp.gt.f32.partialorder %v13012_v26, %v9441_v58  ;;  %19833 = vst [vmem:[#allocation188_spill] sm:$0xff] %v13264_v30  ;;  %vm18660_vm4 = vcmp.ne.s32.totalorder %v13112_v46, %v9488_v28  ;;  %v19841_v26 = vld [vmem:[#allocation38_spill] sm:$0xff] }
 0x39c   : > { %vm13227_vm6 = vmand %vm19822_vm10, %vm19821_vm15  ;;  %v13246_v2 = vsel %vm19826_vm5, 1.0, %v18893_v32  ;;  %vm19828_vm15 = vcmp.gt.f32.partialorder %v19794_v35, %v9228_v15  ;;  %v7115_v59 = vsel %vm19832_vm9, 1.0, %v18893_v32  ;;  %vm19834_vm5 = vcmp.eq.f32.partialorder %v19704_v4, %v9441_v58  ;;  %7835 = vset.pattern.permute.xlu1 %v19753_v17 }
 0x39d   : > { %19827 = vst [vmem:[#allocation166_spill] sm:$0xff] %v13246_v2  ;;  %v13252_v37 = vsel %vm19828_vm15, 1.0, %v18893_v32  ;;  %vm6678_vm10 = vmand %vm19831_vm3, %vm18652_vm2  ;;  %vm19835_vm15 = vcmp.gt.f32.partialorder %v19704_v4, %v9441_v58  ;;  %v13290_v30 = vadd.f32 %v7051_v63, %v1593_v10  ;;  %v2342_v45 = vadd.f32 %v19841_v26, %v2341_v6  ;;  %v19849_v63 = vld [vmem:[#allocation98_spill] sm:$0xff]  ;;  %4597 = vperm.xlu1 %7835, %v19816_v52  }
 0x39e   : > { %19829 = vst [vmem:[#allocation187_spill] sm:$0xff] %v13252_v37  ;;  %vm13272_vm8 = vmor %vm19835_vm15, %vm19834_vm5  ;;  %v19838_v37 = vld [vmem:[#allocation26_spill] sm:$0xff]  ;;  %vm19840_vm5 = vcmp.gt.f32.partialorder %v19830_v57, %v9232_v44  ;;  %vm19842_vm3 = vcmp.eq.f32.partialorder %v19704_v4, %v9446_v5  ;;  %vm19843_vm9 = vcmp.gt.f32.partialorder %v19704_v4, %v9446_v5  ;;  %v19846_v6 = vmov 0 }
 0x39f   : > { %v13283_v2 = vadd.s32 128, %v19838_v37  ;;  %vm6694_vm15 = vmor %vm19840_vm5, %vm6678_vm10  ;;  %v1839_v10 = vadd.f32 %v12307_v61, %v13068_v0  ;;  %v2508_v26 = vadd.f32 %v12313_v14, %v13095_v23  ;;  %v2002_v57 = vadd.f32 %v7074_v3, %v12327_v31  ;;  %v13354_v3 = vpop.permute.xlu0 %4569 }
 0x3a0   : > { %vm13299_vm2 = vmor %vm19843_vm9, %vm19842_vm3  ;;  %vm1713_vm3 = vcmp.gt.f32.partialorder %v13120_v22, %v9436_v11  ;;  %vm2382_vm9 = vcmp.gt.f32.partialorder %v13120_v22, %v9441_v58  ;;  %v7202_v61 = vsel %vm13162_vm12, 1.0, %v18893_v32  ;;  %vm19851_vm5 = vcmp.gt.f32.partialorder %v19704_v4, %v9452_v8 }
 0x3a1   : > { %19839 = vst [vmem:[#allocation26_spill] sm:$0xff] %v13283_v2  ;;  %vm13312_vm7 = vmand %vm18660_vm4, %vm6694_vm15  ;;  %vm19850_vm4 = vcmp.eq.f32.partialorder %v19704_v4, %v9452_v8  ;;  %v19852_v14 = vmov 0  ;;  %vm19854_vm15 = vcmp.eq.f32.partialorder %v19711_v56, %v9452_v8  ;;  %v13356_v0 = vadd.f32 %v7115_v59, %v2342_v45  ;;  %7836 = vset.pattern.permute.xlu1 %v19585_v13 }
 0x3a2   : > { %v19847_v6 = vsel %vm13312_vm7, 4294967295, %v19846_v6  ;;  %vm13340_vm13 = vmor %vm19851_vm5, %vm19850_vm4  ;;  %vm19859_vm12 = vcmp.ne.s32.totalorder %v19789_v55, %v18983_v42  ;;  %v7067_v45 = vsel %vm1713_vm3, 1.0, %v18893_v32  ;;  %v7131_v1 = vsel %vm2382_vm9, 1.0, %v18893_v32  ;;  %v13395_v55 = vpop.permute.xlu1 %1193  ;;  %4791 = vperm.xlu1 %7836, %v19761_v27  }
 0x3a3   : > { %19848 = vst [vmem:[#allocation38_spill] sm:$0xff] %v19847_v6  ;;  %v7138_v6 = vsel %vm13077_vm14, 1.0, %v18893_v32  ;;  %v19853_v14 = vsel %vm13340_vm13, 4294967295, %v19852_v14  ;;  %vm19855_vm14 = vcmp.gt.f32.partialorder %v19711_v56, %v9452_v8  ;;  %19858 = vst [vmem:[#allocation98_spill] sm:$0xff] %v13356_v0  ;;  %v3177_v23 = vadd.f32 %v12459_v19, %v13141_v51  ;;  %v19869_v19 = vld [vmem:[#allocation134_spill] sm:$0xff] }
 0x3a4   : > { %vm13350_vm10 = vmor %vm19855_vm14, %vm19854_vm15  ;;  %vm3051_vm15 = vcmp.gt.f32.partialorder %v13120_v22, %v9446_v5  ;;  %v13390_v59 = vadd.f32 %v7067_v45, %v1839_v10  ;;  %v13392_v46 = vadd.f32 %v7131_v1, %v2508_v26  ;;  %19868 = vst [vmem:[#allocation190_spill] sm:$0xff] %v13395_v55  ;;  %vm19870_vm9 = vnez %v19869_v19  ;;  %v19880_v1 = vld [vmem:[#allocation54_spill] sm:$0xff] }
 0x3a5   : > { %vm13364_vm4 = vmand %vm19859_vm12, %vm13187_vm11  ;;  %vm19862_vm11 = vcmp.gt.f32.partialorder %v19757_v24, %v9436_v11  ;;  %v7195_v22 = vsel %vm3051_vm15, 1.0, %v18893_v32  ;;  %v13400_v51 = vsel %vm19870_vm9, 1.0, %v18893_v32  ;;  %v2671_v54 = vadd.f32 %v7138_v6, %v12440_v7  ;;  %v19877_v7 = vld [vmem:[#allocation135_spill] sm:$0xff] }
 0x3a6   : > { %vm13384_vm14 = vmor %vm19862_vm11, %vm13227_vm6  ;;  %19866 = vst [vmem:[#allocation65_spill] sm:$0xff] %v13390_v59  ;;  %vm19872_vm12 = vcmp.lt.s32.totalorder %v12782_v9, %v9462_v39  ;;  %vm19873_vm11 = vcmp.eq.f32.partialorder %v19814_v60, %v9446_v5  ;;  %v13417_v26 = vadd.f32 %v7195_v22, %v3177_v23  ;;  %vm19878_vm6 = vnez %v19877_v7  ;;  %v19897_v23 = vld [vmem:[#allocation127_spill] sm:$0xff]  ;;  %v13525_v47 = vpop.permute.xlu1 %955 }
 0x3a7   : > { %19867 = vst [vmem:[#allocation189_spill] sm:$0xff] %v13392_v46  ;;  %19871 = vst [vmem:[#allocation134_spill] sm:$0xff] %v13400_v51  ;;  %v13424_v6 = vsel %vm19878_vm6, 1.0, %v18893_v32  ;;  %v3340_v45 = vadd.f32 %v7202_v61, %v12443_v38  ;;  %v19883_v19 = vmov 0  ;;  %vm19885_vm7 = vcmp.eq.f32.partialorder %v19801_v40, %v9228_v15  ;;  %v19898_v51 = vld [vmem:[#allocation133_spill] sm:$0xff]  ;;  %v19900_v46 = vld [vmem:[#allocation90_spill] sm:$0xff]  ;;  %7837 = vset.pattern.permute.xlu1 %v18859_v29 }
 0x3a8   : > { %vm13411_vm5 = vmand %vm19873_vm11, %vm19872_vm12  ;;  %19876 = vst [vmem:[#allocation191_spill] sm:$0xff] %v13417_v26  ;;  %vm19881_vm12 = vcmp.lt.s32.totalorder %v19880_v1, %v9488_v28  ;;  %vm19882_vm11 = vcmp.eq.f32.partialorder %v19752_v50, %v9232_v44  ;;  %v19887_v38 = vmov 0  ;;  %vm19889_vm9 = vcmp.eq.f32.partialorder %v19801_v40, %v9232_v44  ;;  %v19899_v26 = vld [vmem:[#allocation63_spill] sm:$0xff] }
 0x3a9   : > { %19879 = vst [vmem:[#allocation135_spill] sm:$0xff] %v13424_v6  ;;  %vm13433_vm3 = vmand %vm19882_vm11, %vm19881_vm12  ;;  %vm19886_vm12 = vcmp.gt.f32.partialorder %v19801_v40, %v9228_v15  ;;  %vm19890_vm15 = vcmp.gt.f32.partialorder %v19801_v40, %v9232_v44  ;;  %v1340_v7 = vadd.f32 %v19897_v23, %v12912_v53  ;;  %v7154_v6 = vsel %vm13178_vm1, 1.0, %v18893_v32  ;;  %v19932_v23 = vld [vmem:[#allocation48_spill] sm:$0xff]  ;;  %v19981_v59 = vld [vmem:[#allocation143_spill] sm:$0xff] }
 0x3aa   : > { %v19884_v19 = vsel %vm13433_vm3, 4294967295, %v19883_v19  ;;  %vm13450_vm11 = vmor %vm19886_vm12, %vm19885_vm7  ;;  %vm19893_vm3 = vcmp.lt.s32.totalorder %v19838_v37, %v18983_v42  ;;  %vm19894_vm7 = vcmp.eq.f32.partialorder %v19865_v49, %v9436_v11  ;;  %v13489_v55 = vadd.f32 %v12799_v33, %v2002_v57  ;;  %19908 = vst [vmem:[#allocation127_spill] sm:$0xff] %v13525_v47  ;;  %4395 = vperm.xlu1 %7837, %v19932_v23   ;;  %v20023_v33 = vld [vmem:[#allocation29_spill] sm:$0xff] }
 0x3ab   : > { %v19888_v38 = vsel %vm13450_vm11, 4294967295, %v19887_v38  ;;  %vm13460_vm13 = vmor %vm19890_vm15, %vm19889_vm9  ;;  %vm19901_vm11 = vcmp.lt.s32.totalorder %v19900_v46, %v9591_v48  ;;  %vm19902_vm15 = vcmp.eq.f32.partialorder %v13354_v3, %v9224_v34  ;;  %v13504_v53 = vsel %vm13215_vm0, 1.0, %v18893_v32 }
 0x3ac   : > { %vm13472_vm12 = vmand %vm19894_vm7, %vm19893_vm3  ;;  %vm1214_vm7 = vcmp.gt.f32.partialorder %v19899_v26, %v9436_v11  ;;  %19903 = vst [vmem:[#allocation54_spill] sm:$0xff] %v13504_v53  ;;  %vm19904_vm1 = vcmp.ne.s32.totalorder %v19712_v43, %v18983_v42  ;;  %v13518_v25 = vadd.f32 %v12812_v18, %v2671_v54  ;;  %vm19907_vm0 = vcmp.gt.f32.partialorder %v13354_v3, %v9224_v34  ;;  %v19940_v43 = vld [vmem:[#allocation140_spill] sm:$0xff] }
 0x3ad   : > { %vm5323_vm6 = vmand %vm19902_vm15, %vm19901_vm11  ;;  %v7218_v57 = vsel %vm13350_vm10, 1.0, %v18893_v32  ;;  %v7006_v20 = vsel %vm13364_vm4, 1.0, %v18893_v32  ;;  %v13546_v31 = vadd.f32 %v12817_v12, %v3340_v45  ;;  %vm19913_vm10 = vcmp.ne.s32.totalorder %v19900_v46, %v9591_v48  ;;  %v13613_v45 = vpop.permute.xlu0 %4573  ;;  %v19974_v46 = vld [vmem:[#allocation24_spill] sm:$0xff] }
 0x3ae   : > { %vm13511_vm3 = vmand %vm19904_vm1, %vm13384_vm14  ;;  %vm19909_vm14 = vcmp.eq.f32.partialorder %v19757_v24, %v9441_v58  ;;  %vm19910_vm1 = vcmp.gt.f32.partialorder %v19757_v24, %v9441_v58  ;;  %v13554_v4 = vsel %vm13272_vm8, 1.0, %v18893_v32  ;;  %v2837_v54 = vadd.f32 %v7154_v6, %v12731_v21 }
 0x3af   : > { %vm5339_vm15 = vmor %vm19907_vm0, %vm5323_vm6  ;;  %19914 = vst [vmem:[#allocation133_spill] sm:$0xff] %v13554_v4  ;;  %vm19915_vm0 = vcmp.eq.f32.partialorder %v19757_v24, %v9446_v5  ;;  %v7028_v21 = vsel %vm1214_vm7, 1.0, %v18893_v32  ;;  %v13585_v10 = vsel %vm13299_vm2, 1.0, %v18893_v32  ;;  %vm19923_vm8 = vcmp.eq.f32.partialorder %v19757_v24, %v9452_v8 }
 0x3b0   : > { %vm13539_vm11 = vmor %vm19910_vm1, %vm19909_vm14  ;;  %vm19916_vm14 = vcmp.gt.f32.partialorder %v19757_v24, %v9446_v5  ;;  %19922 = vst [vmem:[#allocation63_spill] sm:$0xff] %v13585_v10  ;;  %vm19927_vm7 = vnez %v19884_v19  ;;  %v19936_v19 = vmov 0  ;;  %vm19938_vm2 = vnez %v19853_v14  ;;  %v19997_v14 = vld [vmem:[#allocation161_spill] sm:$0xff] }
 0x3b1   : > { %vm5355_vm4 = vmand %vm19913_vm10, %vm5339_vm15  ;;  %vm19919_vm15 = vcmp.gt.f32.partialorder %v19814_v60, %v9446_v5  ;;  %v19925_v60 = vmov 0  ;;  %v1090_v53 = vadd.f32 %v19940_v43, %v7006_v20  ;;  %vm19944_vm6 = vcmp.eq.f32.partialorder %v19865_v49, %v9441_v58  ;;  %v19948_v43 = vld [vmem:[#allocation93_spill] sm:$0xff]  ;;  %v19958_v20 = vld [vmem:[#allocation142_spill] sm:$0xff] }
 0x3b2   : > { %vm13563_vm1 = vmor %vm19916_vm14, %vm19915_vm0  ;;  %v7396_v16 = vsel %vm5355_vm4, 1.0, %v18893_v32  ;;  %vm19928_vm4 = vcmp.gt.f32.partialorder %v19752_v50, %v9232_v44  ;;  %v19933_v50 = vld [vmem:[#allocation22_spill] sm:$0xff]  ;;  %vm19945_vm9 = vcmp.gt.f32.partialorder %v19865_v49, %v9441_v58  ;;  %v13668_v61 = vadd.f32 %v7028_v21, %v1340_v7 }
 0x3b3   : > { %vm13572_vm10 = vmor %vm19919_vm15, %vm13411_vm5  ;;  %vm19924_vm5 = vcmp.gt.f32.partialorder %v19757_v24, %v9452_v8  ;;  %v19931_v24 = vld [vmem:[#allocation75_spill] sm:$0xff]  ;;  %v13691_v21 = vadd.f32 %v19958_v20, %v2837_v54  ;;  %v19967_v54 = vmov 0  ;;  %v13903_v18 = vsel %vm13563_vm1, 1.0, %v18893_v32  ;;  %v20069_v20 = vld [vmem:[#allocation160_spill] sm:$0xff] }
 0x3b4   : > { %vm13593_vm0 = vmor %vm19924_vm5, %vm19923_vm8  ;;  %v13611_v36 = vadd.f32 %v7396_v16, %v19931_v24  ;;  %vm19934_vm5 = vcmp.lt.s32.totalorder %v19933_v50, %v18983_v42  ;;  %v13631_v16 = vsel %vm19938_vm2, 1.0, %v18893_v32  ;;  %v3506_v24 = vadd.f32 %v7218_v57, %v12761_v41  ;;  %v13676_v57 = vpop.permute.xlu1 %1697 }
 0x3b5   : > { %v19926_v60 = vsel %vm13593_vm0, 4294967295, %v19925_v60  ;;  %vm13602_vm14 = vmor %vm19928_vm4, %vm19927_vm7  ;;  %vm19935_vm7 = vcmp.eq.f32.partialorder %v19849_v63, %v9220_v62  ;;  %19939 = vst [vmem:[#allocation90_spill] sm:$0xff] %v13631_v16  ;;  %v19946_v41 = vmov 0  ;;  %vm19949_vm8 = vcmp.lt.s32.totalorder %v19948_v43, %v9488_v28  ;;  %v19959_v16 = vld [vmem:[#allocation146_spill] sm:$0xff] }
 0x3b6   : > { %vm13624_vm4 = vmand %vm19935_vm7, %vm19934_vm5  ;;  %vm19941_vm5 = vcmp.gt.f32.partialorder %v19865_v49, %v9436_v11  ;;  %19953 = vst [vmem:[#allocation75_spill] sm:$0xff] %v13676_v57  ;;  %v13753_v29 = vadd.f32 %v19981_v59, %v3506_v24  ;;  %v19984_v57 = vld [vmem:[#allocation158_spill] sm:$0xff]  ;;  %v19994_v59 = vld [vmem:[#allocation28_spill] sm:$0xff]  ;;  %vm20042_vm1 = vcmp.gt.f32.partialorder %v19849_v63, %v9220_v62 }
 0x3b7   : > { %v19937_v19 = vsel %vm13624_vm4, 4294967295, %v19936_v19  ;;  %vm13642_vm7 = vmor %vm19941_vm5, %vm13472_vm12  ;;  %vm19950_vm12 = vcmp.eq.f32.partialorder %v19794_v35, %v9232_v44  ;;  %v19995_v24 = vld [vmem:[#allocation155_spill] sm:$0xff] }
 0x3b8   : > { %vm13654_vm15 = vmor %vm19945_vm9, %vm19944_vm6  ;;  %vm19960_vm9 = vcmp.gt.f32.partialorder %v19959_v16, %v9220_v62  ;;  %v13817_v0 = vpop.permute.xlu1 %1201 }
 0x3b9   : > { %v19947_v41 = vsel %vm13654_vm15, 4294967295, %v19946_v41  ;;  %vm13664_vm5 = vmand %vm19950_vm12, %vm19949_vm8  ;;  %vm19954_vm8 = vcmp.lt.s32.totalorder %v13283_v2, %v9591_v48  ;;  %vm19955_vm12 = vcmp.eq.f32.partialorder %v19899_v26, %v9441_v58  ;;  %v13697_v4 = vsel %vm19960_vm9, 1.0, %v18893_v32 }
 0x3ba   : > { %vm13686_vm4 = vmand %vm19955_vm12, %vm19954_vm8  ;;  %19961 = vst [vmem:[#allocation140_spill] sm:$0xff] %v13697_v4  ;;  %vm19962_vm15 = vcmp.gt.f32.partialorder %v19959_v16, %v9224_v34  ;;  %vm19964_vm8 = vcmp.gt.f32.partialorder %v19959_v16, %v9228_v15  ;;  %vm19966_vm12 = vcmp.ne.s32.totalorder %v12782_v9, %v9462_v39  ;;  %vm19969_vm9 = vcmp.eq.f32.partialorder %v19865_v49, %v9446_v5  ;;  %v19973_v16 = vld [vmem:[#allocation150_spill] sm:$0xff] }
 0x3bb   : > { %v13703_v47 = vsel %vm19962_vm15, 1.0, %v18893_v32  ;;  %v13709_v23 = vsel %vm19964_vm8, 1.0, %v18893_v32  ;;  %vm13716_vm6 = vmand %vm19966_vm12, %vm13572_vm10  ;;  %vm19970_vm15 = vcmp.gt.f32.partialorder %v19865_v49, %v9446_v5  ;;  %v13737_v9 = vadd.s32 128, %v19974_v46  ;;  %19982 = vst [vmem:[#allocation150_spill] sm:$0xff] %v13753_v29 }
 0x3bc   : > { %19963 = vst [vmem:[#allocation93_spill] sm:$0xff] %v13703_v47  ;;  %19965 = vst [vmem:[#allocation142_spill] sm:$0xff] %v13709_v23  ;;  %v19968_v54 = vsel %vm13716_vm6, 4294967295, %v19967_v54  ;;  %v19975_v23 = vmov 3   ;;  %v19976_v47 = vld [vmem:[#allocation139_spill] sm:$0xff]  ;;  %vm19978_vm12 = vcmp.gt.f32.partialorder %v19794_v35, %v9232_v44  ;;  %vm19987_vm8 = vcmp.eq.f32.partialorder %v19865_v49, %v9452_v8 }
 0x3bd   : > { %vm13726_vm2 = vmor %vm19970_vm15, %vm19969_vm9  ;;  %7838 = vset.pattern.permute.xlu1 %v19975_v23  ;;  %v13741_v4 = vadd.f32 %v19976_v47, %v1090_v53  ;;  %vm19983_vm15 = vcmp.gt.f32.partialorder %v19801_v40, %v9220_v62  ;;  %v19985_v53 = vld [vmem:[#allocation149_spill] sm:$0xff]  ;;  %v19999_v44 = vld [vmem:[#allocation59_spill] sm:$0xff]  ;;  %20007 = vst [vmem:[#allocation139_spill] sm:$0xff] %v13817_v0  ;;  %v13822_v29 = vsel %vm13511_vm3, 1.0, %v18893_v32  ;;  %vm20015_vm3 = vcmp.eq.f32.partialorder %v19899_v26, %v9446_v5 }
 0x3be   : > { %vm13748_vm9 = vmor %vm19978_vm12, %vm13664_vm5  ;;  %v7331_v46 = vsel %vm19983_vm15, 1.0, %v18893_v32  ;;  %v4732_v47 = vadd.f32 %v19985_v53, %v19984_v57  ;;  %vm19988_vm5 = vcmp.gt.f32.partialorder %v19865_v49, %v9452_v8  ;;  %vm19991_vm15 = vcmp.gt.f32.partialorder %v19899_v26, %v9441_v58  ;;  %v19998_v57 = vld [vmem:[#allocation69_spill] sm:$0xff]  ;;  %20008 = vst [vmem:[#allocation143_spill] sm:$0xff] %v13822_v29  ;;  %v20028_v29 = vld [vmem:[#allocation114_spill] sm:$0xff] }
 0x3bf   : > { %19977 = vst [vmem:[#allocation146_spill] sm:$0xff] %v13741_v4  ;;  %v19986_v4 = vld [vmem:[#allocation47_spill] sm:$0xff]  ;;  %vm13768_vm12 = vmor %vm19988_vm5, %vm19987_vm8  ;;  %vm19996_vm8 = vnez %v19888_v38  ;;  %v5940_v7 = vadd.f32 %v19998_v57, %v19997_v14  ;;  %v7523_v53 = vsel %vm13460_vm13, 1.0, %v18893_v32  ;;  %vm20000_vm5 = vcmp.lt.s32.totalorder %v19999_v44, %v9488_v28  ;;  %v20004_v14 = vld [vmem:[#allocation164_spill] sm:$0xff] }
 0x3c0   : > { %4985 = vperm.xlu1 %7838, %v19986_v4   ;;  %vm13777_vm0 = vmor %vm19991_vm15, %vm13686_vm4  ;;  %v7459_v49 = vsel %vm19996_vm8, 1.0, %v18893_v32  ;;  %v13795_v4 = vpop.permute.xlu0 %4577  ;;  %vm20001_vm15 = vcmp.eq.f32.partialorder %v19898_v51, %v9452_v8  ;;  %v20005_v57 = vld [vmem:[#allocation64_spill] sm:$0xff]  ;;  %vm20006_vm13 = vcmp.gt.f32.partialorder %v13354_v3, %v9220_v62  ;;  %vm20016_vm8 = vcmp.gt.f32.partialorder %v19899_v26, %v9446_v5 }
 0x3c1   : > { %vm13803_vm6 = vmand %vm20001_vm15, %vm20000_vm5  ;;  %v6480_v50 = vadd.f32 %v20005_v57, %v20004_v14  ;;  %v7332_v22 = vsel %vm20006_vm13, 1.0, %v18893_v32  ;;  %vm20009_vm5 = vcmp.ne.s32.totalorder %v19880_v1, %v9488_v28  ;;  %vm20012_vm13 = vcmp.ne.s32.totalorder %v19838_v37, %v18983_v42  ;;  %v20181_v14 = vld [vmem:[#allocation190_spill] sm:$0xff] }
 0x3c2   : > { %vm13829_vm15 = vmand %vm20009_vm5, %vm13602_vm14  ;;  %v20013_v57 = vmov 0  ;;  %vm20019_vm14 = vcmp.eq.f32.partialorder %v19899_v26, %v9452_v8  ;;  %vm20020_vm5 = vcmp.gt.f32.partialorder %v19899_v26, %v9452_v8  ;;  %v20021_v37 = vmov 0 }
 0x3c3   : > { %vm13838_vm10 = vmand %vm20012_vm13, %vm13642_vm7  ;;  %vm20024_vm13 = vcmp.lt.s32.totalorder %v20023_v33, %v18983_v42  ;;  %v4733_v6 = vadd.f32 %v7331_v46, %v4732_v47  ;;  %v13879_v26 = vsel %vm13539_vm11, 1.0, %v18893_v32  ;;  %v13887_v46 = vadd.f32 %v7459_v49, %v5940_v7 }
 0x3c4   : > { %v20014_v57 = vsel %vm13838_vm10, 4294967295, %v20013_v57  ;;  %vm13848_vm4 = vmor %vm20016_vm8, %vm20015_vm3  ;;  %vm20025_vm10 = vcmp.eq.f32.partialorder %v19973_v16, %v9436_v11  ;;  %v13889_v47 = vadd.f32 %v7523_v53, %v6480_v50  ;;  %vm20031_vm11 = vcmp.eq.f32.partialorder %v13613_v45, %v9224_v34  ;;  %7839 = vset.pattern.permute.xlu1 %v19585_v13 }
 0x3c5   : > { %vm13858_vm7 = vmor %vm20020_vm5, %vm20019_vm14  ;;  %vm18677_vm14 = vcmp.lt.s32.totalorder %v13737_v9, %v9591_v48  ;;  %20029 = vst [vmem:[#allocation158_spill] sm:$0xff] %v13887_v46  ;;  %v20033_v50 = vmov 0  ;;  %v4734_v49 = vadd.f32 %v7332_v22, %v4733_v6  ;;  %vm20035_vm5 = vcmp.gt.f32.partialorder %v13613_v45, %v9220_v62  ;;  %4795 = vperm.xlu1 %7839, %v19816_v52   ;;  %v20061_v46 = vld [vmem:[#allocation78_spill] sm:$0xff]  ;;  %v20130_v52 = vld [vmem:[#allocation75_spill] sm:$0xff] }
 0x3c6   : > { %v20022_v37 = vsel %vm13858_vm7, 4294967295, %v20021_v37  ;;  %vm13868_vm8 = vmand %vm20025_vm10, %vm20024_vm13  ;;  %20030 = vst [vmem:[#allocation149_spill] sm:$0xff] %v13889_v47  ;;  %vm20032_vm13 = vcmp.ne.s32.totalorder %v19948_v43, %v9488_v28  ;;  %v7333_v39 = vsel %vm20035_vm5, 1.0, %v18893_v32  ;;  %v13938_v43 = vadd.s32 128, %v19994_v59 }
 0x3c7   : > { %vm5324_vm3 = vmand %vm20031_vm11, %vm18677_vm14  ;;  %vm20037_vm11 = vnez %v19926_v60  ;;  %vm20040_vm5 = vcmp.ne.s32.totalorder %v13737_v9, %v9591_v48  ;;  %vm20041_vm14 = vnez %v19937_v19  ;;  %v20048_v19 = vld [vmem:[#allocation144_spill] sm:$0xff]  ;;  %v7140_v13 = vsel %vm13726_vm2, 1.0, %v18893_v32 }
 0x3c8   : > { %vm13910_vm10 = vmand %vm20032_vm13, %vm13748_vm9  ;;  %vm20036_vm9 = vcmp.gt.f32.partialorder %v13613_v45, %v9224_v34  ;;  %v13931_v12 = vsel %vm20037_vm11, 1.0, %v18893_v32  ;;  %20038 = vst [vmem:[#allocation155_spill] sm:$0xff] %v13938_v43  ;;  %vm5309_vm11 = vcmp.eq.f32.partialorder %v13795_v4, %v9224_v34  ;;  %v1342_v53 = vadd.f32 %v20048_v19, %v13668_v61  ;;  %v20051_v61 = vld [vmem:[#allocation45_spill] sm:$0xff] }
 0x3c9   : > { %v20034_v50 = vsel %vm13910_vm10, 4294967295, %v20033_v50  ;;  %vm5340_vm13 = vmor %vm20036_vm9, %vm5324_vm3  ;;  %vm20039_vm3 = vcmp.gt.f32.partialorder %v20028_v29, %v9436_v11  ;;  %7841 = vset.pattern.permute.xlu1 %v19753_v17 }
 0x3ca   : > { %v7030_v7 = vsel %vm20039_vm3, 1.0, %v18893_v32  ;;  %vm5356_vm9 = vmand %vm20040_vm5, %vm5340_vm13  ;;  %vm20045_vm3 = vcmp.gt.f32.partialorder %v19898_v51, %v9452_v8  ;;  %v13978_v51 = vpop.permute.xlu1 %1447  ;;  %vm5172_vm5 = vcmp.eq.f32.partialorder %v19849_v63, %v9224_v34 }
 0x3cb   : > { %vm13954_vm10 = vmor %vm20042_vm1, %vm20041_vm14  ;;  %v7397_v22 = vsel %vm5356_vm9, 1.0, %v18893_v32  ;;  %vm20049_vm14 = vcmp.gt.f32.partialorder %v13795_v4, %v9220_v62  ;;  %vm5293_vm1 = vcmp.gt.f32.partialorder %v13795_v4, %v9224_v34  ;;  %20050 = vst [vmem:[#allocation161_spill] sm:$0xff] %v13978_v51  ;;  %vm20054_vm9 = vnez %v19947_v41  ;;  %v20058_v41 = vld [vmem:[#allocation112_spill] sm:$0xff] }
 0x3cc   : > { %vm13963_vm7 = vmor %vm20045_vm3, %vm13803_vm6  ;;  %v7334_v38 = vsel %vm20049_vm14, 1.0, %v18893_v32  ;;  %vm20052_vm3 = vnez %v20051_v61  ;;  %v7076_v19 = vsel %vm20054_vm9, 1.0, %v18893_v32  ;;  %vm20055_vm14 = vcmp.gt.f32.partialorder %v19973_v16, %v9436_v11 }
 0x3cd   : > { %v13987_v6 = vsel %vm20052_vm3, 1.0, %v18893_v32  ;;  %vm13997_vm13 = vmor %vm20055_vm14, %vm13868_vm8  ;;  %v4735_v61 = vadd.f32 %v7333_v39, %v4734_v49  ;;  %vm20059_vm9 = vnez %v20058_v41  ;;  %vm20062_vm8 = vnez %v20061_v46  ;;  %v20067_v49 = vld [vmem:[#allocation91_spill] sm:$0xff] }
 0x3ce   : > { %20053 = vst [vmem:[#allocation69_spill] sm:$0xff] %v13987_v6  ;;  %v5403_v6 = vadd.f32 %v7397_v22, %v13611_v36  ;;  %v14009_v10 = vsel %vm20059_vm9, 1.0, %v18893_v32  ;;  %v14014_v0 = vsel %vm20062_vm8, 1.0, %v18893_v32  ;;  %vm20064_vm14 = vcmp.ne.s32.totalorder %v13283_v2, %v9591_v48  ;;  %v20148_v36 = vld [vmem:[#allocation50_spill] sm:$0xff] }
 0x3cf   : > { %20060 = vst [vmem:[#allocation59_spill] sm:$0xff] %v14009_v10  ;;  %20063 = vst [vmem:[#allocation164_spill] sm:$0xff] %v14014_v0  ;;  %v14032_v46 = vadd.f32 %v7030_v7, %v1342_v53  ;;  %vm20068_vm2 = vcmp.lt.s32.totalorder %v20067_v49, %v9591_v48  ;;  %v20074_v7 = vld [vmem:[#allocation40_spill] sm:$0xff]  ;;  %v14057_v41 = vadd.f32 %v7334_v38, %v4735_v61  ;;  %v20080_v38 = vld [vmem:[#allocation31_spill] sm:$0xff]  ;;  %v14119_v0 = vpop.permute.xlu1 %1693 }
 0x3d0   : > { %vm14024_vm6 = vmand %vm20064_vm14, %vm13777_vm0  ;;  %vm20070_vm0 = vnez %v20069_v20  ;;  %vm20072_vm14 = vnez %v19968_v54  ;;  %v20075_v53 = vld [vmem:[#allocation128_spill] sm:$0xff]  ;;  %v20077_v20 = vld [vmem:[#allocation51_spill] sm:$0xff]  ;;  %v2004_v2 = vadd.f32 %v7076_v19, %v13489_v55  ;;  %v14072_v54 = vadd.s32 384, %v19994_v59  ;;  %20092 = vst [vmem:[#allocation91_spill] sm:$0xff] %v14119_v0 }
 0x3d1   : > { %vm5325_vm3 = vmand %vm5309_vm11, %vm20068_vm2  ;;  %v14044_v40 = vsel %vm20070_vm0, 1.0, %v18893_v32  ;;  %v14049_v39 = vsel %vm20072_vm14, 1.0, %v18893_v32  ;;  %v14055_v22 = vadd.f32 %v20075_v53, %v20074_v7  ;;  %20076 = vst [vmem:[#allocation114_spill] sm:$0xff] %v14057_v41  ;;  %4605 = vperm.xlu1 %7841, %v20077_v20   ;;  %vm20078_vm14 = vcmp.ne.s32.totalorder %v20067_v49, %v9591_v48  ;;  %v20121_v10 = vld [vmem:[#allocation98_spill] sm:$0xff] }
 0x3d2   : > { %20071 = vst [vmem:[#allocation64_spill] sm:$0xff] %v14044_v40  ;;  %20073 = vst [vmem:[#allocation29_spill] sm:$0xff] %v14049_v39  ;;  %v14075_v61 = vadd.s32 256, %v20080_v38  ;;  %v2673_v55 = vadd.f32 %v7140_v13, %v13518_v25  ;;  %v7204_v19 = vsel %vm13768_vm12, 1.0, %v18893_v32  ;;  %v14113_v53 = vadd.s32 384, %v20080_v38  ;;  %v20091_v40 = vld [vmem:[#allocation179_spill] sm:$0xff] }
 0x3d3   : > { %vm5341_vm11 = vmor %vm5293_vm1, %vm5325_vm3  ;;  %20079 = vst [vmem:[#allocation144_spill] sm:$0xff] %v14072_v54  ;;  %vm1468_vm1 = vcmp.gt.f32.partialorder %v13978_v51, %v9436_v11  ;;  %vm20082_vm3 = vcmp.lt.s32.totalorder %v19994_v59, %v18983_v42  ;;  %vm20097_vm12 = vcmp.ne.s32.totalorder %v20023_v33, %v18983_v42  ;;  %v20107_v33 = vld [vmem:[#allocation30_spill] sm:$0xff]  ;;  %v20141_v39 = vmov 0  }
 0x3d4   : > { %vm5357_vm9 = vmand %vm20078_vm14, %vm5341_vm11  ;;  %20081 = vst [vmem:[#allocation45_spill] sm:$0xff] %v14075_v61  ;;  %vm20083_vm11 = vcmp.eq.f32.partialorder %v19995_v24, %v9436_v11  ;;  %v7052_v25 = vsel %vm1468_vm1, 1.0, %v18893_v32  ;;  %vm2217_vm1 = vcmp.gt.f32.partialorder %v13978_v51, %v9441_v58  ;;  %v14179_v47 = vadd.s32 128, %v20107_v33  ;;  %v20147_v51 = vld [vmem:[#allocation65_spill] sm:$0xff] }
 0x3d5   : > { %vm14089_vm14 = vmand %vm20083_vm11, %vm20082_vm3  ;;  %v7398_v13 = vsel %vm5357_vm9, 1.0, %v18893_v32  ;;  %vm20086_vm3 = vcmp.ne.s32.totalorder %v19999_v44, %v9488_v28  ;;  %20090 = vst [vmem:[#allocation78_spill] sm:$0xff] %v14113_v53  ;;  %vm1218_vm9 = vcmp.gt.f32.partialorder %v20091_v40, %v9436_v11  ;;  %v14124_v44 = vsel %vm13829_vm15, 1.0, %v18893_v32  ;;  %7842 = vset.pattern.permute.xlu1 %v19975_v23  ;;  %v20149_v53 = vld [vmem:[#allocation148_spill] sm:$0xff] }
 0x3d6   : > { %vm14106_vm11 = vmand %vm20086_vm3, %vm13963_vm7  ;;  %v14110_v7 = vadd.f32 %v7398_v13, %v5403_v6  ;;  %20093 = vst [vmem:[#allocation160_spill] sm:$0xff] %v14124_v44  ;;  %vm20094_vm7 = vnez %v20014_v57  ;;  %v7156_v6 = vsel %vm13848_vm4, 1.0, %v18893_v32  ;;  %vm20096_vm3 = vnez %v20022_v37  ;;  %4989 = vperm.xlu1 %7842, %v19761_v27  }
 0x3d7   : > { %v14129_v60 = vsel %vm20094_vm7, 1.0, %v18893_v32  ;;  %v7220_v13 = vsel %vm20096_vm3, 1.0, %v18893_v32  ;;  %vm14142_vm15 = vmand %vm20097_vm12, %vm13997_vm13  ;;  %v3342_v57 = vadd.f32 %v7204_v19, %v13546_v31  ;;  %vm20100_vm4 = vcmp.eq.f32.partialorder %v19973_v16, %v9441_v58  ;;  %20108 = vst [vmem:[#allocation128_spill] sm:$0xff] %v14179_v47 }
 0x3d8   : > { %20089 = vst [vmem:[#allocation112_spill] sm:$0xff] %v14110_v7  ;;  %20095 = vst [vmem:[#allocation40_spill] sm:$0xff] %v14129_v60  ;;  %vm20101_vm3 = vcmp.gt.f32.partialorder %v19973_v16, %v9441_v58  ;;  %vm20104_vm12 = vcmp.gt.f32.partialorder %v19995_v24, %v9436_v11  ;;  %v14172_v31 = vadd.f32 %v13879_v26, %v2004_v2  ;;  %v7032_v27 = vsel %vm1218_vm9, 1.0, %v18893_v32 }
 0x3d9   : > { %vm14158_vm13 = vmor %vm20101_vm3, %vm20100_vm4  ;;  %v1595_v19 = vadd.f32 %v7052_v25, %v13290_v30  ;;  %vm20111_vm3 = vcmp.eq.f32.partialorder %v19973_v16, %v9446_v5  ;;  %v14199_v26 = vadd.f32 %v13903_v18, %v2673_v55  ;;  %v7116_v30 = vsel %vm2217_vm1, 1.0, %v18893_v32  ;;  %v20115_v18 = vld [vmem:[#allocation150_spill] sm:$0xff] }
 0x3da   : > { %vm14167_vm7 = vmor %vm20104_vm12, %vm14089_vm14  ;;  %vm20109_vm14 = vnez %v20034_v50  ;;  %vm20112_vm12 = vcmp.gt.f32.partialorder %v19973_v16, %v9446_v5  ;;  %v2839_v50 = vadd.f32 %v7156_v6, %v13691_v21  ;;  %v3508_v55 = vadd.f32 %v7220_v13, %v20115_v18  ;;  %v20122_v21 = vld [vmem:[#allocation22_spill] sm:$0xff]  ;;  %v20126_v13 = vld [vmem:[#allocation37_spill] sm:$0xff]  ;;  %7843 = vset.pattern.permute.xlu1 %v20141_v39 }
 0x3db   : > { %v14186_v49 = vsel %vm20109_vm14, 1.0, %v18893_v32  ;;  %vm14194_vm2 = vmor %vm20112_vm12, %vm20111_vm3  ;;  %vm20116_vm12 = vcmp.eq.f32.partialorder %v19973_v16, %v9452_v8  ;;  %vm20117_vm9 = vcmp.gt.f32.partialorder %v19973_v16, %v9452_v8  ;;  %v2344_v60 = vadd.f32 %v7116_v30, %v20121_v10  ;;  %4405 = vperm.xlu1 %7843, %v20148_v36   ;;  %v20213_v10 = vld [vmem:[#allocation104_spill] sm:$0xff] }
 0x3dc   : > { %20110 = vst [vmem:[#allocation51_spill] sm:$0xff] %v14186_v49  ;;  %vm14221_vm4 = vmor %vm20117_vm9, %vm20116_vm12  ;;  %v20120_v49 = vld [vmem:[#allocation119_spill] sm:$0xff]  ;;  %vm20123_vm1 = vcmp.ne.s32.totalorder %v20122_v21, %v18983_v42  ;;  %v20124_v6 = vmov 0  ;;  %vm20127_vm3 = vcmp.ne.s32.totalorder %v19994_v59, %v18983_v42  ;;  %v20128_v16 = vmov 0  ;;  %v14290_v59 = vpop.permute.xlu1 %4355 }
 0x3dd   : > { %v14226_v7 = vadd.f32 %v20120_v49, %v1595_v19  ;;  %vm14234_vm14 = vmand %vm20123_vm1, %vm13954_vm10  ;;  %vm1714_vm12 = vcmp.gt.f32.partialorder %v14119_v0, %v9436_v11  ;;  %vm2383_vm9 = vcmp.gt.f32.partialorder %v14119_v0, %v9441_v58  ;;  %vm20134_vm10 = vcmp.eq.f32.partialorder %v19995_v24, %v9441_v58  ;;  %v20138_v19 = vld [vmem:[#allocation125_spill] sm:$0xff]  ;;  %20140 = vst [vmem:[#allocation150_spill] sm:$0xff] %v14290_v59 }
 0x3de   : > { %v20125_v6 = vsel %vm14234_vm14, 4294967295, %v20124_v6  ;;  %vm14247_vm0 = vmand %vm20127_vm3, %vm14167_vm7  ;;  %vm20131_vm7 = vcmp.gt.f32.partialorder %v19849_v63, %v9224_v34  ;;  %vm20135_vm1 = vcmp.gt.f32.partialorder %v19995_v24, %v9441_v58  ;;  %v14284_v49 = vadd.f32 %v20138_v19, %v2344_v60 }
 0x3df   : > { %v20129_v16 = vsel %vm14247_vm0, 4294967295, %v20128_v16  ;;  %vm14265_vm3 = vmor %vm20131_vm7, %vm5172_vm5  ;;  %v7068_v30 = vsel %vm1714_vm12, 1.0, %v18893_v32  ;;  %v7132_v18 = vsel %vm2383_vm9, 1.0, %v18893_v32  ;;  %vm3052_vm5 = vcmp.gt.f32.partialorder %v14119_v0, %v9446_v5  ;;  %v20169_v0 = vld [vmem:[#allocation33_spill] sm:$0xff]  ;;  %7844 = vset.pattern.permute.xlu1 %v19753_v17 }
 0x3e0   : > { %vm14275_vm8 = vmor %vm20135_vm1, %vm20134_vm10  ;;  %20139 = vst [vmem:[#allocation179_spill] sm:$0xff] %v14284_v49  ;;  %v14296_v44 = vsel %vm14024_vm6, 1.0, %v18893_v32  ;;  %vm20142_vm10 = vcmp.eq.f32.partialorder %v19995_v24, %v9446_v5  ;;  %vm20143_vm12 = vcmp.gt.f32.partialorder %v19995_v24, %v9446_v5  ;;  %v3343_v19 = vadd.f32 %v13931_v12, %v3342_v57  ;;  %4609 = vperm.xlu1 %7844, %v20148_v36  }
 0x3e1   : > { %vm14304_vm1 = vmor %vm20143_vm12, %vm20142_vm10  ;;  %v14310_v21 = vadd.s32 256, %v20107_v33  ;;  %v1841_v41 = vadd.f32 %v7068_v30, %v20147_v51  ;;  %v14319_v49 = vadd.f32 %v20149_v53, %v2839_v50  ;;  %vm20150_vm7 = vcmp.lt.s32.totalorder %v13737_v9, %v9591_v48  ;;  %v20154_v51 = vld [vmem:[#allocation66_spill] sm:$0xff]  ;;  %v20156_v53 = vld [vmem:[#allocation189_spill] sm:$0xff] }
 0x3e2   : > { %vm20151_vm10 = vcmp.eq.f32.partialorder %v19711_v56, %v9441_v58  ;;  %v1344_v57 = vadd.f32 %v20154_v51, %v14032_v46  ;;  %vm20155_vm6 = vcmp.gt.f32.partialorder %v20130_v52, %v9436_v11  ;;  %v2510_v50 = vadd.f32 %v7132_v18, %v20156_v53 }
 0x3e3   : > { %20146 = vst [vmem:[#allocation119_spill] sm:$0xff] %v14310_v21  ;;  %vm14327_vm12 = vmand %vm20151_vm10, %vm20150_vm7  ;;  %v7069_v30 = vsel %vm20155_vm6, 1.0, %v18893_v32  ;;  %vm20157_vm9 = vcmp.eq.f32.partialorder %v19995_v24, %v9452_v8  ;;  %vm20158_vm0 = vcmp.gt.f32.partialorder %v19995_v24, %v9452_v8  ;;  %vm2045_vm10 = vcmp.gt.f32.partialorder %v20028_v29, %v9441_v58  ;;  %v14428_v21 = vpop.permute.xlu1 %4763 }
 0x3e4   : > { %vm14344_vm7 = vmor %vm20158_vm0, %vm20157_vm9  ;;  %vm20161_vm14 = vcmp.gt.f32.partialorder %v20130_v52, %v9441_v58  ;;  %vm3053_vm6 = vcmp.gt.f32.partialorder %v20130_v52, %v9446_v5  ;;  %v14356_v18 = vadd.f32 %v7069_v30, %v1841_v41  ;;  %v7196_v24 = vsel %vm3052_vm5, 1.0, %v18893_v32  ;;  %v20168_v41 = vld [vmem:[#allocation61_spill] sm:$0xff]  ;;  %20182 = vst [vmem:[#allocation148_spill] sm:$0xff] %v14428_v21  ;;  %v20212_v52 = vld [vmem:[#allocation70_spill] sm:$0xff] }
 0x3e5   : > { %v7133_v46 = vsel %vm20161_vm14, 1.0, %v18893_v32  ;;  %v14365_v51 = vsel %vm14106_vm11, 1.0, %v18893_v32  ;;  %vm20164_vm0 = vcmp.eq.f32.partialorder %v13354_v3, %v9228_v15  ;;  %vm20165_vm14 = vcmp.gt.f32.partialorder %v13354_v3, %v9228_v15 }
 0x3e6   : > { %20162 = vst [vmem:[#allocation98_spill] sm:$0xff] %v14356_v18  ;;  %20163 = vst [vmem:[#allocation37_spill] sm:$0xff] %v14365_v51  ;;  %v14378_v30 = vadd.f32 %v20168_v41, %v3508_v55  ;;  %v14381_v33 = vadd.s32 256, %v20169_v0  ;;  %v14383_v18 = vadd.f32 %v7133_v46, %v2510_v50  ;;  %v7078_v35 = vsel %vm14275_vm8, 1.0, %v18893_v32  ;;  %v20175_v50 = vld [vmem:[#allocation191_spill] sm:$0xff] }
 0x3e7   : > { %vm14373_vm9 = vmor %vm20165_vm14, %vm20164_vm0  ;;  %v7142_v51 = vsel %vm14304_vm1, 1.0, %v18893_v32  ;;  %vm20172_vm11 = vcmp.gt.f32.partialorder %v19711_v56, %v9441_v58  ;;  %v1345_v41 = vadd.f32 %v7032_v27, %v1344_v57  ;;  %v3179_v46 = vadd.f32 %v7196_v24, %v20175_v50  ;;  %v20209_v56 = vld [vmem:[#allocation87_spill] sm:$0xff] }
 0x3e8   : > { %20170 = vst [vmem:[#allocation125_spill] sm:$0xff] %v14381_v33  ;;  %20171 = vst [vmem:[#allocation65_spill] sm:$0xff] %v14383_v18  ;;  %v14405_v37 = vsel %vm14142_vm15, 1.0, %v18893_v32  ;;  %v7206_v60 = vsel %vm14344_vm7, 1.0, %v18893_v32  ;;  %vm18700_vm8 = vcmp.ne.s32.totalorder %v13938_v43, %v9591_v48  ;;  %vm20177_vm1 = vcmp.eq.f32.partialorder %v20028_v29, %v9446_v5 }
 0x3e9   : > { %vm14396_vm5 = vmor %vm20172_vm11, %vm14327_vm12  ;;  %20176 = vst [vmem:[#allocation50_spill] sm:$0xff] %v14405_v37  ;;  %vm20178_vm12 = vcmp.gt.f32.partialorder %v20028_v29, %v9446_v5  ;;  %vm1220_vm15 = vcmp.gt.f32.partialorder %v20181_v14, %v9436_v11  ;;  %v7197_v27 = vsel %vm3053_vm6, 1.0, %v18893_v32  ;;  %v7079_v12 = vsel %vm14158_vm13, 1.0, %v18893_v32 }
 0x3ea   : > { %vm14418_vm0 = vmor %vm20178_vm12, %vm20177_vm1  ;;  %v7143_v57 = vsel %vm14194_vm2, 1.0, %v18893_v32  ;;  %v14440_v24 = vsel %vm14221_vm4, 1.0, %v18893_v32  ;;  %vm20183_vm7 = vcmp.eq.f32.partialorder %v20028_v29, %v9452_v8  ;;  %vm20184_vm6 = vcmp.gt.f32.partialorder %v20028_v29, %v9452_v8 }
 0x3eb   : > { %vm14448_vm14 = vmor %vm20184_vm6, %vm20183_vm7  ;;  %vm5848_vm2 = vcmp.eq.f32.partialorder %v13613_v45, %v9228_v15  ;;  %v14456_v1 = vadd.f32 %v7197_v27, %v3179_v46  ;;  %vm20188_vm4 = vnez %v20129_v16  ;;  %v2006_v25 = vadd.f32 %v7078_v35, %v14172_v31  ;;  %v20198_v35 = vld [vmem:[#allocation157_spill] sm:$0xff]  ;;  %v20225_v46 = vld [vmem:[#allocation126_spill] sm:$0xff] }
 0x3ec   : > { %v14461_v2 = vsel %vm20188_vm4, 1.0, %v18893_v32  ;;  %v2675_v37 = vadd.f32 %v7142_v51, %v14199_v26  ;;  %vm20190_vm11 = vcmp.ne.s32.totalorder %v13737_v9, %v9591_v48  ;;  %vm6388_vm7 = vcmp.eq.f32.partialorder %v13613_v45, %v20126_v13  ;;  %v20250_v9 = vld [vmem:[#allocation162_spill] sm:$0xff] }
 0x3ed   : > { %20187 = vst [vmem:[#allocation66_spill] sm:$0xff] %v14456_v1  ;;  %20189 = vst [vmem:[#allocation189_spill] sm:$0xff] %v14461_v2  ;;  %v14479_v16 = vadd.s32 384, %v20169_v0  ;;  %vm20194_vm6 = vcmp.eq.f32.partialorder %v19849_v63, %v9228_v15  ;;  %vm20195_vm4 = vcmp.gt.f32.partialorder %v19849_v63, %v9228_v15  ;;  %v3344_v31 = vadd.f32 %v7206_v60, %v3343_v19  ;;  %v20232_v1 = vld [vmem:[#allocation158_spill] sm:$0xff] }
 0x3ee   : > { %vm14470_vm1 = vmand %vm20190_vm11, %vm14396_vm5  ;;  %v7460_v26 = vsel %vm14373_vm9, 1.0, %v18893_v32  ;;  %v7034_v51 = vsel %vm1220_vm15, 1.0, %v18893_v32  ;;  %v1346_v55 = vadd.f32 %v20198_v35, %v1345_v41  ;;  %vm20199_vm5 = vcmp.eq.f32.partialorder %v19849_v63, %v20126_v13  ;;  %v20210_v35 = vld [vmem:[#allocation115_spill] sm:$0xff] }
 0x3ef   : > { %20193 = vst [vmem:[#allocation61_spill] sm:$0xff] %v14479_v16  ;;  %vm14487_vm13 = vmor %vm20195_vm4, %vm20194_vm6  ;;  %vm20200_vm11 = vcmp.gt.f32.partialorder %v19849_v63, %v20126_v13  ;;  %v7158_v19 = vsel %vm14418_vm0, 1.0, %v18893_v32  ;;  %vm5849_vm15 = vcmp.eq.f32.partialorder %v13795_v4, %v9228_v15  ;;  %vm20203_vm4 = vnez %v20125_v6  ;;  %v20226_v16 = vld [vmem:[#allocation139_spill] sm:$0xff] }
 0x3f0   : > { %vm14505_vm6 = vmor %vm20200_vm11, %vm20199_vm5  ;;  %v7315_v53 = vsel %vm20203_vm4, 1.0, %v18893_v32  ;;  %v20204_v63 = vmov 2   ;;  %vm20205_vm0 = vcmp.lt.s32.totalorder %v13938_v43, %v9591_v48  ;;  %vm20206_vm9 = vcmp.eq.f32.partialorder %v20028_v29, %v9441_v58  ;;  %v20227_v29 = vld [vmem:[#allocation79_spill] sm:$0xff] }
 0x3f1   : > { %7846 = vset.pattern.permute.xlu1 %v20204_v63  ;;  %vm14530_vm12 = vmand %vm20206_vm9, %vm20205_vm0  ;;  %v7222_v6 = vsel %vm14448_vm14, 1.0, %v18893_v32  ;;  %v7090_v60 = vsel %vm14470_vm1, 1.0, %v18893_v32  ;;  %vm18701_vm4 = vcmp.lt.s32.totalorder %v14072_v54, %v9488_v28  ;;  %vm3731_vm5 = vcmp.eq.f32.partialorder %v20209_v56, %v9452_v8 }
 0x3f2   : > { %v7379_v27 = vsel %vm14265_vm3, 1.0, %v18893_v32  ;;  %v14548_v2 = vadd.f32 %v7315_v53, %v20210_v35  ;;  %4803 = vperm.xlu1 %7846, %v20077_v20   ;;  %v7443_v50 = vsel %vm14487_vm13, 1.0, %v18893_v32  ;;  %v14565_v35 = vpop.permute.xlu1 %4360  ;;  %vm20216_vm0 = vcmp.eq.f32.partialorder %v13354_v3, %v20126_v13 }
 0x3f3   : > { %v14563_v53 = vadd.f32 %v7379_v27, %v20213_v10  ;;  %20215 = vst [vmem:[#allocation157_spill] sm:$0xff] %v14565_v35  ;;  %vm20217_vm11 = vcmp.gt.f32.partialorder %v13354_v3, %v20126_v13  ;;  %v7507_v27 = vsel %vm14505_vm6, 1.0, %v18893_v32  ;;  %v20221_v3 = vld [vmem:[#allocation77_spill] sm:$0xff]  ;;  %vm3551_vm6 = vcmp.gt.f32.partialorder %v20225_v46, %v9452_v8 }
 0x3f4   : > { %20211 = vst [vmem:[#allocation191_spill] sm:$0xff] %v14548_v2  ;;  %vm14573_vm1 = vmor %vm20217_vm11, %vm20216_vm0  ;;  %v20220_v2 = vld [vmem:[#allocation163_spill] sm:$0xff]  ;;  %v14589_v10 = vadd.f32 %v7443_v50, %v20221_v3  ;;  %vm3567_vm0 = vcmp.eq.f32.partialorder %v20225_v46, %v9452_v8  ;;  %vm1222_vm3 = vcmp.gt.f32.partialorder %v20226_v16, %v9436_v11  ;;  %v14611_v41 = vadd.f32 %v7507_v27, %v20227_v29 }
 0x3f5   : > { %20214 = vst [vmem:[#allocation190_spill] sm:$0xff] %v14563_v53  ;;  %vm3568_vm9 = vcmp.eq.f32.partialorder %v20220_v2, %v9452_v8  ;;  %vm14596_vm11 = vmor %vm2045_vm10, %vm14530_vm12  ;;  %v14615_v50 = vadd.f32 %v7079_v12, %v2006_v25  ;;  %v14617_v3 = vadd.f32 %v7143_v57, %v2675_v37  ;;  %v1347_v0 = vadd.f32 %v7034_v51, %v1346_v55  ;;  %v20233_v12 = vld [vmem:[#allocation82_spill] sm:$0xff]  ;;  %v20234_v25 = vld [vmem:[#allocation117_spill] sm:$0xff] }
 0x3f6   : > { %20222 = vst [vmem:[#allocation87_spill] sm:$0xff] %v14589_v10  ;;  %20228 = vst [vmem:[#allocation115_spill] sm:$0xff] %v14611_v41  ;;  %v20230_v10 = vld [vmem:[#allocation32_spill] sm:$0xff]  ;;  %7847 = vset.pattern.permute.xlu1 %v20141_v39  ;;  %v5942_v18 = vadd.f32 %v7460_v26, %v20232_v1  ;;  %v2168_v59 = vadd.f32 %v7090_v60, %v14055_v22  ;;  %v14628_v27 = vadd.f32 %v14440_v24, %v3344_v31  ;;  %v20236_v57 = vld [vmem:[#allocation43_spill] sm:$0xff]  ;;  %v14677_v60 = vpop.permute.xlu1 %4953 }
 0x3f7   : > { %20229 = vst [vmem:[#allocation70_spill] sm:$0xff] %v14617_v3  ;;  %v14620_v33 = vadd.s32 128, %v20230_v10  ;;  %v14632_v37 = vadd.f32 %v20234_v25, %v20233_v12  ;;  %4410 = vperm.xlu1 %7847, %v20236_v57   ;;  %v7524_v39 = vsel %vm14573_vm1, 1.0, %v18893_v32  ;;  %vm14643_vm14 = vmand %vm18700_vm8, %vm14596_vm11  ;;  %v2841_v24 = vadd.f32 %v7158_v19, %v14319_v49  ;;  %v20243_v26 = vld [vmem:[#allocation67_spill] sm:$0xff]  ;;  %v20244_v55 = vld [vmem:[#allocation81_spill] sm:$0xff] }
 0x3f8   : > { %v3510_v1 = vadd.f32 %v7222_v6, %v14378_v30  ;;  %v7036_v31 = vsel %vm1222_vm3, 1.0, %v18893_v32  ;;  %vm20239_vm1 = vcmp.gt.f32.partialorder %v13613_v45, %v9228_v15  ;;  %v20242_v30 = vld [vmem:[#allocation165_spill] sm:$0xff]  ;;  %vm4820_vm3 = vcmp.gt.f32.partialorder %v14428_v21, %v9220_v62  ;;  %20246 = vst [vmem:[#allocation77_spill] sm:$0xff] %v14677_v60  ;;  %v20257_v49 = vld [vmem:[#allocation48_spill] sm:$0xff]  ;;  %v20261_v22 = vld [vmem:[#allocation35_spill] sm:$0xff] }
 0x3f9   : > { %20231 = vst [vmem:[#allocation104_spill] sm:$0xff] %v14620_v33  ;;  %20235 = vst [vmem:[#allocation163_spill] sm:$0xff] %v14632_v37  ;;  %v4930_v51 = vadd.f32 %v20243_v26, %v20242_v30  ;;  %v20245_v19 = vld [vmem:[#allocation153_spill] sm:$0xff]  ;;  %vm5424_vm13 = vcmp.gt.f32.partialorder %v14428_v21, %v9224_v34  ;;  %vm18712_vm8 = vcmp.ne.s32.totalorder %v20080_v38, %v18983_v42  ;;  %v7347_v12 = vsel %vm4820_vm3, 1.0, %v18893_v32  ;;  %v20343_v37 = vld [vmem:[#allocation98_spill] sm:$0xff] }
 0x3fa   : > { %vm14663_vm11 = vmor %vm20239_vm1, %vm5848_vm2  ;;  %v5534_v6 = vadd.f32 %v20245_v19, %v20244_v55  ;;  %vm20247_vm2 = vcmp.gt.f32.partialorder %v13613_v45, %v20126_v13  ;;  %vm1898_vm10 = vcmp.eq.f32.partialorder %v20212_v52, %v9441_v58  ;;  %v1348_v29 = vadd.f32 %v20250_v9, %v1347_v0  ;;  %v20251_v45 = vld [vmem:[#allocation149_spill] sm:$0xff] }
 0x3fb   : > { %vm14685_vm1 = vmor %vm20247_vm2, %vm6388_vm7  ;;  %v7411_v25 = vsel %vm5424_vm13, 1.0, %v18893_v32  ;;  %v6482_v30 = vadd.f32 %v7524_v39, %v20251_v45  ;;  %v20252_v26 = vld [vmem:[#allocation141_spill] sm:$0xff]  ;;  %v14706_v19 = vadd.f32 %v7347_v12, %v4930_v51  ;;  %7848 = vset.pattern.permute.xlu1 %v19975_v23  ;;  %v7461_v9 = vsel %vm14663_vm11, 1.0, %v18893_v32 }
 0x3fc   : > { %v2169_v55 = vadd.f32 %v20252_v26, %v2168_v59  ;;  %v14708_v0 = vadd.f32 %v7411_v25, %v5534_v6  ;;  %vm20253_vm13 = vcmp.gt.f32.partialorder %v13795_v4, %v9228_v15  ;;  %v20256_v39 = vld [vmem:[#allocation53_spill] sm:$0xff]  ;;  %vm2899_vm2 = vcmp.eq.f32.partialorder %v20220_v2, %v9446_v5  ;;  %4997 = vperm.xlu1 %7848, %v20257_v49   ;;  %v20267_v26 = vld [vmem:[#allocation80_spill] sm:$0xff]  ;;  %v20270_v49 = vld [vmem:[#allocation34_spill] sm:$0xff] }
 0x3fd   : > { %vm14720_vm3 = vmor %vm20253_vm13, %vm5849_vm15  ;;  %vm18715_vm7 = vcmp.lt.s32.totalorder %v14075_v61, %v20256_v39  ;;  %v1349_v51 = vadd.f32 %v7036_v31, %v1348_v29  ;;  %v14736_v6 = vsel %vm14643_vm14, 1.0, %v18893_v32  ;;  %v7525_v12 = vsel %vm14685_vm1, 1.0, %v18893_v32  ;;  %v20260_v29 = vld [vmem:[#allocation55_spill] sm:$0xff]  ;;  %v20283_v31 = vld [vmem:[#allocation41_spill] sm:$0xff] }
 0x3fe   : > { %vm14747_vm15 = vmand %vm3731_vm5, %vm18701_vm4  ;;  %v14756_v25 = vadd.s32 384, %v20261_v22  ;;  %v2170_v53 = vadd.f32 %v14296_v44, %v2169_v55  ;;  %vm20263_vm5 = vcmp.lt.s32.totalorder %v20080_v38, %v18983_v42  ;;  %vm20264_vm4 = vcmp.eq.f32.partialorder %v20212_v52, %v9436_v11  ;;  %v20269_v44 = vld [vmem:[#allocation159_spill] sm:$0xff]  ;;  %v20306_v38 = vld [vmem:[#allocation89_spill] sm:$0xff] }
 0x3ff   : > { %vm14767_vm12 = vmand %vm20264_vm4, %vm20263_vm5  ;;  %v14776_v57 = vadd.f32 %v20267_v26, %v2841_v24  ;;  %v14779_v55 = vadd.f32 %v20269_v44, %v3510_v1  ;;  %v14782_v43 = vadd.s32 128, %v20270_v49  ;;  %v14784_v10 = vadd.f32 %v7461_v9, %v5942_v18  ;;  %v14804_v18 = vpop.permute.xlu1 %4767  ;;  %v20276_v9 = vld [vmem:[#allocation177_spill] sm:$0xff] }
 0x400   : > { %20262 = vst [vmem:[#allocation139_spill] sm:$0xff] %v14756_v25  ;;  %vm20272_vm5 = vcmp.gt.f32.partialorder %v20220_v2, %v9452_v8  ;;  %20275 = vst [vmem:[#allocation82_spill] sm:$0xff] %v14804_v18  ;;  %v14806_v1 = vadd.f32 %v7525_v12, %v6482_v30  ;;  %vm18717_vm4 = vcmp.lt.s32.totalorder %v14179_v47, %v9591_v48  ;;  %7849 = vset.pattern.permute.xlu1 %v20204_v63  ;;  %v20298_v30 = vld [vmem:[#allocation168_spill] sm:$0xff] }
 0x401   : > { %20268 = vst [vmem:[#allocation79_spill] sm:$0xff] %v14776_v57  ;;  %20271 = vst [vmem:[#allocation158_spill] sm:$0xff] %v14782_v43  ;;  %v14819_v26 = vadd.f32 %v20276_v9, %v1349_v51  ;;  %vm20277_vm13 = vcmp.gt.f32.partialorder %v20209_v56, %v9452_v8  ;;  %4807 = vperm.xlu1 %7849, %v20148_v36   ;;  %v20284_v9 = vld [vmem:[#allocation57_spill] sm:$0xff]  ;;  %vm6096_vm14 = vcmp.gt.f32.partialorder %v14677_v60, %v9228_v15 }
 0x402   : > { %vm14794_vm1 = vmor %vm20272_vm5, %vm3568_vm9  ;;  %v1597_v25 = vrot.slane %v14226_v7, 4  ;;  %v14993_v41 = vadd.s32 256, %v20270_v49  ;;  %v15167_v59 = vadd.s32 384, %v20270_v49  ;;  %v20389_v49 = vld [vmem:[#allocation114_spill] sm:$0xff] }
 0x403   : > { %vm3615_vm5 = vmor %vm3551_vm6, %vm3567_vm0  ;;  %v7241_v12 = vsel %vm14794_vm1, 1.0, %v18893_v32  ;;  %vm20286_vm1 = vcmp.gt.f32.partialorder %v13795_v4, %v20126_v13  ;;  %vm2550_vm0 = vcmp.gt.f32.partialorder %v20260_v29, %v9446_v5 }
 0x404   : > { %vm14831_vm9 = vmor %vm20277_vm13, %vm14747_vm15  ;;  %v7240_v51 = vsel %vm3615_vm5, 1.0, %v18893_v32  ;;  %vm20280_vm13 = vcmp.gt.f32.partialorder %v20212_v52, %v9436_v11  ;;  %vm5016_vm15 = vcmp.gt.f32.partialorder %v14677_v60, %v9220_v62  ;;  %20315 = vst [vmem:[#allocation165_spill] sm:$0xff] %v14993_v41  ;;  %v1598_v57 = vadd.f32 %v1597_v25, %v14226_v7  ;;  %v20321_v7 = vld [vmem:[#allocation179_spill] sm:$0xff] }
 0x405   : > { %vm14852_vm6 = vmor %vm20280_vm13, %vm14767_vm12  ;;  %v3678_v44 = vadd.f32 %v7240_v51, %v20283_v31  ;;  %vm5556_vm12 = vcmp.gt.f32.partialorder %v14677_v60, %v9224_v34  ;;  %vm20285_vm13 = vcmp.eq.f32.partialorder %v13795_v4, %v20126_v13  ;;  %v7361_v24 = vsel %vm5016_vm15, 1.0, %v18893_v32  ;;  %v20289_v31 = vld [vmem:[#allocation147_spill] sm:$0xff]  ;;  %7852 = vset.pattern.permute.xlu1 %v19753_v17  ;;  %v20307_v60 = vld [vmem:[#allocation170_spill] sm:$0xff]  ;;  %20351 = vst [vmem:[#allocation55_spill] sm:$0xff] %v15167_v59 }
 0x406   : > { %vm14874_vm11 = vmor %vm20286_vm1, %vm20285_vm13  ;;  %v7425_v51 = vsel %vm5556_vm12, 1.0, %v18893_v32  ;;  %v2171_v35 = vadd.f32 %v20289_v31, %v2170_v53  ;;  %v7462_v4 = vsel %vm14720_vm3, 1.0, %v18893_v32  ;;  %vm20290_vm13 = vcmp.ne.s32.totalorder %v14072_v54, %v9488_v28  ;;  %v14930_v54 = vpop.permute.xlu1 %4365  ;;  %4617 = vperm.xlu1 %7852, %v20307_v60  }
 0x407   : > { %vm14895_vm15 = vmand %vm20290_vm13, %vm14831_vm9  ;;  %v3679_v21 = vadd.f32 %v7241_v12, %v3678_v44  ;;  %vm20295_vm3 = vcmp.gt.f32.partialorder %v20212_v52, %v9441_v58  ;;  %v14922_v56 = vadd.f32 %v20298_v30, %v7361_v24  ;;  %v20299_v12 = vld [vmem:[#allocation156_spill] sm:$0xff]  ;;  %v7489_v31 = vsel %vm6096_vm14, 1.0, %v18893_v32  ;;  %20300 = vst [vmem:[#allocation117_spill] sm:$0xff] %v14930_v54 }
 0x408   : > { %vm14905_vm12 = vmand %vm18712_vm8, %vm14852_vm6  ;;  %v14925_v44 = vadd.f32 %v20299_v12, %v7425_v51  ;;  %vm20302_vm13 = vcmp.gt.f32.partialorder %v20212_v52, %v9446_v5  ;;  %v20305_v51 = vld [vmem:[#allocation138_spill] sm:$0xff]  ;;  %v1351_v12 = vrot.slane %v14819_v26, 4  ;;  %v14950_v17 = vadd.f32 %v20306_v38, %v7489_v31  ;;  %v20314_v31 = vld [vmem:[#allocation131_spill] sm:$0xff] }
 0x409   : > { %vm14915_vm9 = vmor %vm20295_vm3, %vm1898_vm10  ;;  %vm20301_vm10 = vcmp.eq.f32.partialorder %v20212_v52, %v9446_v5  ;;  %v14946_v30 = vadd.f32 %v20305_v51, %v3679_v21  ;;  %vm4821_vm8 = vcmp.gt.f32.partialorder %v14804_v18, %v9220_v62  ;;  %v7526_v22 = vsel %vm14874_vm11, 1.0, %v18893_v32 }
 0x40a   : > { %vm14939_vm3 = vmor %vm20302_vm13, %vm20301_vm10  ;;  %v7348_v38 = vsel %vm4821_vm8, 1.0, %v18893_v32  ;;  %vm5425_vm11 = vcmp.gt.f32.partialorder %v14804_v18, %v9224_v34  ;;  %v2172_v51 = vadd.f32 %v14736_v6, %v2171_v35  ;;  %v20320_v35 = vld [vmem:[#allocation188_spill] sm:$0xff]  ;;  %v2346_v6 = vrot.slane %v20321_v7, 4  ;;  %7853 = vset.pattern.permute.xlu1 %v19975_v23 }
 0x40b   : > { %vm14964_vm10 = vmand %vm2899_vm2, %vm18715_vm7  ;;  %vm20310_vm2 = vcmp.eq.f32.partialorder %v20260_v29, %v9441_v58  ;;  %vm20311_vm7 = vcmp.gt.f32.partialorder %v20260_v29, %v9441_v58  ;;  %v14997_v3 = vadd.f32 %v7348_v38, %v14706_v19  ;;  %v7412_v19 = vsel %vm5425_vm11, 1.0, %v18893_v32  ;;  %5001 = vperm.xlu1 %7853, %v20077_v20  }
 0x40c   : > { %vm14983_vm14 = vmor %vm20311_vm7, %vm20310_vm2  ;;  %vm20316_vm7 = vcmp.eq.f32.partialorder %v20212_v52, %v9452_v8  ;;  %vm20317_vm2 = vcmp.gt.f32.partialorder %v20212_v52, %v9452_v8  ;;  %v15020_v52 = vadd.f32 %v7462_v4, %v14784_v10  ;;  %v15023_v25 = vadd.f32 %v7526_v22, %v14806_v1  ;;  %v15068_v1 = vpop.permute.xlu1 %4961  ;;  %v20345_v22 = vld [vmem:[#allocation60_spill] sm:$0xff]  ;;  %v20356_v4 = vld [vmem:[#allocation65_spill] sm:$0xff] }
 0x40d   : > { %vm15005_vm6 = vmor %vm20317_vm2, %vm20316_vm7  ;;  %vm20324_vm7 = vcmp.gt.f32.partialorder %v20220_v2, %v9446_v5  ;;  %v15039_v10 = vadd.f32 %v7412_v19, %v14708_v0  ;;  %v7080_v2 = vsel %vm14983_vm14, 1.0, %v18893_v32  ;;  %v15062_v0 = vadd.f32 %v1351_v12, %v14819_v26  ;;  %20331 = vst [vmem:[#allocation162_spill] sm:$0xff] %v15068_v1 }
 0x40e   : > { %20322 = vst [vmem:[#allocation67_spill] sm:$0xff] %v15020_v52  ;;  %20323 = vst [vmem:[#allocation81_spill] sm:$0xff] %v15023_v25  ;;  %vm20337_vm14 = vcmp.gt.f32.partialorder %v20284_v9, %v9452_v8  ;;  %vm2049_vm1 = vcmp.gt.f32.partialorder %v20181_v14, %v9441_v58  ;;  %v1599_v20 = vrot.slane %v1598_v57, 2  ;;  %v15102_v26 = vadd.f32 %v2346_v6, %v20321_v7  ;;  %v20342_v7 = vld [vmem:[#allocation96_spill] sm:$0xff]  ;;  %v20344_v25 = vld [vmem:[#allocation78_spill] sm:$0xff] }
 0x40f   : > { %vm15030_vm2 = vmor %vm20324_vm7, %vm14964_vm10  ;;  %vm20327_vm10 = vcmp.eq.f32.partialorder %v20091_v40, %v9441_v58  ;;  %20330 = vst [vmem:[#allocation153_spill] sm:$0xff] %v15062_v0  ;;  %v15111_v12 = vsel %vm14895_vm15, 1.0, %v18893_v32  ;;  %vm18724_vm8 = vcmp.ne.s32.totalorder %v14620_v33, %v9591_v48  ;;  %v15126_v6 = vadd.f32 %v20342_v7, %v2172_v51  ;;  %5005 = vperm.xlu1 %7853, %v20148_v36  }
 0x410   : > { %vm15053_vm7 = vmand %vm20327_vm10, %vm18717_vm4  ;;  %vm20332_vm10 = vcmp.eq.f32.partialorder %v20260_v29, %v9452_v8  ;;  %vm20333_vm4 = vcmp.gt.f32.partialorder %v20260_v29, %v9452_v8  ;;  %20338 = vst [vmem:[#allocation149_spill] sm:$0xff] %v15111_v12  ;;  %v1843_v19 = vrot.slane %v20343_v37, 4  ;;  %vm18725_vm15 = vcmp.lt.s32.totalorder %v20344_v25, %v9488_v28  ;;  %v15141_v7 = vpop.permute.xlu1 %4771 }
 0x411   : > { %vm15077_vm11 = vmor %vm20333_vm4, %vm20332_vm10  ;;  %vm20336_vm10 = vcmp.eq.f32.partialorder %v20284_v9, %v9452_v8  ;;  %vm3734_vm4 = vcmp.eq.f32.partialorder %v20345_v22, %v9452_v8  ;;  %v2008_v54 = vadd.f32 %v7080_v2, %v14615_v50  ;;  %20346 = vst [vmem:[#allocation141_spill] sm:$0xff] %v15141_v7  ;;  %v15147_v18 = vsel %vm14905_vm12, 1.0, %v18893_v32 }
 0x412   : > { %vm3618_vm5 = vmor %vm20337_vm14, %vm20336_vm10  ;;  %vm20339_vm14 = vcmp.gt.f32.partialorder %v20091_v40, %v9441_v58  ;;  %v7208_v52 = vsel %vm15077_vm11, 1.0, %v18893_v32  ;;  %20347 = vst [vmem:[#allocation53_spill] sm:$0xff] %v15147_v18  ;;  %v7081_v50 = vsel %vm14915_vm9, 1.0, %v18893_v32  ;;  %v15164_v36 = vsel %vm14939_vm3, 1.0, %v18893_v32 }
 0x413   : > { %vm15118_vm10 = vmor %vm20339_vm14, %vm15053_vm7  ;;  %v7243_v45 = vsel %vm3618_vm5, 1.0, %v18893_v32  ;;  %vm20348_vm5 = vcmp.ne.s32.totalorder %v14075_v61, %v20256_v39  ;;  %vm20352_vm12 = vcmp.ne.s32.totalorder %v14179_v47, %v9591_v48  ;;  %v7209_v53 = vsel %vm15005_vm6, 1.0, %v18893_v32  ;;  %7854 = vset.pattern.permute.xlu1 %v20204_v63 }
 0x414   : > { %v15137_v12 = vadd.f32 %v7243_v45, %v14946_v30  ;;  %vm15154_vm11 = vmand %vm20348_vm5, %vm15030_vm2  ;;  %v15181_v2 = vadd.f32 %v1599_v20, %v1598_v57  ;;  %vm3718_vm9 = vcmp.gt.f32.partialorder %v20345_v22, %v9452_v8  ;;  %vm20357_vm3 = vcmp.eq.f32.partialorder %v20091_v40, %v9452_v8  ;;  %4815 = vperm.xlu1 %7854, %v20307_v60   ;;  %v20419_v22 = vld [vmem:[#allocation23_spill] sm:$0xff] }
 0x415   : > { %vm15174_vm2 = vmand %vm20352_vm12, %vm15118_vm10  ;;  %vm20358_vm7 = vcmp.gt.f32.partialorder %v20091_v40, %v9452_v8  ;;  %v3346_v46 = vadd.f32 %v7208_v52, %v14628_v27  ;;  %v15199_v57 = vadd.f32 %v1843_v19, %v20343_v37  ;;  %vm5018_vm6 = vcmp.gt.f32.partialorder %v15068_v1, %v9220_v62 }
 0x416   : > { %20355 = vst [vmem:[#allocation80_spill] sm:$0xff] %v15181_v2  ;;  %vm15193_vm14 = vmor %vm20358_vm7, %vm20357_vm3  ;;  %vm5558_vm10 = vcmp.gt.f32.partialorder %v15068_v1, %v9224_v34  ;;  %vm20361_vm5 = vcmp.eq.f32.partialorder %v20314_v31, %v9441_v58  ;;  %vm20362_vm12 = vcmp.gt.f32.partialorder %v20314_v31, %v9441_v58  ;;  %v2009_v27 = vadd.f32 %v7081_v50, %v2008_v54  ;;  %v20367_v54 = vld [vmem:[#allocation127_spill] sm:$0xff] }
 0x417   : > { %vm15211_vm3 = vmor %vm20362_vm12, %vm20361_vm5  ;;  %v7363_v52 = vsel %vm5018_vm6, 1.0, %v18893_v32  ;;  %v7427_v37 = vsel %vm5558_vm10, 1.0, %v18893_v32  ;;  %vm6098_vm13 = vcmp.gt.f32.partialorder %v15068_v1, %v9228_v15  ;;  %v7096_v19 = vsel %vm15174_vm2, 1.0, %v18893_v32  ;;  %v20465_v1 = vld [vmem:[#allocation16_spill] sm:$0xff] }
 0x418   : > { %vm20365_vm5 = vcmp.eq.f32.partialorder %v20320_v35, %v9441_v58  ;;  %vm20366_vm12 = vcmp.gt.f32.partialorder %v20320_v35, %v9441_v58  ;;  %v15238_v50 = vadd.f32 %v7363_v52, %v14922_v56  ;;  %v15241_v51 = vadd.f32 %v7427_v37, %v14925_v44  ;;  %v15263_v44 = vpop.permute.xlu1 %4581  ;;  %7856 = vset.pattern.permute.xlu1 %v19975_v23  ;;  %v20425_v23 = vld [vmem:[#allocation137_spill] sm:$0xff] }
 0x419   : > { %vm1947_vm7 = vmor %vm20366_vm12, %vm20365_vm5  ;;  %v7491_v38 = vsel %vm6098_vm13, 1.0, %v18893_v32  ;;  %vm20368_vm2 = vcmp.eq.f32.partialorder %v20314_v31, %v9452_v8  ;;  %vm20369_vm5 = vcmp.gt.f32.partialorder %v20314_v31, %v9452_v8  ;;  %20372 = vst [vmem:[#allocation159_spill] sm:$0xff] %v15263_v44  ;;  %v7224_v37 = vsel %vm15193_vm14, 1.0, %v18893_v32  ;;  %5013 = vperm.xlu1 %7856, %v20307_v60   ;;  %v20428_v60 = vld [vmem:[#allocation70_spill] sm:$0xff] }
 0x41a   : > { %vm15251_vm12 = vmor %vm20369_vm5, %vm20368_vm2  ;;  %v7082_v56 = vsel %vm1947_vm7, 1.0, %v18893_v32  ;;  %v15257_v52 = vadd.f32 %v7491_v38, %v14950_v17  ;;  %vm20373_vm2 = vcmp.eq.f32.partialorder %v20320_v35, %v9452_v8  ;;  %vm20374_vm7 = vcmp.gt.f32.partialorder %v20320_v35, %v9452_v8 }
 0x41b   : > { %vm3285_vm5 = vmor %vm20374_vm7, %vm20373_vm2  ;;  %v3347_v17 = vadd.f32 %v7209_v53, %v3346_v46  ;;  %vm4822_vm10 = vcmp.gt.f32.partialorder %v15141_v7, %v9220_v62  ;;  %vm5426_vm14 = vcmp.gt.f32.partialorder %v15141_v7, %v9224_v34  ;;  %v2010_v21 = vadd.f32 %v7082_v56, %v2009_v27 }
 0x41c   : > { %v7210_v38 = vsel %vm3285_vm5, 1.0, %v18893_v32  ;;  %vm20375_vm2 = vcmp.lt.s32.totalorder %v14620_v33, %v9591_v48  ;;  %vm20376_vm7 = vcmp.eq.f32.partialorder %v20181_v14, %v9441_v58  ;;  %v7349_v53 = vsel %vm4822_vm10, 1.0, %v18893_v32 }
 0x41d   : > { %vm2097_vm13 = vmand %vm20376_vm7, %vm20375_vm2  ;;  %v7413_v46 = vsel %vm5426_vm14, 1.0, %v18893_v32  ;;  %v15296_v24 = vsel %vm15154_vm11, 1.0, %v18893_v32  ;;  %vm2566_vm5 = vcmp.eq.f32.partialorder %v20260_v29, %v9446_v5  ;;  %v2174_v27 = vadd.f32 %v7096_v19, %v15126_v6 }
 0x41e   : > { %20377 = vst [vmem:[#allocation177_spill] sm:$0xff] %v15296_v24  ;;  %vm2113_vm6 = vmor %vm2049_vm1, %vm2097_vm13  ;;  %v15307_v56 = vadd.f32 %v7349_v53, %v14997_v3  ;;  %v15310_v61 = vadd.f32 %v7413_v46, %v15039_v10  ;;  %vm2716_vm11 = vcmp.gt.f32.partialorder %v20091_v40, %v9446_v5  ;;  %vm2732_vm10 = vcmp.eq.f32.partialorder %v20091_v40, %v9446_v5  ;;  %v15366_v46 = vpop.permute.xlu1 %4965  ;;  %v20394_v3 = vld [vmem:[#allocation185_spill] sm:$0xff] }
 0x41f   : > { %v3348_v30 = vadd.f32 %v7210_v38, %v3347_v17  ;;  %vm15320_vm1 = vmand %vm18724_vm8, %vm2113_vm6  ;;  %v7083_v10 = vsel %vm15211_vm3, 1.0, %v18893_v32  ;;  %v3512_v19 = vadd.f32 %v7224_v37, %v14779_v55  ;;  %vm18730_vm7 = vcmp.lt.s32.totalorder %v14782_v43, %v9591_v48  ;;  %20384 = vst [vmem:[#allocation41_spill] sm:$0xff] %v15366_v46  ;;  %v20388_v55 = vld [vmem:[#allocation183_spill] sm:$0xff] }
 0x420   : > { %vm15337_vm6 = vmand %vm3734_vm4, %vm18725_vm15  ;;  %vm2067_vm8 = vcmp.eq.f32.partialorder %v20226_v16, %v9441_v58  ;;  %v20382_v17 = vrot.slane %v15102_v26, 2  ;;  %v2011_v53 = vadd.f32 %v7083_v10, %v2010_v21  ;;  %v20383_v20 = vrot.slane %v20356_v4, 4  ;;  %v20385_v10 = vld [vmem:[#allocation66_spill] sm:$0xff] }
 0x421   : > { %vm4626_vm15 = vcmp.gt.f32.partialorder %v15263_v44, %v9220_v62  ;;  %v7098_v21 = vsel %vm15320_vm1, 1.0, %v18893_v32  ;;  %vm15383_vm4 = vmor %vm3718_vm9, %vm15337_vm6  ;;  %v2175_v6 = vadd.f32 %v20388_v55, %v2174_v27  ;;  %vm20391_vm1 = vcmp.gt.f32.partialorder %v20181_v14, %v9452_v8  ;;  %v20397_v27 = vld [vmem:[#allocation133_spill] sm:$0xff] }
 0x422   : > { %v15352_v38 = vadd.f32 %v20382_v17, %v15102_v26  ;;  %v15362_v37 = vadd.f32 %v20383_v20, %v20356_v4  ;;  %v7211_v26 = vsel %vm15251_vm12, 1.0, %v18893_v32  ;;  %v7335_v4 = vsel %vm4626_vm15, 1.0, %v18893_v32 }
 0x423   : > { %v3349_v45 = vadd.f32 %v7211_v26, %v3348_v30  ;;  %v15389_v33 = vadd.f32 %v7335_v4, %v20389_v49  ;;  %vm20390_vm15 = vcmp.eq.f32.partialorder %v20181_v14, %v9452_v8  ;;  %v3513_v30 = vadd.f32 %v20394_v3, %v3512_v19  ;;  %v15441_v3 = vpop.permute.xlu1 %4375 }
 0x424   : > { %vm15399_vm13 = vmor %vm20391_vm1, %vm20390_vm15  ;;  %v2176_v49 = vadd.f32 %v7098_v21, %v2175_v6  ;;  %vm20395_vm1 = vcmp.eq.f32.partialorder %v20367_v54, %v9441_v58  ;;  %vm20396_vm2 = vcmp.gt.f32.partialorder %v20367_v54, %v9441_v58  ;;  %v2012_v19 = vadd.f32 %v20397_v27, %v2011_v53  ;;  %v20400_v53 = vld [vmem:[#allocation90_spill] sm:$0xff]  ;;  %20401 = vst [vmem:[#allocation57_spill] sm:$0xff] %v15441_v3 }
 0x425   : > { %vm1950_vm9 = vmor %vm20396_vm2, %vm20395_vm1  ;;  %vm5019_vm14 = vcmp.gt.f32.partialorder %v15366_v46, %v9220_v62  ;;  %vm5559_vm15 = vcmp.gt.f32.partialorder %v15366_v46, %v9224_v34  ;;  %vm6099_vm3 = vcmp.gt.f32.partialorder %v15366_v46, %v9228_v15  ;;  %vm20398_vm2 = vcmp.eq.f32.partialorder %v20367_v54, %v9452_v8 }
 0x426   : > { %v7085_v55 = vsel %vm1950_vm9, 1.0, %v18893_v32  ;;  %vm20399_vm1 = vcmp.gt.f32.partialorder %v20367_v54, %v9452_v8  ;;  %v3350_v21 = vadd.f32 %v20400_v53, %v3349_v45  ;;  %v7364_v4 = vsel %vm5019_vm14, 1.0, %v18893_v32 }
 0x427   : > { %v2013_v26 = vadd.f32 %v7085_v55, %v2012_v19  ;;  %vm3288_vm6 = vmor %vm20399_vm1, %vm20398_vm2  ;;  %v7428_v6 = vsel %vm5559_vm15, 1.0, %v18893_v32  ;;  %vm20402_vm9 = vcmp.ne.s32.totalorder %v20344_v25, %v9488_v28  ;;  %v7226_v19 = vsel %vm15399_vm13, 1.0, %v18893_v32  ;;  %v20405_v55 = vld [vmem:[#allocation161_spill] sm:$0xff]  ;;  %v15530_v27 = vpop.permute.xlu1 %4585 }
 0x428   : > { %vm15448_vm12 = vmand %vm20402_vm9, %vm15383_vm4  ;;  %v7213_v45 = vsel %vm3288_vm6, 1.0, %v18893_v32  ;;  %vm3555_vm14 = vcmp.gt.f32.partialorder %v20405_v55, %v9452_v8  ;;  %vm3571_vm15 = vcmp.eq.f32.partialorder %v20405_v55, %v9452_v8  ;;  %v15461_v20 = vadd.f32 %v7364_v4, %v15238_v50  ;;  %20415 = vst [vmem:[#allocation89_spill] sm:$0xff] %v15530_v27 }
 0x429   : > { %v15464_v53 = vadd.f32 %v7428_v6, %v15241_v51  ;;  %vm15472_vm13 = vmor %vm2550_vm0, %vm2566_vm5  ;;  %v2014_v17 = vrot.slane %v2013_v26, 4  ;;  %v3351_v25 = vadd.f32 %v7213_v45, %v3350_v21  ;;  %v7492_v50 = vsel %vm6099_vm3, 1.0, %v18893_v32  ;;  %v20418_v45 = vld [vmem:[#allocation83_spill] sm:$0xff] }
 0x42a   : > { %20406 = vst [vmem:[#allocation147_spill] sm:$0xff] %v15461_v20  ;;  %vm15488_vm0 = vmor %vm2716_vm11, %vm2732_vm10  ;;  %v2514_v21 = vrot.slane %v15362_v37, 2  ;;  %v15494_v4 = vadd.f32 %v7492_v50, %v15257_v52  ;;  %v15503_v6 = vsel %vm15448_vm12, 1.0, %v18893_v32  ;;  %vm2553_vm11 = vcmp.gt.f32.partialorder %v20314_v31, %v9446_v5 }
 0x42b   : > { %20407 = vst [vmem:[#allocation168_spill] sm:$0xff] %v15464_v53  ;;  %20413 = vst [vmem:[#allocation138_spill] sm:$0xff] %v15503_v6  ;;  %vm2569_vm10 = vcmp.eq.f32.partialorder %v20314_v31, %v9446_v5  ;;  %v3514_v40 = vadd.f32 %v7226_v19, %v3513_v30  ;;  %v3352_v52 = vrot.slane %v3351_v25, 4  ;;  %vm2552_vm12 = vcmp.gt.f32.partialorder %v20320_v35, %v9446_v5 }
 0x42c   : > { %20412 = vst [vmem:[#allocation156_spill] sm:$0xff] %v15494_v4  ;;  %vm2099_vm6 = vmand %vm2067_vm8, %vm18730_vm7  ;;  %vm2568_vm1 = vcmp.eq.f32.partialorder %v20320_v35, %v9446_v5  ;;  %vm20414_vm9 = vcmp.gt.f32.partialorder %v20226_v16, %v9441_v58  ;;  %v2015_v30 = vadd.f32 %v2014_v17, %v2013_v26  ;;  %v7144_v19 = vsel %vm15472_vm13, 1.0, %v18893_v32  ;;  %v20417_v58 = vld [vmem:[#allocation17_spill] sm:$0xff] }
 0x42d   : > { %vm2115_vm3 = vmor %vm20414_vm9, %vm2099_vm6  ;;  %vm2718_vm2 = vcmp.gt.f32.partialorder %v20181_v14, %v9446_v5  ;;  %vm2734_vm6 = vcmp.eq.f32.partialorder %v20181_v14, %v9446_v5  ;;  %vm20416_vm9 = vcmp.ne.s32.totalorder %v14782_v43, %v9591_v48  ;;  %v2177_v17 = vadd.f32 %v20417_v58, %v2176_v49  ;;  %v20420_v49 = vld [vmem:[#allocation30_spill] sm:$0xff]  ;;  %v20421_v43 = vld [vmem:[#allocation119_spill] sm:$0xff] }
 0x42e   : > { %vm2131_vm4 = vmand %vm20416_vm9, %vm2115_vm3  ;;  %v3353_v50 = vadd.f32 %v3352_v52, %v3351_v25  ;;  %vm4627_vm9 = vcmp.gt.f32.partialorder %v15530_v27, %v9220_v62  ;;  %vm988_vm8 = vcmp.eq.f32.partialorder %v20260_v29, %v9436_v11  ;;  %v7160_v58 = vsel %vm15488_vm0, 1.0, %v18893_v32  ;;  %v20422_v25 = vld [vmem:[#allocation126_spill] sm:$0xff] }
 0x42f   : > { %v7100_v26 = vsel %vm2131_vm4, 1.0, %v18893_v32  ;;  %vm18760_vm4 = vcmp.lt.s32.totalorder %v20421_v43, %v20256_v39  ;;  %vm2898_vm13 = vcmp.eq.f32.partialorder %v20422_v25, %v9446_v5  ;;  %vm20423_vm3 = vcmp.eq.f32.partialorder %v20226_v16, %v9452_v8 }
 0x430   : > { %v2178_v52 = vadd.f32 %v7100_v26, %v2177_v17  ;;  %vm20424_vm7 = vcmp.gt.f32.partialorder %v20226_v16, %v9452_v8  ;;  %v3515_v47 = vadd.f32 %v20425_v23, %v3514_v40  ;;  %v20426_v51 = vrot.slane %v20385_v10, 4  ;;  %v20429_v26 = vld [vmem:[#allocation44_spill] sm:$0xff]  ;;  %v20432_v23 = vld [vmem:[#allocation22_spill] sm:$0xff] }
 0x431   : > { %vm3453_vm5 = vmor %vm20424_vm7, %vm20423_vm3  ;;  %v2677_v3 = vadd.f32 %v7144_v19, %v20428_v60  ;;  %v2016_v44 = vrot.slane %v2015_v30, 2  ;;  %v7336_v17 = vsel %vm4627_vm9, 1.0, %v18893_v32  ;;  %v20430_v24 = vrot.slane %v15199_v57, 2  ;;  %v15595_v19 = vpop.permute.xlu1 %4779 }
 0x432   : > { %v15577_v63 = vadd.f32 %v20426_v51, %v20385_v10  ;;  %v7228_v46 = vsel %vm3453_vm5, 1.0, %v18893_v32  ;;  %v2179_v48 = vadd.f32 %v20429_v26, %v2178_v52  ;;  %v15589_v40 = vadd.s32 256, %v20432_v23  ;;  %v20433_v10 = vld [vmem:[#allocation79_spill] sm:$0xff]  ;;  %20434 = vst [vmem:[#allocation179_spill] sm:$0xff] %v15595_v19  ;;  %vm3619_vm9 = vmor %vm3555_vm14, %vm3571_vm15  ;;  %v20438_v26 = vld [vmem:[#allocation172_spill] sm:$0xff] }
 0x433   : > { %v3516_v18 = vadd.f32 %v7228_v46, %v3515_v47  ;;  %v15586_v7 = vadd.f32 %v20430_v24, %v15199_v57  ;;  %v2843_v51 = vadd.f32 %v7160_v58, %v20433_v10  ;;  %v3354_v6 = vrot.slane %v3353_v50, 2  ;;  %v20435_v47 = vld [vmem:[#allocation118_spill] sm:$0xff]  ;;  %v20436_v46 = vld [vmem:[#allocation33_spill] sm:$0xff]  ;;  %v20437_v57 = vld [vmem:[#allocation151_spill] sm:$0xff] }
 0x434   : > { %20427 = vst [vmem:[#allocation131_spill] sm:$0xff] %v15577_v63  ;;  %v4738_v60 = vadd.f32 %v7336_v17, %v15389_v33  ;;  %vm3733_vm0 = vcmp.eq.f32.partialorder %v20435_v47, %v9452_v8  ;;  %v2180_v24 = vrot.slane %v2179_v48, 4  ;;  %v15611_v33 = vadd.f32 %v2514_v21, %v15362_v37  ;;  %v20439_v23 = vld [vmem:[#allocation116_spill] sm:$0xff]  ;;  %v20440_v37 = vld [vmem:[#allocation95_spill] sm:$0xff]  ;;  %v20441_v21 = vld [vmem:[#allocation125_spill] sm:$0xff] }
 0x435   : > { %20431 = vst [vmem:[#allocation188_spill] sm:$0xff] %v15586_v7  ;;  %v3517_v58 = vadd.f32 %v20437_v57, %v3516_v18  ;;  %vm18762_vm7 = vcmp.ne.s32.totalorder %v20419_v22, %v18983_v42  ;;  %v15619_v18 = vadd.f32 %v15164_v36, %v2677_v3  ;;  %v7244_v17 = vsel %vm3619_vm9, 1.0, %v18893_v32  ;;  %vm15647_vm5 = vmor %vm2553_vm11, %vm2569_vm10 }
 0x436   : > { %v15624_v10 = vadd.f32 %v20439_v23, %v20438_v26  ;;  %v2017_v57 = vadd.f32 %v2016_v44, %v2015_v30  ;;  %vm18766_vm15 = vcmp.lt.s32.totalorder %v20441_v21, %v20256_v39  ;;  %v2181_v52 = vadd.f32 %v2180_v24, %v2179_v48  ;;  %v15637_v44 = vpop.permute.xlu0 %4589  ;;  %vm15664_vm11 = vmor %vm2552_vm12, %vm2568_vm1  ;;  %v20449_v26 = vld [vmem:[#allocation152_spill] sm:$0xff] }
 0x437   : > { %v3682_v36 = vadd.f32 %v7244_v17, %v15137_v12  ;;  %v3518_v3 = vrot.slane %v3517_v58, 4  ;;  %20442 = vst [vmem:[#allocation96_spill] sm:$0xff] %v15637_v44  ;;  %v20445_v12 = vld [vmem:[#allocation184_spill] sm:$0xff]  ;;  %v3355_v24 = vadd.f32 %v3354_v6, %v3353_v50  ;;  %v2350_v50 = vrot.slane %v15352_v38, 1  ;;  %vm15678_vm3 = vmor %vm2718_vm2, %vm2734_vm6 }
 0x438   : > { %v15652_v30 = vadd.f32 %v20445_v12, %v2843_v51  ;;  %v2182_v6 = vrot.slane %v2181_v52, 2  ;;  %v2018_v7 = vrot.slane %v2017_v57, 1  ;;  %vm4628_vm14 = vcmp.gt.f32.partialorder %v15637_v44, %v9220_v62  ;;  %v20474_v17 = vld [vmem:[#allocation136_spill] sm:$0xff] }
 0x439   : > { %v3683_v51 = vadd.f32 %v20449_v26, %v3682_v36  ;;  %v3519_v23 = vadd.f32 %v3518_v3, %v3517_v58  ;;  %v15688_v58 = vpop.permute.xlu1 %4380  ;;  %vm20453_vm10 = vcmp.lt.s32.totalorder %v20419_v22, %v18983_v42  ;;  %vm20454_vm2 = vcmp.eq.f32.partialorder %v20418_v45, %v9436_v11 }
 0x43a   : > { %20446 = vst [vmem:[#allocation98_spill] sm:$0xff] %v15652_v30  ;;  %20452 = vst [vmem:[#allocation60_spill] sm:$0xff] %v15688_v58  ;;  %v2183_v3 = vadd.f32 %v2182_v6, %v2181_v52  ;;  %v7337_v27 = vsel %vm4628_vm14, 1.0, %v18893_v32  ;;  %vm20457_vm1 = vcmp.lt.s32.totalorder %v20420_v49, %v18983_v42  ;;  %v20463_v6 = vld [vmem:[#allocation150_spill] sm:$0xff]  ;;  %v15732_v63 = vadd.s32 384, %v20465_v1  ;;  %v20535_v52 = vld [vmem:[#allocation163_spill] sm:$0xff] }
 0x43b   : > { %v3684_v36 = vrot.slane %v3683_v51, 4  ;;  %vm15696_vm6 = vmand %vm20454_vm2, %vm20453_vm10  ;;  %v3520_v26 = vrot.slane %v3519_v23, 2  ;;  %v2516_v2 = vrot.slane %v15611_v33, 1  ;;  %v3356_v0 = vrot.slane %v3355_v24, 1 }
 0x43c   : > { %vm15709_vm9 = vmand %vm988_vm8, %vm20457_vm1  ;;  %vm20464_vm8 = vcmp.eq.f32.partialorder %v20463_v6, %v9220_v62  ;;  %v15735_v4 = vadd.f32 %v7337_v27, %v4738_v60  ;;  %v15745_v53 = vadd.s32 256, %v20419_v22  ;;  %v2184_v1 = vrot.slane %v2183_v3, 1 }
 0x43d   : > { %vm15721_vm14 = vmand %vm2898_vm13, %vm18760_vm4  ;;  %vm2571_vm4 = vcmp.eq.f32.partialorder %v20367_v54, %v9446_v5  ;;  %v3521_v30 = vadd.f32 %v3520_v26, %v3519_v23  ;;  %v3685_v20 = vadd.f32 %v3684_v36, %v3683_v51  ;;  %v15750_v27 = vsel %vm15647_vm5, 1.0, %v18893_v32  ;;  %v15763_v48 = vpop.permute.xlu1 %4973  ;;  %v20473_v36 = vld [vmem:[#allocation61_spill] sm:$0xff] }
 0x43e   : > { %vm20462_vm2 = vmmov %vm20453_vm10  ;;  %20466 = vst [vmem:[#allocation65_spill] sm:$0xff] %v15735_v4  ;;  %vm20467_vm10 = vcmp.gt.f32.partialorder %v20463_v6, %v9220_v62  ;;  %v7146_v60 = vsel %vm15664_vm11, 1.0, %v18893_v32  ;;  %v20470_v4 = vld [vmem:[#allocation121_spill] sm:$0xff]  ;;  %v2019_v51 = vadd.f32 %v2018_v7, %v2017_v57  ;;  %v2351_v23 = vadd.f32 %v2350_v50, %v15352_v38 }
 0x43f   : > { %vm4457_vm1 = vmand %vm20464_vm8, %vm20462_vm2  ;;  %20468 = vst [vmem:[#allocation127_spill] sm:$0xff] %v15745_v53  ;;  %v20471_v53 = vld [vmem:[#allocation24_spill] sm:$0xff]  ;;  %v2185_v7 = vadd.f32 %v2184_v1, %v2183_v3  ;;  %v3522_v38 = vrot.slane %v3521_v30, 1  ;;  %v3686_v57 = vrot.slane %v3685_v20, 2  ;;  %v20477_v50 = vld [vmem:[#allocation73_spill] sm:$0xff]  ;;  %vm20482_vm11 = vcmp.eq.f32.partialorder %v20314_v31, %v9436_v11 }
 0x440   : > { %vm4473_vm12 = vmor %vm20467_vm10, %vm4457_vm1  ;;  %20469 = vst [vmem:[#allocation66_spill] sm:$0xff] %v15750_v27  ;;  %vm20476_vm10 = vcmp.gt.f32.partialorder %v20463_v6, %v9224_v34  ;;  %vm20478_vm1 = vcmp.lt.s32.totalorder %v20477_v50, %v9488_v28  ;;  %v20485_v3 = vld [vmem:[#allocation191_spill] sm:$0xff]  ;;  %v20562_v1 = vld [vmem:[#allocation124_spill] sm:$0xff] }
 0x441   : > { %vm4489_vm2 = vmand %vm18762_vm7, %vm4473_vm12  ;;  %20472 = vst [vmem:[#allocation183_spill] sm:$0xff] %v15763_v48  ;;  %vm20475_vm7 = vcmp.eq.f32.partialorder %v20463_v6, %v9224_v34  ;;  %v2517_v48 = vadd.f32 %v2516_v2, %v15611_v33  ;;  %v20493_v2 = vld [vmem:[#allocation190_spill] sm:$0xff]  ;;  %v3523_v14 = vadd.f32 %v3522_v38, %v3521_v30  ;;  %v20561_v27 = vld [vmem:[#allocation147_spill] sm:$0xff] }
 0x442   : > { %v7316_v26 = vsel %vm4489_vm2, 1.0, %v18893_v32  ;;  %vm5205_vm8 = vmor %vm20476_vm10, %vm20475_vm7  ;;  %vm20481_vm10 = vcmp.lt.s32.totalorder %v20436_v46, %v18983_v42  ;;  %v3357_v46 = vadd.f32 %v3356_v0, %v3355_v24  ;;  %v2186_v24 = vadd.f32 %v2185_v7, %v2019_v51  ;;  %v15867_v7 = vpop.permute.xlu1 %4783 }
 0x443   : > { %vm15790_vm2 = vmand %vm3733_vm0, %vm20478_vm1  ;;  %v15807_v50 = vadd.f32 %v7316_v26, %v20485_v3  ;;  %v7380_v22 = vsel %vm5205_vm8, 1.0, %v18893_v32  ;;  %vm20487_vm0 = vcmp.eq.f32.partialorder %v20463_v6, %v9228_v15  ;;  %vm20488_vm1 = vcmp.gt.f32.partialorder %v20463_v6, %v9228_v15  ;;  %v20489_v26 = vld [vmem:[#allocation91_spill] sm:$0xff]  ;;  %20504 = vst [vmem:[#allocation90_spill] sm:$0xff] %v15867_v7  ;;  %v20580_v3 = vld [vmem:[#allocation168_spill] sm:$0xff] }
 0x444   : > { %vm15802_vm12 = vmand %vm20482_vm11, %vm20481_vm10  ;;  %vm20490_vm8 = vcmp.gt.f32.partialorder %v20418_v45, %v9436_v11  ;;  %v15833_v0 = vadd.f32 %v7380_v22, %v20493_v2  ;;  %v15855_v22 = vadd.f32 %v7146_v60, %v15619_v18  ;;  %v3687_v51 = vadd.f32 %v3686_v57, %v3685_v20  ;;  %v20505_v60 = vld [vmem:[#allocation115_spill] sm:$0xff] }
 0x445   : > { %20486 = vst [vmem:[#allocation114_spill] sm:$0xff] %v15807_v50  ;;  %vm5745_vm7 = vmor %vm20488_vm1, %vm20487_vm0  ;;  %vm20495_vm0 = vcmp.eq.f32.partialorder %v20463_v6, %v20126_v13  ;;  %vm20496_vm1 = vcmp.gt.f32.partialorder %v20463_v6, %v20126_v13  ;;  %v20500_v6 = vld [vmem:[#allocation87_spill] sm:$0xff]  ;;  %v15872_v18 = vsel %vm15678_vm3, 1.0, %v18893_v32  ;;  %v2352_v20 = vadd.f32 %v2351_v23, %v2186_v24 }
 0x446   : > { %vm15828_vm13 = vmor %vm20490_vm8, %vm15696_vm6  ;;  %20494 = vst [vmem:[#allocation185_spill] sm:$0xff] %v15833_v0  ;;  %v7444_v33 = vsel %vm5745_vm7, 1.0, %v18893_v32  ;;  %vm20497_vm8 = vcmp.eq.f32.partialorder %v20284_v9, %v9446_v5  ;;  %vm20502_vm7 = vcmp.lt.s32.totalorder %v15589_v40, %v20256_v39  ;;  %v3524_v57 = vadd.f32 %v3523_v14, %v3357_v46  ;;  %v20512_v23 = vld [vmem:[#allocation75_spill] sm:$0xff]  ;;  %v20514_v14 = vld [vmem:[#allocation148_spill] sm:$0xff]  ;;  %v15924_v46 = vpop.permute.xlu1 %4593 }
 0x447   : > { %vm6285_vm5 = vmor %vm20496_vm1, %vm20495_vm0  ;;  %v15858_v2 = vadd.f32 %v7444_v33, %v20500_v6  ;;  %vm20503_vm0 = vcmp.eq.f32.partialorder %v20440_v37, %v9446_v5  ;;  %v20508_v33 = vld [vmem:[#allocation35_spill] sm:$0xff]  ;;  %v3688_v12 = vrot.slane %v3687_v51, 1  ;;  %v20510_v6 = vld [vmem:[#allocation88_spill] sm:$0xff] }
 0x448   : > { %vm15850_vm10 = vmand %vm20497_vm8, %vm18766_vm15  ;;  %v7508_v30 = vsel %vm6285_vm5, 1.0, %v18893_v32  ;;  %vm20509_vm8 = vcmp.ne.s32.totalorder %v15589_v40, %v20256_v39  ;;  %vm4824_vm5 = vcmp.gt.f32.partialorder %v15595_v19, %v9220_v62  ;;  %v20520_v0 = vld [vmem:[#allocation182_spill] sm:$0xff] }
 0x449   : > { %20501 = vst [vmem:[#allocation133_spill] sm:$0xff] %v15858_v2  ;;  %vm2922_vm1 = vmand %vm20503_vm0, %vm20502_vm7  ;;  %v15879_v38 = vadd.f32 %v7508_v30, %v20505_v60  ;;  %vm20507_vm7 = vcmp.gt.f32.partialorder %v20440_v37, %v9446_v5  ;;  %v4934_v37 = vadd.f32 %v20510_v6, %v15307_v56  ;;  %v15910_v56 = vadd.f32 %v2517_v48, %v2352_v20  ;;  %v20517_v6 = vld [vmem:[#allocation76_spill] sm:$0xff]  ;;  %v20521_v48 = vld [vmem:[#allocation74_spill] sm:$0xff] }
 0x44a   : > { %vm2938_vm0 = vmor %vm20507_vm7, %vm2922_vm1  ;;  %vm5428_vm1 = vcmp.gt.f32.partialorder %v15595_v19, %v9224_v34  ;;  %v7351_v30 = vsel %vm4824_vm5, 1.0, %v18893_v32  ;;  %v5538_v50 = vadd.f32 %v20520_v0, %v15310_v61  ;;  %v20586_v58 = vld [vmem:[#allocation66_spill] sm:$0xff] }
 0x44b   : > { %20506 = vst [vmem:[#allocation161_spill] sm:$0xff] %v15879_v38  ;;  %vm2954_vm6 = vmand %vm20509_vm8, %vm2938_vm0  ;;  %vm20513_vm8 = vcmp.lt.s32.totalorder %v15589_v40, %v20256_v39  ;;  %vm20515_vm0 = vcmp.eq.f32.partialorder %v20514_v14, %v9228_v15  ;;  %v7415_v60 = vsel %vm5428_vm1, 1.0, %v18893_v32  ;;  %v3689_v38 = vadd.f32 %v3688_v12, %v3687_v51 }
 0x44c   : > { %v7168_v24 = vsel %vm2954_vm6, 1.0, %v18893_v32  ;;  %vm5996_vm15 = vmand %vm20515_vm0, %vm20513_vm8  ;;  %20516 = vst [vmem:[#allocation17_spill] sm:$0xff] %v15910_v56  ;;  %vm20519_vm6 = vcmp.gt.f32.partialorder %v20514_v14, %v9228_v15  ;;  %v15920_v2 = vadd.f32 %v7351_v30, %v4934_v37  ;;  %vm20522_vm8 = vcmp.gt.f32.partialorder %v20260_v29, %v9436_v11  ;;  %v16037_v37 = vpop.permute.xlu1 %4977  ;;  %v20634_v29 = vld [vmem:[#allocation113_spill] sm:$0xff] }
 0x44d   : > { %v15915_v7 = vadd.f32 %v7168_v24, %v20517_v6  ;;  %vm6012_vm3 = vmor %vm20519_vm6, %vm5996_vm15  ;;  %vm20525_vm6 = vcmp.gt.f32.partialorder %v20422_v25, %v9446_v5  ;;  %vm20528_vm1 = vcmp.ne.s32.totalorder %v15589_v40, %v20256_v39  ;;  %vm20533_vm0 = vcmp.gt.f32.partialorder %v20514_v14, %v20126_v13 }
 0x44e   : > { %vm15935_vm15 = vmor %vm20522_vm8, %vm15709_vm9  ;;  %v15980_v40 = vadd.f32 %v3689_v38, %v3524_v57  ;;  %v15982_v44 = vadd.f32 %v7415_v60, %v5538_v50  ;;  %vm20541_vm8 = vcmp.lt.s32.totalorder %v20473_v36, %v9488_v28  ;;  %v20543_v50 = vmov 0  ;;  %v20568_v60 = vld [vmem:[#allocation98_spill] sm:$0xff]  ;;  %v20602_v38 = vld [vmem:[#allocation139_spill] sm:$0xff] }
 0x44f   : > { %20518 = vst [vmem:[#allocation83_spill] sm:$0xff] %v15915_v7  ;;  %vm15946_vm5 = vmor %vm20525_vm6, %vm15721_vm14  ;;  %vm20532_vm6 = vcmp.eq.f32.partialorder %v20514_v14, %v20126_v13  ;;  %v20555_v24 = vmov 0  ;;  %v5131_v14 = vadd.f32 %v20562_v1, %v20561_v27  ;;  %v20566_v30 = vmov 0  ;;  %v20581_v27 = vld [vmem:[#allocation166_spill] sm:$0xff] }
 0x450   : > { %vm6028_vm7 = vmand %vm20528_vm1, %vm6012_vm3  ;;  %vm20529_vm3 = vcmp.gt.f32.partialorder %v20367_v54, %v9446_v5  ;;  %20534 = vst [vmem:[#allocation126_spill] sm:$0xff] %v15980_v40  ;;  %v2845_v6 = vadd.f32 %v15872_v18, %v20568_v60  ;;  %vm20569_vm14 = vcmp.lt.s32.totalorder %v15167_v59, %v9488_v28  ;;  %v5671_v1 = vadd.f32 %v20581_v27, %v20580_v3  ;;  %v20582_v60 = vld [vmem:[#allocation85_spill] sm:$0xff]  ;;  %v16169_v19 = vpop.permute.xlu1 %4390 }
 0x451   : > { %vm15969_vm1 = vmor %vm20529_vm3, %vm2571_vm4  ;;  %v7475_v25 = vsel %vm6028_vm7, 1.0, %v18893_v32  ;;  %vm20537_vm4 = vcmp.lt.s32.totalorder %v20471_v53, %v18983_v42  ;;  %vm20538_vm7 = vcmp.eq.f32.partialorder %v20470_v4, %v9436_v11  ;;  %v2680_v56 = vadd.f32 %v20586_v58, %v15855_v22  ;;  %v20593_v22 = vld [vmem:[#allocation156_spill] sm:$0xff]  ;;  %20595 = vst [vmem:[#allocation44_spill] sm:$0xff] %v16169_v19 }
 0x452   : > { %vm6552_vm11 = vmor %vm20533_vm0, %vm20532_vm6  ;;  %v15987_v0 = vadd.f32 %v7475_v25, %v20535_v52  ;;  %vm20545_vm0 = vcmp.eq.f32.partialorder %v20226_v16, %v9446_v5  ;;  %vm20546_vm6 = vcmp.gt.f32.partialorder %v20226_v16, %v9446_v5  ;;  %v20551_v16 = vmov 0  ;;  %v20573_v52 = vld [vmem:[#allocation23_spill] sm:$0xff]  ;;  %v20607_v19 = vld [vmem:[#allocation20_spill] sm:$0xff] }
 0x453   : > { %v7539_v20 = vsel %vm6552_vm11, 1.0, %v18893_v32  ;;  %vm15996_vm3 = vmand %vm20538_vm7, %vm20537_vm4  ;;  %vm20542_vm4 = vcmp.eq.f32.partialorder %v20474_v17, %v9452_v8  ;;  %vm20577_vm11 = vcmp.lt.s32.totalorder %v20471_v53, %v18983_v42  ;;  %v2846_v40 = vadd.f32 %v20607_v19, %v2845_v6 }
 0x454   : > { %20536 = vst [vmem:[#allocation137_spill] sm:$0xff] %v15987_v0  ;;  %vm16014_vm7 = vmand %vm20542_vm4, %vm20541_vm8  ;;  %v16029_v57 = vadd.f32 %v7539_v20, %v15624_v10  ;;  %v20553_v10 = vld [vmem:[#allocation33_spill] sm:$0xff]  ;;  %vm20554_vm8 = vcmp.gt.f32.partialorder %v20314_v31, %v9436_v11  ;;  %v20560_v31 = vld [vmem:[#allocation183_spill] sm:$0xff]  ;;  %v16276_v61 = vpop.permute.xlu1 %4597  ;;  %v20667_v25 = vmov 0 }
 0x455   : > { %v20544_v50 = vsel %vm16014_vm7, 4294967295, %v20543_v50  ;;  %vm16024_vm9 = vmor %vm20546_vm6, %vm20545_vm0  ;;  %vm20550_vm0 = vcmp.gt.f32.partialorder %v20435_v47, %v9452_v8  ;;  %v20578_v20 = vld [vmem:[#allocation157_spill] sm:$0xff]  ;;  %v20617_v47 = vld [vmem:[#allocation127_spill] sm:$0xff] }
 0x456   : > { %20549 = vst [vmem:[#allocation70_spill] sm:$0xff] %v16029_v57  ;;  %vm16044_vm6 = vmor %vm20550_vm0, %vm15790_vm2  ;;  %vm20557_vm2 = vcmp.gt.f32.partialorder %v20470_v4, %v9436_v11  ;;  %v20563_v4 = vld [vmem:[#allocation32_spill] sm:$0xff]  ;;  %v20608_v57 = vld [vmem:[#allocation114_spill] sm:$0xff] }
 0x457   : > { %v20552_v16 = vsel %vm16044_vm6, 4294967295, %v20551_v16  ;;  %vm16055_vm4 = vmor %vm20554_vm8, %vm15802_vm12  ;;  %vm5021_vm12 = vcmp.gt.f32.partialorder %v20560_v31, %v9220_v62  ;;  %vm20570_vm8 = vcmp.eq.f32.partialorder %v20489_v26, %v9452_v8 }
 0x458   : > { %v20556_v24 = vsel %vm16055_vm4, 4294967295, %v20555_v24  ;;  %vm16064_vm0 = vmor %vm20557_vm2, %vm15996_vm3  ;;  %vm20564_vm3 = vcmp.lt.s32.totalorder %v20563_v4, %v18983_v42  ;;  %vm20565_vm2 = vcmp.eq.f32.partialorder %v20320_v35, %v9436_v11  ;;  %v7366_v12 = vsel %vm5021_vm12, 1.0, %v18893_v32 }
 0x459   : > { %vm16084_vm4 = vmand %vm20565_vm2, %vm20564_vm3  ;;  %vm20574_vm3 = vcmp.ne.s32.totalorder %v20573_v52, %v18983_v42  ;;  %v20584_v52 = vmov 0  ;;  %v16140_v3 = vadd.f32 %v7366_v12, %v5131_v14  ;;  %v20594_v14 = vld [vmem:[#allocation187_spill] sm:$0xff] }
 0x45a   : > { %v20567_v30 = vsel %vm16084_vm4, 4294967295, %v20566_v30  ;;  %vm16098_vm6 = vmand %vm20570_vm8, %vm20569_vm14  ;;  %vm20579_vm4 = vcmp.eq.f32.partialorder %v20578_v20, %v9220_v62  ;;  %vm5561_vm14 = vcmp.gt.f32.partialorder %v20560_v31, %v9224_v34  ;;  %vm20588_vm8 = vcmp.lt.s32.totalorder %v14993_v41, %v20256_v39 }
 0x45b   : > { %vm16107_vm2 = vmand %vm20574_vm3, %vm15828_vm13  ;;  %vm20583_vm3 = vcmp.gt.f32.partialorder %v20284_v9, %v9446_v5  ;;  %v7430_v27 = vsel %vm5561_vm14, 1.0, %v18893_v32  ;;  %vm6101_vm13 = vcmp.gt.f32.partialorder %v20560_v31, %v9228_v15  ;;  %vm20592_vm14 = vcmp.ne.s32.totalorder %v20471_v53, %v18983_v42 }
 0x45c   : > { %vm4458_vm7 = vmand %vm20579_vm4, %vm20577_vm11  ;;  %vm20587_vm4 = vcmp.gt.f32.partialorder %v20578_v20, %v9220_v62  ;;  %v16162_v58 = vadd.f32 %v7430_v27, %v5671_v1  ;;  %v7494_v45 = vsel %vm6101_vm13, 1.0, %v18893_v32  ;;  %v6211_v12 = vadd.f32 %v20594_v14, %v20593_v22 }
 0x45d   : > { %vm16131_vm11 = vmor %vm20583_vm3, %vm15850_vm10  ;;  %v20598_v1 = vmov 0  ;;  %v7164_v27 = vsel %vm16024_vm9, 1.0, %v18893_v32  ;;  %vm20600_vm13 = vcmp.eq.f32.partialorder %v20578_v20, %v9224_v34  ;;  %vm20601_vm10 = vcmp.gt.f32.partialorder %v20578_v20, %v9224_v34 }
 0x45e   : > { %v20585_v52 = vsel %vm16131_vm11, 4294967295, %v20584_v52  ;;  %vm4474_vm12 = vmor %vm20587_vm4, %vm4458_vm7  ;;  %vm20589_vm11 = vcmp.eq.f32.partialorder %v20405_v55, %v9446_v5  ;;  %vm20603_vm9 = vcmp.lt.s32.totalorder %v20602_v38, %v9488_v28  ;;  %v16220_v7 = vadd.f32 %v7494_v45, %v6211_v12  ;;  %v20625_v12 = vld [vmem:[#allocation133_spill] sm:$0xff] }
 0x45f   : > { %vm16155_vm7 = vmand %vm20589_vm11, %vm20588_vm8  ;;  %vm20596_vm11 = vcmp.lt.s32.totalorder %v20508_v33, %v18983_v42  ;;  %v2847_v51 = vadd.f32 %v7164_v27, %v2846_v40  ;;  %v20629_v40 = vld [vmem:[#allocation161_spill] sm:$0xff] }
 0x460   : > { %vm4490_vm4 = vmand %vm20592_vm14, %vm4474_vm12  ;;  %vm20597_vm12 = vcmp.eq.f32.partialorder %v20367_v54, %v9436_v11 }
 0x461   : > { %vm16179_vm14 = vmand %vm20597_vm12, %vm20596_vm11  ;;  %v7317_v22 = vsel %vm4490_vm4, 1.0, %v18893_v32  ;;  %vm20604_vm4 = vcmp.eq.f32.partialorder %v20512_v23, %v9452_v8 }
 0x462   : > { %v20599_v1 = vsel %vm16179_vm14, 4294967295, %v20598_v1  ;;  %vm5206_vm8 = vmor %vm20601_vm10, %vm20600_vm13  ;;  %v16211_v0 = vadd.f32 %v7317_v22, %v20608_v57  ;;  %vm20609_vm10 = vcmp.eq.f32.partialorder %v20578_v20, %v9228_v15  ;;  %vm20610_vm13 = vcmp.gt.f32.partialorder %v20578_v20, %v9228_v15  ;;  %v20614_v57 = vld [vmem:[#allocation185_spill] sm:$0xff] }
 0x463   : > { %vm16205_vm14 = vmand %vm20604_vm4, %vm20603_vm9  ;;  %v7381_v31 = vsel %vm5206_vm8, 1.0, %v18893_v32  ;;  %vm20611_vm9 = vcmp.ne.s32.totalorder %v20471_v53, %v18983_v42  ;;  %vm20615_vm8 = vcmp.eq.f32.partialorder %v20578_v20, %v20126_v13 }
 0x464   : > { %vm5746_vm11 = vmor %vm20610_vm13, %vm20609_vm10  ;;  %v16232_v6 = vadd.f32 %v7381_v31, %v20614_v57  ;;  %vm20616_vm10 = vcmp.gt.f32.partialorder %v20578_v20, %v20126_v13  ;;  %v20622_v31 = vmov 0  ;;  %v20624_v20 = vld [vmem:[#allocation63_spill] sm:$0xff] }
 0x465   : > { %vm16227_vm4 = vmand %vm20611_vm9, %vm16064_vm0  ;;  %v7445_v22 = vsel %vm5746_vm11, 1.0, %v18893_v32  ;;  %vm20618_vm9 = vcmp.ne.s32.totalorder %v20420_v49, %v18983_v42  ;;  %vm20621_vm11 = vcmp.ne.s32.totalorder %v20421_v43, %v20256_v39  ;;  %v16264_v45 = vadd.f32 %v20624_v20, %v2680_v56  ;;  %v20641_v43 = vld [vmem:[#allocation77_spill] sm:$0xff] }
 0x466   : > { %vm6286_vm13 = vmor %vm20616_vm10, %vm20615_vm8  ;;  %v16267_v57 = vadd.f32 %v7445_v22, %v20625_v12  ;;  %vm20628_vm10 = vcmp.eq.f32.partialorder %v20521_v48, %v9452_v8  ;;  %v16281_v56 = vsel %vm15969_vm1, 1.0, %v18893_v32  ;;  %v20632_v22 = vld [vmem:[#allocation90_spill] sm:$0xff]  ;;  %vm20637_vm1 = vcmp.gt.f32.partialorder %v20474_v17, %v9452_v8  ;;  %v20646_v17 = vld [vmem:[#allocation73_spill] sm:$0xff] }
 0x467   : > { %vm16250_vm3 = vmand %vm20618_vm9, %vm15935_vm15  ;;  %v7509_v49 = vsel %vm6286_vm13, 1.0, %v18893_v32  ;;  %vm20627_vm15 = vcmp.lt.s32.totalorder %v15732_v63, %v9488_v28  ;;  %vm4629_vm0 = vcmp.gt.f32.partialorder %v15924_v46, %v9220_v62 }
 0x468   : > { %vm16259_vm8 = vmand %vm20621_vm11, %vm15946_vm5  ;;  %20626 = vst [vmem:[#allocation22_spill] sm:$0xff] %v16267_v57  ;;  %v16284_v27 = vadd.f32 %v7509_v49, %v20629_v40  ;;  %vm20631_vm5 = vcmp.gt.f32.partialorder %v20521_v48, %v9452_v8  ;;  %vm4825_vm11 = vcmp.gt.f32.partialorder %v20632_v22, %v9220_v62  ;;  %v20635_v49 = vld [vmem:[#allocation25_spill] sm:$0xff]  ;;  %v20648_v57 = vmov 0 }
 0x469   : > { %v20623_v31 = vsel %vm16259_vm8, 4294967295, %v20622_v31  ;;  %vm3755_vm9 = vmand %vm20628_vm10, %vm20627_vm15  ;;  %vm5429_vm15 = vcmp.gt.f32.partialorder %v20632_v22, %v9224_v34  ;;  %vm20633_vm10 = vcmp.ne.s32.totalorder %v15732_v63, %v9488_v28  ;;  %v7352_v20 = vsel %vm4825_vm11, 1.0, %v18893_v32 }
 0x46a   : > { %20630 = vst [vmem:[#allocation79_spill] sm:$0xff] %v16284_v27  ;;  %vm3771_vm13 = vmor %vm20631_vm5, %vm3755_vm9  ;;  %v7416_v48 = vsel %vm5429_vm15, 1.0, %v18893_v32  ;;  %vm20640_vm15 = vcmp.lt.s32.totalorder %v15732_v63, %v9488_v28  ;;  %vm20642_vm9 = vcmp.eq.f32.partialorder %v20641_v43, %v20126_v13  ;;  %v16327_v27 = vadd.f32 %v7352_v20, %v15920_v2 }
 0x46b   : > { %vm3787_vm12 = vmand %vm20633_vm10, %vm3771_vm13  ;;  %vm20636_vm10 = vnez %v20544_v50  ;;  %v16330_v50 = vadd.f32 %v7416_v48, %v15982_v44  ;;  %v20652_v2 = vmov 0  ;;  %v20654_v44 = vld [vmem:[#allocation71_spill] sm:$0xff] }
 0x46c   : > { %vm16315_vm11 = vmor %vm20637_vm1, %vm20636_vm10  ;;  %v7246_v40 = vsel %vm3787_vm12, 1.0, %v18893_v32  ;;  %20643 = vst [vmem:[#allocation118_spill] sm:$0xff] %v16327_v27  ;;  %vm20645_vm10 = vnez %v20552_v16  ;;  %vm20647_vm12 = vcmp.ne.s32.totalorder %v20646_v17, %v9488_v28  ;;  %v16353_v20 = vadd.f32 %v20654_v44, %v2847_v51  ;;  %v20655_v16 = vld [vmem:[#allocation122_spill] sm:$0xff]  ;;  %v20676_v44 = vld [vmem:[#allocation160_spill] sm:$0xff] }
 0x46d   : > { %vm6668_vm5 = vmand %vm20642_vm9, %vm20640_vm15  ;;  %20644 = vst [vmem:[#allocation151_spill] sm:$0xff] %v16330_v50  ;;  %vm20650_vm9 = vnez %v20556_v24  ;;  %vm20651_vm15 = vcmp.ne.s32.totalorder %v20553_v10, %v18983_v42  ;;  %v3835_v48 = vadd.f32 %v20655_v16, %v7246_v40  ;;  %v20672_v40 = vld [vmem:[#allocation65_spill] sm:$0xff]  ;;  %v20674_v17 = vmov 0  ;;  %v20762_v27 = vld [vmem:[#allocation138_spill] sm:$0xff] }
 0x46e   : > { %vm16339_vm8 = vmand %vm20647_vm12, %vm20645_vm10  ;;  %vm20656_vm10 = vcmp.gt.f32.partialorder %v20641_v43, %v20126_v13 }
 0x46f   : > { %v20649_v57 = vsel %vm16339_vm8, 4294967295, %v20648_v57  ;;  %vm16348_vm13 = vmand %vm20651_vm15, %vm20650_vm9  ;;  %vm20657_vm15 = vnez %v20567_v30  ;;  %v7338_v30 = vsel %vm4629_vm0, 1.0, %v18893_v32  ;;  %vm20670_vm0 = vcmp.lt.s32.totalorder %v20617_v47, %v20256_v39 }
 0x470   : > { %v20653_v2 = vsel %vm16348_vm13, 4294967295, %v20652_v2  ;;  %vm6684_vm12 = vmor %vm20656_vm10, %vm6668_vm5  ;;  %vm20658_vm13 = vcmp.gt.f32.partialorder %v20320_v35, %v9436_v11  ;;  %vm20661_vm10 = vcmp.gt.f32.partialorder %v20489_v26, %v9452_v8  ;;  %v7009_v35 = vsel %vm16107_vm2, 1.0, %v18893_v32  ;;  %v16396_v26 = vpop.permute.xlu1 %4791 }
 0x471   : > { %vm16370_vm8 = vmor %vm20658_vm13, %vm20657_vm15  ;;  %vm20664_vm13 = vcmp.ne.s32.totalorder %v15732_v63, %v9488_v28  ;;  %v20669_v63 = vld [vmem:[#allocation186_spill] sm:$0xff]  ;;  %vm5022_vm9 = vcmp.gt.f32.partialorder %v16037_v37, %v9220_v62 }
 0x472   : > { %vm16381_vm1 = vmor %vm20661_vm10, %vm16098_vm6  ;;  %vm20665_vm6 = vnez %v20585_v52  ;;  %vm20666_vm10 = vcmp.ne.s32.totalorder %v20441_v21, %v20256_v39  ;;  %v3836_v18 = vadd.f32 %v20669_v63, %v3835_v48  ;;  %v16416_v52 = vadd.f32 %v7338_v30, %v20672_v40  ;;  %v20688_v30 = vld [vmem:[#allocation82_spill] sm:$0xff]  ;;  %v20691_v40 = vld [vmem:[#allocation83_spill] sm:$0xff] }
 0x473   : > { %vm6700_vm15 = vmand %vm20664_vm13, %vm6684_vm12  ;;  %vm20671_vm12 = vcmp.eq.f32.partialorder %v20582_v60, %v9446_v5  ;;  %v7367_v9 = vsel %vm5022_vm9, 1.0, %v18893_v32  ;;  %vm20687_vm9 = vcmp.lt.s32.totalorder %v20617_v47, %v20256_v39 }
 0x474   : > { %vm16403_vm2 = vmand %vm20666_vm10, %vm20665_vm6  ;;  %v7553_v51 = vsel %vm6700_vm15, 1.0, %v18893_v32  ;;  %vm20673_vm15 = vcmp.gt.f32.partialorder %v20405_v55, %v9446_v5  ;;  %vm5562_vm10 = vcmp.gt.f32.partialorder %v16037_v37, %v9224_v34  ;;  %v20682_v55 = vld [vmem:[#allocation180_spill] sm:$0xff]  ;;  %vm6102_vm6 = vcmp.gt.f32.partialorder %v16037_v37, %v9228_v15 }
 0x475   : > { %v20668_v25 = vsel %vm16403_vm2, 4294967295, %v20667_v25  ;;  %vm2923_vm13 = vmand %vm20671_vm12, %vm20670_vm0  ;;  %v16432_v16 = vadd.f32 %v20676_v44, %v7553_v51  ;;  %vm20677_vm0 = vcmp.gt.f32.partialorder %v20582_v60, %v9446_v5  ;;  %v3837_v60 = vadd.f32 %v20682_v55, %v3836_v18  ;;  %v20690_v18 = vld [vmem:[#allocation145_spill] sm:$0xff]  ;;  %v20740_v5 = vld [vmem:[#allocation131_spill] sm:$0xff] }
 0x476   : > { %vm16427_vm5 = vmor %vm20673_vm15, %vm16155_vm7  ;;  %vm20678_vm15 = vnez %v20599_v1  ;;  %v7431_v48 = vsel %vm5562_vm10, 1.0, %v18893_v32  ;;  %vm18785_vm7 = vcmp.ne.s32.totalorder %v20602_v38, %v9488_v28  ;;  %vm20689_vm10 = vcmp.eq.f32.partialorder %v20688_v30, %v9228_v15  ;;  %v20758_v38 = vld [vmem:[#allocation79_spill] sm:$0xff] }
 0x477   : > { %v20675_v17 = vsel %vm16427_vm5, 4294967295, %v20674_v17  ;;  %vm2939_vm12 = vmor %vm20677_vm0, %vm2923_vm13  ;;  %vm20679_vm5 = vcmp.gt.f32.partialorder %v20367_v54, %v9436_v11  ;;  %vm20683_vm13 = vcmp.ne.s32.totalorder %v20617_v47, %v20256_v39  ;;  %v16481_v63 = vadd.f32 %v7367_v9, %v16140_v3  ;;  %v20747_v54 = vld [vmem:[#allocation86_spill] sm:$0xff] }
 0x478   : > { %vm16450_vm2 = vmor %vm20679_vm5, %vm20678_vm15  ;;  %vm20684_vm5 = vcmp.gt.f32.partialorder %v20512_v23, %v9452_v8  ;;  %v16484_v14 = vadd.f32 %v7431_v48, %v16162_v58  ;;  %v7495_v8 = vsel %vm6102_vm6, 1.0, %v18893_v32  ;;  %v7010_v23 = vsel %vm16227_vm4, 1.0, %v18893_v32  ;;  %v20696_v48 = vld [vmem:[#allocation106_spill] sm:$0xff] }
 0x479   : > { %vm2955_vm0 = vmand %vm20683_vm13, %vm2939_vm12  ;;  %v3838_v51 = vadd.f32 %v20690_v18, %v3837_v60  ;;  %v16496_v3 = vadd.f32 %v7495_v8, %v16220_v7  ;;  %v16501_v58 = vsel %vm16250_vm3, 1.0, %v18893_v32  ;;  %vm20693_vm6 = vnez %v20623_v31  ;;  %v20694_v60 = vld [vmem:[#allocation146_spill] sm:$0xff]  ;;  %v16514_v7 = vpop.permute.xlu1 %4395 }
 0x47a   : > { %vm16469_vm15 = vmor %vm20684_vm5, %vm16205_vm14  ;;  %v7169_v1 = vsel %vm2955_vm0, 1.0, %v18893_v32  ;;  %vm20692_vm14 = vcmp.gt.f32.partialorder %v20688_v30, %v9228_v15  ;;  %v16506_v19 = vsel %vm20693_vm6, 1.0, %v18893_v32  ;;  %v2682_v55 = vadd.f32 %v16281_v56, %v16264_v45  ;;  %v20700_v45 = vld [vmem:[#allocation137_spill] sm:$0xff] }
 0x47b   : > { %vm5997_vm12 = vmand %vm20689_vm10, %vm20687_vm9  ;;  %v3002_v44 = vadd.f32 %v7169_v1, %v20691_v40  ;;  %v1092_v9 = vadd.f32 %v7009_v35, %v20694_v60  ;;  %vm20695_vm4 = vcmp.ne.s32.totalorder %v20617_v47, %v20256_v39  ;;  %v3839_v53 = vadd.f32 %v20696_v48, %v3838_v51  ;;  %v20697_v1 = vld [vmem:[#allocation39_spill] sm:$0xff]  ;;  %v20707_v40 = vld [vmem:[#allocation49_spill] sm:$0xff] }
 0x47c   : > { %vm6013_vm13 = vmor %vm20692_vm14, %vm5997_vm12  ;;  %vm20698_vm3 = vcmp.eq.f32.partialorder %v20688_v30, %v20126_v13  ;;  %vm20699_vm5 = vcmp.gt.f32.partialorder %v20688_v30, %v20126_v13  ;;  %vm867_vm10 = vcmp.ne.s32.totalorder %v20635_v49, %v18983_v42  ;;  %v2849_v47 = vrot.slane %v16353_v20, 4  ;;  %v20708_v60 = vld [vmem:[#allocation70_spill] sm:$0xff]  ;;  %v20710_v48 = vld [vmem:[#allocation153_spill] sm:$0xff] }
 0x47d   : > { %vm6029_vm0 = vmand %vm20695_vm4, %vm6013_vm13  ;;  %v3003_v8 = vadd.f32 %v20697_v1, %v3002_v44  ;;  %v1093_v31 = vadd.f32 %v7010_v23, %v1092_v9  ;;  %vm20701_vm12 = vcmp.lt.s32.totalorder %v20635_v49, %v18983_v42  ;;  %vm20702_vm14 = vcmp.eq.f32.partialorder %v20634_v29, %v9436_v11  ;;  %v20706_v23 = vld [vmem:[#allocation99_spill] sm:$0xff]  ;;  %v20772_v30 = vld [vmem:[#allocation56_spill] sm:$0xff] }
 0x47e   : > { %v7476_v18 = vsel %vm6029_vm0, 1.0, %v18893_v32  ;;  %vm6553_vm9 = vmor %vm20699_vm5, %vm20698_vm3  ;;  %vm20703_vm6 = vcmp.ne.s32.totalorder %v20473_v36, %v9488_v28  ;;  %v3840_v51 = vadd.f32 %v20706_v23, %v3839_v53  ;;  %vm20709_vm0 = vcmp.gt.f32.partialorder %v20634_v29, %v9436_v11  ;;  %v20723_v23 = vld [vmem:[#allocation117_spill] sm:$0xff] }
 0x47f   : > { %v16529_v56 = vadd.f32 %v7476_v18, %v20700_v45  ;;  %v7540_v35 = vsel %vm6553_vm9, 1.0, %v18893_v32  ;;  %vm1015_vm13 = vmand %vm20702_vm14, %vm20701_vm12  ;;  %v3004_v44 = vadd.f32 %v20707_v40, %v3003_v8  ;;  %v20711_v12 = vrot.slane %v20710_v48, 2  ;;  %v20721_v45 = vld [vmem:[#allocation68_spill] sm:$0xff] }
 0x480   : > { %vm16543_vm4 = vmand %vm20703_vm6, %vm16315_vm11  ;;  %v16550_v9 = vadd.f32 %v7540_v35, %v20708_v60  ;;  %vm20712_vm11 = vnez %v20649_v57  ;;  %vm20713_vm5 = vnez %v20653_v2  ;;  %v2683_v11 = vrot.slane %v2682_v55, 4  ;;  %v20720_v2 = vld [vmem:[#allocation37_spill] sm:$0xff] }
 0x481   : > { %vm1031_vm3 = vmor %vm20709_vm0, %vm1015_vm13  ;;  %v16558_v1 = vadd.f32 %v20711_v12, %v20710_v48  ;;  %v7256_v18 = vsel %vm20712_vm11, 1.0, %v18893_v32  ;;  %v16566_v53 = vsel %vm20713_vm5, 1.0, %v18893_v32  ;;  %vm4630_vm12 = vcmp.gt.f32.partialorder %v16276_v61, %v9220_v62  ;;  %v16613_v48 = vpop.permute.xlu1 %4985  ;;  %v20778_v57 = vld [vmem:[#allocation53_spill] sm:$0xff] }
 0x482   : > { %vm1047_vm9 = vmand %vm867_vm10, %vm1031_vm3  ;;  %vm20714_vm14 = vcmp.ne.s32.totalorder %v20563_v4, %v18983_v42  ;;  %vm20717_vm6 = vcmp.ne.s32.totalorder %v15167_v59, %v9488_v28  ;;  %v3841_v8 = vadd.f32 %v20720_v2, %v3840_v51  ;;  %v3005_v24 = vadd.f32 %v20721_v45, %v3004_v44  ;;  %v20732_v2 = vld [vmem:[#allocation29_spill] sm:$0xff] }
 0x483   : > { %vm16578_vm13 = vmand %vm20714_vm14, %vm16370_vm8  ;;  %v7011_v35 = vsel %vm1047_vm9, 1.0, %v18893_v32  ;;  %vm20722_vm8 = vcmp.lt.s32.totalorder %v20635_v49, %v18983_v42  ;;  %vm20724_vm3 = vcmp.eq.f32.partialorder %v20723_v23, %v9220_v62  ;;  %v7339_v43 = vsel %vm4630_vm12, 1.0, %v18893_v32 }
 0x484   : > { %vm16587_vm0 = vmand %vm20717_vm6, %vm16381_vm1  ;;  %vm20725_vm1 = vnez %v20668_v25  ;;  %v1094_v60 = vadd.f32 %v7011_v35, %v1093_v31  ;;  %vm20726_vm5 = vcmp.gt.f32.partialorder %v20723_v23, %v9220_v62  ;;  %v2850_v51 = vadd.f32 %v2849_v47, %v16353_v20  ;;  %v20731_v31 = vld [vmem:[#allocation149_spill] sm:$0xff] }
 0x485   : > { %vm4459_vm11 = vmand %vm20724_vm3, %vm20722_vm8  ;;  %v16604_v40 = vsel %vm20725_vm1, 1.0, %v18893_v32  ;;  %v16611_v44 = vadd.f32 %v7339_v43, %v16416_v52  ;;  %vm20727_vm9 = vnez %v20675_v17  ;;  %vm20728_vm12 = vcmp.ne.s32.totalorder %v14993_v41, %v20256_v39  ;;  %v20733_v52 = vld [vmem:[#allocation80_spill] sm:$0xff]  ;;  %v20786_v17 = vld [vmem:[#allocation134_spill] sm:$0xff] }
 0x486   : > { %vm4475_vm14 = vmor %vm20726_vm5, %vm4459_vm11  ;;  %v3842_v12 = vadd.f32 %v20731_v31, %v3841_v8  ;;  %v3006_v45 = vadd.f32 %v20732_v2, %v3005_v24  ;;  %vm20734_vm3 = vcmp.ne.s32.totalorder %v20508_v33, %v18983_v42  ;;  %v20737_v8 = vld [vmem:[#allocation40_spill] sm:$0xff]  ;;  %vm20739_vm1 = vcmp.gt.f32.partialorder %v20723_v23, %v9224_v34  ;;  %v20744_v2 = vld [vmem:[#allocation181_spill] sm:$0xff] }
 0x487   : > { %vm16620_vm6 = vmand %vm20728_vm12, %vm20727_vm9  ;;  %v1095_v35 = vadd.f32 %v20737_v8, %v1094_v60  ;;  %v2684_v49 = vadd.f32 %v2683_v11, %v2682_v55  ;;  %v20741_v43 = vrot.slane %v20740_v5, 2  ;;  %vm20746_vm9 = vcmp.gt.f32.partialorder %v20723_v23, %v9228_v15  ;;  %v20789_v60 = vld [vmem:[#allocation135_spill] sm:$0xff] }
 0x488   : > { %vm4491_vm8 = vmand %vm867_vm10, %vm4475_vm14  ;;  %vm20738_vm10 = vcmp.eq.f32.partialorder %v20723_v23, %v9224_v34  ;;  %v3007_v8 = vadd.f32 %v20744_v2, %v3006_v45  ;;  %vm20745_vm14 = vcmp.eq.f32.partialorder %v20723_v23, %v9228_v15  ;;  %v3843_v11 = vadd.f32 %v20747_v54, %v3842_v12  ;;  %v20751_v45 = vld [vmem:[#allocation176_spill] sm:$0xff]  ;;  %v20752_v2 = vld [vmem:[#allocation22_spill] sm:$0xff] }
 0x489   : > { %vm16636_vm11 = vmand %vm20734_vm3, %vm16450_vm2  ;;  %v7318_v24 = vsel %vm4491_vm8, 1.0, %v18893_v32  ;;  %v16651_v31 = vadd.f32 %v20741_v43, %v20740_v5  ;;  %v20748_v5 = vld [vmem:[#allocation143_spill] sm:$0xff]  ;;  %vm20750_vm8 = vcmp.gt.f32.partialorder %v20723_v23, %v20126_v13  ;;  %v2685_v50 = vrot.slane %v2684_v49, 2 }
 0x48a   : > { %vm5207_vm5 = vmor %vm20739_vm1, %vm20738_vm10  ;;  %v4538_v47 = vadd.f32 %v7318_v24, %v16211_v0  ;;  %v1096_v43 = vadd.f32 %v20748_v5, %v1095_v35  ;;  %v2851_v0 = vrot.slane %v2850_v51, 2  ;;  %v3008_v24 = vadd.f32 %v20751_v45, %v3007_v8  ;;  %v20753_v35 = vld [vmem:[#allocation108_spill] sm:$0xff]  ;;  %v20760_v8 = vld [vmem:[#allocation69_spill] sm:$0xff] }
 0x48b   : > { %vm16658_vm2 = vmand %vm18785_vm7, %vm16469_vm15  ;;  %v7382_v55 = vsel %vm5207_vm5, 1.0, %v18893_v32  ;;  %vm20749_vm15 = vcmp.eq.f32.partialorder %v20723_v23, %v20126_v13  ;;  %v3844_v54 = vadd.f32 %v7256_v18, %v3843_v11  ;;  %vm20754_vm10 = vcmp.lt.s32.totalorder %v20753_v35, %v9488_v28  ;;  %v20761_v45 = vld [vmem:[#allocation59_spill] sm:$0xff]  ;;  %v16701_v11 = vpop.permute.xlu1 %4795 }
 0x48c   : > { %vm5747_vm12 = vmor %vm20746_vm9, %vm20745_vm14  ;;  %v5270_v20 = vadd.f32 %v7382_v55, %v16232_v6  ;;  %v20755_v6 = vld [vmem:[#allocation162_spill] sm:$0xff]  ;;  %v20757_v55 = vld [vmem:[#allocation189_spill] sm:$0xff]  ;;  %v7021_v25 = vsel %vm16636_vm11, 1.0, %v18893_v32 }
 0x48d   : > { %v7446_v59 = vsel %vm5747_vm12, 1.0, %v18893_v32  ;;  %vm6287_vm3 = vmor %vm20750_vm8, %vm20749_vm15  ;;  %vm20756_vm1 = vcmp.eq.f32.partialorder %v20755_v6, %v20126_v13  ;;  %v1097_v5 = vadd.f32 %v20757_v55, %v1096_v43  ;;  %vm20759_vm14 = vcmp.gt.f32.partialorder %v20755_v6, %v20126_v13  ;;  %v20766_v55 = vld [vmem:[#allocation92_spill] sm:$0xff] }
 0x48e   : > { %v5810_v41 = vadd.f32 %v7446_v59, %v20752_v2  ;;  %v7510_v12 = vsel %vm6287_vm3, 1.0, %v18893_v32  ;;  %vm6670_vm5 = vmand %vm20756_vm1, %vm20754_vm10  ;;  %v16696_v59 = vadd.f32 %v20760_v8, %v4538_v47  ;;  %v16699_v18 = vadd.f32 %v20761_v45, %v5270_v20  ;;  %v20765_v20 = vld [vmem:[#allocation50_spill] sm:$0xff] }
 0x48f   : > { %v6350_v23 = vadd.f32 %v7510_v12, %v20758_v38  ;;  %vm6686_vm9 = vmor %vm20759_vm14, %vm6670_vm5  ;;  %v3009_v2 = vadd.f32 %v16506_v19, %v3008_v24  ;;  %v3845_v33 = vadd.f32 %v20762_v27, %v3844_v54  ;;  %vm20763_vm12 = vcmp.ne.s32.totalorder %v20753_v35, %v9488_v28  ;;  %v20764_v38 = vld [vmem:[#allocation164_spill] sm:$0xff]  ;;  %v20768_v19 = vld [vmem:[#allocation141_spill] sm:$0xff] }
 0x490   : > { %vm6702_vm15 = vmand %vm20763_vm12, %vm6686_vm9  ;;  %v16709_v43 = vadd.f32 %v20764_v38, %v5810_v41  ;;  %v7259_v47 = vsel %vm16543_vm4, 1.0, %v18893_v32  ;;  %v1098_v12 = vadd.f32 %v20765_v20, %v1097_v5  ;;  %vm20767_vm8 = vcmp.lt.s32.totalorder %v20766_v55, %v20256_v39  ;;  %v20770_v27 = vld [vmem:[#allocation64_spill] sm:$0xff]  ;;  %v20771_v41 = vld [vmem:[#allocation177_spill] sm:$0xff] }
 0x491   : > { %v7555_v6 = vsel %vm6702_vm15, 1.0, %v18893_v32  ;;  %vm20769_vm3 = vcmp.eq.f32.partialorder %v20768_v19, %v9228_v15  ;;  %v16723_v24 = vadd.f32 %v20770_v27, %v6350_v23  ;;  %v3010_v54 = vadd.f32 %v20771_v41, %v3009_v2 }
 0x492   : > { %vm5998_vm10 = vmand %vm20769_vm3, %vm20767_vm8  ;;  %v3185_v35 = vrot.slane %v16651_v31, 1  ;;  %v3846_v8 = vadd.f32 %v20772_v30, %v3845_v33  ;;  %v6749_v5 = vadd.f32 %v7555_v6, %v16432_v16  ;;  %vm20773_vm4 = vcmp.gt.f32.partialorder %v20768_v19, %v9228_v15  ;;  %v20775_v16 = vld [vmem:[#allocation97_spill] sm:$0xff] }
 0x493   : > { %vm6014_vm1 = vmor %vm20773_vm4, %vm5998_vm10  ;;  %v7018_v45 = vsel %vm16578_vm13, 1.0, %v18893_v32  ;;  %v7260_v23 = vsel %vm16587_vm0, 1.0, %v18893_v32  ;;  %v1099_v2 = vadd.f32 %v16501_v58, %v1098_v12  ;;  %v2852_v38 = vadd.f32 %v2851_v0, %v2850_v51  ;;  %v20780_v0 = vld [vmem:[#allocation62_spill] sm:$0xff]  ;;  %v16762_v12 = vpop.permute.xlu1 %4605 }
 0x494   : > { %vm20774_vm5 = vcmp.ne.s32.totalorder %v20766_v55, %v20256_v39  ;;  %v2686_v33 = vadd.f32 %v2685_v50, %v2684_v49  ;;  %v3011_v20 = vadd.f32 %v20775_v16, %v3010_v54  ;;  %v3847_v6 = vadd.f32 %v7259_v47, %v3846_v8  ;;  %v20779_v49 = vld [vmem:[#allocation26_spill] sm:$0xff]  ;;  %v20782_v47 = vld [vmem:[#allocation159_spill] sm:$0xff] }
 0x495   : > { %vm6030_vm14 = vmand %vm20774_vm5, %vm6014_vm1  ;;  %vm20776_vm13 = vcmp.eq.f32.partialorder %v20768_v19, %v20126_v13  ;;  %vm20777_vm9 = vcmp.gt.f32.partialorder %v20768_v19, %v20126_v13  ;;  %v7180_v58 = vsel %vm16620_vm6, 1.0, %v18893_v32  ;;  %v1100_v29 = vadd.f32 %v20778_v57, %v1099_v2 }
 0x496   : > { %v7477_v27 = vsel %vm6030_vm14, 1.0, %v18893_v32  ;;  %vm6554_vm0 = vmor %vm20777_vm9, %vm20776_vm13  ;;  %vm20781_vm12 = vcmp.lt.s32.totalorder %v20779_v49, %v20780_v0  ;;  %vm20783_vm15 = vcmp.eq.f32.partialorder %v20782_v47, %v9224_v34  ;;  %v3012_v55 = vadd.f32 %v16604_v40, %v3011_v20  ;;  %v20790_v20 = vld [vmem:[#allocation112_spill] sm:$0xff] }
 0x497   : > { %v6077_v50 = vadd.f32 %v7477_v27, %v16529_v56  ;;  %v7541_v51 = vsel %vm6554_vm0, 1.0, %v18893_v32  ;;  %vm5326_vm8 = vmand %vm20783_vm15, %vm20781_vm12  ;;  %v3848_v19 = vadd.f32 %v7260_v23, %v3847_v6  ;;  %vm20784_vm6 = vcmp.gt.f32.partialorder %v20782_v47, %v9224_v34 }
 0x498   : > { %v6617_v56 = vadd.f32 %v7541_v51, %v16550_v9  ;;  %vm5342_vm3 = vmor %vm20784_vm6, %vm5326_vm8  ;;  %v7261_v41 = vsel %vm16658_vm2, 1.0, %v18893_v32  ;;  %v1101_v54 = vadd.f32 %v7018_v45, %v1100_v29  ;;  %v2853_v30 = vrot.slane %v2852_v38, 1 }
 0x499   : > { %vm20785_vm10 = vcmp.ne.s32.totalorder %v20779_v49, %v20780_v0  ;;  %v16779_v8 = vadd.f32 %v20786_v17, %v6077_v50  ;;  %v3013_v40 = vadd.f32 %v7180_v58, %v3012_v55  ;;  %v3849_v23 = vadd.f32 %v7261_v41, %v3848_v19  ;;  %v20793_v58 = vld [vmem:[#allocation132_spill] sm:$0xff]  ;;  %v20794_v50 = vld [vmem:[#allocation67_spill] sm:$0xff]  ;;  %v20795_v49 = vld [vmem:[#allocation102_spill] sm:$0xff] }
 0x49a   : > { %vm5358_vm4 = vmand %vm20785_vm10, %vm5342_vm3  ;;  %vm20787_vm11 = vcmp.eq.f32.partialorder %v20782_v47, %v9228_v15  ;;  %vm20788_vm1 = vcmp.gt.f32.partialorder %v20782_v47, %v9228_v15  ;;  %v16789_v45 = vadd.f32 %v20789_v60, %v6617_v56  ;;  %v1102_v2 = vadd.f32 %v16566_v53, %v1101_v54  ;;  %v20797_v55 = vld [vmem:[#allocation41_spill] sm:$0xff]  ;;  %v20799_v19 = vld [vmem:[#allocation54_spill] sm:$0xff] }
 0x49b   : > { %v7399_v9 = vsel %vm5358_vm4, 1.0, %v18893_v32  ;;  %vm5882_vm2 = vmor %vm20788_vm1, %vm20787_vm11  ;;  %v2687_v16 = vrot.slane %v2686_v33, 1  ;;  %vm20791_vm5 = vcmp.eq.f32.partialorder %v20782_v47, %v20126_v13  ;;  %vm20792_vm14 = vcmp.gt.f32.partialorder %v20782_v47, %v20126_v13  ;;  %v20800_v41 = vld [vmem:[#allocation188_spill] sm:$0xff]  ;;  %v20801_v17 = vld [vmem:[#allocation81_spill] sm:$0xff] }
 0x49c   : > { %v16793_v6 = vadd.f32 %v7399_v9, %v20790_v20  ;;  %v7463_v27 = vsel %vm5882_vm2, 1.0, %v18893_v32  ;;  %vm6422_vm13 = vmor %vm20792_vm14, %vm20791_vm5  ;;  %v3014_v57 = vadd.f32 %v20793_v58, %v3013_v40  ;;  %v3850_v29 = vrot.slane %v3849_v23, 4  ;;  %v16821_v9 = vpop.permute.xlu1 %4989 }
 0x49d   : > { %v16804_v51 = vadd.f32 %v7463_v27, %v20794_v50  ;;  %v7527_v53 = vsel %vm6422_vm13, 1.0, %v18893_v32  ;;  %vm20796_vm9 = vcmp.lt.s32.totalorder %v20795_v49, %v9488_v28  ;;  %vm20798_vm0 = vcmp.eq.f32.partialorder %v20797_v55, %v20126_v13 }
 0x49e   : > { %vm6671_vm12 = vmand %vm20798_vm0, %vm20796_vm9  ;;  %v1103_v56 = vadd.f32 %v20799_v19, %v1102_v2  ;;  %v1847_v47 = vrot.slane %v20800_v41, 1  ;;  %v2854_v54 = vadd.f32 %v2853_v30, %v2852_v38  ;;  %v16816_v40 = vadd.f32 %v7527_v53, %v20801_v17  ;;  %v20808_v19 = vld [vmem:[#allocation57_spill] sm:$0xff] }
 0x49f   : > { %vm20802_vm15 = vcmp.gt.f32.partialorder %v20797_v55, %v20126_v13  ;;  %v20803_v60 = vrot.slane %v16558_v1, 1  ;;  %v20804_v2 = vrot.slane %v20733_v52, 1  ;;  %v3015_v38 = vrot.slane %v3014_v57, 4 }
 0x4a0   : > { %vm6687_vm8 = vmor %vm20802_vm15, %vm6671_vm12  ;;  %v3851_v30 = vadd.f32 %v3850_v29, %v3849_v23  ;;  %vm20805_vm6 = vcmp.ne.s32.totalorder %v20795_v49, %v9488_v28  ;;  %v1104_v58 = vadd.f32 %v7021_v25, %v1103_v56  ;;  %v2688_v50 = vadd.f32 %v2687_v16, %v2686_v33  ;;  %v20811_v33 = vld [vmem:[#allocation96_spill] sm:$0xff] }
 0x4a1   : > { %v16826_v20 = vadd.f32 %v20803_v60, %v16558_v1  ;;  %v16831_v27 = vadd.f32 %v20804_v2, %v20733_v52  ;;  %vm6703_vm3 = vmand %vm20805_vm6, %vm6687_vm8  ;;  %v16837_v53 = vadd.f32 %v3185_v35, %v16651_v31  ;;  %v20806_v1 = vld [vmem:[#allocation27_spill] sm:$0xff]  ;;  %vm20809_vm4 = vcmp.eq.f32.partialorder %v20808_v19, %v9220_v62  ;;  %v16885_v2 = vpop.permute.xlu1 %4405 }
 0x4a2   : > { %v7556_v55 = vsel %vm6703_vm3, 1.0, %v18893_v32  ;;  %vm20807_vm10 = vcmp.lt.s32.totalorder %v20806_v1, %v18983_v42  ;;  %v3016_v52 = vadd.f32 %v3015_v38, %v3014_v57  ;;  %v3852_v23 = vrot.slane %v3851_v30, 2  ;;  %v20815_v57 = vld [vmem:[#allocation51_spill] sm:$0xff] }
 0x4a3   : > { %vm4461_vm11 = vmand %vm20809_vm4, %vm20807_vm10  ;;  %v6750_v29 = vadd.f32 %v7556_v55, %v6749_v5  ;;  %vm20810_vm1 = vcmp.gt.f32.partialorder %v20808_v19, %v9220_v62  ;;  %vm5296_vm5 = vcmp.gt.f32.partialorder %v20811_v33, %v9224_v34  ;;  %v1105_v31 = vrot.slane %v1104_v58, 4 }
 0x4a4   : > { %vm4477_vm2 = vmor %vm20810_vm1, %vm4461_vm11  ;;  %v2855_v35 = vadd.f32 %v2854_v54, %v2688_v50  ;;  %vm20812_vm14 = vcmp.ne.s32.totalorder %v20806_v1, %v18983_v42  ;;  %vm5312_vm9 = vcmp.eq.f32.partialorder %v20811_v33, %v9224_v34  ;;  %vm5024_vm0 = vcmp.gt.f32.partialorder %v16613_v48, %v9220_v62 }
 0x4a5   : > { %vm4493_vm13 = vmand %vm20812_vm14, %vm4477_vm2  ;;  %v3017_v5 = vrot.slane %v3016_v52, 2  ;;  %v3853_v25 = vadd.f32 %v3852_v23, %v3851_v30  ;;  %vm20813_vm12 = vcmp.eq.f32.partialorder %v20808_v19, %v9224_v34  ;;  %vm20814_vm15 = vcmp.gt.f32.partialorder %v20808_v19, %v9224_v34  ;;  %v20824_v23 = vld [vmem:[#allocation140_spill] sm:$0xff] }
 0x4a6   : > { %v7320_v16 = vsel %vm4493_vm13, 1.0, %v18893_v32  ;;  %vm5209_vm8 = vmor %vm20814_vm15, %vm20813_vm12  ;;  %vm5836_vm6 = vcmp.gt.f32.partialorder %v20811_v33, %v9228_v15  ;;  %vm5852_vm3 = vcmp.eq.f32.partialorder %v20811_v33, %v9228_v15  ;;  %v16870_v49 = vadd.f32 %v20815_v57, %v6750_v29 }
 0x4a7   : > { %v1106_v56 = vadd.f32 %v1105_v31, %v1104_v58  ;;  %v16873_v54 = vadd.f32 %v7320_v16, %v16696_v59  ;;  %v7384_v17 = vsel %vm5209_vm8, 1.0, %v18893_v32  ;;  %vm20816_vm10 = vcmp.eq.f32.partialorder %v20808_v19, %v9228_v15 }
 0x4a8   : > { %vm20817_vm4 = vcmp.gt.f32.partialorder %v20808_v19, %v9228_v15  ;;  %vm6376_vm1 = vcmp.gt.f32.partialorder %v20811_v33, %v20126_v13  ;;  %v7369_v60 = vsel %vm5024_vm0, 1.0, %v18893_v32  ;;  %v3018_v38 = vadd.f32 %v3017_v5, %v3016_v52  ;;  %v20820_v52 = vld [vmem:[#allocation94_spill] sm:$0xff] }
 0x4a9   : > { %vm5749_vm11 = vmor %vm20817_vm4, %vm20816_vm10  ;;  %v3854_v30 = vrot.slane %v3853_v25, 1  ;;  %v16888_v59 = vadd.f32 %v7384_v17, %v16699_v18  ;;  %vm20818_vm2 = vcmp.eq.f32.partialorder %v20808_v19, %v20126_v13  ;;  %vm20819_vm14 = vcmp.gt.f32.partialorder %v20808_v19, %v20126_v13  ;;  %v20822_v18 = vld [vmem:[#allocation89_spill] sm:$0xff]  ;;  %v20828_v17 = vld [vmem:[#allocation126_spill] sm:$0xff] }
 0x4aa   : > { %v7448_v58 = vsel %vm5749_vm11, 1.0, %v18893_v32  ;;  %vm6289_vm13 = vmor %vm20819_vm14, %vm20818_vm2  ;;  %v1107_v50 = vrot.slane %v1106_v56, 2  ;;  %vm20821_vm0 = vcmp.lt.s32.totalorder %v20820_v52, %v20780_v0  ;;  %vm20823_vm12 = vcmp.eq.f32.partialorder %v20822_v18, %v9224_v34 }
 0x4ab   : > { %v16898_v55 = vadd.f32 %v7448_v58, %v16709_v43  ;;  %v7512_v1 = vsel %vm6289_vm13, 1.0, %v18893_v32  ;;  %vm5327_vm15 = vmand %vm20823_vm12, %vm20821_vm0  ;;  %v5134_v29 = vadd.f32 %v20824_v23, %v16481_v63  ;;  %v3019_v31 = vrot.slane %v3018_v38, 1 }
 0x4ac   : > { %v3855_v5 = vadd.f32 %v3854_v30, %v3853_v25  ;;  %v16910_v19 = vadd.f32 %v7512_v1, %v16723_v24  ;;  %vm20825_vm8 = vcmp.gt.f32.partialorder %v20822_v18, %v9224_v34  ;;  %vm5564_vm4 = vcmp.gt.f32.partialorder %v16613_v48, %v9224_v34  ;;  %v20827_v24 = vld [vmem:[#allocation93_spill] sm:$0xff] }
 0x4ad   : > { %vm5343_vm10 = vmor %vm20825_vm8, %vm5327_vm15  ;;  %v1108_v43 = vadd.f32 %v1107_v50, %v1106_v56  ;;  %vm20826_vm11 = vcmp.ne.s32.totalorder %v20820_v52, %v20780_v0  ;;  %v16922_v63 = vadd.f32 %v7369_v60, %v5134_v29  ;;  %v7433_v25 = vsel %vm5564_vm4, 1.0, %v18893_v32  ;;  %v16951_v50 = vpop.permute.xlu1 %4609  ;;  %v16961_v29 = vpop.permute.xlu0 %4601 }
 0x4ae   : > { %vm5359_vm2 = vmand %vm20826_vm11, %vm5343_vm10  ;;  %v5674_v16 = vadd.f32 %v20827_v24, %v16484_v14  ;;  %v3020_v57 = vadd.f32 %v3019_v31, %v3018_v38  ;;  %v16928_v30 = vadd.f32 %v3855_v5, %v20828_v17  ;;  %vm20829_vm14 = vcmp.eq.f32.partialorder %v20822_v18, %v9228_v15 }
 0x4af   : > { %v7400_v58 = vsel %vm5359_vm2, 1.0, %v18893_v32  ;;  %vm20830_vm13 = vcmp.gt.f32.partialorder %v20822_v18, %v9228_v15  ;;  %vm6104_vm12 = vcmp.gt.f32.partialorder %v16613_v48, %v9228_v15  ;;  %v1109_v56 = vrot.slane %v1108_v43, 1 }
 0x4b0   : > { %vm5883_vm0 = vmor %vm20830_vm13, %vm20829_vm14  ;;  %v5406_v14 = vadd.f32 %v7400_v58, %v16793_v6  ;;  %vm20831_vm15 = vcmp.eq.f32.partialorder %v20822_v18, %v20126_v13  ;;  %vm20832_vm8 = vcmp.gt.f32.partialorder %v20822_v18, %v20126_v13  ;;  %v16949_v38 = vadd.f32 %v7433_v25, %v5674_v16  ;;  %v20833_v6 = vld [vmem:[#allocation155_spill] sm:$0xff]  ;;  %v20837_v58 = vld [vmem:[#allocation100_spill] sm:$0xff] }
 0x4b1   : > { %v7464_v60 = vsel %vm5883_vm0, 1.0, %v18893_v32  ;;  %vm6423_vm10 = vmor %vm20832_vm8, %vm20831_vm15  ;;  %v3021_v1 = vadd.f32 %v3020_v57, %v2855_v35  ;;  %vm20834_vm4 = vcmp.lt.s32.totalorder %v20833_v6, %v20780_v0  ;;  %v7497_v18 = vsel %vm6104_vm12, 1.0, %v18893_v32 }
 0x4b2   : > { %v5946_v52 = vadd.f32 %v7464_v60, %v16804_v51  ;;  %v7528_v23 = vsel %vm6423_vm10, 1.0, %v18893_v32  ;;  %vm5328_vm11 = vmand %vm5312_vm9, %vm20834_vm4  ;;  %v1110_v31 = vadd.f32 %v1109_v56, %v1108_v43  ;;  %vm6392_vm14 = vcmp.eq.f32.partialorder %v20811_v33, %v20126_v13  ;;  %v20835_v51 = vld [vmem:[#allocation142_spill] sm:$0xff]  ;;  %v20839_v56 = vld [vmem:[#allocation179_spill] sm:$0xff] }
 0x4b3   : > { %v6486_v5 = vadd.f32 %v7528_v23, %v16816_v40  ;;  %vm5344_vm2 = vmor %vm5296_vm5, %vm5328_vm11  ;;  %v6214_v35 = vadd.f32 %v20835_v51, %v16496_v3  ;;  %v18786_v25 = vstv %s16939_s8  ;;  %v1848_v24 = vadd.f32 %v1847_v47, %v20800_v41  ;;  %v20846_v51 = vld [vmem:[#allocation28_spill] sm:$0xff] }
 0x4b4   : > { %v3187_v43 = vadd.f32 %v16837_v53, %v3021_v1  ;;  %vm20836_vm9 = vcmp.ne.s32.totalorder %v20833_v6, %v20780_v0  ;;  %v1357_v40 = vadd.f32 %v16826_v20, %v1110_v31  ;;  %vm5884_vm5 = vmor %vm5836_vm6, %vm5852_vm3  ;;  %vm4631_vm0 = vcmp.gt.f32.partialorder %v16961_v29, %v9220_v62  ;;  %v20845_v6 = vld [vmem:[#allocation17_spill] sm:$0xff] }
 0x4b5   : > { %vm5360_vm13 = vmand %vm20836_vm9, %vm5344_vm2  ;;  %v6215_v3 = vadd.f32 %v7497_v18, %v6214_v35  ;;  %v7465_v47 = vsel %vm5884_vm5, 1.0, %v18893_v32  ;;  %v715_v20 = vmul.f32 3.0, %v18786_v25  ;;  %vm20838_vm6 = vcmp.lt.s32.totalorder %v20837_v58, %v20256_v39 }
 0x4b6   : > { %v7401_v16 = vsel %vm5360_vm13, 1.0, %v18893_v32  ;;  %vm6424_vm12 = vmor %vm6376_vm1, %vm6392_vm14  ;;  %v1603_v53 = vadd.f32 %v16831_v27, %v1357_v40  ;;  %v16999_v57 = vadd.f32 %v7465_v47, %v5946_v52  ;;  %vm20840_vm3 = vcmp.eq.f32.partialorder %v20839_v56, %v9228_v15 }
 0x4b7   : > { %v16990_v41 = vadd.f32 %v7401_v16, %v5406_v14  ;;  %v7529_v17 = vsel %vm6424_vm12, 1.0, %v18893_v32  ;;  %vm6000_vm15 = vmand %vm20840_vm3, %vm20838_vm6  ;;  %v17008_v14 = vpop.permute.xlu1 %4803  ;;  %vm18784_vm8 = vcmask 1040384   ;;  %vm20841_vm1 = vcmp.gt.f32.partialorder %v20839_v56, %v9228_v15 }
 0x4b8   : > { %v17010_v33 = vadd.f32 %v7529_v17, %v6486_v5  ;;  %vm6016_vm10 = vmor %vm20841_vm1, %vm6000_vm15  ;;  %v7340_v27 = vsel %vm4631_vm0, 1.0, %v18893_v32  ;;  %vm4632_vm4 = vcmp.gt.f32.partialorder %v16762_v12, %v9220_v62  ;;  %v1849_v60 = vadd.f32 %v1848_v24, %v1603_v53 }
 0x4b9   : > { %vm18783_vm11 = vcmask 1041408   ;;  %vm20842_vm2 = vcmp.ne.s32.totalorder %v20837_v58, %v20256_v39  ;;  %v7341_v1 = vsel %vm4632_vm4, 1.0, %v18893_v32  ;;  %v4742_v52 = vadd.f32 %v7340_v27, %v16611_v44  ;;  %v20848_v44 = vld [vmem:[#allocation60_spill] sm:$0xff]  ;;  %v20856_v27 = vld [vmem:[#allocation167_spill] sm:$0xff] }
 0x4ba   : > { %vm6032_vm14 = vmand %vm20842_vm2, %vm6016_vm10  ;;  %vm18782_vm9 = vcmask 1042432   ;;  %vm20843_vm13 = vcmp.eq.f32.partialorder %v20839_v56, %v20126_v13  ;;  %vm20844_vm5 = vcmp.gt.f32.partialorder %v20839_v56, %v20126_v13  ;;  %v3858_v18 = vsel %vm18784_vm8, %v1849_v60, %v20845_v6  ;;  %v20861_v6 = vld [vmem:[#allocation21_spill] sm:$0xff] }
 0x4bb   : > { %v7479_v23 = vsel %vm6032_vm14, 1.0, %v18893_v32  ;;  %vm6556_vm0 = vmor %vm20844_vm5, %vm20843_vm13  ;;  %vm20847_vm12 = vcmp.lt.s32.totalorder %v20846_v51, %v18983_v42  ;;  %vm20849_vm6 = vcmp.eq.f32.partialorder %v20848_v44, %v9220_v62  ;;  %v4743_v35 = vadd.f32 %v7341_v1, %v4742_v52 }
 0x4bc   : > { %v17033_v31 = vadd.f32 %v7479_v23, %v16779_v8  ;;  %v7543_v5 = vsel %vm6556_vm0, 1.0, %v18893_v32  ;;  %vm4462_vm3 = vmand %vm20849_vm6, %vm20847_vm12  ;;  %v716_v24 = vmin.f32 %v715_v20, 499.0  ;;  %v3860_v40 = vsel %vm18783_vm11, %v3858_v18, %v3187_v43  ;;  %v20854_v20 = vld [vmem:[#allocation18_spill] sm:$0xff]  ;;  %v20859_v23 = vld [vmem:[#allocation169_spill] sm:$0xff] }
 0x4bd   : > { %v17044_v16 = vadd.f32 %v7543_v5, %v16789_v45  ;;  %vm20850_vm15 = vcmp.gt.f32.partialorder %v20848_v44, %v9220_v62  ;;  %v3862_v8 = vsel %vm18782_vm9, %v3860_v40, %v16928_v30  ;;  %vm20851_vm10 = vcmp.ne.s32.totalorder %v20846_v51, %v18983_v42  ;;  %v17060_v45 = vpop.permute.xlu1 %4410 }
 0x4be   : > { %vm4478_vm1 = vmor %vm20850_vm15, %vm4462_vm3  ;;  %vm5025_vm2 = vcmp.gt.f32.partialorder %v16821_v9, %v9220_v62  ;;  %vm5565_vm14 = vcmp.gt.f32.partialorder %v16821_v9, %v9224_v34  ;;  %vm6105_vm13 = vcmp.gt.f32.partialorder %v16821_v9, %v9228_v15  ;;  %vm3863_vm5 = vcmp.lt.f32.partialorder %v3862_v8, %v716_v24  ;;  %v20867_v8 = vld [vmem:[#allocation130_spill] sm:$0xff] }
 0x4bf   : > { %vm4494_vm4 = vmand %vm20851_vm10, %vm4478_vm1  ;;  %vm20852_vm0 = vcmp.eq.f32.partialorder %v20848_v44, %v9224_v34  ;;  %vm20853_vm12 = vcmp.gt.f32.partialorder %v20848_v44, %v9224_v34  ;;  %v7370_v30 = vsel %vm5025_vm2, 1.0, %v18893_v32  ;;  %v7434_v47 = vsel %vm5565_vm14, 1.0, %v18893_v32 }
 0x4c0   : > { %v7321_v43 = vsel %vm4494_vm4, 1.0, %v18893_v32  ;;  %vm5210_vm6 = vmor %vm20853_vm12, %vm20852_vm0  ;;  %vm20855_vm3 = vcmp.ge.s32.totalorder %v20854_v20, 0  ;;  %v5136_v58 = vadd.f32 %v7370_v30, %v16922_v63  ;;  %v5676_v56 = vadd.f32 %v7434_v47, %v16949_v38  ;;  %v20871_v30 = vld [vmem:[#allocation84_spill] sm:$0xff] }
 0x4c1   : > { %vm3864_vm15 = vmand %vm3863_vm5, %vm20855_vm3  ;;  %v4541_v53 = vadd.f32 %v7321_v43, %v16873_v54  ;;  %v7385_v17 = vsel %vm5210_vm6, 1.0, %v18893_v32  ;;  %vm20857_vm1 = vnez %v20856_v27  ;;  %vm20858_vm10 = vcmp.gt.s32.totalorder %v20854_v20, 0  ;;  %v17114_v43 = vpop.permute.xlu1 %4997 }
 0x4c2   : > { %v7322_v60 = vsel %vm20857_vm1, 1.0, %v18893_v32  ;;  %vm3865_vm4 = vmor %vm20858_vm10, %vm3864_vm15  ;;  %v5273_v1 = vadd.f32 %v7385_v17, %v16888_v59  ;;  %v7498_v52 = vsel %vm6105_vm13, 1.0, %v18893_v32  ;;  %vm20860_vm2 = vnez %v20859_v23 }
 0x4c3   : > { %v7386_v54 = vsel %vm20860_vm2, 1.0, %v18893_v32  ;;  %v3866_v18 = vsel %vm3865_vm4, %v20861_v6, 0.0  ;;  %vm20862_vm14 = vcmp.eq.f32.partialorder %v20848_v44, %v9228_v15  ;;  %vm20863_vm5 = vcmp.gt.f32.partialorder %v20848_v44, %v9228_v15 }
 0x4c4   : > { %vm5750_vm0 = vmor %vm20863_vm5, %vm20862_vm14  ;;  %v17094_v63 = vadd.f32 %v7322_v60, %v4541_v53  ;;  %v6216_v38 = vadd.f32 %v7498_v52, %v6215_v3  ;;  %vm20864_vm12 = vcmask 1043456   ;;  %vm20865_vm13 = vcmp.eq.f32.partialorder %v20848_v44, %v20126_v13  ;;  %v20869_v3 = vld [vmem:[#allocation183_spill] sm:$0xff]  ;;  %v20877_v52 = vld [vmem:[#allocation110_spill] sm:$0xff] }
 0x4c5   : > { %v3867_v59 = vsel %vm20864_vm12, %v3866_v18, 0.0  ;;  %v7449_v5 = vsel %vm5750_vm0, 1.0, %v18893_v32  ;;  %vm20866_vm6 = vcmp.gt.f32.partialorder %v20848_v44, %v20126_v13  ;;  %v17104_v51 = vadd.f32 %v7386_v54, %v5273_v1  ;;  %v17147_v23 = vpop.permute.xlu1 %4807  ;;  %v20879_v54 = vld [vmem:[#allocation154_spill] sm:$0xff] }
 0x4c6   : > { %vm6290_vm3 = vmor %vm20866_vm6, %vm20865_vm13  ;;  %3868 = vadd.xlane.f32.xlu0 %v3867_v59  ;;  %v5813_v24 = vadd.f32 %v7449_v5, %v16898_v55  ;;  %vm20868_vm15 = vcmp.lt.s32.totalorder %v20867_v8, %v9488_v28  ;;  %vm20870_vm1 = vcmp.eq.f32.partialorder %v20869_v3, %v20126_v13  ;;  %vm20872_vm4 = vnez %v20871_v30  ;;  %v20874_v55 = vld [vmem:[#allocation171_spill] sm:$0xff]  ;;  %v20881_v18 = vld [vmem:[#allocation42_spill] sm:$0xff] }
 0x4c7   : > { %v7513_v40 = vsel %vm6290_vm3, 1.0, %v18893_v32  ;;  %vm6673_vm10 = vmand %vm20870_vm1, %vm20868_vm15  ;;  %v7450_v44 = vsel %vm20872_vm4, 1.0, %v18893_v32  ;;  %vm20873_vm2 = vcmp.gt.f32.partialorder %v20869_v3, %v20126_v13  ;;  %vm20875_vm5 = vnez %v20874_v55  ;;  %v17197_v3 = vpop.permute.xlu0 %4613 }
 0x4c8   : > { %v6353_v47 = vadd.f32 %v7513_v40, %v16910_v19  ;;  %vm6689_vm14 = vmor %vm20873_vm2, %vm6673_vm10  ;;  %v7514_v20 = vsel %vm20875_vm5, 1.0, %v18893_v32  ;;  %vm20876_vm0 = vcmp.ne.s32.totalorder %v20867_v8, %v9488_v28  ;;  %v17129_v53 = vadd.f32 %v7450_v44, %v5813_v24  ;;  %v20929_v24 = vld [vmem:[#allocation31_spill] sm:$0xff] }
 0x4c9   : > { %vm6705_vm12 = vmand %vm20876_vm0, %vm6689_vm14  ;;  %vm4633_vm13 = vcmp.gt.f32.partialorder %v16951_v50, %v9220_v62  ;;  %vm5315_vm6 = vcmp.eq.f32.partialorder %v16961_v29, %v9224_v34  ;;  %vm5299_vm3 = vcmp.gt.f32.partialorder %v16961_v29, %v9224_v34  ;;  %vm20878_vm15 = vcmp.lt.s32.totalorder %v20877_v52, %v20780_v0 }
 0x4ca   : > { %v7558_v17 = vsel %vm6705_vm12, 1.0, %v18893_v32  ;;  %v17136_v19 = vadd.f32 %v7514_v20, %v6353_v47  ;;  %v7342_v27 = vsel %vm4633_vm13, 1.0, %v18893_v32  ;;  %vm5331_vm1 = vmand %vm5315_vm6, %vm20878_vm15  ;;  %vm20880_vm10 = vcmp.gt.f32.partialorder %v20879_v54, %v9220_v62  ;;  %v20894_v20 = vld [vmem:[#allocation103_spill] sm:$0xff] }
 0x4cb   : > { %v17140_v60 = vadd.f32 %v7558_v17, %v16870_v49  ;;  %v4744_v1 = vadd.f32 %v7342_v27, %v4743_v35  ;;  %v7371_v6 = vsel %vm20880_vm10, 1.0, %v18893_v32  ;;  %vm20882_vm4 = vcmp.lt.s32.totalorder %v20881_v18, %v20256_v39  ;;  %v20884_v49 = vld [vmem:[#allocation46_spill] sm:$0xff]  ;;  %vm17172_vm13 = vmor %vm5299_vm3, %vm5331_vm1 }
 0x4cc   : > { %vm20883_vm2 = vcmp.eq.f32.partialorder %v20632_v22, %v9228_v15  ;;  %vm20885_vm5 = vnez %v20884_v49  ;;  %vm20886_vm0 = vcmp.gt.f32.partialorder %v20879_v54, %v9224_v34  ;;  %vm20887_vm12 = vcmp.gt.f32.partialorder %v20879_v54, %v9228_v15  ;;  %v20901_v49 = vld [vmem:[#allocation44_spill] sm:$0xff] }
 0x4cd   : > { %vm6001_vm14 = vmand %vm20883_vm2, %vm20882_vm4  ;;  %v17162_v35 = vsel %vm20885_vm5, 1.0, %v18893_v32  ;;  %v7435_v59 = vsel %vm20886_vm0, 1.0, %v18893_v32  ;;  %v7499_v5 = vsel %vm20887_vm12, 1.0, %v18893_v32  ;;  %vm20890_vm6 = vcmp.gt.f32.partialorder %v20632_v22, %v9228_v15 }
 0x4ce   : > { %vm6017_vm15 = vmor %vm20890_vm6, %vm6001_vm14  ;;  %vm5313_vm10 = vcmp.eq.f32.partialorder %v15924_v46, %v9224_v34  ;;  %vm20891_vm4 = vcmp.ne.s32.totalorder %v20881_v18, %v20256_v39  ;;  %vm5297_vm5 = vcmp.gt.f32.partialorder %v15924_v46, %v9224_v34  ;;  %vm5027_vm3 = vcmp.gt.f32.partialorder %v17114_v43, %v9220_v62 }
 0x4cf   : > { %vm6033_vm2 = vmand %vm20891_vm4, %vm6017_vm15  ;;  %v5137_v40 = vadd.f32 %v7371_v6, %v5136_v58  ;;  %vm5567_vm1 = vcmp.gt.f32.partialorder %v17114_v43, %v9224_v34  ;;  %vm20892_vm14 = vcmp.eq.f32.partialorder %v20632_v22, %v20126_v13  ;;  %vm20893_vm0 = vcmp.gt.f32.partialorder %v20632_v22, %v20126_v13  ;;  %v17210_v22 = vpop.permute.xlu1 %4617 }
 0x4d0   : > { %v7480_v8 = vsel %vm6033_vm2, 1.0, %v18893_v32  ;;  %vm6557_vm12 = vmor %vm20893_vm0, %vm20892_vm14  ;;  %v7372_v30 = vsel %vm5027_vm3, 1.0, %v18893_v32  ;;  %v7436_v44 = vsel %vm5567_vm1, 1.0, %v18893_v32  ;;  %v5677_v47 = vadd.f32 %v7435_v59, %v5676_v56 }
 0x4d1   : > { %v17202_v58 = vadd.f32 %v7480_v8, %v17033_v31  ;;  %v7544_v55 = vsel %vm6557_vm12, 1.0, %v18893_v32  ;;  %vm20895_vm6 = vcmp.lt.s32.totalorder %v20894_v20, %v20780_v0  ;;  %v5138_v17 = vadd.f32 %v7372_v30, %v5137_v40  ;;  %v20908_v30 = vld [vmem:[#allocation30_spill] sm:$0xff] }
 0x4d2   : > { %vm5329_vm15 = vmand %vm5313_vm10, %vm20895_vm6  ;;  %vm6107_vm4 = vcmp.gt.f32.partialorder %v17114_v43, %v9228_v15  ;;  %v17213_v27 = vadd.f32 %v7544_v55, %v17044_v16  ;;  %v5678_v31 = vadd.f32 %v7436_v44, %v5677_v47  ;;  %v6217_v54 = vadd.f32 %v7499_v5, %v6216_v38  ;;  %v20902_v5 = vld [vmem:[#allocation101_spill] sm:$0xff]  ;;  %v20912_v47 = vld [vmem:[#allocation170_spill] sm:$0xff] }
 0x4d3   : > { %vm5345_vm2 = vmor %vm5297_vm5, %vm5329_vm15  ;;  %v7500_v56 = vsel %vm6107_vm4, 1.0, %v18893_v32  ;;  %vm5839_vm10 = vcmp.gt.f32.partialorder %v16961_v29, %v9228_v15  ;;  %vm5855_vm3 = vcmp.eq.f32.partialorder %v16961_v29, %v9228_v15  ;;  %vm20896_vm1 = vcmp.ne.s32.totalorder %v20894_v20, %v20780_v0  ;;  %v17272_v40 = vpop.permute.xlu1 %5001 }
 0x4d4   : > { %vm5361_vm14 = vmand %vm20896_vm1, %vm5345_vm2  ;;  %vm6658_vm0 = vcmp.eq.f32.partialorder %v16037_v37, %v20126_v13  ;;  %vm4634_vm5 = vcmp.gt.f32.partialorder %v17197_v3, %v9220_v62  ;;  %vm6379_vm12 = vcmp.gt.f32.partialorder %v16961_v29, %v20126_v13  ;;  %vm20897_vm6 = vcmp.eq.f32.partialorder %v15924_v46, %v9228_v15 }
 0x4d5   : > { %v7402_v16 = vsel %vm5361_vm14, 1.0, %v18893_v32  ;;  %vm20898_vm15 = vcmp.gt.f32.partialorder %v15924_v46, %v9228_v15  ;;  %vm6642_vm2 = vcmp.gt.f32.partialorder %v16037_v37, %v20126_v13  ;;  %v6218_v38 = vadd.f32 %v7500_v56, %v6217_v54 }
 0x4d6   : > { %vm5885_vm4 = vmor %vm20898_vm15, %vm20897_vm6  ;;  %vm6395_vm1 = vcmp.eq.f32.partialorder %v16961_v29, %v20126_v13  ;;  %v17244_v6 = vadd.f32 %v7402_v16, %v16990_v41  ;;  %vm20899_vm14 = vcmp.eq.f32.partialorder %v15924_v46, %v20126_v13  ;;  %vm20900_vm9 = vcmp.gt.f32.partialorder %v15924_v46, %v20126_v13 }
 0x4d7   : > { %v7466_v18 = vsel %vm5885_vm4, 1.0, %v18893_v32  ;;  %vm6425_vm11 = vmor %vm20900_vm9, %vm20899_vm14  ;;  %vm4432_vm6 = vcmp.gt.f32.partialorder %v20901_v49, %v9220_v62  ;;  %vm20903_vm15 = vcmp.lt.s32.totalorder %v20902_v5, %v9488_v28  ;;  %vm4448_vm4 = vcmp.eq.f32.partialorder %v20901_v49, %v9220_v62 }
 0x4d8   : > { %v17256_v37 = vadd.f32 %v7466_v18, %v16999_v57  ;;  %v7530_v59 = vsel %vm6425_vm11, 1.0, %v18893_v32  ;;  %vm6674_vm8 = vmand %vm6658_vm0, %vm20903_vm15  ;;  %v7343_v41 = vsel %vm4634_vm5, 1.0, %v18893_v32  ;;  %vm4635_vm7 = vcmp.gt.f32.partialorder %v17210_v22, %v9220_v62 }
 0x4d9   : > { %v17266_v46 = vadd.f32 %v7530_v59, %v17010_v33  ;;  %vm6690_vm9 = vmor %vm6642_vm2, %vm6674_vm8  ;;  %v4745_v57 = vadd.f32 %v7343_v41, %v4744_v1  ;;  %vm20904_vm11 = vcmp.ne.s32.totalorder %v20902_v5, %v9488_v28  ;;  %vm5180_vm5 = vcmp.eq.f32.partialorder %v20901_v49, %v9224_v34 }
 0x4da   : > { %vm6706_vm0 = vmand %vm20904_vm11, %vm6690_vm9  ;;  %vm5720_vm8 = vcmp.eq.f32.partialorder %v20901_v49, %v9228_v15  ;;  %v7344_v33 = vsel %vm4635_vm7, 1.0, %v18893_v32  ;;  %vm20905_vm2 = vcmp.ne.s32.totalorder %v20877_v52, %v20780_v0  ;;  %vm20909_vm9 = vcmp.lt.s32.totalorder %v20908_v30, %v18983_v42 }
 0x4db   : > { %vm17289_vm14 = vmand %vm20905_vm2, %vm17172_vm13  ;;  %v7559_v8 = vsel %vm6706_vm0, 1.0, %v18893_v32  ;;  %vm6244_vm7 = vcmp.gt.f32.partialorder %v20901_v49, %v20126_v13  ;;  %vm6260_vm15 = vcmp.eq.f32.partialorder %v20901_v49, %v20126_v13  ;;  %v17304_v52 = vadd.f32 %v7344_v33, %v4745_v57  ;;  %v20919_v33 = vld [vmem:[#allocation128_spill] sm:$0xff] }
 0x4dc   : > { %vm4464_vm11 = vmand %vm4448_vm4, %vm20909_vm9  ;;  %v6753_v44 = vadd.f32 %v7559_v8, %v17140_v60  ;;  %vm5028_vm0 = vcmp.gt.f32.partialorder %v17272_v40, %v9220_v62  ;;  %vm5568_vm2 = vcmp.gt.f32.partialorder %v17272_v40, %v9224_v34  ;;  %vm6108_vm9 = vcmp.gt.f32.partialorder %v17272_v40, %v9228_v15  ;;  %4415 = vperm.xlu0 %7850, %v20912_v47  }
 0x4dd   : > { %vm17312_vm13 = vmor %vm5839_vm10, %vm5855_vm3  ;;  %vm20915_vm3 = vcmp.ne.s32.totalorder %v20908_v30, %v18983_v42  ;;  %v7373_v55 = vsel %vm5028_vm0, 1.0, %v18893_v32  ;;  %v7437_v20 = vsel %vm5568_vm2, 1.0, %v18893_v32  ;;  %v7501_v56 = vsel %vm6108_vm9, 1.0, %v18893_v32 }
 0x4de   : > { %vm4480_vm4 = vmor %vm4432_vm6, %vm4464_vm11  ;;  %vm5314_vm11 = vcmp.eq.f32.partialorder %v16276_v61, %v9224_v34  ;;  %v17353_v29 = vadd.f32 %v17162_v35, %v6753_v44  ;;  %v17355_v16 = vadd.f32 %v7373_v55, %v5138_v17  ;;  %v17357_v18 = vadd.f32 %v7437_v20, %v5678_v31 }
 0x4df   : > { %vm17333_vm10 = vmor %vm6379_vm12, %vm6395_vm1  ;;  %vm20916_vm12 = vcmp.gt.f32.partialorder %v20901_v49, %v9224_v34  ;;  %v17369_v35 = vadd.f32 %v7501_v56, %v6218_v38  ;;  %v7404_v30 = vsel %vm17289_vm14, 1.0, %v18893_v32  ;;  %v7468_v47 = vsel %vm17312_vm13, 1.0, %v18893_v32 }
 0x4e0   : > { %vm4496_vm6 = vmand %vm20915_vm3, %vm4480_vm4  ;;  %vm20917_vm4 = vcmp.gt.f32.partialorder %v20901_v49, %v9228_v15  ;;  %vm5838_vm3 = vcmp.gt.f32.partialorder %v16276_v61, %v9228_v15  ;;  %v7532_v20 = vsel %vm17333_vm10, 1.0, %v18893_v32  ;;  %vm4449_vm14 = vcmp.eq.f32.partialorder %v16514_v7, %v9220_v62 }
 0x4e1   : > { %v7323_v54 = vsel %vm4496_vm6, 1.0, %v18893_v32  ;;  %vm5212_vm1 = vmor %vm20916_vm12, %vm5180_vm5  ;;  %vm5298_vm5 = vcmp.gt.f32.partialorder %v16276_v61, %v9224_v34  ;;  %vm5854_vm6 = vcmp.eq.f32.partialorder %v16276_v61, %v9228_v15  ;;  %vm6394_vm12 = vcmp.eq.f32.partialorder %v16276_v61, %v20126_v13 }
 0x4e2   : > { %v4543_v59 = vadd.f32 %v7323_v54, %v17094_v63  ;;  %v7387_v5 = vsel %vm5212_vm1, 1.0, %v18893_v32  ;;  %vm5752_vm0 = vmor %vm20917_vm4, %vm5720_vm8  ;;  %v20918_v63 = vmov 2   ;;  %vm20920_vm8 = vcmp.lt.s32.totalorder %v20919_v33, %v20780_v0  ;;  %v20924_v54 = vld [vmem:[#allocation43_spill] sm:$0xff] }
 0x4e3   : > { %v5275_v17 = vadd.f32 %v7387_v5, %v17104_v51  ;;  %v7451_v31 = vsel %vm5752_vm0, 1.0, %v18893_v32  ;;  %vm6292_vm2 = vmor %vm6244_vm7, %vm6260_vm15  ;;  %7851 = vset.pattern.permute.xlu0 %v20918_v63  ;;  %v20921_v51 = vld [vmem:[#allocation47_spill] sm:$0xff]  ;;  %vm6378_vm7 = vcmp.gt.f32.partialorder %v16276_v61, %v20126_v13  ;;  %vm4433_vm13 = vcmp.gt.f32.partialorder %v16514_v7, %v9220_v62  ;;  %v20932_v5 = vld [vmem:[#allocation174_spill] sm:$0xff] }
 0x4e4   : > { %v5815_v41 = vadd.f32 %v7451_v31, %v17129_v53  ;;  %v7515_v57 = vsel %vm6292_vm2, 1.0, %v18893_v32  ;;  %vm5330_vm9 = vmand %vm5314_vm11, %vm20920_vm8  ;;  %4787 = vperm.xlu0 %7851, %v20921_v51   ;;  %vm20922_vm11 = vcmp.ne.s32.totalorder %v20919_v33, %v20780_v0  ;;  %vm20927_vm2 = vcmp.ne.s32.totalorder %v20563_v4, %v18983_v42  ;;  %v17453_v4 = vpop.permute.xlu1 %5005 }
 0x4e5   : > { %v6355_v38 = vadd.f32 %v7515_v57, %v17136_v19  ;;  %vm5346_vm15 = vmor %vm5298_vm5, %vm5330_vm9  ;;  %v20923_v19 = vld [vmem:[#allocation48_spill] sm:$0xff]  ;;  %vm20930_vm10 = vcmp.lt.s32.totalorder %v20929_v24, %v18983_v42 }
 0x4e6   : > { %vm5362_vm1 = vmand %vm20922_vm11, %vm5346_vm15  ;;  %vm20931_vm11 = vcmp.ne.s32.totalorder %v20929_v24, %v18983_v42 }
 0x4e7   : > { %v7403_v53 = vsel %vm5362_vm1, 1.0, %v18893_v32  ;;  %vm5886_vm4 = vmor %vm5838_vm3, %vm5854_vm6  ;;  %vm5165_vm3 = vcmp.gt.f32.partialorder %v16514_v7, %v9224_v34  ;;  %vm5181_vm6 = vcmp.eq.f32.partialorder %v16514_v7, %v9224_v34 }
 0x4e8   : > { %v5409_v49 = vadd.f32 %v7403_v53, %v17244_v6  ;;  %v7467_v8 = vsel %vm5886_vm4, 1.0, %v18893_v32  ;;  %vm6426_vm0 = vmor %vm6378_vm7, %vm6394_vm12  ;;  %4799 = vperm.xlu0 %7851, %v20923_v19   ;;  %vm5705_vm7 = vcmp.gt.f32.partialorder %v16514_v7, %v9228_v15  ;;  %vm5721_vm12 = vcmp.eq.f32.partialorder %v16514_v7, %v9228_v15 }
 0x4e9   : > { %v5949_v61 = vadd.f32 %v7467_v8, %v17256_v37  ;;  %v7531_v44 = vsel %vm6426_vm0, 1.0, %v18893_v32  ;;  %v20925_v37 = vld [vmem:[#allocation173_spill] sm:$0xff]  ;;  %vm4465_vm9 = vmand %vm4449_vm14, %vm20930_vm10  ;;  %vm6245_vm4 = vcmp.gt.f32.partialorder %v16514_v7, %v20126_v13  ;;  %vm6261_vm0 = vcmp.eq.f32.partialorder %v16514_v7, %v20126_v13  ;;  %v20934_v8 = vld [vmem:[#allocation144_spill] sm:$0xff] }
 0x4ea   : > { %v6489_v55 = vadd.f32 %v7531_v44, %v17266_v46  ;;  %v17414_v6 = vadd.f32 %v7404_v30, %v5409_v49  ;;  %vm20926_vm5 = vnez %v20925_v37  ;;  %v20928_v46 = vmov 3   ;;  %vm4481_vm15 = vmor %vm4433_vm13, %vm4465_vm9  ;;  %v20936_v7 = vld [vmem:[#allocation175_spill] sm:$0xff] }
 0x4eb   : > { %v17419_v56 = vadd.f32 %v7468_v47, %v5949_v61  ;;  %vm4498_vm8 = vmand %vm20927_vm2, %vm20926_vm5  ;;  %vm20933_vm14 = vnez %v20932_v5  ;;  %vm6660_vm5 = vcmp.eq.f32.partialorder %v16613_v48, %v20126_v13  ;;  %vm5318_vm2 = vcmp.eq.f32.partialorder %v17197_v3, %v9224_v34 }
 0x4ec   : > { %v17421_v1 = vadd.f32 %v7532_v20, %v6489_v55  ;;  %4811 = vperm.xlu0 %7851, %v20924_v54   ;;  %vm4497_vm1 = vmand %vm20931_vm11, %vm4481_vm15  ;;  %v7325_v60 = vsel %vm4498_vm8, 1.0, %v18893_v32  ;;  %v7389_v31 = vsel %vm20933_vm14, 1.0, %v18893_v32  ;;  %vm6644_vm8 = vcmp.gt.f32.partialorder %v16613_v48, %v20126_v13  ;;  %v20941_v55 = vld [vmem:[#allocation158_spill] sm:$0xff] }
 0x4ed   : > { %v7324_v63 = vsel %vm4497_vm1, 1.0, %v18893_v32  ;;  %vm5213_vm13 = vmor %vm5165_vm3, %vm5181_vm6  ;;  %vm5029_vm3 = vcmp.gt.f32.partialorder %v17453_v4, %v9220_v62  ;;  %vm5569_vm6 = vcmp.gt.f32.partialorder %v17453_v4, %v9224_v34  ;;  %vm20935_vm15 = vcmp.lt.s32.totalorder %v20934_v8, %v9488_v28 }
 0x4ee   : > { %v4544_v57 = vadd.f32 %v7324_v63, %v4543_v59  ;;  %v7388_v33 = vsel %vm5213_vm13, 1.0, %v18893_v32  ;;  %vm5753_vm10 = vmor %vm5705_vm7, %vm5721_vm12  ;;  %vm6109_vm12 = vcmp.gt.f32.partialorder %v17453_v4, %v9228_v15  ;;  %vm20937_vm11 = vnez %v20936_v7 }
 0x4ef   : > { %v5276_v51 = vadd.f32 %v7388_v33, %v5275_v17  ;;  %v7452_v53 = vsel %vm5753_vm10, 1.0, %v18893_v32  ;;  %vm6293_vm9 = vmor %vm6245_vm4, %vm6261_vm0  ;;  %v7453_v17 = vsel %vm20937_vm11, 1.0, %v18893_v32  ;;  %vm5302_vm0 = vcmp.gt.f32.partialorder %v17197_v3, %v9224_v34  ;;  %v20957_v33 = vld [vmem:[#allocation38_spill] sm:$0xff] }
 0x4f0   : > { %7855 = vset.pattern.permute.xlu0 %v20928_v46  ;;  %v5816_v59 = vadd.f32 %v7452_v53, %v5815_v41  ;;  %v7516_v49 = vsel %vm6293_vm9, 1.0, %v18893_v32  ;;  %vm6676_vm7 = vmand %vm6660_vm5, %vm20935_vm15  ;;  %v17479_v48 = vadd.f32 %v7325_v60, %v4544_v57  ;;  %v20938_v41 = vld [vmem:[#allocation178_spill] sm:$0xff]  ;;  %vm20940_vm14 = vcmp.ne.s32.totalorder %v20934_v8, %v9488_v28  ;;  %v20948_v57 = vld [vmem:[#allocation107_spill] sm:$0xff] }
 0x4f1   : > { %5009 = vperm.xlu0 %7855, %v20924_v54   ;;  %v6356_v19 = vadd.f32 %v7516_v49, %v6355_v38  ;;  %vm6692_vm1 = vmor %vm6644_vm8, %vm6676_vm7  ;;  %v17486_v30 = vadd.f32 %v7389_v31, %v5276_v51  ;;  %vm20939_vm4 = vnez %v20938_v41  ;;  %v7374_v47 = vsel %vm5029_vm3, 1.0, %v18893_v32  ;;  %v20962_v41 = vld [vmem:[#allocation111_spill] sm:$0xff] }
 0x4f2   : > { %v7517_v61 = vsel %vm20939_vm4, 1.0, %v18893_v32  ;;  %vm6708_vm13 = vmand %vm20940_vm14, %vm6692_vm1  ;;  %v17496_v44 = vadd.f32 %v7453_v17, %v5816_v59  ;;  %vm20942_vm5 = vcmp.lt.s32.totalorder %v20941_v55, %v20780_v0  ;;  %v7438_v54 = vsel %vm5569_vm6, 1.0, %v18893_v32 }
 0x4f3   : > { %vm5334_vm10 = vmand %vm5318_vm2, %vm20942_vm5  ;;  %v7561_v38 = vsel %vm6708_vm13, 1.0, %v18893_v32  ;;  %v17506_v20 = vadd.f32 %v7517_v61, %v6356_v19  ;;  %v7502_v37 = vsel %vm6109_vm12, 1.0, %v18893_v32  ;;  %vm5316_vm8 = vcmp.eq.f32.partialorder %v16762_v12, %v9224_v34 }
 0x4f4   : > { %v6755_v46 = vadd.f32 %v7561_v38, %v17353_v29  ;;  %vm5300_vm9 = vcmp.gt.f32.partialorder %v16762_v12, %v9224_v34  ;;  %vm17518_vm2 = vmor %vm5302_vm0, %vm5334_vm10  ;;  %v17523_v60 = vadd.f32 %v7374_v47, %v17355_v16  ;;  %v17526_v5 = vadd.f32 %v7438_v54, %v17357_v18  ;;  %v20945_v29 = vld [vmem:[#allocation104_spill] sm:$0xff] }
 0x4f5   : > { %v17529_v31 = vadd.f32 %v7502_v37, %v17369_v35  ;;  %vm20946_vm3 = vcmp.lt.s32.totalorder %v20945_v29, %v20780_v0  ;;  %vm5840_vm15 = vcmp.gt.f32.partialorder %v16762_v12, %v9228_v15  ;;  %vm5856_vm7 = vcmp.eq.f32.partialorder %v16762_v12, %v9228_v15 }
 0x4f6   : > { %vm5332_vm6 = vmand %vm5316_vm8, %vm20946_vm3  ;;  %vm6380_vm11 = vcmp.gt.f32.partialorder %v16762_v12, %v20126_v13  ;;  %vm6396_vm1 = vcmp.eq.f32.partialorder %v16762_v12, %v20126_v13  ;;  %vm20947_vm4 = vcmp.ne.s32.totalorder %v20945_v29, %v20780_v0  ;;  %vm6661_vm14 = vcmp.eq.f32.partialorder %v16821_v9, %v20126_v13  ;;  %v20965_v29 = vld [vmem:[#allocation34_spill] sm:$0xff] }
 0x4f7   : > { %vm5348_vm12 = vmor %vm5300_vm9, %vm5332_vm6  ;;  %vm6645_vm5 = vcmp.gt.f32.partialorder %v16821_v9, %v20126_v13  ;;  %vm20949_vm8 = vcmp.lt.s32.totalorder %v20948_v57, %v9488_v28  ;;  %vm4451_vm3 = vcmp.eq.f32.partialorder %v16885_v2, %v9220_v62  ;;  %vm5842_vm6 = vcmp.gt.f32.partialorder %v17197_v3, %v9228_v15 }
 0x4f8   : > { %vm5364_vm0 = vmand %vm20947_vm4, %vm5348_vm12  ;;  %vm4435_vm12 = vcmp.gt.f32.partialorder %v16885_v2, %v9220_v62  ;;  %vm20950_vm4 = vcmp.ne.s32.totalorder %v20948_v57, %v9488_v28 }
 0x4f9   : > { %v7405_v16 = vsel %vm5364_vm0, 1.0, %v18893_v32  ;;  %vm5888_vm13 = vmor %vm5840_vm15, %vm5856_vm7  ;;  %vm5858_vm15 = vcmp.eq.f32.partialorder %v17197_v3, %v9228_v15 }
 0x4fa   : > { %v5411_v18 = vadd.f32 %v7405_v16, %v17414_v6  ;;  %v7469_v35 = vsel %vm5888_vm13, 1.0, %v18893_v32  ;;  %vm6428_vm10 = vmor %vm6380_vm11, %vm6396_vm1  ;;  %vm6382_vm11 = vcmp.gt.f32.partialorder %v17197_v3, %v20126_v13  ;;  %vm6398_vm1 = vcmp.eq.f32.partialorder %v17197_v3, %v20126_v13  ;;  %v20971_v3 = vld [vmem:[#allocation72_spill] sm:$0xff] }
 0x4fb   : > { %v5951_v12 = vadd.f32 %v7469_v35, %v17419_v56  ;;  %v7533_v63 = vsel %vm6428_vm10, 1.0, %v18893_v32  ;;  %vm6677_vm9 = vmand %vm6661_vm14, %vm20949_vm8  ;;  %vm20951_vm14 = vcmp.ne.s32.totalorder %v20941_v55, %v20780_v0  ;;  %vm5167_vm8 = vcmp.gt.f32.partialorder %v16885_v2, %v9224_v34 }
 0x4fc   : > { %v6491_v9 = vadd.f32 %v7533_v63, %v17421_v1  ;;  %vm6693_vm7 = vmor %vm6645_vm5, %vm6677_vm9  ;;  %vm20954_vm5 = vcmp.lt.s32.totalorder %v20553_v10, %v18983_v42  ;;  %vm5183_vm9 = vcmp.eq.f32.partialorder %v16885_v2, %v9224_v34 }
 0x4fd   : > { %vm6709_vm0 = vmand %vm20950_vm4, %vm6693_vm7  ;;  %vm5707_vm4 = vcmp.gt.f32.partialorder %v16885_v2, %v9228_v15 }
 0x4fe   : > { %vm17578_vm13 = vmand %vm20951_vm14, %vm17518_vm2  ;;  %v7562_v56 = vsel %vm6709_vm0, 1.0, %v18893_v32  ;;  %vm5723_vm0 = vcmp.eq.f32.partialorder %v16885_v2, %v9228_v15 }
 0x4ff   : > { %vm4467_vm10 = vmand %vm4451_vm3, %vm20954_vm5  ;;  %v6756_v1 = vadd.f32 %v7562_v56, %v6755_v46  ;;  %vm20958_vm3 = vnez %v20957_v33  ;;  %vm6263_vm5 = vcmp.eq.f32.partialorder %v16885_v2, %v20126_v13  ;;  %v7407_v47 = vsel %vm17578_vm13, 1.0, %v18893_v32 }
 0x500   : > { %vm17590_vm7 = vmor %vm5842_vm6, %vm5858_vm15  ;;  %v7563_v51 = vsel %vm20958_vm3, 1.0, %v18893_v32  ;;  %vm20961_vm6 = vcmp.ne.s32.totalorder %v20553_v10, %v18983_v42  ;;  %vm5317_vm3 = vcmp.eq.f32.partialorder %v16951_v50, %v9224_v34  ;;  %vm20966_vm13 = vcmp.lt.s32.totalorder %v20965_v29, %v18983_v42 }
 0x501   : > { %vm4483_vm2 = vmor %vm4435_vm12, %vm4467_vm10  ;;  %vm6247_vm12 = vcmp.gt.f32.partialorder %v16885_v2, %v20126_v13  ;;  %v6757_v49 = vadd.f32 %v7563_v51, %v6756_v1 }
 0x502   : > { %vm17601_vm14 = vmor %vm6382_vm11, %vm6398_vm1  ;;  %vm5301_vm1 = vcmp.gt.f32.partialorder %v16951_v50, %v9224_v34 }
 0x503   : > { %vm4499_vm15 = vmand %vm20961_vm6, %vm4483_vm2  ;;  %vm5841_vm6 = vcmp.gt.f32.partialorder %v16951_v50, %v9228_v15  ;;  %v7535_v37 = vsel %vm17601_vm14, 1.0, %v18893_v32  ;;  %vm5724_vm14 = vcmp.eq.f32.partialorder %v17060_v45, %v9228_v15 }
 0x504   : > { %v7326_v59 = vsel %vm4499_vm15, 1.0, %v18893_v32  ;;  %vm5215_vm10 = vmor %vm5167_vm8, %vm5183_vm9  ;;  %vm20963_vm8 = vcmp.lt.s32.totalorder %v20962_v41, %v20780_v0  ;;  %vm6381_vm15 = vcmp.gt.f32.partialorder %v16951_v50, %v20126_v13 }
 0x505   : > { %v4546_v8 = vadd.f32 %v7326_v59, %v17479_v48  ;;  %v7390_v7 = vsel %vm5215_vm10, 1.0, %v18893_v32  ;;  %vm5755_vm11 = vmor %vm5707_vm4, %vm5723_vm0  ;;  %vm5857_vm4 = vcmp.eq.f32.partialorder %v16951_v50, %v9228_v15 }
 0x506   : > { %v5278_v10 = vadd.f32 %v7390_v7, %v17486_v30  ;;  %v7454_v17 = vsel %vm5755_vm11, 1.0, %v18893_v32  ;;  %vm6295_vm2 = vmor %vm6247_vm12, %vm6263_vm5  ;;  %vm6397_vm12 = vcmp.eq.f32.partialorder %v16951_v50, %v20126_v13  ;;  %vm20964_vm5 = vcmp.ne.s32.totalorder %v20962_v41, %v20780_v0 }
 0x507   : > { %v5818_v2 = vadd.f32 %v7454_v17, %v17496_v44  ;;  %v7518_v19 = vsel %vm6295_vm2, 1.0, %v18893_v32  ;;  %vm5333_vm9 = vmand %vm5317_vm3, %vm20963_vm8  ;;  %v7471_v50 = vsel %vm17590_vm7, 1.0, %v18893_v32  ;;  %vm4436_vm2 = vcmp.gt.f32.partialorder %v17060_v45, %v9220_v62  ;;  %v20980_v17 = vld [vmem:[#allocation58_spill] sm:$0xff] }
 0x508   : > { %v6358_v48 = vadd.f32 %v7518_v19, %v17506_v20  ;;  %vm5349_vm0 = vmor %vm5301_vm1, %vm5333_vm9  ;;  %vm4452_vm1 = vcmp.eq.f32.partialorder %v17060_v45, %v9220_v62  ;;  %vm5168_vm7 = vcmp.gt.f32.partialorder %v17060_v45, %v9224_v34  ;;  %vm5184_vm9 = vcmp.eq.f32.partialorder %v17060_v45, %v9224_v34  ;;  %v20981_v19 = vld [vmem:[#allocation105_spill] sm:$0xff] }
 0x509   : > { %vm5365_vm10 = vmand %vm20964_vm5, %vm5349_vm0  ;;  %vm20967_vm0 = vcmp.ne.s32.totalorder %v20965_v29, %v18983_v42  ;;  %vm6264_vm5 = vcmp.eq.f32.partialorder %v17060_v45, %v20126_v13  ;;  %v4747_v41 = vrot.slane %v17304_v52, 4 }
 0x50a   : > { %v7406_v30 = vsel %vm5365_vm10, 1.0, %v18893_v32  ;;  %vm5889_vm3 = vmor %vm5841_vm6, %vm5857_vm4  ;;  %vm5708_vm4 = vcmp.gt.f32.partialorder %v17060_v45, %v9228_v15 }
 0x50b   : > { %v5412_v61 = vadd.f32 %v7406_v30, %v5411_v18  ;;  %v7470_v44 = vsel %vm5889_vm3, 1.0, %v18893_v32  ;;  %vm6429_vm11 = vmor %vm6381_vm15, %vm6397_vm12  ;;  %vm6248_vm12 = vcmp.gt.f32.partialorder %v17060_v45, %v20126_v13  ;;  %vm6663_vm3 = vcmp.eq.f32.partialorder %v17114_v43, %v20126_v13 }
 0x50c   : > { %v5952_v55 = vadd.f32 %v7470_v44, %v5951_v12  ;;  %v7534_v38 = vsel %vm6429_vm11, 1.0, %v18893_v32  ;;  %vm4468_vm8 = vmand %vm4452_vm1, %vm20966_vm13  ;;  %vm6647_vm1 = vcmp.gt.f32.partialorder %v17114_v43, %v20126_v13 }
 0x50d   : > { %v6492_v20 = vadd.f32 %v7534_v38, %v6491_v9  ;;  %v5413_v54 = vadd.f32 %v7407_v47, %v5412_v61  ;;  %vm4484_vm6 = vmor %vm4436_vm2, %vm4468_vm8  ;;  %v20968_v9 = vld [vmem:[#allocation78_spill] sm:$0xff]  ;;  %v20985_v61 = vld [vmem:[#allocation119_spill] sm:$0xff]  ;;  %v17791_v38 = vpop.permute.xlu1 %4815 }
 0x50e   : > { %v5953_v46 = vadd.f32 %v7471_v50, %v5952_v55  ;;  %vm4500_vm15 = vmand %vm20967_vm0, %vm4484_vm6  ;;  %vm20969_vm13 = vcmp.lt.s32.totalorder %v20968_v9, %v9488_v28  ;;  %vm20972_vm0 = vcmp.lt.s32.totalorder %v20971_v3, %v20780_v0  ;;  %v4748_v55 = vadd.f32 %v4747_v41, %v17304_v52 }
 0x50f   : > { %v6493_v24 = vadd.f32 %v7535_v37, %v6492_v20  ;;  %v7327_v16 = vsel %vm4500_vm15, 1.0, %v18893_v32  ;;  %vm5216_vm10 = vmor %vm5168_vm7, %vm5184_vm9  ;;  %vm20970_vm9 = vcmp.ne.s32.totalorder %v20968_v9, %v9488_v28  ;;  %v20990_v37 = vld [vmem:[#allocation120_spill] sm:$0xff]  ;;  %v21033_v20 = vld [vmem:[#allocation109_spill] sm:$0xff] }
 0x510   : > { %v17675_v18 = vadd.f32 %v7327_v16, %v4546_v8  ;;  %v7391_v35 = vsel %vm5216_vm10, 1.0, %v18893_v32  ;;  %vm5756_vm11 = vmor %vm5708_vm4, %vm5724_vm14  ;;  %vm5319_vm4 = vcmp.eq.f32.partialorder %v17210_v22, %v9224_v34  ;;  %vm5303_vm14 = vcmp.gt.f32.partialorder %v17210_v22, %v9224_v34 }
 0x511   : > { %v17680_v12 = vadd.f32 %v7391_v35, %v5278_v10  ;;  %v7455_v63 = vsel %vm5756_vm11, 1.0, %v18893_v32  ;;  %vm6296_vm2 = vmor %vm6248_vm12, %vm6264_vm5  ;;  %vm5843_vm12 = vcmp.gt.f32.partialorder %v17210_v22, %v9228_v15  ;;  %vm5859_vm5 = vcmp.eq.f32.partialorder %v17210_v22, %v9228_v15 }
 0x512   : > { %v17683_v45 = vadd.f32 %v7455_v63, %v5818_v2  ;;  %v7519_v57 = vsel %vm6296_vm2, 1.0, %v18893_v32  ;;  %vm6679_vm8 = vmand %vm6663_vm3, %vm20969_vm13  ;;  %vm6383_vm3 = vcmp.gt.f32.partialorder %v17210_v22, %v20126_v13  ;;  %vm6399_vm11 = vcmp.eq.f32.partialorder %v17210_v22, %v20126_v13 }
 0x513   : > { %v17689_v6 = vadd.f32 %v7519_v57, %v6358_v48  ;;  %vm6695_vm7 = vmor %vm6647_vm1, %vm6679_vm8  ;;  %vm20973_vm1 = vcmp.ne.s32.totalorder %v20971_v3, %v20780_v0  ;;  %vm6664_vm13 = vcmp.eq.f32.partialorder %v17272_v40, %v20126_v13  ;;  %v20974_v0 = vld [vmem:[#allocation123_spill] sm:$0xff]  ;;  %v3935_v2 = vrot.slane %v20980_v17, 4  ;;  %v21031_v3 = vld [vmem:[#allocation118_spill] sm:$0xff] }
 0x514   : > { %vm6711_vm6 = vmand %vm20970_vm9, %vm6695_vm7  ;;  %vm6648_vm7 = vcmp.gt.f32.partialorder %v17272_v40, %v20126_v13  ;;  %v4749_v63 = vrot.slane %v4748_v55, 2 }
 0x515   : > { %v7564_v43 = vsel %vm6711_vm6, 1.0, %v18893_v32  ;;  %vm5335_vm15 = vmand %vm5319_vm4, %vm20972_vm0  ;;  %vm20975_vm6 = vcmp.lt.s32.totalorder %v20974_v0, %v9488_v28  ;;  %v3936_v48 = vadd.f32 %v3935_v2, %v20980_v17 }
 0x516   : > { %v6758_v56 = vadd.f32 %v7564_v43, %v6757_v49  ;;  %vm5351_vm10 = vmor %vm5303_vm14, %vm5335_vm15  ;;  %vm6665_vm14 = vcmp.eq.f32.partialorder %v17453_v4, %v20126_v13  ;;  %vm6649_vm15 = vcmp.gt.f32.partialorder %v17453_v4, %v20126_v13  ;;  %v20979_v4 = vld [vmem:[#allocation52_spill] sm:$0xff] }
 0x517   : > { %vm5367_vm2 = vmand %vm20973_vm1, %vm5351_vm10  ;;  %vm20977_vm10 = vcmp.lt.s32.totalorder %v20473_v36, %v9488_v28  ;;  %vm20978_vm1 = vcmp.ne.s32.totalorder %v20473_v36, %v9488_v28  ;;  %v4183_v10 = vrot.slane %v20979_v4, 4 }
 0x518   : > { %v7408_v1 = vsel %vm5367_vm2, 1.0, %v18893_v32  ;;  %vm5891_vm8 = vmor %vm5843_vm12, %vm5859_vm5  ;;  %vm20976_vm12 = vcmp.ne.s32.totalorder %v20974_v0, %v9488_v28 }
 0x519   : > { %v17718_v33 = vadd.f32 %v7408_v1, %v5413_v54  ;;  %v7472_v51 = vsel %vm5891_vm8, 1.0, %v18893_v32  ;;  %vm6431_vm9 = vmor %vm6383_vm3, %vm6399_vm11  ;;  %vm5971_vm8 = vcmp.gt.f32.partialorder %v16396_v26, %v9228_v15  ;;  %v4184_v36 = vadd.f32 %v4183_v10, %v20979_v4  ;;  %v17893_v1 = vpop.permute.xlu1 %5013 }
 0x51a   : > { %v17721_v53 = vadd.f32 %v7472_v51, %v5953_v46  ;;  %v7536_v22 = vsel %vm6431_vm9, 1.0, %v18893_v32  ;;  %vm6680_vm4 = vmand %vm6664_vm13, %vm20975_vm6  ;;  %vm5987_vm13 = vcmp.eq.f32.partialorder %v16396_v26, %v9228_v15  ;;  %vm5988_vm6 = vcmp.eq.f32.partialorder %v16701_v11, %v9228_v15 }
 0x51b   : > { %v17729_v59 = vadd.f32 %v7536_v22, %v6493_v24  ;;  %vm6696_vm0 = vmor %vm6648_vm7, %vm6680_vm4  ;;  %vm20982_vm7 = vcmp.lt.s32.totalorder %v20981_v19, %v20256_v39  ;;  %vm4827_vm4 = vcmp.gt.f32.partialorder %v16396_v26, %v9220_v62  ;;  %v4185_v44 = vrot.slane %v4184_v36, 2 }
 0x51c   : > { %vm6712_vm5 = vmand %vm20976_vm12, %vm6696_vm0  ;;  %vm5431_vm0 = vcmp.gt.f32.partialorder %v16396_v26, %v9224_v34  ;;  %vm5432_vm12 = vcmp.gt.f32.partialorder %v16701_v11, %v9224_v34  ;;  %v17778_v47 = vsel %vm4827_vm4, 1.0, %v18893_v32  ;;  %vm6512_vm4 = vcmp.gt.f32.partialorder %v16701_v11, %v20126_v13 }
 0x51d   : > { %v7565_v40 = vsel %vm6712_vm5, 1.0, %v18893_v32  ;;  %vm6681_vm3 = vmand %vm6665_vm14, %vm20977_vm10  ;;  %vm5972_vm5 = vcmp.gt.f32.partialorder %v16701_v11, %v9228_v15  ;;  %vm20986_vm10 = vcmp.lt.s32.totalorder %v20985_v61, %v20256_v39  ;;  %v17794_v50 = vsel %vm5431_vm0, 1.0, %v18893_v32 }
 0x51e   : > { %v6759_v49 = vadd.f32 %v7565_v40, %v6758_v56  ;;  %vm6697_vm11 = vmor %vm6649_vm15, %vm6681_vm3  ;;  %vm4828_vm15 = vcmp.gt.f32.partialorder %v16701_v11, %v9220_v62  ;;  %v17812_v52 = vsel %vm5432_vm12, 1.0, %v18893_v32  ;;  %vm20991_vm0 = vcmp.lt.s32.totalorder %v20990_v37, %v20256_v39 }
 0x51f   : > { %vm6713_vm2 = vmand %vm20978_vm1, %vm6697_vm11  ;;  %vm6511_vm11 = vcmp.gt.f32.partialorder %v16396_v26, %v20126_v13  ;;  %vm5990_vm1 = vcmp.eq.f32.partialorder %v17008_v14, %v9228_v15  ;;  %v17809_v54 = vsel %vm4828_vm15, 1.0, %v18893_v32  ;;  %vm4831_vm15 = vcmp.gt.f32.partialorder %v17147_v23, %v9220_v62 }
 0x520   : > { %v7566_v8 = vsel %vm6713_vm2, 1.0, %v18893_v32  ;;  %vm6003_vm9 = vmand %vm5987_vm13, %vm20982_vm7  ;;  %vm6527_vm2 = vcmp.eq.f32.partialorder %v16396_v26, %v20126_v13  ;;  %vm4830_vm13 = vcmp.gt.f32.partialorder %v17008_v14, %v9220_v62  ;;  %vm20987_vm7 = vcmp.ne.s32.totalorder %v20981_v19, %v20256_v39  ;;  %v21007_v19 = vld [vmem:[#allocation129_spill] sm:$0xff] }
 0x521   : > { %v17744_v7 = vadd.f32 %v7566_v8, %v6759_v49  ;;  %vm17762_vm14 = vmor %vm5971_vm8, %vm6003_vm9  ;;  %vm5434_vm8 = vcmp.gt.f32.partialorder %v17008_v14, %v9224_v34  ;;  %vm5435_vm12 = vcmp.gt.f32.partialorder %v17147_v23, %v9224_v34  ;;  %v3937_v46 = vrot.slane %v3936_v48, 2 }
 0x522   : > { %vm6004_vm3 = vmand %vm5988_vm6, %vm20986_vm10  ;;  %v17844_v29 = vsel %vm4830_vm13, 1.0, %v18893_v32  ;;  %v17850_v16 = vsel %vm5434_vm8, 1.0, %v18893_v32  ;;  %v5415_v26 = vrot.slane %v17718_v33, 4  ;;  %vm5991_vm13 = vcmp.eq.f32.partialorder %v17147_v23, %v9228_v15 }
 0x523   : > { %vm17801_vm9 = vmand %vm20987_vm7, %vm17762_vm14  ;;  %vm5974_vm14 = vcmp.gt.f32.partialorder %v17008_v14, %v9228_v15  ;;  %v5955_v57 = vrot.slane %v17721_v53, 4  ;;  %vm6530_vm7 = vcmp.eq.f32.partialorder %v17008_v14, %v20126_v13  ;;  %v17875_v43 = vsel %vm4831_vm15, 1.0, %v18893_v32 }
 0x524   : > { %vm6020_vm6 = vmor %vm5972_vm5, %vm6004_vm3  ;;  %vm6528_vm3 = vcmp.eq.f32.partialorder %v16701_v11, %v20126_v13  ;;  %v17878_v56 = vsel %vm5435_vm12, 1.0, %v18893_v32  ;;  %v3938_v51 = vadd.f32 %v3937_v46, %v3936_v48  ;;  %v4186_v22 = vadd.f32 %v4185_v44, %v4184_v36 }
 0x525   : > { %vm6006_vm10 = vmand %vm5990_vm1, %vm20991_vm0  ;;  %vm5975_vm15 = vcmp.gt.f32.partialorder %v17147_v23, %v9228_v15  ;;  %vm21001_vm12 = vcmp.lt.s32.totalorder %v20441_v21, %v20256_v39  ;;  %v5416_v0 = vadd.f32 %v5415_v26, %v17718_v33  ;;  %v6495_v40 = vrot.slane %v17729_v59, 4 }
 0x526   : > { %vm17834_vm5 = vmor %vm6511_vm11, %vm6527_vm2  ;;  %vm20994_vm11 = vcmp.ne.s32.totalorder %v20985_v61, %v20256_v39  ;;  %v4750_v4 = vadd.f32 %v4749_v63, %v4748_v55  ;;  %v5956_v10 = vadd.f32 %v5955_v57, %v17721_v53  ;;  %v3939_v41 = vrot.slane %v3938_v51, 1 }
 0x527   : > { %vm17856_vm1 = vmand %vm20994_vm11, %vm6020_vm6  ;;  %vm4833_vm6 = vcmp.gt.f32.partialorder %v17791_v38, %v9220_v62  ;;  %vm21004_vm11 = vcmp.ne.s32.totalorder %v20990_v37, %v20256_v39  ;;  %v4187_v48 = vrot.slane %v4186_v22, 1  ;;  %v5417_v61 = vrot.slane %v5416_v0, 2 }
 0x528   : > { %vm17868_vm8 = vmor %vm5974_vm14, %vm6006_vm10  ;;  %vm5437_vm14 = vcmp.gt.f32.partialorder %v17791_v38, %v9224_v34  ;;  %vm5993_vm10 = vcmp.eq.f32.partialorder %v17791_v38, %v9228_v15  ;;  %v17927_v33 = vsel %vm4833_vm6, 1.0, %v18893_v32  ;;  %vm5031_vm6 = vcmp.gt.f32.partialorder %v17893_v1, %v9220_v62 }
 0x529   : > { %vm17885_vm0 = vmor %vm6512_vm4, %vm6528_vm3  ;;  %v17933_v2 = vsel %vm5437_vm14, 1.0, %v18893_v32  ;;  %vm5571_vm3 = vcmp.gt.f32.partialorder %v17893_v1, %v9224_v34  ;;  %v6496_v44 = vadd.f32 %v6495_v40, %v17729_v59  ;;  %v17974_v55 = vsel %vm17801_vm9, 1.0, %v18893_v32 }
 0x52a   : > { %vm17903_vm4 = vmand %vm5991_vm13, %vm21001_vm12  ;;  %vm6531_vm13 = vcmp.eq.f32.partialorder %v17147_v23, %v20126_v13  ;;  %vm21008_vm12 = vcmp.lt.s32.totalorder %v21007_v19, %v20256_v39  ;;  %v5957_v46 = vrot.slane %v5956_v10, 2  ;;  %v17988_v59 = vsel %vm17834_vm5, 1.0, %v18893_v32 }
 0x52b   : > { %vm17916_vm2 = vmand %vm21004_vm11, %vm17868_vm8  ;;  %vm5977_vm8 = vcmp.gt.f32.partialorder %v17791_v38, %v9228_v15  ;;  %vm21016_vm9 = vcmp.ne.s32.totalorder %v20441_v21, %v20256_v39  ;;  %v18003_v26 = vsel %vm5031_vm6, 1.0, %v18893_v32  ;;  %v18009_v24 = vsel %vm5571_vm3, 1.0, %v18893_v32 }
 0x52c   : > { %vm6009_vm11 = vmand %vm5993_vm10, %vm21008_vm12  ;;  %vm21011_vm10 = vcmp.gt.f32.partialorder %v17008_v14, %v20126_v13  ;;  %v4751_v63 = vrot.slane %v4750_v4, 1  ;;  %vm21019_vm5 = vcmp.gt.f32.partialorder %v17147_v23, %v20126_v13  ;;  %v3940_v11 = vadd.f32 %v3939_v41, %v3938_v51 }
 0x52d   : > { %vm17950_vm14 = vmor %vm5975_vm15, %vm17903_vm4  ;;  %vm6111_vm4 = vcmp.gt.f32.partialorder %v17893_v1, %v9228_v15  ;;  %v4188_v40 = vadd.f32 %v4187_v48, %v4186_v22  ;;  %vm21022_vm3 = vcmp.ne.s32.totalorder %v21007_v19, %v20256_v39  ;;  %v5418_v22 = vadd.f32 %v5417_v61, %v5416_v0 }
 0x52e   : > { %vm17962_vm12 = vmor %vm21011_vm10, %vm6530_vm7  ;;  %vm6533_vm10 = vcmp.eq.f32.partialorder %v17791_v38, %v20126_v13  ;;  %v18022_v57 = vsel %vm6111_vm4, 1.0, %v18893_v32  ;;  %v6497_v35 = vrot.slane %v6496_v44, 2  ;;  %v18048_v53 = vsel %vm17916_vm2, 1.0, %v18893_v32 }
 0x52f   : > { %vm17979_vm7 = vmor %vm5977_vm8, %vm6009_vm11  ;;  %vm6667_vm2 = vcmp.eq.f32.partialorder %v17893_v1, %v20126_v13  ;;  %v18066_v0 = vadd.f32 %v5957_v46, %v5956_v10  ;;  %v18071_v8 = vsel %vm17962_vm12, 1.0, %v18893_v32  ;;  %v18080_v19 = vadd.f32 %v4751_v63, %v4750_v4 }
 0x530   : > { %vm17995_vm15 = vmand %vm21016_vm9, %vm17950_vm14  ;;  %v5419_v48 = vrot.slane %v5418_v22, 1  ;;  %v18104_v30 = vadd.f32 %v6497_v35, %v6496_v44 }
 0x531   : > { %vm18017_vm8 = vmor %vm21019_vm5, %vm6531_vm13  ;;  %v18085_v10 = vsel %vm17995_vm15, 1.0, %v18893_v32 }
 0x532   : > { %vm18039_vm13 = vmand %vm21022_vm3, %vm17979_vm7  ;;  %v18094_v41 = vsel %vm18017_vm8, 1.0, %v18893_v32 }
 0x533   : > { %v18099_v4 = vsel %vm18039_vm13, 1.0, %v18893_v32 }
 0x553   : > { %v3869_v49 = vpop.xlane.xlu0 %3868 }
 0x554   : > { %v3870_v17 = vrot.slane %v3869_v49, 4 }
 0x556   : > { %v3871_v36 = vadd.f32 %v3870_v17, %v3869_v49  ;;  %v18027_v49 = vsel %vm17856_vm1, 1.0, %v18893_v32  ;;  %v18032_v17 = vsel %vm17885_vm0, 1.0, %v18893_v32  ;;  %vm21025_vm1 = vcmp.gt.f32.partialorder %v17791_v38, %v20126_v13  ;;  %v21028_v38 = vld [vmem:[#allocation35_spill] sm:$0xff] }
 0x557   : > { %vm18056_vm0 = vmor %vm21025_vm1, %vm6533_vm10  ;;  %vm21029_vm14 = vcmp.lt.s32.totalorder %v21028_v38, %v18983_v42  ;;  %vm21030_vm15 = vcmp.ne.s32.totalorder %v21028_v38, %v18983_v42 }
 0x558   : > { %v3872_v37 = vrot.slane %v3871_v36, 2  ;;  %v18109_v61 = vsel %vm18056_vm0, 1.0, %v18893_v32 }
 0x55a   : > { %v3873_v9 = vadd.f32 %v3872_v37, %v3871_v36 }
 0x55b   : > { %v18043_v51 = vpop.permute.xlu0 %4415 }
 0x55c   : > { %vm4437_vm11 = vcmp.gt.f32.partialorder %v18043_v51, %v9220_v62  ;;  %vm4453_vm6 = vcmp.eq.f32.partialorder %v18043_v51, %v9220_v62  ;;  %vm5169_vm7 = vcmp.gt.f32.partialorder %v18043_v51, %v9224_v34  ;;  %vm5185_vm10 = vcmp.eq.f32.partialorder %v18043_v51, %v9224_v34 }
 0x55d   : > { %vm4469_vm4 = vmand %vm4453_vm6, %vm21029_vm14  ;;  %vm5709_vm12 = vcmp.gt.f32.partialorder %v18043_v51, %v9228_v15  ;;  %vm5725_vm5 = vcmp.eq.f32.partialorder %v18043_v51, %v9228_v15  ;;  %v3874_v36 = vrot.slane %v3873_v9, 1  ;;  %vm21034_vm14 = vcmp.lt.s32.totalorder %v21033_v20, %v20256_v39 }
 0x55e   : > { %vm4485_vm9 = vmor %vm4437_vm11, %vm4469_vm4 }
 0x55f   : > { %vm4501_vm3 = vmand %vm21030_vm15, %vm4485_vm9  ;;  %v3875_v14 = vadd.f32 %v3874_v36, %v3873_v9  ;;  %v18136_v36 = vadd.f32 %v5419_v48, %v5418_v22 }
 0x560   : > { %v7328_v37 = vsel %vm4501_vm3, 1.0, %v18893_v32  ;;  %vm5217_vm8 = vmor %vm5169_vm7, %vm5185_vm10  ;;  %vm6651_vm3 = vcmp.gt.f32.partialorder %v17893_v1, %v20126_v13 }
 0x561   : > { %v4548_v42 = vadd.f32 %v7328_v37, %v17675_v18  ;;  %v7392_v44 = vsel %vm5217_vm8, 1.0, %v18893_v32  ;;  %vm5757_vm13 = vmor %vm5709_vm12, %vm5725_vm5  ;;  %7671 = vpush %v3875_v14 }
 0x562   : > { %v18127_v63 = vadd.f32 %v7392_v44, %v17680_v12  ;;  %v7456_v21 = vsel %vm5757_vm13, 1.0, %v18893_v32  ;;  %7673 = vpush %v3940_v11  ;;  %v21032_v12 = vld [vmem:[#allocation151_spill] sm:$0xff] }
 0x563   : > { %v4788_v46 = vpop.permute.xlu0 %4787  ;;  %v4549_v23 = vrot.slane %v4548_v42, 4  ;;  %v18133_v35 = vadd.f32 %v7456_v21, %v17683_v45  ;;  %7675 = vpush %v4188_v40 }
 0x564   : > { %vm4826_vm1 = vcmp.gt.f32.partialorder %v4788_v46, %v9220_v62  ;;  %vm5430_vm0 = vcmp.gt.f32.partialorder %v4788_v46, %v9224_v34  ;;  %v5281_v37 = vrot.slane %v18127_v63, 4  ;;  %vm5970_vm11 = vcmp.gt.f32.partialorder %v4788_v46, %v9228_v15 }
 0x565   : > { %v7353_v18 = vsel %vm4826_vm1, 1.0, %v18893_v32  ;;  %v7417_v9 = vsel %vm5430_vm0, 1.0, %v18893_v32  ;;  %vm5986_vm6 = vcmp.eq.f32.partialorder %v4788_v46, %v9228_v15  ;;  %vm6510_vm7 = vcmp.gt.f32.partialorder %v4788_v46, %v20126_v13 }
 0x566   : > { %v4937_v38 = vadd.f32 %v7353_v18, %v21031_v3  ;;  %v5541_v44 = vadd.f32 %v7417_v9, %v21032_v12  ;;  %vm6002_vm4 = vmand %vm5986_vm6, %vm21034_vm14  ;;  %vm6526_vm10 = vcmp.eq.f32.partialorder %v4788_v46, %v20126_v13  ;;  %vm21039_vm1 = vcmp.ne.s32.totalorder %v21033_v20, %v20256_v39  ;;  %v21040_v3 = vld [vmem:[#allocation45_spill] sm:$0xff] }
 0x567   : > { %v4800_v14 = vpop.permute.xlu0 %4799  ;;  %vm6018_vm12 = vmor %vm5970_vm11, %vm6002_vm4  ;;  %v18179_v18 = vadd.f32 %v4549_v23, %v4548_v42  ;;  %vm21041_vm4 = vcmp.lt.s32.totalorder %v21040_v3, %v20256_v39 }
 0x568   : > { %v4938_v25 = vadd.f32 %v17778_v47, %v4937_v38  ;;  %vm4829_vm9 = vcmp.gt.f32.partialorder %v4800_v14, %v9220_v62  ;;  %v5542_v45 = vadd.f32 %v17794_v50, %v5541_v44  ;;  %vm5433_vm5 = vcmp.gt.f32.partialorder %v4800_v14, %v9224_v34  ;;  %v21035_v47 = vld [vmem:[#allocation139_spill] sm:$0xff]  ;;  %vm6034_vm0 = vmand %vm21039_vm1, %vm6018_vm12 }
 0x569   : > { %v7356_v11 = vsel %vm4829_vm9, 1.0, %v18893_v32  ;;  %vm5973_vm15 = vcmp.gt.f32.partialorder %v4800_v14, %v9228_v15  ;;  %vm21036_vm8 = vcmp.lt.s32.totalorder %v21035_v47, %v9488_v28  ;;  %v7420_v22 = vsel %vm5433_vm5, 1.0, %v18893_v32 }
 0x56a   : > { %vm18161_vm13 = vmand %vm6667_vm2, %vm21036_vm8  ;;  %v4939_v50 = vadd.f32 %v17809_v54, %v4938_v25  ;;  %vm5989_vm11 = vcmp.eq.f32.partialorder %v4800_v14, %v9228_v15  ;;  %vm6513_vm6 = vcmp.gt.f32.partialorder %v4800_v14, %v20126_v13  ;;  %v7481_v48 = vsel %vm6034_vm0, 1.0, %v18893_v32 }
 0x56b   : > { %vm6558_vm2 = vmor %vm6510_vm7, %vm6526_vm10  ;;  %v5543_v21 = vadd.f32 %v17812_v52, %v5542_v45  ;;  %vm6529_vm14 = vcmp.eq.f32.partialorder %v4800_v14, %v20126_v13  ;;  %v4812_v20 = vpop.permute.xlu0 %4811  ;;  %v6081_v25 = vadd.f32 %v7481_v48, %v17202_v58  ;;  %vm21042_vm5 = vcmp.ne.s32.totalorder %v21040_v3, %v20256_v39 }
 0x56c   : > { %v7545_v54 = vsel %vm6558_vm2, 1.0, %v18893_v32  ;;  %v4940_v9 = vadd.f32 %v7356_v11, %v4939_v50  ;;  %vm6005_vm9 = vmand %vm5989_vm11, %vm21041_vm4  ;;  %vm4832_vm12 = vcmp.gt.f32.partialorder %v4812_v20, %v9220_v62  ;;  %vm5436_vm10 = vcmp.gt.f32.partialorder %v4812_v20, %v9224_v34  ;;  %v21043_v11 = vld [vmem:[#allocation165_spill] sm:$0xff] }
 0x56d   : > { %v6621_v46 = vadd.f32 %v7545_v54, %v17213_v27  ;;  %v5544_v38 = vadd.f32 %v7420_v22, %v5543_v21  ;;  %vm6021_vm7 = vmor %vm5973_vm15, %vm6005_vm9  ;;  %v7359_v52 = vsel %vm4832_vm12, 1.0, %v18893_v32  ;;  %v6082_v58 = vadd.f32 %v17974_v55, %v6081_v25 }
 0x56e   : > { %v4941_v42 = vadd.f32 %v17844_v29, %v4940_v9  ;;  %vm6037_vm8 = vmand %vm21042_vm5, %vm6021_vm7  ;;  %v7423_v23 = vsel %vm5436_vm10, 1.0, %v18893_v32  ;;  %vm5976_vm1 = vcmp.gt.f32.partialorder %v4812_v20, %v9228_v15  ;;  %vm5992_vm0 = vcmp.eq.f32.partialorder %v4812_v20, %v9228_v15 }
 0x56f   : > { %v6622_v27 = vadd.f32 %v17988_v59, %v6621_v46  ;;  %v5545_v12 = vadd.f32 %v17850_v16, %v5544_v38  ;;  %v7484_v44 = vsel %vm6037_vm8, 1.0, %v18893_v32  ;;  %vm6561_vm15 = vmor %vm6513_vm6, %vm6529_vm14  ;;  %v6083_v29 = vadd.f32 %v18027_v49, %v6082_v58  ;;  %v21049_v38 = vld [vmem:[#allocation55_spill] sm:$0xff] }
 0x570   : > { %v7548_v55 = vsel %vm6561_vm15, 1.0, %v18893_v32  ;;  %v4942_v45 = vadd.f32 %v17875_v43, %v4941_v42  ;;  %vm21044_vm11 = vcmp.lt.s32.totalorder %v21043_v11, %v20256_v39  ;;  %vm6516_vm4 = vcmp.gt.f32.partialorder %v4812_v20, %v20126_v13  ;;  %v5010_v16 = vpop.permute.xlu0 %5009  ;;  %vm6699_vm15 = vmor %vm6651_vm3, %vm18161_vm13 }
 0x571   : > { %vm6008_vm2 = vmand %vm5992_vm0, %vm21044_vm11  ;;  %v6623_v59 = vadd.f32 %v18032_v17, %v6622_v27  ;;  %v5546_v14 = vadd.f32 %v17878_v56, %v5545_v12  ;;  %vm6532_vm14 = vcmp.eq.f32.partialorder %v4812_v20, %v20126_v13  ;;  %vm5030_vm9 = vcmp.gt.f32.partialorder %v5010_v16, %v9220_v62 }
 0x572   : > { %vm6024_vm6 = vmor %vm5976_vm1, %vm6008_vm2  ;;  %vm6249_vm12 = vcmp.gt.f32.partialorder %v18043_v51, %v20126_v13  ;;  %vm6265_vm7 = vcmp.eq.f32.partialorder %v18043_v51, %v20126_v13  ;;  %v6084_v43 = vadd.f32 %v7484_v44, %v6083_v29  ;;  %v4943_v49 = vadd.f32 %v7359_v52, %v4942_v45 }
 0x573   : > { %vm21045_vm10 = vcmp.ne.s32.totalorder %v21043_v11, %v20256_v39  ;;  %v7375_v17 = vsel %vm5030_vm9, 1.0, %v18893_v32  ;;  %vm5570_vm8 = vcmp.gt.f32.partialorder %v5010_v16, %v9224_v34  ;;  %v6624_v56 = vadd.f32 %v7548_v55, %v6623_v59  ;;  %vm6564_vm1 = vmor %vm6516_vm4, %vm6532_vm14 }
 0x574   : > { %vm6040_vm5 = vmand %vm21045_vm10, %vm6024_vm6  ;;  %v5547_v50 = vadd.f32 %v7423_v23, %v5546_v14  ;;  %v5141_v22 = vadd.f32 %v7375_v17, %v17523_v60  ;;  %v6085_v48 = vadd.f32 %v18048_v53, %v6084_v43  ;;  %v4944_v21 = vadd.f32 %v17927_v33, %v4943_v49 }
 0x575   : > { %v7487_v62 = vsel %vm6040_vm5, 1.0, %v18893_v32  ;;  %v7551_v39 = vsel %vm6564_vm1, 1.0, %v18893_v32  ;;  %v7439_v25 = vsel %vm5570_vm8, 1.0, %v18893_v32  ;;  %v6625_v34 = vadd.f32 %v18071_v8, %v6624_v56  ;;  %vm6297_vm5 = vmor %vm6249_vm12, %vm6265_vm7 }
 0x576   : > { %v5548_v20 = vadd.f32 %v17933_v2, %v5547_v50  ;;  %v5142_v60 = vadd.f32 %v18003_v26, %v5141_v22  ;;  %v5681_v53 = vadd.f32 %v7439_v25, %v17526_v5  ;;  %v6086_v33 = vadd.f32 %v18085_v10, %v6085_v48 }
 0x577   : > { %v4945_v54 = vrot.slane %v4944_v21, 4  ;;  %vm6110_vm0 = vcmp.gt.f32.partialorder %v5010_v16, %v9228_v15  ;;  %vm6650_vm11 = vcmp.gt.f32.partialorder %v5010_v16, %v20126_v13  ;;  %v6626_v40 = vadd.f32 %v18094_v41, %v6625_v34 }
 0x578   : > { %v5549_v9 = vrot.slane %v5548_v20, 4  ;;  %v5143_v1 = vrot.slane %v5142_v60, 4  ;;  %v5682_v3 = vadd.f32 %v18009_v24, %v5681_v53  ;;  %vm21046_vm3 = vcmp.ne.s32.totalorder %v21035_v47, %v9488_v28 }
 0x579   : > { %vm18252_vm13 = vmand %vm21046_vm3, %vm6699_vm15  ;;  %v4946_v5 = vadd.f32 %v4945_v54, %v4944_v21  ;;  %v6087_v26 = vadd.f32 %v7487_v62, %v6086_v33  ;;  %v7503_v8 = vsel %vm6110_vm0, 1.0, %v18893_v32  ;;  %vm6666_vm2 = vcmp.eq.f32.partialorder %v5010_v16, %v20126_v13 }
 0x57a   : > { %v5550_v15 = vadd.f32 %v5549_v9, %v5548_v20  ;;  %v6627_v10 = vadd.f32 %v7551_v39, %v6626_v40  ;;  %v5144_v41 = vadd.f32 %v5143_v1, %v5142_v60  ;;  %v5683_v46 = vrot.slane %v5682_v3, 4 }
 0x57b   : > { %vm21050_vm4 = vcmp.lt.s32.totalorder %v21049_v38, %v9488_v28  ;;  %v4947_v24 = vrot.slane %v4946_v5, 2  ;;  %v6088_v47 = vadd.f32 %v18099_v4, %v6087_v26  ;;  %v6221_v52 = vadd.f32 %v7503_v8, %v17529_v31 }
 0x57c   : > { %vm6682_vm6 = vmand %vm6666_vm2, %vm21050_vm4  ;;  %v4551_v58 = vrot.slane %v18179_v18, 2  ;;  %v5551_v42 = vrot.slane %v5550_v15, 2  ;;  %v6628_v23 = vadd.f32 %v18109_v61, %v6627_v10  ;;  %v5145_v27 = vrot.slane %v5144_v41, 2 }
 0x57d   : > { %vm6698_vm14 = vmor %vm6650_vm11, %vm6682_vm6  ;;  %v5684_v12 = vadd.f32 %v5683_v46, %v5682_v3  ;;  %vm21051_vm9 = vcmp.ne.s32.totalorder %v21049_v38, %v9488_v28  ;;  %v7568_v4 = vsel %vm18252_vm13, 1.0, %v18893_v32  ;;  %v4948_v44 = vadd.f32 %v4947_v24, %v4946_v5 }
 0x57e   : > { %vm6714_vm10 = vmand %vm21051_vm9, %vm6698_vm14  ;;  %v6222_v31 = vadd.f32 %v18022_v57, %v6221_v52  ;;  %v5552_v61 = vadd.f32 %v5551_v42, %v5550_v15  ;;  %v6089_v55 = vrot.slane %v6088_v47, 4  ;;  %v5146_v28 = vadd.f32 %v5145_v27, %v5144_v41 }
 0x57f   : > { %v7567_v29 = vsel %vm6714_vm10, 1.0, %v18893_v32  ;;  %v5685_v45 = vrot.slane %v5684_v12, 2  ;;  %v4552_v59 = vadd.f32 %v4551_v58, %v18179_v18  ;;  %v4949_v14 = vrot.slane %v4948_v44, 1 }
 0x580   : > { %v6223_v11 = vrot.slane %v6222_v31, 4  ;;  %v6761_v16 = vadd.f32 %v7567_v29, %v17744_v7  ;;  %v5147_v57 = vrot.slane %v5146_v28, 1  ;;  %v5282_v49 = vadd.f32 %v5281_v37, %v18127_v63 }
 0x581   : > { %v5686_v43 = vadd.f32 %v5685_v45, %v5684_v12  ;;  %v5553_v17 = vrot.slane %v5552_v61, 1  ;;  %v7520_v13 = vsel %vm6297_vm5, 1.0, %v18893_v32  ;;  %v4553_v50 = vrot.slane %v4552_v59, 1 }
 0x582   : > { %v6224_v51 = vadd.f32 %v6223_v11, %v6222_v31  ;;  %v6762_v56 = vadd.f32 %v7568_v4, %v6761_v16  ;;  %v6629_v62 = vrot.slane %v6628_v23, 4  ;;  %v5148_v22 = vadd.f32 %v5147_v57, %v5146_v28 }
 0x583   : > { %v4950_v48 = vadd.f32 %v4949_v14, %v4948_v44  ;;  %v5283_v21 = vrot.slane %v5282_v49, 2  ;;  %v5687_v7 = vrot.slane %v5686_v43, 1  ;;  %v4554_v18 = vadd.f32 %v4553_v50, %v4552_v59 }
 0x584   : > { %v6763_v39 = vrot.slane %v6762_v56, 4  ;;  %v5821_v25 = vrot.slane %v18133_v35, 4  ;;  %v5554_v20 = vadd.f32 %v5553_v17, %v5552_v61  ;;  %v6090_v60 = vadd.f32 %v6089_v55, %v6088_v47 }
 0x585   : > { %v5284_v34 = vadd.f32 %v5283_v21, %v5282_v49  ;;  %v6360_v63 = vadd.f32 %v7520_v13, %v17689_v6  ;;  %v6225_v37 = vrot.slane %v6224_v51, 2  ;;  %v4753_v32 = vadd.f32 %v18080_v19, %v4554_v18  ;;  %v21059_v18 = vld [vmem:[#allocation36_spill] sm:$0xff] }
 0x586   : > { %v6764_v53 = vadd.f32 %v6763_v39, %v6762_v56  ;;  %v5822_v33 = vadd.f32 %v5821_v25, %v18133_v35  ;;  %v6091_v40 = vrot.slane %v6090_v60, 2  ;;  %v6630_v1 = vadd.f32 %v6629_v62, %v6628_v23  ;;  %v21056_v39 = vld [vmem:[#allocation19_spill] sm:$0xff] }
 0x587   : > { %v5285_v54 = vrot.slane %v5284_v34, 1  ;;  %v6361_v9 = vrot.slane %v6360_v63, 4  ;;  %v5688_v3 = vadd.f32 %v5687_v7, %v5686_v43  ;;  %v4951_v2 = vadd.f32 %v4950_v48, %v4753_v32 }
 0x588   : > { %v5823_v5 = vrot.slane %v5822_v33, 2  ;;  %v6765_v26 = vrot.slane %v6764_v53, 2  ;;  %v6092_v15 = vadd.f32 %v6091_v40, %v6090_v60  ;;  %v6631_v41 = vrot.slane %v6630_v1, 2 }
 0x589   : > { %v5286_v8 = vadd.f32 %v5285_v54, %v5284_v34  ;;  %v6362_v10 = vadd.f32 %v6361_v9, %v6360_v63  ;;  %v6226_v46 = vadd.f32 %v6225_v37, %v6224_v51  ;;  %v5149_v6 = vadd.f32 %v5148_v22, %v4951_v2  ;;  %v21062_v9 = vld [vmem:[#allocation16_spill] sm:$0xff] }
 0x58a   : > { %v5824_v38 = vadd.f32 %v5823_v5, %v5822_v33  ;;  %v6766_v24 = vadd.f32 %v6765_v26, %v6764_v53  ;;  %v6093_v47 = vrot.slane %v6092_v15, 1  ;;  %v6632_v52 = vadd.f32 %v6631_v41, %v6630_v1 }
 0x58b   : > { %v5421_v19 = vadd.f32 %v18136_v36, %v5286_v8  ;;  %v6363_v35 = vrot.slane %v6362_v10, 2  ;;  %v6499_v27 = vrot.slane %v18104_v30, 1  ;;  %v21052_v44 = vrot.slane %v18066_v0, 1 }
 0x58c   : > { %v5825_v58 = vrot.slane %v5824_v38, 1  ;;  %v6633_v12 = vrot.slane %v6632_v52, 1  ;;  %v6094_v29 = vadd.f32 %v6093_v47, %v6092_v15  ;;  %v6227_v61 = vrot.slane %v6226_v46, 1 }
 0x58d   : > { %v5555_v42 = vadd.f32 %v5554_v20, %v5421_v19  ;;  %v6364_v23 = vadd.f32 %v6363_v35, %v6362_v10  ;;  %v5960_v31 = vadd.f32 %v21052_v44, %v18066_v0  ;;  %v6767_v45 = vrot.slane %v6766_v24, 1 }
 0x58e   : > { %v5826_v4 = vadd.f32 %v5825_v58, %v5824_v38  ;;  %v6500_v16 = vadd.f32 %v6499_v27, %v18104_v30  ;;  %v6634_v59 = vadd.f32 %v6633_v12, %v6632_v52  ;;  %vm21053_vm12 = vcmask 1040384  }
 0x58f   : > { %v5689_v55 = vadd.f32 %v5688_v3, %v5555_v42  ;;  %v6365_v28 = vrot.slane %v6364_v23, 1  ;;  %v6228_v43 = vadd.f32 %v6227_v61, %v6226_v46  ;;  %v6768_v17 = vadd.f32 %v6767_v45, %v6766_v24 }
 0x590   : > { %v5961_v36 = vadd.f32 %v5960_v31, %v5826_v4  ;;  %vm21054_vm7 = vcmask 1041408   ;;  %vm21055_vm8 = vcmask 1042432   ;;  %v467_v62 = vstv %s16917_s25 }
 0x591   : > { %v6366_v11 = vadd.f32 %v6365_v28, %v6364_v23  ;;  %v6770_v14 = vsel %vm21053_vm12, %v5149_v6, %v5689_v55  ;;  %vm21057_vm15 = vcmp.ge.s32.totalorder %v21056_v39, 0  ;;  %vm21058_vm11 = vcmp.gt.s32.totalorder %v21056_v39, 0 }
 0x592   : > { %v6095_v57 = vadd.f32 %v6094_v29, %v5961_v36  ;;  %s18299_s22 = spop %7671  ;;  %vm21060_vm13 = vcmask 1043456   ;;  %v21061_v54 = vstv %s16939_s8  ;;  %vm6792_vm2 = vcmp.eq.s32.totalorder %v21062_v9, 2 }
 0x593   : > { %v6501_v49 = vadd.f32 %v6500_v16, %v6366_v11  ;;  %s7674_s6 = spop %7673  ;;  %v3877_v1 = vstv %s18299_s22  ;;  %vm6791_vm4 = vcmp.eq.s32.totalorder %v21062_v9, 1  ;;  %vm6790_vm6 = vcmp.eq.s32.totalorder %v21062_v9, 0 }
 0x594   : > { %v6229_v13 = vadd.f32 %v6228_v43, %v6095_v57  ;;  %v3942_v22 = vstv %s7674_s6  ;;  %s7676_s24 = spop %7675 }
 0x595   : > { %v6635_v51 = vadd.f32 %v6634_v59, %v6501_v49  ;;  %v3943_v30 = vadd.f32 %v3942_v22, %v467_v62  ;;  %v4190_v48 = vstv %s7676_s24 }
 0x596   : > { %v6771_v0 = vsel %vm21054_vm7, %v6770_v14, %v6229_v13  ;;  %v4191_v21 = vmul.f32 3.0, %v4190_v48  ;;  %v6789_v40 = vadd.f32 %v4190_v48, %v21061_v54 }
 0x597   : > { %v6769_v56 = vadd.f32 %v6768_v17, %v6635_v51 }
 0x598   : > { %v4192_v7 = vmin.f32 %v4191_v21, 499.0  ;;  %v6793_v5 = vsel %vm6792_vm2, %v6789_v40, 0.0 }
 0x599   : > { %v6772_v50 = vsel %vm21055_vm8, %v6771_v0, %v6769_v56 }
 0x59a   : > { %vm6773_vm1 = vcmp.lt.f32.partialorder %v6772_v50, %v4192_v7 }
 0x59b   : > { %vm6774_vm0 = vmand %vm6773_vm1, %vm21057_vm15 }
 0x59c   : > { %vm6775_vm3 = vmor %vm21058_vm11, %vm6774_vm0 }
 0x59d   : > { %v6776_v25 = vsel %vm6775_vm3, %v21059_v18, 0.0 }
 0x59e   : > { %v6777_v34 = vsel %vm21060_vm13, %v6776_v25, 0.0 }
 0x59f   : > { %6778 = vadd.xlane.f32.xlu1 %v6777_v34 }
 0x62c   : > { %v6779_v20 = vpop.xlane.xlu1 %6778 }
 0x62d   : > { %v6780_v60 = vrot.slane %v6779_v20, 4 }
 0x62f   : > { %v6781_v63 = vadd.f32 %v6780_v60, %v6779_v20 }
 0x631   : > { %v6782_v37 = vrot.slane %v6781_v63, 2 }
 0x633   : > { %v6783_v53 = vadd.f32 %v6782_v37, %v6781_v63 }
 0x635   : > { %v6784_v32 = vrot.slane %v6783_v53, 1 }
 0x637   : > { %v6785_v33 = vadd.f32 %v6784_v32, %v6783_v53 }
 0x639   : > { %7677 = vpush %v6785_v33 }
 0x66a   : > { %s7678_s5 = spop %7677 }
 0x66b   : > { %v6787_v3 = vstv %s7678_s5 }
 0x66c   : > { %v6788_v2 = vadd.f32 %v6787_v3, %v3877_v1 }
 0x66e   : > { %v6794_v26 = vsel %vm6791_vm4, %v6788_v2, %v6793_v5 }
 0x66f   : > { %v6795_v8 = vsel %vm6790_vm6, %v3943_v30, %v6794_v26 }
 0x670   : > { %6796 = vst [vmem:[%s335_s1] sm:$0xff] %v6795_v8 }
 0x671   : > { %8078 = shalt.err (!%p8075_p3)
}
 0x672   : > { %s8079_s20 = scalar_lea.hbm %s18321_s12, 128  ;;  %s8083_s25 = scalar_lea.hbm %s18369_s4, 256 }
 0x673   : > { %p8080_p1 = scmp.ne.s32.totalorder %s18321_s12, %s8079_s20  ;;  %p8084_p6 = scmp.lt.u32.totalorder %s18321_s12, %s18369_s4 }
 0x674   : > { %p8085_p4 = scmp.lt.u32.totalorder %s8083_s25, %s8079_s20  ;;  %p8087_p13 = scmp.lt.u32.totalorder %s8079_s20, %s18321_s12 }
 0x675   : > { %p8081_p5 = pnand %p8080_p1, %p21063_p9 }
 0x676   : > { %p8086_p8 = por %p8085_p4, %p8084_p6 }
 0x677   : > { %p8082_p10 = pneg %p8081_p5 }
 0x678   : > { %p8088_p12 = por %p8087_p13, %p8086_p8 }
 0x67a   : > { %p8089_p2 = pnand %p8088_p12, %p8082_p10 }
 0x67c   : > { %8092 = shalt.err (!%p8089_p2)
}
 0x67d   : > { %7687 = dma.vmem_to_hbm [thread:$0]  (%p21063_p9), %s18323_s10, 128, %s18321_s12, %s6798_s19  }
 0x67e PF: > { %s6823_s6 = sand.u32 1, %s8127_s15   ;;  %p21064_p11 = scmp.ne.s32.totalorder %s18791_s27, 0 }
 0x67f   : > { %p21065_p7 = scmp.ge.s32.totalorder %s8139_s18, 2  ;;  %s6824_s24 = scalar_lea.sflag [#allocation4], %s6823_s6 }
 0x681   : > { %p7703_p0 = pnand %p21065_p7, %p21064_p11 }
 0x683   : > { %8122 = dma.done.wait (!%p7703_p0), %s6824_s24, 128  }
 0x684   : > { %8124 = vsyncadd (!%p7703_p0), %s6824_s24, 4294967168  ;;  %s21066_s5 = sld [smem:[#allocation15_spill]]  ;;  %p23_p3 = scmp.ge.s32.totalorder %s8204_s21, 4  }
 0x685   : > { %s21067_s15 = smov %s8131_s16  ;;  %s21068_s16 = smov %s8135_s17 }
 0x686   : > { %s21070_s18 = smov %s8204_s21  ;;  %25 = sbr.rel (!%p23_p3) target bundleno = 11 (0xb), region = 122 }
 0x68a   : > { %s21069_s17 = smov %s21066_s5 }
 0x68d   :  { %6829 = vsyncpa [#allocation3], 1 }
 0x68e   :  { %6831 = vsyncpa [#allocation3 + $0x1], 1 }
 0x68f   :  { %6832 = vsyncpa [#allocation6], 1 }
 0x690   :  { %6834 = vsyncpa [#allocation6 + $0x1], 1 }
 0x691   :  { %6835 = vsyncpa [#allocation9], 1 }
 0x692   :  { %6837 = vsyncpa [#allocation9 + $0x1], 1 }
 0x693   :  { %6838 = vsyncpa [#allocation4], 1 }
 0x694   :  { %6840 = vsyncpa [#allocation4 + $0x1], 1 }

</bundles_post_ra>
